<compile_context>
chip_gen: v6e
topology: v6e:2x2x1
jax: 0.10.0
libtpu: 0.0.40
codegen_flags: <defaults>
</compile_context>

<pallas_src>
import math

import jax
import jax.numpy as jnp
from jax.experimental import pallas as pl
from jax.experimental.pallas import tpu as pltpu

# ----------------------------- model config ---------------------------------
D        = 128                    # shared hidden dim
HEADS    = 4
DH       = D // HEADS             # 32
FFN_DIM  = 256
VOCAB    = 256                    # shared text / target vocab
TEXT_SEQ = 8
AUD_SEQ  = 8                      # audio max length (pad_or_truncate target)
AUD_DIM  = 64
IMG_C, IMG_H, IMG_W = 3, 16, 16
PATCH    = 8
N_PATCH  = (IMG_H // PATCH) * (IMG_W // PATCH)   # 4
TGT_SEQ  = 8
EPS      = 1e-5
SCALE    = 1.0 / math.sqrt(DH)
BF16     = jnp.bfloat16
VMEM_LIMIT = 32 * 1024 * 1024     # safe on all generations (v7x scoped default)

# Kernel weight-operand order (wrapper and kernel signature must agree).
_WEIGHT_NAMES = (
    # stacked encoder layers: [0]=text, [1]=audio, [2]=vision, [3]=fusion
    "e_ln1g", "e_ln1b", "e_wqkv", "e_bqkv", "e_wo", "e_bo",
    "e_ln2g", "e_ln2b", "e_w1", "e_b1", "e_w2", "e_b2",
    # modality input projections (proj bias folded with positional embedding)
    "aud_w", "aud_pb", "pat_w", "pat_pb", "fus_w", "fus_b",
    # decoder layer (causal self-attn + cross-attn + FFN)
    "d_ln1g", "d_ln1b", "d_sa_wqkv", "d_sa_bqkv", "d_sa_wo", "d_sa_bo",
    "d_ln2g", "d_ln2b", "d_ca_wq", "d_ca_bq", "d_ca_wkv", "d_ca_bkv",
    "d_ca_wo", "d_ca_bo", "d_ln3g", "d_ln3b", "d_w1", "d_b1", "d_w2", "d_b2",
    # final LN + vocab head
    "f_lng", "f_lnb", "out_w", "out_b",
)


# ----------------------------- fused kernel ----------------------------------
def _fused_forward_kernel(
    # per-batch-element activations
    text_ref, audio_ref, patch_ref, dec_ref,
    # stacked encoder-layer weights
    e_ln1g, e_ln1b, e_wqkv, e_bqkv, e_wo, e_bo,
    e_ln2g, e_ln2b, e_w1, e_b1, e_w2, e_b2,
    # modality projections
    aud_w, aud_pb, pat_w, pat_pb, fus_w, fus_b,
    # decoder layer
    d_ln1g, d_ln1b, d_sa_wqkv, d_sa_bqkv, d_sa_wo, d_sa_bo,
    d_ln2g, d_ln2b, d_ca_wq, d_ca_bq, d_ca_wkv, d_ca_bkv,
    d_ca_wo, d_ca_bo, d_ln3g, d_ln3b, d_w1, d_b1, d_w2, d_b2,
    # final LN + vocab
    f_lng, f_lnb, out_w, out_b,
    # output
    logits_ref,
):
    """Whole MultiModalAI training forward for one batch element (grid=(B,))."""

    def mm(a, w, b=None):
        # MXU matmul: bf16 operands (weights already bf16 at rest), f32 accumulation.
        y = jnp.dot(a.astype(BF16), w, preferred_element_type=jnp.float32)
        return y if b is None else y + b

    def ln(x, g, b):
        mu = jnp.mean(x, axis=-1, keepdims=True)
        var = jnp.mean(jnp.square(x - mu), axis=-1, keepdims=True)
        return (x - mu) * jax.lax.rsqrt(var + EPS) * g + b

    def attn_core(q, k, v, wo, bo, mask=None):
        # q: [Tq, H, DH] bf16, k/v: [Tk, H, DH] bf16
        tq = q.shape[0]
        s = jnp.einsum("qhd,khd->hqk", q, k,
                       preferred_element_type=jnp.float32) * SCALE     # [H,Tq,Tk]
        if mask is not None:
            s = jnp.where(mask[None], s, -1e30)
        s = s - jnp.max(s, axis=-1, keepdims=True)
        p = jnp.exp(s)
        p = p / jnp.sum(p, axis=-1, keepdims=True)                      # exact softmax
        ctx = jnp.einsum("hqk,khd->qhd", p.astype(BF16), v,
                         preferred_element_type=jnp.float32)            # [Tq,H,DH]
        ctx = ctx.reshape(tq, D)         # merge heads -> lane-dense [Tq, 128]
        return mm(ctx, wo, bo)           # single K=128 output projection

    def self_attn(h, wqkv, bqkv, wo, bo, mask=None):
        t = h.shape[0]
        qkv = mm(h, wqkv, bqkv).astype(BF16)          # one [T,128] @ [128,384]
        q = qkv[:, :D].reshape(t, HEADS, DH)
        k = qkv[:, D:2 * D].reshape(t, HEADS, DH)
        v = qkv[:, 2 * D:].reshape(t, HEADS, DH)
        return attn_core(q, k, v, wo, bo, mask)

    def cross_attn(h, mem, wq, bq, wkv, bkv, wo, bo):
        tq, tk = h.shape[0], mem.shape[0]
        q = mm(h, wq, bq).astype(BF16).reshape(tq, HEADS, DH)
        kv = mm(mem, wkv, bkv).astype(BF16)           # one [Tk,128] @ [128,256]
        k = kv[:, :D].reshape(tk, HEADS, DH)
        v = kv[:, D:].reshape(tk, HEADS, DH)
        return attn_core(q, k, v, wo, bo, None)

    def enc_layer(x, i):
        # Pre-LN transformer encoder layer `i` of the stacked weights.
        h = ln(x, e_ln1g[i], e_ln1b[i])
        x = x + self_attn(h, e_wqkv[i], e_bqkv[i], e_wo[i], e_bo[i])
        h = ln(x, e_ln2g[i], e_ln2b[i])
        f = jax.nn.gelu(mm(h, e_w1[i], e_b1[i]))
        return x + mm(f, e_w2[i], e_b2[i])

    # ---------------- modality encoders ----------------
    t = enc_layer(text_ref[0].astype(jnp.float32), 0)                   # [8, D]
    a = enc_layer(mm(audio_ref[0], aud_w[...], aud_pb[...]), 1)         # [8, D]
    v = enc_layer(mm(patch_ref[0], pat_w[...], pat_pb[...]), 2)         # [4, D]

    # ---------------- multimodal fusion -----------------
    fused = jnp.concatenate([t, a, v], axis=0)                          # [20, D]
    fused = enc_layer(mm(fused, fus_w[...], fus_b[...]), 3)             # [20, D]

    # ---------------- text decoder (causal SA + cross-attn + FFN) -------------
    x = dec_ref[0].astype(jnp.float32)                                  # [8, D]
    tt = x.shape[0]
    row = jax.lax.broadcasted_iota(jnp.int32, (tt, tt), 0)
    col = jax.lax.broadcasted_iota(jnp.int32, (tt, tt), 1)
    causal = col <= row

    h = ln(x, d_ln1g[...], d_ln1b[...])
    x = x + self_attn(h, d_sa_wqkv[...], d_sa_bqkv[...],
                      d_sa_wo[...], d_sa_bo[...], mask=causal)
    h = ln(x, d_ln2g[...], d_ln2b[...])
    x = x + cross_attn(h, fused, d_ca_wq[...], d_ca_bq[...],
                       d_ca_wkv[...], d_ca_bkv[...],
                       d_ca_wo[...], d_ca_bo[...])
    h = ln(x, d_ln3g[...], d_ln3b[...])
    f = jax.nn.gelu(mm(h, d_w1[...], d_b1[...]))
    x = x + mm(f, d_w2[...], d_b2[...])

    # ---------------- final LN + vocab projection (lane-dense N=256 store) ----
    h = ln(x, f_lng[...], f_lnb[...])
    logits_ref[0] = mm(h, out_w[...], out_b[...]).astype(logits_ref.dtype)


# ----------------------------- spec helpers -----------------------------------
def _const_spec(arr):
    # Whole array, same block for every grid step -> stays VMEM-resident
    # (constant-index-map residency; no re-DMA across the batch loop).
    nd = arr.ndim
    return pl.BlockSpec(arr.shape, lambda b, _nd=nd: (0,) * _nd)


def _batch_spec(arr):
    _, t, f = arr.shape
    return pl.BlockSpec((1, t, f), lambda b: (b, 0, 0))


# ----------------------------- forward wrapper ----------------------------------
def multimodal_forward(params, text_tokens, audio_features, image_data, target_tokens):
    B = text_tokens.shape[0]
    p = params

    # --- XLA prologue: embedding gathers, positional adds, image patchify ---
    text_x = p["text_embed"][text_tokens] + p["text_pos"][None, :TEXT_SEQ]   # [B,8,128]
    dec_x = p["dec_embed"][target_tokens] + p["dec_pos"][None, :TGT_SEQ]     # [B,8,128]

    # VisionPreprocessor: normalize, image_to_video (F=1), patchify (C,P,P)-major
    img = (image_data - 0.5) / 0.5
    patch_x = img.reshape(B, IMG_C, IMG_H // PATCH, PATCH, IMG_W // PATCH, PATCH)
    patch_x = patch_x.transpose(0, 2, 4, 1, 3, 5).reshape(B, N_PATCH,
                                                          IMG_C * PATCH * PATCH)

    # AudioPreprocessor.pad_or_truncate is identity at AUD_SEQ
    audio_x = audio_features.astype(jnp.float32)

    act_args = [text_x, audio_x, patch_x, dec_x]
    weight_args = [p[name] for name in _WEIGHT_NAMES]

    in_specs = ([_batch_spec(a) for a in act_args] +
                [_const_spec(w) for w in weight_args])
    out_spec = pl.BlockSpec((1, TGT_SEQ, VOCAB), lambda b: (b, 0, 0))

    return pl.pallas_call(
        _fused_forward_kernel,
        out_shape=jax.ShapeDtypeStruct((B, TGT_SEQ, VOCAB), jnp.float32),
        grid=(B,),
        in_specs=in_specs,
        out_specs=out_spec,
        compiler_params=pltpu.CompilerParams(
            dimension_semantics=("parallel",),   # B=2 -> one element per TC on v7x
            vmem_limit_bytes=VMEM_LIMIT),
    )(*act_args, *weight_args)


# ----------------------------- parameter init ----------------------------------
def _rand_w(key, shape, fan_in):
    # MXU weights stored bf16 at rest.
    return (jax.random.normal(key, shape, jnp.float32) / math.sqrt(fan_in)).astype(BF16)


def _init_enc_stack(key):
    """Stacked weights for the 4 identically-shaped encoder layers."""
    n = 4  # text, audio, vision, fusion
    ks = jax.random.split(key, 4 * n).reshape(n, 4, 2)
    ones = lambda c: jnp.ones((n, 1, c), jnp.float32)
    zeros = lambda c: jnp.zeros((n, 1, c), jnp.float32)
    return {
        "e_ln1g": ones(D), "e_ln1b": zeros(D),
        "e_wqkv": jnp.stack([_rand_w(ks[i, 0], (D, 3 * D), D) for i in range(n)]),
        "e_bqkv": zeros(3 * D),
        "e_wo": jnp.stack([_rand_w(ks[i, 1], (D, D), D) for i in range(n)]),
        "e_bo": zeros(D),
        "e_ln2g": ones(D), "e_ln2b": zeros(D),
        "e_w1": jnp.stack([_rand_w(ks[i, 2], (D, FFN_DIM), D) for i in range(n)]),
        "e_b1": zeros(FFN_DIM),
        "e_w2": jnp.stack([_rand_w(ks[i, 3], (FFN_DIM, D), FFN_DIM) for i in range(n)]),
        "e_b2": zeros(D),
    }


def _init_decoder(key):
    ks = jax.random.split(key, 7)
    z = lambda c: jnp.zeros((1, c), jnp.float32)
    o = lambda c: jnp.ones((1, c), jnp.float32)
    return {
        "d_ln1g": o(D), "d_ln1b": z(D),
        "d_sa_wqkv": _rand_w(ks[0], (D, 3 * D), D), "d_sa_bqkv": z(3 * D),
        "d_sa_wo": _rand_w(ks[1], (D, D), D), "d_sa_bo": z(D),
        "d_ln2g": o(D), "d_ln2b": z(D),
        "d_ca_wq": _rand_w(ks[2], (D, D), D), "d_ca_bq": z(D),
        "d_ca_wkv": _rand_w(ks[3], (D, 2 * D), D), "d_ca_bkv": z(2 * D),
        "d_ca_wo": _rand_w(ks[4], (D, D), D), "d_ca_bo": z(D),
        "d_ln3g": o(D), "d_ln3b": z(D),
        "d_w1": _rand_w(ks[5], (D, FFN_DIM), D), "d_b1": z(FFN_DIM),
        "d_w2": _rand_w(ks[6], (FFN_DIM, D), FFN_DIM), "d_b2": z(D),
    }


def init_params(key):
    ks = jax.random.split(key, 12)
    p = {}
    p["text_embed"] = jax.random.normal(ks[0], (VOCAB, D), jnp.float32) * 0.02
    p["text_pos"] = jax.random.normal(ks[1], (TEXT_SEQ, D), jnp.float32) * 0.02
    p["dec_embed"] = jax.random.normal(ks[2], (VOCAB, D), jnp.float32) * 0.02
    p["dec_pos"] = jax.random.normal(ks[3], (TGT_SEQ, D), jnp.float32) * 0.02
    p.update(_init_enc_stack(ks[4]))
    p.update(_init_decoder(ks[5]))
    # modality projections (projection bias, init 0, folded with positional embed)
    p["aud_w"] = _rand_w(ks[6], (AUD_DIM, D), AUD_DIM)
    p["aud_pb"] = jax.random.normal(ks[7], (AUD_SEQ, D), jnp.float32) * 0.02
    p["pat_w"] = _rand_w(ks[8], (IMG_C * PATCH * PATCH, D), IMG_C * PATCH * PATCH)
    p["pat_pb"] = jax.random.normal(ks[9], (N_PATCH, D), jnp.float32) * 0.02
    p["fus_w"] = _rand_w(ks[10], (D, D), D)
    p["fus_b"] = jnp.zeros((1, D), jnp.float32)
    # final decoder LN + vocab head
    p["f_lng"] = jnp.ones((1, D), jnp.float32)
    p["f_lnb"] = jnp.zeros((1, D), jnp.float32)
    p["out_w"] = _rand_w(ks[11], (D, VOCAB), D)
    p["out_b"] = jnp.zeros((1, VOCAB), jnp.float32)
    return p


# ----------------------------- main ----------------------------------------------
if __name__ == "__main__":
    key = jax.random.PRNGKey(0)
    k_params, k_text, k_audio, k_img, k_tgt = jax.random.split(key, 5)

    params = init_params(k_params)

    B = 2
    text_tokens = jax.random.randint(k_text, (B, TEXT_SEQ), 0, VOCAB)
    audio_features = jax.random.normal(k_audio, (B, AUD_SEQ, AUD_DIM), jnp.float32)
    image_data = jax.random.uniform(k_img, (B, IMG_C, IMG_H, IMG_W), jnp.float32)  # NCHW
    target_tokens = jax.random.randint(k_tgt, (B, TGT_SEQ), 0, VOCAB)

    fwd = jax.jit(multimodal_forward)
    logits = fwd(params, text_tokens, audio_features, image_data, target_tokens)
    jax.block_until_ready(logits)

    assert logits.shape == (B, TGT_SEQ, VOCAB)
    assert bool(jnp.all(jnp.isfinite(logits)))
    print("KERNEL_OK")
</pallas_src>

<mosaic_0001>
module attributes {stable_mosaic.version = 11 : i64} {
  func.func @_fused_forward_kernel(%arg0: i32, %arg1: memref<1x8x128xf32, #tpu.memory_space<vmem>>, %arg2: memref<1x8x64xf32, #tpu.memory_space<vmem>>, %arg3: memref<1x4x192xf32, #tpu.memory_space<vmem>>, %arg4: memref<1x8x128xf32, #tpu.memory_space<vmem>>, %arg5: memref<4x1x128xf32, #tpu.memory_space<vmem>>, %arg6: memref<4x1x128xf32, #tpu.memory_space<vmem>>, %arg7: memref<4x128x384xbf16, #tpu.memory_space<vmem>>, %arg8: memref<4x1x384xf32, #tpu.memory_space<vmem>>, %arg9: memref<4x128x128xbf16, #tpu.memory_space<vmem>>, %arg10: memref<4x1x128xf32, #tpu.memory_space<vmem>>, %arg11: memref<4x1x128xf32, #tpu.memory_space<vmem>>, %arg12: memref<4x1x128xf32, #tpu.memory_space<vmem>>, %arg13: memref<4x128x256xbf16, #tpu.memory_space<vmem>>, %arg14: memref<4x1x256xf32, #tpu.memory_space<vmem>>, %arg15: memref<4x256x128xbf16, #tpu.memory_space<vmem>>, %arg16: memref<4x1x128xf32, #tpu.memory_space<vmem>>, %arg17: memref<64x128xbf16, #tpu.memory_space<vmem>>, %arg18: memref<8x128xf32, #tpu.memory_space<vmem>>, %arg19: memref<192x128xbf16, #tpu.memory_space<vmem>>, %arg20: memref<4x128xf32, #tpu.memory_space<vmem>>, %arg21: memref<128x128xbf16, #tpu.memory_space<vmem>>, %arg22: memref<1x128xf32, #tpu.memory_space<vmem>>, %arg23: memref<1x128xf32, #tpu.memory_space<vmem>>, %arg24: memref<1x128xf32, #tpu.memory_space<vmem>>, %arg25: memref<128x384xbf16, #tpu.memory_space<vmem>>, %arg26: memref<1x384xf32, #tpu.memory_space<vmem>>, %arg27: memref<128x128xbf16, #tpu.memory_space<vmem>>, %arg28: memref<1x128xf32, #tpu.memory_space<vmem>>, %arg29: memref<1x128xf32, #tpu.memory_space<vmem>>, %arg30: memref<1x128xf32, #tpu.memory_space<vmem>>, %arg31: memref<128x128xbf16, #tpu.memory_space<vmem>>, %arg32: memref<1x128xf32, #tpu.memory_space<vmem>>, %arg33: memref<128x256xbf16, #tpu.memory_space<vmem>>, %arg34: memref<1x256xf32, #tpu.memory_space<vmem>>, %arg35: memref<128x128xbf16, #tpu.memory_space<vmem>>, %arg36: memref<1x128xf32, #tpu.memory_space<vmem>>, %arg37: memref<1x128xf32, #tpu.memory_space<vmem>>, %arg38: memref<1x128xf32, #tpu.memory_space<vmem>>, %arg39: memref<128x256xbf16, #tpu.memory_space<vmem>>, %arg40: memref<1x256xf32, #tpu.memory_space<vmem>>, %arg41: memref<256x128xbf16, #tpu.memory_space<vmem>>, %arg42: memref<1x128xf32, #tpu.memory_space<vmem>>, %arg43: memref<1x128xf32, #tpu.memory_space<vmem>>, %arg44: memref<1x128xf32, #tpu.memory_space<vmem>>, %arg45: memref<128x256xbf16, #tpu.memory_space<vmem>>, %arg46: memref<1x256xf32, #tpu.memory_space<vmem>>, %arg47: memref<1x8x256xf32, #tpu.memory_space<vmem>>) attributes {dimension_semantics = [#tpu.dimension_semantics<parallel>], iteration_bounds = array<i64: 2>, scalar_prefetch = 0 : i64, scratch_operands = 0 : i64, tpu.core_type = #tpu.core_type<tc>, window_params = [{transform_indices = @transform_0, window_bounds = array<i64: 1, 8, 128>}, {transform_indices = @transform_1, window_bounds = array<i64: 1, 8, 64>}, {transform_indices = @transform_2, window_bounds = array<i64: 1, 4, 192>}, {transform_indices = @transform_3, window_bounds = array<i64: 1, 8, 128>}, {pipeline_mode = #tpu.pipeline_mode<synchronous>, transform_indices = @transform_4, window_bounds = array<i64: 4, 1, 128>}, {pipeline_mode = #tpu.pipeline_mode<synchronous>, transform_indices = @transform_5, window_bounds = array<i64: 4, 1, 128>}, {pipeline_mode = #tpu.pipeline_mode<synchronous>, transform_indices = @transform_6, window_bounds = array<i64: 4, 128, 384>}, {pipeline_mode = #tpu.pipeline_mode<synchronous>, transform_indices = @transform_7, window_bounds = array<i64: 4, 1, 384>}, {pipeline_mode = #tpu.pipeline_mode<synchronous>, transform_indices = @transform_8, window_bounds = array<i64: 4, 128, 128>}, {pipeline_mode = #tpu.pipeline_mode<synchronous>, transform_indices = @transform_9, window_bounds = array<i64: 4, 1, 128>}, {pipeline_mode = #tpu.pipeline_mode<synchronous>, transform_indices = @transform_10, window_bounds = array<i64: 4, 1, 128>}, {pipeline_mode = #tpu.pipeline_mode<synchronous>, transform_indices = @transform_11, window_bounds = array<i64: 4, 1, 128>}, {pipeline_mode = #tpu.pipeline_mode<synchronous>, transform_indices = @transform_12, window_bounds = array<i64: 4, 128, 256>}, {pipeline_mode = #tpu.pipeline_mode<synchronous>, transform_indices = @transform_13, window_bounds = array<i64: 4, 1, 256>}, {pipeline_mode = #tpu.pipeline_mode<synchronous>, transform_indices = @transform_14, window_bounds = array<i64: 4, 256, 128>}, {pipeline_mode = #tpu.pipeline_mode<synchronous>, transform_indices = @transform_15, window_bounds = array<i64: 4, 1, 128>}, {pipeline_mode = #tpu.pipeline_mode<synchronous>, transform_indices = @transform_16, window_bounds = array<i64: 64, 128>}, {pipeline_mode = #tpu.pipeline_mode<synchronous>, transform_indices = @transform_17, window_bounds = array<i64: 8, 128>}, {pipeline_mode = #tpu.pipeline_mode<synchronous>, transform_indices = @transform_18, window_bounds = array<i64: 192, 128>}, {pipeline_mode = #tpu.pipeline_mode<synchronous>, transform_indices = @transform_19, window_bounds = array<i64: 4, 128>}, {pipeline_mode = #tpu.pipeline_mode<synchronous>, transform_indices = @transform_20, window_bounds = array<i64: 128, 128>}, {pipeline_mode = #tpu.pipeline_mode<synchronous>, transform_indices = @transform_21, window_bounds = array<i64: 1, 128>}, {pipeline_mode = #tpu.pipeline_mode<synchronous>, transform_indices = @transform_22, window_bounds = array<i64: 1, 128>}, {pipeline_mode = #tpu.pipeline_mode<synchronous>, transform_indices = @transform_23, window_bounds = array<i64: 1, 128>}, {pipeline_mode = #tpu.pipeline_mode<synchronous>, transform_indices = @transform_24, window_bounds = array<i64: 128, 384>}, {pipeline_mode = #tpu.pipeline_mode<synchronous>, transform_indices = @transform_25, window_bounds = array<i64: 1, 384>}, {pipeline_mode = #tpu.pipeline_mode<synchronous>, transform_indices = @transform_26, window_bounds = array<i64: 128, 128>}, {pipeline_mode = #tpu.pipeline_mode<synchronous>, transform_indices = @transform_27, window_bounds = array<i64: 1, 128>}, {pipeline_mode = #tpu.pipeline_mode<synchronous>, transform_indices = @transform_28, window_bounds = array<i64: 1, 128>}, {pipeline_mode = #tpu.pipeline_mode<synchronous>, transform_indices = @transform_29, window_bounds = array<i64: 1, 128>}, {pipeline_mode = #tpu.pipeline_mode<synchronous>, transform_indices = @transform_30, window_bounds = array<i64: 128, 128>}, {pipeline_mode = #tpu.pipeline_mode<synchronous>, transform_indices = @transform_31, window_bounds = array<i64: 1, 128>}, {pipeline_mode = #tpu.pipeline_mode<synchronous>, transform_indices = @transform_32, window_bounds = array<i64: 128, 256>}, {pipeline_mode = #tpu.pipeline_mode<synchronous>, transform_indices = @transform_33, window_bounds = array<i64: 1, 256>}, {pipeline_mode = #tpu.pipeline_mode<synchronous>, transform_indices = @transform_34, window_bounds = array<i64: 128, 128>}, {pipeline_mode = #tpu.pipeline_mode<synchronous>, transform_indices = @transform_35, window_bounds = array<i64: 1, 128>}, {pipeline_mode = #tpu.pipeline_mode<synchronous>, transform_indices = @transform_36, window_bounds = array<i64: 1, 128>}, {pipeline_mode = #tpu.pipeline_mode<synchronous>, transform_indices = @transform_37, window_bounds = array<i64: 1, 128>}, {pipeline_mode = #tpu.pipeline_mode<synchronous>, transform_indices = @transform_38, window_bounds = array<i64: 128, 256>}, {pipeline_mode = #tpu.pipeline_mode<synchronous>, transform_indices = @transform_39, window_bounds = array<i64: 1, 256>}, {pipeline_mode = #tpu.pipeline_mode<synchronous>, transform_indices = @transform_40, window_bounds = array<i64: 256, 128>}, {pipeline_mode = #tpu.pipeline_mode<synchronous>, transform_indices = @transform_41, window_bounds = array<i64: 1, 128>}, {pipeline_mode = #tpu.pipeline_mode<synchronous>, transform_indices = @transform_42, window_bounds = array<i64: 1, 128>}, {pipeline_mode = #tpu.pipeline_mode<synchronous>, transform_indices = @transform_43, window_bounds = array<i64: 1, 128>}, {pipeline_mode = #tpu.pipeline_mode<synchronous>, transform_indices = @transform_44, window_bounds = array<i64: 128, 256>}, {pipeline_mode = #tpu.pipeline_mode<synchronous>, transform_indices = @transform_45, window_bounds = array<i64: 1, 256>}, {transform_indices = @transform_46, window_bounds = array<i64: 1, 8, 256>}]} {
    %c0 = arith.constant 0 : index
    %c0_0 = arith.constant 0 : index
    %c0_1 = arith.constant 0 : index
    %0 = vector.load %arg1[%c0, %c0_0, %c0_1] : memref<1x8x128xf32, #tpu.memory_space<vmem>>, vector<1x8x128xf32>
    %1 = vector.shape_cast %0 : vector<1x8x128xf32> to vector<8x128xf32>
    %c0_2 = arith.constant 0 : index
    %c0_3 = arith.constant 0 : index
    %c0_4 = arith.constant 0 : index
    %2 = vector.load %arg5[%c0_2, %c0_3, %c0_4] : memref<4x1x128xf32, #tpu.memory_space<vmem>>, vector<1x1x128xf32>
    %3 = vector.shape_cast %2 : vector<1x1x128xf32> to vector<1x128xf32>
    %c0_5 = arith.constant 0 : index
    %c0_6 = arith.constant 0 : index
    %c0_7 = arith.constant 0 : index
    %4 = vector.load %arg6[%c0_5, %c0_6, %c0_7] : memref<4x1x128xf32, #tpu.memory_space<vmem>>, vector<1x1x128xf32>
    %5 = vector.shape_cast %4 : vector<1x1x128xf32> to vector<1x128xf32>
    %cst = arith.constant dense<0.000000e+00> : vector<8xf32>
    %6 = vector.multi_reduction <add>, %1, %cst [1] : vector<8x128xf32> to vector<8xf32>
    %7 = vector.shape_cast %6 : vector<8xf32> to vector<8x1xf32>
    %cst_8 = arith.constant 1.280000e+02 : f32
    %8 = vector.broadcast %cst_8 : f32 to vector<8x1xf32>
    %9 = arith.divf %7, %8 : vector<8x1xf32>
    %10 = vector.broadcast %9 : vector<8x1xf32> to vector<8x128xf32>
    %11 = arith.subf %1, %10 : vector<8x128xf32>
    %12 = arith.mulf %11, %11 : vector<8x128xf32>
    %cst_9 = arith.constant dense<0.000000e+00> : vector<8xf32>
    %13 = vector.multi_reduction <add>, %12, %cst_9 [1] : vector<8x128xf32> to vector<8xf32>
    %14 = vector.shape_cast %13 : vector<8xf32> to vector<8x1xf32>
    %cst_10 = arith.constant 1.280000e+02 : f32
    %15 = vector.broadcast %cst_10 : f32 to vector<8x1xf32>
    %16 = arith.divf %14, %15 : vector<8x1xf32>
    %17 = vector.broadcast %9 : vector<8x1xf32> to vector<8x128xf32>
    %18 = arith.subf %1, %17 : vector<8x128xf32>
    %cst_11 = arith.constant 9.99999974E-6 : f32
    %19 = vector.broadcast %cst_11 : f32 to vector<8x1xf32>
    %20 = arith.addf %16, %19 : vector<8x1xf32>
    %21 = math.rsqrt %20 : vector<8x1xf32>
    %22 = vector.broadcast %21 : vector<8x1xf32> to vector<8x128xf32>
    %23 = arith.mulf %18, %22 : vector<8x128xf32>
    %24 = vector.broadcast %3 : vector<1x128xf32> to vector<8x128xf32>
    %25 = arith.mulf %23, %24 : vector<8x128xf32>
    %26 = vector.broadcast %5 : vector<1x128xf32> to vector<8x128xf32>
    %27 = arith.addf %25, %26 : vector<8x128xf32>
    %c0_12 = arith.constant 0 : index
    %c0_13 = arith.constant 0 : index
    %c0_14 = arith.constant 0 : index
    %28 = vector.load %arg7[%c0_12, %c0_13, %c0_14] : memref<4x128x384xbf16, #tpu.memory_space<vmem>>, vector<1x128x384xbf16>
    %29 = vector.shape_cast %28 : vector<1x128x384xbf16> to vector<128x384xbf16>
    %c0_15 = arith.constant 0 : index
    %c0_16 = arith.constant 0 : index
    %c0_17 = arith.constant 0 : index
    %30 = vector.load %arg8[%c0_15, %c0_16, %c0_17] : memref<4x1x384xf32, #tpu.memory_space<vmem>>, vector<1x1x384xf32>
    %31 = vector.shape_cast %30 : vector<1x1x384xf32> to vector<1x384xf32>
    %c0_18 = arith.constant 0 : index
    %c0_19 = arith.constant 0 : index
    %c0_20 = arith.constant 0 : index
    %32 = vector.load %arg9[%c0_18, %c0_19, %c0_20] : memref<4x128x128xbf16, #tpu.memory_space<vmem>>, vector<1x128x128xbf16>
    %33 = vector.shape_cast %32 : vector<1x128x128xbf16> to vector<128x128xbf16>
    %c0_21 = arith.constant 0 : index
    %c0_22 = arith.constant 0 : index
    %c0_23 = arith.constant 0 : index
    %34 = vector.load %arg10[%c0_21, %c0_22, %c0_23] : memref<4x1x128xf32, #tpu.memory_space<vmem>>, vector<1x1x128xf32>
    %35 = vector.shape_cast %34 : vector<1x1x128xf32> to vector<1x128xf32>
    %36 = arith.truncf %27 : vector<8x128xf32> to vector<8x128xbf16>
    %cst_24 = arith.constant dense<0.000000e+00> : vector<8x384xf32>
    %37 = tpu.matmul %36, %29, %cst_24 {dimension_numbers = #tpu.dot_dimension_numbers<[1], [0], [0], [1], [0, 0, 1, 1], [], []>} : vector<8x128xbf16>, vector<128x384xbf16>, vector<8x384xf32> -> vector<8x384xf32>
    %38 = vector.broadcast %31 : vector<1x384xf32> to vector<8x384xf32>
    %39 = arith.addf %37, %38 : vector<8x384xf32>
    %40 = arith.truncf %39 : vector<8x384xf32> to vector<8x384xbf16>
    %41 = vector.extract_strided_slice %40 {offsets = [0, 0], sizes = [8, 128], strides = [1, 1]} : vector<8x384xbf16> to vector<8x128xbf16>
    %42 = vector.shape_cast %41 : vector<8x128xbf16> to vector<8x4x32xbf16>
    %43 = vector.extract_strided_slice %40 {offsets = [0, 128], sizes = [8, 128], strides = [1, 1]} : vector<8x384xbf16> to vector<8x128xbf16>
    %44 = vector.shape_cast %43 : vector<8x128xbf16> to vector<8x4x32xbf16>
    %45 = vector.extract_strided_slice %40 {offsets = [0, 256], sizes = [8, 128], strides = [1, 1]} : vector<8x384xbf16> to vector<8x128xbf16>
    %46 = vector.shape_cast %45 : vector<8x128xbf16> to vector<8x4x32xbf16>
    "tpu.trace_start"() <{level = 10 : i32, message = "qhd,khd->hqk"}> : () -> ()
    %cst_25 = arith.constant dense<0.000000e+00> : vector<4x8x8xf32>
    %47 = tpu.matmul %42, %44, %cst_25 {dimension_numbers = #tpu.dot_dimension_numbers<[2], [2], [0], [0], [0, 1, 0, 0, 1, 0], [1], [1]>} : vector<8x4x32xbf16>, vector<8x4x32xbf16>, vector<4x8x8xf32> -> vector<4x8x8xf32>
    "tpu.trace_stop"() : () -> ()
    %cst_26 = arith.constant 0.176776692 : f32
    %48 = vector.broadcast %cst_26 : f32 to vector<4x8x8xf32>
    %49 = arith.mulf %47, %48 : vector<4x8x8xf32>
    %cst_27 = arith.constant dense<0xFF800000> : vector<4x8xf32>
    %50 = vector.multi_reduction <maximumf>, %49, %cst_27 [2] : vector<4x8x8xf32> to vector<4x8xf32>
    %51 = vector.shape_cast %50 : vector<4x8xf32> to vector<4x8x1xf32>
    %52 = vector.broadcast %51 : vector<4x8x1xf32> to vector<4x8x8xf32>
    %53 = arith.subf %49, %52 : vector<4x8x8xf32>
    %54 = math.exp %53 : vector<4x8x8xf32>
    %cst_28 = arith.constant dense<0.000000e+00> : vector<4x8xf32>
    %55 = vector.multi_reduction <add>, %54, %cst_28 [2] : vector<4x8x8xf32> to vector<4x8xf32>
    %56 = vector.shape_cast %55 : vector<4x8xf32> to vector<4x8x1xf32>
    %57 = vector.broadcast %56 : vector<4x8x1xf32> to vector<4x8x8xf32>
    %58 = arith.divf %54, %57 : vector<4x8x8xf32>
    %59 = arith.truncf %58 : vector<4x8x8xf32> to vector<4x8x8xbf16>
    "tpu.trace_start"() <{level = 10 : i32, message = "hqk,khd->qhd"}> : () -> ()
    %cst_29 = arith.constant dense<0.000000e+00> : vector<4x32x8xf32>
    %60 = tpu.matmul %46, %59, %cst_29 {dimension_numbers = #tpu.dot_dimension_numbers<[0], [2], [2], [1], [0, 1, 0, 2, 1, 1], [1], [0]>} : vector<8x4x32xbf16>, vector<4x8x8xbf16>, vector<4x32x8xf32> -> vector<4x32x8xf32>
    %61 = tpu.transpose %60, [2, 0, 1] : vector<4x32x8xf32> -> vector<8x4x32xf32>
    "tpu.trace_stop"() : () -> ()
    %62 = vector.shape_cast %61 : vector<8x4x32xf32> to vector<8x128xf32>
    %63 = arith.truncf %62 : vector<8x128xf32> to vector<8x128xbf16>
    %cst_30 = arith.constant dense<0.000000e+00> : vector<8x128xf32>
    %64 = tpu.matmul %63, %33, %cst_30 {dimension_numbers = #tpu.dot_dimension_numbers<[1], [0], [0], [1], [0, 0, 1, 1], [], []>} : vector<8x128xbf16>, vector<128x128xbf16>, vector<8x128xf32> -> vector<8x128xf32>
    %65 = vector.broadcast %35 : vector<1x128xf32> to vector<8x128xf32>
    %66 = arith.addf %64, %65 : vector<8x128xf32>
    %67 = arith.addf %1, %66 : vector<8x128xf32>
    %c0_31 = arith.constant 0 : index
    %c0_32 = arith.constant 0 : index
    %c0_33 = arith.constant 0 : index
    %68 = vector.load %arg11[%c0_31, %c0_32, %c0_33] : memref<4x1x128xf32, #tpu.memory_space<vmem>>, vector<1x1x128xf32>
    %69 = vector.shape_cast %68 : vector<1x1x128xf32> to vector<1x128xf32>
    %c0_34 = arith.constant 0 : index
    %c0_35 = arith.constant 0 : index
    %c0_36 = arith.constant 0 : index
    %70 = vector.load %arg12[%c0_34, %c0_35, %c0_36] : memref<4x1x128xf32, #tpu.memory_space<vmem>>, vector<1x1x128xf32>
    %71 = vector.shape_cast %70 : vector<1x1x128xf32> to vector<1x128xf32>
    %cst_37 = arith.constant dense<0.000000e+00> : vector<8xf32>
    %72 = vector.multi_reduction <add>, %67, %cst_37 [1] : vector<8x128xf32> to vector<8xf32>
    %73 = vector.shape_cast %72 : vector<8xf32> to vector<8x1xf32>
    %cst_38 = arith.constant 1.280000e+02 : f32
    %74 = vector.broadcast %cst_38 : f32 to vector<8x1xf32>
    %75 = arith.divf %73, %74 : vector<8x1xf32>
    %76 = vector.broadcast %75 : vector<8x1xf32> to vector<8x128xf32>
    %77 = arith.subf %67, %76 : vector<8x128xf32>
    %78 = arith.mulf %77, %77 : vector<8x128xf32>
    %cst_39 = arith.constant dense<0.000000e+00> : vector<8xf32>
    %79 = vector.multi_reduction <add>, %78, %cst_39 [1] : vector<8x128xf32> to vector<8xf32>
    %80 = vector.shape_cast %79 : vector<8xf32> to vector<8x1xf32>
    %cst_40 = arith.constant 1.280000e+02 : f32
    %81 = vector.broadcast %cst_40 : f32 to vector<8x1xf32>
    %82 = arith.divf %80, %81 : vector<8x1xf32>
    %83 = vector.broadcast %75 : vector<8x1xf32> to vector<8x128xf32>
    %84 = arith.subf %67, %83 : vector<8x128xf32>
    %cst_41 = arith.constant 9.99999974E-6 : f32
    %85 = vector.broadcast %cst_41 : f32 to vector<8x1xf32>
    %86 = arith.addf %82, %85 : vector<8x1xf32>
    %87 = math.rsqrt %86 : vector<8x1xf32>
    %88 = vector.broadcast %87 : vector<8x1xf32> to vector<8x128xf32>
    %89 = arith.mulf %84, %88 : vector<8x128xf32>
    %90 = vector.broadcast %69 : vector<1x128xf32> to vector<8x128xf32>
    %91 = arith.mulf %89, %90 : vector<8x128xf32>
    %92 = vector.broadcast %71 : vector<1x128xf32> to vector<8x128xf32>
    %93 = arith.addf %91, %92 : vector<8x128xf32>
    %c0_42 = arith.constant 0 : index
    %c0_43 = arith.constant 0 : index
    %c0_44 = arith.constant 0 : index
    %94 = vector.load %arg13[%c0_42, %c0_43, %c0_44] : memref<4x128x256xbf16, #tpu.memory_space<vmem>>, vector<1x128x256xbf16>
    %95 = vector.shape_cast %94 : vector<1x128x256xbf16> to vector<128x256xbf16>
    %c0_45 = arith.constant 0 : index
    %c0_46 = arith.constant 0 : index
    %c0_47 = arith.constant 0 : index
    %96 = vector.load %arg14[%c0_45, %c0_46, %c0_47] : memref<4x1x256xf32, #tpu.memory_space<vmem>>, vector<1x1x256xf32>
    %97 = vector.shape_cast %96 : vector<1x1x256xf32> to vector<1x256xf32>
    %98 = arith.truncf %93 : vector<8x128xf32> to vector<8x128xbf16>
    %cst_48 = arith.constant dense<0.000000e+00> : vector<8x256xf32>
    %99 = tpu.matmul %98, %95, %cst_48 {dimension_numbers = #tpu.dot_dimension_numbers<[1], [0], [0], [1], [0, 0, 1, 1], [], []>} : vector<8x128xbf16>, vector<128x256xbf16>, vector<8x256xf32> -> vector<8x256xf32>
    %100 = vector.broadcast %97 : vector<1x256xf32> to vector<8x256xf32>
    %101 = arith.addf %99, %100 : vector<8x256xf32>
    %102 = arith.mulf %101, %101 : vector<8x256xf32>
    %103 = arith.mulf %101, %102 : vector<8x256xf32>
    %cst_49 = arith.constant 4.471500e-02 : f32
    %104 = vector.broadcast %cst_49 : f32 to vector<8x256xf32>
    %105 = arith.mulf %104, %103 : vector<8x256xf32>
    %106 = arith.addf %101, %105 : vector<8x256xf32>
    %cst_50 = arith.constant 0.797884583 : f32
    %107 = vector.broadcast %cst_50 : f32 to vector<8x256xf32>
    %108 = arith.mulf %107, %106 : vector<8x256xf32>
    %109 = math.tanh %108 : vector<8x256xf32>
    %cst_51 = arith.constant 1.000000e+00 : f32
    %110 = vector.broadcast %cst_51 : f32 to vector<8x256xf32>
    %111 = arith.addf %110, %109 : vector<8x256xf32>
    %cst_52 = arith.constant 5.000000e-01 : f32
    %112 = vector.broadcast %cst_52 : f32 to vector<8x256xf32>
    %113 = arith.mulf %112, %111 : vector<8x256xf32>
    %114 = arith.mulf %101, %113 : vector<8x256xf32>
    %c0_53 = arith.constant 0 : index
    %c0_54 = arith.constant 0 : index
    %c0_55 = arith.constant 0 : index
    %115 = vector.load %arg15[%c0_53, %c0_54, %c0_55] : memref<4x256x128xbf16, #tpu.memory_space<vmem>>, vector<1x256x128xbf16>
    %116 = vector.shape_cast %115 : vector<1x256x128xbf16> to vector<256x128xbf16>
    %c0_56 = arith.constant 0 : index
    %c0_57 = arith.constant 0 : index
    %c0_58 = arith.constant 0 : index
    %117 = vector.load %arg16[%c0_56, %c0_57, %c0_58] : memref<4x1x128xf32, #tpu.memory_space<vmem>>, vector<1x1x128xf32>
    %118 = vector.shape_cast %117 : vector<1x1x128xf32> to vector<1x128xf32>
    %119 = arith.truncf %114 : vector<8x256xf32> to vector<8x256xbf16>
    %cst_59 = arith.constant dense<0.000000e+00> : vector<8x128xf32>
    %120 = tpu.matmul %119, %116, %cst_59 {dimension_numbers = #tpu.dot_dimension_numbers<[1], [0], [0], [1], [0, 0, 1, 1], [], []>} : vector<8x256xbf16>, vector<256x128xbf16>, vector<8x128xf32> -> vector<8x128xf32>
    %121 = vector.broadcast %118 : vector<1x128xf32> to vector<8x128xf32>
    %122 = arith.addf %120, %121 : vector<8x128xf32>
    %123 = arith.addf %67, %122 : vector<8x128xf32>
    %c0_60 = arith.constant 0 : index
    %c0_61 = arith.constant 0 : index
    %c0_62 = arith.constant 0 : index
    %124 = vector.load %arg2[%c0_60, %c0_61, %c0_62] : memref<1x8x64xf32, #tpu.memory_space<vmem>>, vector<1x8x64xf32>
    %125 = vector.shape_cast %124 : vector<1x8x64xf32> to vector<8x64xf32>
    %c0_63 = arith.constant 0 : index
    %c0_64 = arith.constant 0 : index
    %126 = vector.load %arg17[%c0_63, %c0_64] : memref<64x128xbf16, #tpu.memory_space<vmem>>, vector<64x128xbf16>
    %c0_65 = arith.constant 0 : index
    %c0_66 = arith.constant 0 : index
    %127 = vector.load %arg18[%c0_65, %c0_66] : memref<8x128xf32, #tpu.memory_space<vmem>>, vector<8x128xf32>
    %128 = arith.truncf %125 : vector<8x64xf32> to vector<8x64xbf16>
    %cst_67 = arith.constant dense<0.000000e+00> : vector<8x128xf32>
    %129 = tpu.matmul %128, %126, %cst_67 {dimension_numbers = #tpu.dot_dimension_numbers<[1], [0], [0], [1], [0, 0, 1, 1], [], []>} : vector<8x64xbf16>, vector<64x128xbf16>, vector<8x128xf32> -> vector<8x128xf32>
    %130 = arith.addf %129, %127 : vector<8x128xf32>
    %c1 = arith.constant 1 : index
    %c0_68 = arith.constant 0 : index
    %c0_69 = arith.constant 0 : index
    %131 = vector.load %arg5[%c1, %c0_68, %c0_69] : memref<4x1x128xf32, #tpu.memory_space<vmem>>, vector<1x1x128xf32>
    %132 = vector.shape_cast %131 : vector<1x1x128xf32> to vector<1x128xf32>
    %c1_70 = arith.constant 1 : index
    %c0_71 = arith.constant 0 : index
    %c0_72 = arith.constant 0 : index
    %133 = vector.load %arg6[%c1_70, %c0_71, %c0_72] : memref<4x1x128xf32, #tpu.memory_space<vmem>>, vector<1x1x128xf32>
    %134 = vector.shape_cast %133 : vector<1x1x128xf32> to vector<1x128xf32>
    %cst_73 = arith.constant dense<0.000000e+00> : vector<8xf32>
    %135 = vector.multi_reduction <add>, %130, %cst_73 [1] : vector<8x128xf32> to vector<8xf32>
    %136 = vector.shape_cast %135 : vector<8xf32> to vector<8x1xf32>
    %cst_74 = arith.constant 1.280000e+02 : f32
    %137 = vector.broadcast %cst_74 : f32 to vector<8x1xf32>
    %138 = arith.divf %136, %137 : vector<8x1xf32>
    %139 = vector.broadcast %138 : vector<8x1xf32> to vector<8x128xf32>
    %140 = arith.subf %130, %139 : vector<8x128xf32>
    %141 = arith.mulf %140, %140 : vector<8x128xf32>
    %cst_75 = arith.constant dense<0.000000e+00> : vector<8xf32>
    %142 = vector.multi_reduction <add>, %141, %cst_75 [1] : vector<8x128xf32> to vector<8xf32>
    %143 = vector.shape_cast %142 : vector<8xf32> to vector<8x1xf32>
    %cst_76 = arith.constant 1.280000e+02 : f32
    %144 = vector.broadcast %cst_76 : f32 to vector<8x1xf32>
    %145 = arith.divf %143, %144 : vector<8x1xf32>
    %146 = vector.broadcast %138 : vector<8x1xf32> to vector<8x128xf32>
    %147 = arith.subf %130, %146 : vector<8x128xf32>
    %cst_77 = arith.constant 9.99999974E-6 : f32
    %148 = vector.broadcast %cst_77 : f32 to vector<8x1xf32>
    %149 = arith.addf %145, %148 : vector<8x1xf32>
    %150 = math.rsqrt %149 : vector<8x1xf32>
    %151 = vector.broadcast %150 : vector<8x1xf32> to vector<8x128xf32>
    %152 = arith.mulf %147, %151 : vector<8x128xf32>
    %153 = vector.broadcast %132 : vector<1x128xf32> to vector<8x128xf32>
    %154 = arith.mulf %152, %153 : vector<8x128xf32>
    %155 = vector.broadcast %134 : vector<1x128xf32> to vector<8x128xf32>
    %156 = arith.addf %154, %155 : vector<8x128xf32>
    %c1_78 = arith.constant 1 : index
    %c0_79 = arith.constant 0 : index
    %c0_80 = arith.constant 0 : index
    %157 = vector.load %arg7[%c1_78, %c0_79, %c0_80] : memref<4x128x384xbf16, #tpu.memory_space<vmem>>, vector<1x128x384xbf16>
    %158 = vector.shape_cast %157 : vector<1x128x384xbf16> to vector<128x384xbf16>
    %c1_81 = arith.constant 1 : index
    %c0_82 = arith.constant 0 : index
    %c0_83 = arith.constant 0 : index
    %159 = vector.load %arg8[%c1_81, %c0_82, %c0_83] : memref<4x1x384xf32, #tpu.memory_space<vmem>>, vector<1x1x384xf32>
    %160 = vector.shape_cast %159 : vector<1x1x384xf32> to vector<1x384xf32>
    %c1_84 = arith.constant 1 : index
    %c0_85 = arith.constant 0 : index
    %c0_86 = arith.constant 0 : index
    %161 = vector.load %arg9[%c1_84, %c0_85, %c0_86] : memref<4x128x128xbf16, #tpu.memory_space<vmem>>, vector<1x128x128xbf16>
    %162 = vector.shape_cast %161 : vector<1x128x128xbf16> to vector<128x128xbf16>
    %c1_87 = arith.constant 1 : index
    %c0_88 = arith.constant 0 : index
    %c0_89 = arith.constant 0 : index
    %163 = vector.load %arg10[%c1_87, %c0_88, %c0_89] : memref<4x1x128xf32, #tpu.memory_space<vmem>>, vector<1x1x128xf32>
    %164 = vector.shape_cast %163 : vector<1x1x128xf32> to vector<1x128xf32>
    %165 = arith.truncf %156 : vector<8x128xf32> to vector<8x128xbf16>
    %cst_90 = arith.constant dense<0.000000e+00> : vector<8x384xf32>
    %166 = tpu.matmul %165, %158, %cst_90 {dimension_numbers = #tpu.dot_dimension_numbers<[1], [0], [0], [1], [0, 0, 1, 1], [], []>} : vector<8x128xbf16>, vector<128x384xbf16>, vector<8x384xf32> -> vector<8x384xf32>
    %167 = vector.broadcast %160 : vector<1x384xf32> to vector<8x384xf32>
    %168 = arith.addf %166, %167 : vector<8x384xf32>
    %169 = arith.truncf %168 : vector<8x384xf32> to vector<8x384xbf16>
    %170 = vector.extract_strided_slice %169 {offsets = [0, 0], sizes = [8, 128], strides = [1, 1]} : vector<8x384xbf16> to vector<8x128xbf16>
    %171 = vector.shape_cast %170 : vector<8x128xbf16> to vector<8x4x32xbf16>
    %172 = vector.extract_strided_slice %169 {offsets = [0, 128], sizes = [8, 128], strides = [1, 1]} : vector<8x384xbf16> to vector<8x128xbf16>
    %173 = vector.shape_cast %172 : vector<8x128xbf16> to vector<8x4x32xbf16>
    %174 = vector.extract_strided_slice %169 {offsets = [0, 256], sizes = [8, 128], strides = [1, 1]} : vector<8x384xbf16> to vector<8x128xbf16>
    %175 = vector.shape_cast %174 : vector<8x128xbf16> to vector<8x4x32xbf16>
    "tpu.trace_start"() <{level = 10 : i32, message = "qhd,khd->hqk"}> : () -> ()
    %cst_91 = arith.constant dense<0.000000e+00> : vector<4x8x8xf32>
    %176 = tpu.matmul %171, %173, %cst_91 {dimension_numbers = #tpu.dot_dimension_numbers<[2], [2], [0], [0], [0, 1, 0, 0, 1, 0], [1], [1]>} : vector<8x4x32xbf16>, vector<8x4x32xbf16>, vector<4x8x8xf32> -> vector<4x8x8xf32>
    "tpu.trace_stop"() : () -> ()
    %cst_92 = arith.constant 0.176776692 : f32
    %177 = vector.broadcast %cst_92 : f32 to vector<4x8x8xf32>
    %178 = arith.mulf %176, %177 : vector<4x8x8xf32>
    %cst_93 = arith.constant dense<0xFF800000> : vector<4x8xf32>
    %179 = vector.multi_reduction <maximumf>, %178, %cst_93 [2] : vector<4x8x8xf32> to vector<4x8xf32>
    %180 = vector.shape_cast %179 : vector<4x8xf32> to vector<4x8x1xf32>
    %181 = vector.broadcast %180 : vector<4x8x1xf32> to vector<4x8x8xf32>
    %182 = arith.subf %178, %181 : vector<4x8x8xf32>
    %183 = math.exp %182 : vector<4x8x8xf32>
    %cst_94 = arith.constant dense<0.000000e+00> : vector<4x8xf32>
    %184 = vector.multi_reduction <add>, %183, %cst_94 [2] : vector<4x8x8xf32> to vector<4x8xf32>
    %185 = vector.shape_cast %184 : vector<4x8xf32> to vector<4x8x1xf32>
    %186 = vector.broadcast %185 : vector<4x8x1xf32> to vector<4x8x8xf32>
    %187 = arith.divf %183, %186 : vector<4x8x8xf32>
    %188 = arith.truncf %187 : vector<4x8x8xf32> to vector<4x8x8xbf16>
    "tpu.trace_start"() <{level = 10 : i32, message = "hqk,khd->qhd"}> : () -> ()
    %cst_95 = arith.constant dense<0.000000e+00> : vector<4x32x8xf32>
    %189 = tpu.matmul %175, %188, %cst_95 {dimension_numbers = #tpu.dot_dimension_numbers<[0], [2], [2], [1], [0, 1, 0, 2, 1, 1], [1], [0]>} : vector<8x4x32xbf16>, vector<4x8x8xbf16>, vector<4x32x8xf32> -> vector<4x32x8xf32>
    %190 = tpu.transpose %189, [2, 0, 1] : vector<4x32x8xf32> -> vector<8x4x32xf32>
    "tpu.trace_stop"() : () -> ()
    %191 = vector.shape_cast %190 : vector<8x4x32xf32> to vector<8x128xf32>
    %192 = arith.truncf %191 : vector<8x128xf32> to vector<8x128xbf16>
    %cst_96 = arith.constant dense<0.000000e+00> : vector<8x128xf32>
    %193 = tpu.matmul %192, %162, %cst_96 {dimension_numbers = #tpu.dot_dimension_numbers<[1], [0], [0], [1], [0, 0, 1, 1], [], []>} : vector<8x128xbf16>, vector<128x128xbf16>, vector<8x128xf32> -> vector<8x128xf32>
    %194 = vector.broadcast %164 : vector<1x128xf32> to vector<8x128xf32>
    %195 = arith.addf %193, %194 : vector<8x128xf32>
    %196 = arith.addf %130, %195 : vector<8x128xf32>
    %c1_97 = arith.constant 1 : index
    %c0_98 = arith.constant 0 : index
    %c0_99 = arith.constant 0 : index
    %197 = vector.load %arg11[%c1_97, %c0_98, %c0_99] : memref<4x1x128xf32, #tpu.memory_space<vmem>>, vector<1x1x128xf32>
    %198 = vector.shape_cast %197 : vector<1x1x128xf32> to vector<1x128xf32>
    %c1_100 = arith.constant 1 : index
    %c0_101 = arith.constant 0 : index
    %c0_102 = arith.constant 0 : index
    %199 = vector.load %arg12[%c1_100, %c0_101, %c0_102] : memref<4x1x128xf32, #tpu.memory_space<vmem>>, vector<1x1x128xf32>
    %200 = vector.shape_cast %199 : vector<1x1x128xf32> to vector<1x128xf32>
    %cst_103 = arith.constant dense<0.000000e+00> : vector<8xf32>
    %201 = vector.multi_reduction <add>, %196, %cst_103 [1] : vector<8x128xf32> to vector<8xf32>
    %202 = vector.shape_cast %201 : vector<8xf32> to vector<8x1xf32>
    %cst_104 = arith.constant 1.280000e+02 : f32
    %203 = vector.broadcast %cst_104 : f32 to vector<8x1xf32>
    %204 = arith.divf %202, %203 : vector<8x1xf32>
    %205 = vector.broadcast %204 : vector<8x1xf32> to vector<8x128xf32>
    %206 = arith.subf %196, %205 : vector<8x128xf32>
    %207 = arith.mulf %206, %206 : vector<8x128xf32>
    %cst_105 = arith.constant dense<0.000000e+00> : vector<8xf32>
    %208 = vector.multi_reduction <add>, %207, %cst_105 [1] : vector<8x128xf32> to vector<8xf32>
    %209 = vector.shape_cast %208 : vector<8xf32> to vector<8x1xf32>
    %cst_106 = arith.constant 1.280000e+02 : f32
    %210 = vector.broadcast %cst_106 : f32 to vector<8x1xf32>
    %211 = arith.divf %209, %210 : vector<8x1xf32>
    %212 = vector.broadcast %204 : vector<8x1xf32> to vector<8x128xf32>
    %213 = arith.subf %196, %212 : vector<8x128xf32>
    %cst_107 = arith.constant 9.99999974E-6 : f32
    %214 = vector.broadcast %cst_107 : f32 to vector<8x1xf32>
    %215 = arith.addf %211, %214 : vector<8x1xf32>
    %216 = math.rsqrt %215 : vector<8x1xf32>
    %217 = vector.broadcast %216 : vector<8x1xf32> to vector<8x128xf32>
    %218 = arith.mulf %213, %217 : vector<8x128xf32>
    %219 = vector.broadcast %198 : vector<1x128xf32> to vector<8x128xf32>
    %220 = arith.mulf %218, %219 : vector<8x128xf32>
    %221 = vector.broadcast %200 : vector<1x128xf32> to vector<8x128xf32>
    %222 = arith.addf %220, %221 : vector<8x128xf32>
    %c1_108 = arith.constant 1 : index
    %c0_109 = arith.constant 0 : index
    %c0_110 = arith.constant 0 : index
    %223 = vector.load %arg13[%c1_108, %c0_109, %c0_110] : memref<4x128x256xbf16, #tpu.memory_space<vmem>>, vector<1x128x256xbf16>
    %224 = vector.shape_cast %223 : vector<1x128x256xbf16> to vector<128x256xbf16>
    %c1_111 = arith.constant 1 : index
    %c0_112 = arith.constant 0 : index
    %c0_113 = arith.constant 0 : index
    %225 = vector.load %arg14[%c1_111, %c0_112, %c0_113] : memref<4x1x256xf32, #tpu.memory_space<vmem>>, vector<1x1x256xf32>
    %226 = vector.shape_cast %225 : vector<1x1x256xf32> to vector<1x256xf32>
    %227 = arith.truncf %222 : vector<8x128xf32> to vector<8x128xbf16>
    %cst_114 = arith.constant dense<0.000000e+00> : vector<8x256xf32>
    %228 = tpu.matmul %227, %224, %cst_114 {dimension_numbers = #tpu.dot_dimension_numbers<[1], [0], [0], [1], [0, 0, 1, 1], [], []>} : vector<8x128xbf16>, vector<128x256xbf16>, vector<8x256xf32> -> vector<8x256xf32>
    %229 = vector.broadcast %226 : vector<1x256xf32> to vector<8x256xf32>
    %230 = arith.addf %228, %229 : vector<8x256xf32>
    %231 = arith.mulf %230, %230 : vector<8x256xf32>
    %232 = arith.mulf %230, %231 : vector<8x256xf32>
    %cst_115 = arith.constant 4.471500e-02 : f32
    %233 = vector.broadcast %cst_115 : f32 to vector<8x256xf32>
    %234 = arith.mulf %233, %232 : vector<8x256xf32>
    %235 = arith.addf %230, %234 : vector<8x256xf32>
    %cst_116 = arith.constant 0.797884583 : f32
    %236 = vector.broadcast %cst_116 : f32 to vector<8x256xf32>
    %237 = arith.mulf %236, %235 : vector<8x256xf32>
    %238 = math.tanh %237 : vector<8x256xf32>
    %cst_117 = arith.constant 1.000000e+00 : f32
    %239 = vector.broadcast %cst_117 : f32 to vector<8x256xf32>
    %240 = arith.addf %239, %238 : vector<8x256xf32>
    %cst_118 = arith.constant 5.000000e-01 : f32
    %241 = vector.broadcast %cst_118 : f32 to vector<8x256xf32>
    %242 = arith.mulf %241, %240 : vector<8x256xf32>
    %243 = arith.mulf %230, %242 : vector<8x256xf32>
    %c1_119 = arith.constant 1 : index
    %c0_120 = arith.constant 0 : index
    %c0_121 = arith.constant 0 : index
    %244 = vector.load %arg15[%c1_119, %c0_120, %c0_121] : memref<4x256x128xbf16, #tpu.memory_space<vmem>>, vector<1x256x128xbf16>
    %245 = vector.shape_cast %244 : vector<1x256x128xbf16> to vector<256x128xbf16>
    %c1_122 = arith.constant 1 : index
    %c0_123 = arith.constant 0 : index
    %c0_124 = arith.constant 0 : index
    %246 = vector.load %arg16[%c1_122, %c0_123, %c0_124] : memref<4x1x128xf32, #tpu.memory_space<vmem>>, vector<1x1x128xf32>
    %247 = vector.shape_cast %246 : vector<1x1x128xf32> to vector<1x128xf32>
    %248 = arith.truncf %243 : vector<8x256xf32> to vector<8x256xbf16>
    %cst_125 = arith.constant dense<0.000000e+00> : vector<8x128xf32>
    %249 = tpu.matmul %248, %245, %cst_125 {dimension_numbers = #tpu.dot_dimension_numbers<[1], [0], [0], [1], [0, 0, 1, 1], [], []>} : vector<8x256xbf16>, vector<256x128xbf16>, vector<8x128xf32> -> vector<8x128xf32>
    %250 = vector.broadcast %247 : vector<1x128xf32> to vector<8x128xf32>
    %251 = arith.addf %249, %250 : vector<8x128xf32>
    %252 = arith.addf %196, %251 : vector<8x128xf32>
    %c0_126 = arith.constant 0 : index
    %c0_127 = arith.constant 0 : index
    %c0_128 = arith.constant 0 : index
    %253 = vector.load %arg3[%c0_126, %c0_127, %c0_128] : memref<1x4x192xf32, #tpu.memory_space<vmem>>, vector<1x4x192xf32>
    %254 = vector.shape_cast %253 : vector<1x4x192xf32> to vector<4x192xf32>
    %c0_129 = arith.constant 0 : index
    %c0_130 = arith.constant 0 : index
    %255 = vector.load %arg19[%c0_129, %c0_130] : memref<192x128xbf16, #tpu.memory_space<vmem>>, vector<192x128xbf16>
    %c0_131 = arith.constant 0 : index
    %c0_132 = arith.constant 0 : index
    %256 = vector.load %arg20[%c0_131, %c0_132] : memref<4x128xf32, #tpu.memory_space<vmem>>, vector<4x128xf32>
    %257 = arith.truncf %254 : vector<4x192xf32> to vector<4x192xbf16>
    %cst_133 = arith.constant dense<0.000000e+00> : vector<4x128xf32>
    %258 = tpu.matmul %257, %255, %cst_133 {dimension_numbers = #tpu.dot_dimension_numbers<[1], [0], [0], [1], [0, 0, 1, 1], [], []>} : vector<4x192xbf16>, vector<192x128xbf16>, vector<4x128xf32> -> vector<4x128xf32>
    %259 = arith.addf %258, %256 : vector<4x128xf32>
    %c2 = arith.constant 2 : index
    %c0_134 = arith.constant 0 : index
    %c0_135 = arith.constant 0 : index
    %260 = vector.load %arg5[%c2, %c0_134, %c0_135] : memref<4x1x128xf32, #tpu.memory_space<vmem>>, vector<1x1x128xf32>
    %261 = vector.shape_cast %260 : vector<1x1x128xf32> to vector<1x128xf32>
    %c2_136 = arith.constant 2 : index
    %c0_137 = arith.constant 0 : index
    %c0_138 = arith.constant 0 : index
    %262 = vector.load %arg6[%c2_136, %c0_137, %c0_138] : memref<4x1x128xf32, #tpu.memory_space<vmem>>, vector<1x1x128xf32>
    %263 = vector.shape_cast %262 : vector<1x1x128xf32> to vector<1x128xf32>
    %cst_139 = arith.constant dense<0.000000e+00> : vector<4xf32>
    %264 = vector.multi_reduction <add>, %259, %cst_139 [1] : vector<4x128xf32> to vector<4xf32>
    %265 = vector.shape_cast %264 : vector<4xf32> to vector<4x1xf32>
    %cst_140 = arith.constant 1.280000e+02 : f32
    %266 = vector.broadcast %cst_140 : f32 to vector<4x1xf32>
    %267 = arith.divf %265, %266 : vector<4x1xf32>
    %268 = vector.broadcast %267 : vector<4x1xf32> to vector<4x128xf32>
    %269 = arith.subf %259, %268 : vector<4x128xf32>
    %270 = arith.mulf %269, %269 : vector<4x128xf32>
    %cst_141 = arith.constant dense<0.000000e+00> : vector<4xf32>
    %271 = vector.multi_reduction <add>, %270, %cst_141 [1] : vector<4x128xf32> to vector<4xf32>
    %272 = vector.shape_cast %271 : vector<4xf32> to vector<4x1xf32>
    %cst_142 = arith.constant 1.280000e+02 : f32
    %273 = vector.broadcast %cst_142 : f32 to vector<4x1xf32>
    %274 = arith.divf %272, %273 : vector<4x1xf32>
    %275 = vector.broadcast %267 : vector<4x1xf32> to vector<4x128xf32>
    %276 = arith.subf %259, %275 : vector<4x128xf32>
    %cst_143 = arith.constant 9.99999974E-6 : f32
    %277 = vector.broadcast %cst_143 : f32 to vector<4x1xf32>
    %278 = arith.addf %274, %277 : vector<4x1xf32>
    %279 = math.rsqrt %278 : vector<4x1xf32>
    %280 = vector.broadcast %279 : vector<4x1xf32> to vector<4x128xf32>
    %281 = arith.mulf %276, %280 : vector<4x128xf32>
    %282 = vector.broadcast %261 : vector<1x128xf32> to vector<4x128xf32>
    %283 = arith.mulf %281, %282 : vector<4x128xf32>
    %284 = vector.broadcast %263 : vector<1x128xf32> to vector<4x128xf32>
    %285 = arith.addf %283, %284 : vector<4x128xf32>
    %c2_144 = arith.constant 2 : index
    %c0_145 = arith.constant 0 : index
    %c0_146 = arith.constant 0 : index
    %286 = vector.load %arg7[%c2_144, %c0_145, %c0_146] : memref<4x128x384xbf16, #tpu.memory_space<vmem>>, vector<1x128x384xbf16>
    %287 = vector.shape_cast %286 : vector<1x128x384xbf16> to vector<128x384xbf16>
    %c2_147 = arith.constant 2 : index
    %c0_148 = arith.constant 0 : index
    %c0_149 = arith.constant 0 : index
    %288 = vector.load %arg8[%c2_147, %c0_148, %c0_149] : memref<4x1x384xf32, #tpu.memory_space<vmem>>, vector<1x1x384xf32>
    %289 = vector.shape_cast %288 : vector<1x1x384xf32> to vector<1x384xf32>
    %c2_150 = arith.constant 2 : index
    %c0_151 = arith.constant 0 : index
    %c0_152 = arith.constant 0 : index
    %290 = vector.load %arg9[%c2_150, %c0_151, %c0_152] : memref<4x128x128xbf16, #tpu.memory_space<vmem>>, vector<1x128x128xbf16>
    %291 = vector.shape_cast %290 : vector<1x128x128xbf16> to vector<128x128xbf16>
    %c2_153 = arith.constant 2 : index
    %c0_154 = arith.constant 0 : index
    %c0_155 = arith.constant 0 : index
    %292 = vector.load %arg10[%c2_153, %c0_154, %c0_155] : memref<4x1x128xf32, #tpu.memory_space<vmem>>, vector<1x1x128xf32>
    %293 = vector.shape_cast %292 : vector<1x1x128xf32> to vector<1x128xf32>
    %294 = arith.truncf %285 : vector<4x128xf32> to vector<4x128xbf16>
    %cst_156 = arith.constant dense<0.000000e+00> : vector<4x384xf32>
    %295 = tpu.matmul %294, %287, %cst_156 {dimension_numbers = #tpu.dot_dimension_numbers<[1], [0], [0], [1], [0, 0, 1, 1], [], []>} : vector<4x128xbf16>, vector<128x384xbf16>, vector<4x384xf32> -> vector<4x384xf32>
    %296 = vector.broadcast %289 : vector<1x384xf32> to vector<4x384xf32>
    %297 = arith.addf %295, %296 : vector<4x384xf32>
    %298 = arith.truncf %297 : vector<4x384xf32> to vector<4x384xbf16>
    %299 = vector.extract_strided_slice %298 {offsets = [0, 0], sizes = [4, 128], strides = [1, 1]} : vector<4x384xbf16> to vector<4x128xbf16>
    %300 = vector.shape_cast %299 : vector<4x128xbf16> to vector<4x4x32xbf16>
    %301 = vector.extract_strided_slice %298 {offsets = [0, 128], sizes = [4, 128], strides = [1, 1]} : vector<4x384xbf16> to vector<4x128xbf16>
    %302 = vector.shape_cast %301 : vector<4x128xbf16> to vector<4x4x32xbf16>
    %303 = vector.extract_strided_slice %298 {offsets = [0, 256], sizes = [4, 128], strides = [1, 1]} : vector<4x384xbf16> to vector<4x128xbf16>
    %304 = vector.shape_cast %303 : vector<4x128xbf16> to vector<4x4x32xbf16>
    "tpu.trace_start"() <{level = 10 : i32, message = "qhd,khd->hqk"}> : () -> ()
    %cst_157 = arith.constant dense<0.000000e+00> : vector<4x4x4xf32>
    %305 = tpu.matmul %300, %302, %cst_157 {dimension_numbers = #tpu.dot_dimension_numbers<[2], [2], [0], [0], [0, 1, 0, 0, 1, 0], [1], [1]>} : vector<4x4x32xbf16>, vector<4x4x32xbf16>, vector<4x4x4xf32> -> vector<4x4x4xf32>
    "tpu.trace_stop"() : () -> ()
    %cst_158 = arith.constant 0.176776692 : f32
    %306 = vector.broadcast %cst_158 : f32 to vector<4x4x4xf32>
    %307 = arith.mulf %305, %306 : vector<4x4x4xf32>
    %cst_159 = arith.constant dense<0xFF800000> : vector<4x4xf32>
    %308 = vector.multi_reduction <maximumf>, %307, %cst_159 [2] : vector<4x4x4xf32> to vector<4x4xf32>
    %309 = vector.shape_cast %308 : vector<4x4xf32> to vector<4x4x1xf32>
    %310 = vector.broadcast %309 : vector<4x4x1xf32> to vector<4x4x4xf32>
    %311 = arith.subf %307, %310 : vector<4x4x4xf32>
    %312 = math.exp %311 : vector<4x4x4xf32>
    %cst_160 = arith.constant dense<0.000000e+00> : vector<4x4xf32>
    %313 = vector.multi_reduction <add>, %312, %cst_160 [2] : vector<4x4x4xf32> to vector<4x4xf32>
    %314 = vector.shape_cast %313 : vector<4x4xf32> to vector<4x4x1xf32>
    %315 = vector.broadcast %314 : vector<4x4x1xf32> to vector<4x4x4xf32>
    %316 = arith.divf %312, %315 : vector<4x4x4xf32>
    %317 = arith.truncf %316 : vector<4x4x4xf32> to vector<4x4x4xbf16>
    "tpu.trace_start"() <{level = 10 : i32, message = "hqk,khd->qhd"}> : () -> ()
    %cst_161 = arith.constant dense<0.000000e+00> : vector<4x32x4xf32>
    %318 = tpu.matmul %304, %317, %cst_161 {dimension_numbers = #tpu.dot_dimension_numbers<[0], [2], [2], [1], [0, 1, 0, 2, 1, 1], [1], [0]>} : vector<4x4x32xbf16>, vector<4x4x4xbf16>, vector<4x32x4xf32> -> vector<4x32x4xf32>
    %319 = tpu.transpose %318, [2, 0, 1] : vector<4x32x4xf32> -> vector<4x4x32xf32>
    "tpu.trace_stop"() : () -> ()
    %320 = vector.shape_cast %319 : vector<4x4x32xf32> to vector<4x128xf32>
    %321 = arith.truncf %320 : vector<4x128xf32> to vector<4x128xbf16>
    %cst_162 = arith.constant dense<0.000000e+00> : vector<4x128xf32>
    %322 = tpu.matmul %321, %291, %cst_162 {dimension_numbers = #tpu.dot_dimension_numbers<[1], [0], [0], [1], [0, 0, 1, 1], [], []>} : vector<4x128xbf16>, vector<128x128xbf16>, vector<4x128xf32> -> vector<4x128xf32>
    %323 = vector.broadcast %293 : vector<1x128xf32> to vector<4x128xf32>
    %324 = arith.addf %322, %323 : vector<4x128xf32>
    %325 = arith.addf %259, %324 : vector<4x128xf32>
    %c2_163 = arith.constant 2 : index
    %c0_164 = arith.constant 0 : index
    %c0_165 = arith.constant 0 : index
    %326 = vector.load %arg11[%c2_163, %c0_164, %c0_165] : memref<4x1x128xf32, #tpu.memory_space<vmem>>, vector<1x1x128xf32>
    %327 = vector.shape_cast %326 : vector<1x1x128xf32> to vector<1x128xf32>
    %c2_166 = arith.constant 2 : index
    %c0_167 = arith.constant 0 : index
    %c0_168 = arith.constant 0 : index
    %328 = vector.load %arg12[%c2_166, %c0_167, %c0_168] : memref<4x1x128xf32, #tpu.memory_space<vmem>>, vector<1x1x128xf32>
    %329 = vector.shape_cast %328 : vector<1x1x128xf32> to vector<1x128xf32>
    %cst_169 = arith.constant dense<0.000000e+00> : vector<4xf32>
    %330 = vector.multi_reduction <add>, %325, %cst_169 [1] : vector<4x128xf32> to vector<4xf32>
    %331 = vector.shape_cast %330 : vector<4xf32> to vector<4x1xf32>
    %cst_170 = arith.constant 1.280000e+02 : f32
    %332 = vector.broadcast %cst_170 : f32 to vector<4x1xf32>
    %333 = arith.divf %331, %332 : vector<4x1xf32>
    %334 = vector.broadcast %333 : vector<4x1xf32> to vector<4x128xf32>
    %335 = arith.subf %325, %334 : vector<4x128xf32>
    %336 = arith.mulf %335, %335 : vector<4x128xf32>
    %cst_171 = arith.constant dense<0.000000e+00> : vector<4xf32>
    %337 = vector.multi_reduction <add>, %336, %cst_171 [1] : vector<4x128xf32> to vector<4xf32>
    %338 = vector.shape_cast %337 : vector<4xf32> to vector<4x1xf32>
    %cst_172 = arith.constant 1.280000e+02 : f32
    %339 = vector.broadcast %cst_172 : f32 to vector<4x1xf32>
    %340 = arith.divf %338, %339 : vector<4x1xf32>
    %341 = vector.broadcast %333 : vector<4x1xf32> to vector<4x128xf32>
    %342 = arith.subf %325, %341 : vector<4x128xf32>
    %cst_173 = arith.constant 9.99999974E-6 : f32
    %343 = vector.broadcast %cst_173 : f32 to vector<4x1xf32>
    %344 = arith.addf %340, %343 : vector<4x1xf32>
    %345 = math.rsqrt %344 : vector<4x1xf32>
    %346 = vector.broadcast %345 : vector<4x1xf32> to vector<4x128xf32>
    %347 = arith.mulf %342, %346 : vector<4x128xf32>
    %348 = vector.broadcast %327 : vector<1x128xf32> to vector<4x128xf32>
    %349 = arith.mulf %347, %348 : vector<4x128xf32>
    %350 = vector.broadcast %329 : vector<1x128xf32> to vector<4x128xf32>
    %351 = arith.addf %349, %350 : vector<4x128xf32>
    %c2_174 = arith.constant 2 : index
    %c0_175 = arith.constant 0 : index
    %c0_176 = arith.constant 0 : index
    %352 = vector.load %arg13[%c2_174, %c0_175, %c0_176] : memref<4x128x256xbf16, #tpu.memory_space<vmem>>, vector<1x128x256xbf16>
    %353 = vector.shape_cast %352 : vector<1x128x256xbf16> to vector<128x256xbf16>
    %c2_177 = arith.constant 2 : index
    %c0_178 = arith.constant 0 : index
    %c0_179 = arith.constant 0 : index
    %354 = vector.load %arg14[%c2_177, %c0_178, %c0_179] : memref<4x1x256xf32, #tpu.memory_space<vmem>>, vector<1x1x256xf32>
    %355 = vector.shape_cast %354 : vector<1x1x256xf32> to vector<1x256xf32>
    %356 = arith.truncf %351 : vector<4x128xf32> to vector<4x128xbf16>
    %cst_180 = arith.constant dense<0.000000e+00> : vector<4x256xf32>
    %357 = tpu.matmul %356, %353, %cst_180 {dimension_numbers = #tpu.dot_dimension_numbers<[1], [0], [0], [1], [0, 0, 1, 1], [], []>} : vector<4x128xbf16>, vector<128x256xbf16>, vector<4x256xf32> -> vector<4x256xf32>
    %358 = vector.broadcast %355 : vector<1x256xf32> to vector<4x256xf32>
    %359 = arith.addf %357, %358 : vector<4x256xf32>
    %360 = arith.mulf %359, %359 : vector<4x256xf32>
    %361 = arith.mulf %359, %360 : vector<4x256xf32>
    %cst_181 = arith.constant 4.471500e-02 : f32
    %362 = vector.broadcast %cst_181 : f32 to vector<4x256xf32>
    %363 = arith.mulf %362, %361 : vector<4x256xf32>
    %364 = arith.addf %359, %363 : vector<4x256xf32>
    %cst_182 = arith.constant 0.797884583 : f32
    %365 = vector.broadcast %cst_182 : f32 to vector<4x256xf32>
    %366 = arith.mulf %365, %364 : vector<4x256xf32>
    %367 = math.tanh %366 : vector<4x256xf32>
    %cst_183 = arith.constant 1.000000e+00 : f32
    %368 = vector.broadcast %cst_183 : f32 to vector<4x256xf32>
    %369 = arith.addf %368, %367 : vector<4x256xf32>
    %cst_184 = arith.constant 5.000000e-01 : f32
    %370 = vector.broadcast %cst_184 : f32 to vector<4x256xf32>
    %371 = arith.mulf %370, %369 : vector<4x256xf32>
    %372 = arith.mulf %359, %371 : vector<4x256xf32>
    %c2_185 = arith.constant 2 : index
    %c0_186 = arith.constant 0 : index
    %c0_187 = arith.constant 0 : index
    %373 = vector.load %arg15[%c2_185, %c0_186, %c0_187] : memref<4x256x128xbf16, #tpu.memory_space<vmem>>, vector<1x256x128xbf16>
    %374 = vector.shape_cast %373 : vector<1x256x128xbf16> to vector<256x128xbf16>
    %c2_188 = arith.constant 2 : index
    %c0_189 = arith.constant 0 : index
    %c0_190 = arith.constant 0 : index
    %375 = vector.load %arg16[%c2_188, %c0_189, %c0_190] : memref<4x1x128xf32, #tpu.memory_space<vmem>>, vector<1x1x128xf32>
    %376 = vector.shape_cast %375 : vector<1x1x128xf32> to vector<1x128xf32>
    %377 = arith.truncf %372 : vector<4x256xf32> to vector<4x256xbf16>
    %cst_191 = arith.constant dense<0.000000e+00> : vector<4x128xf32>
    %378 = tpu.matmul %377, %374, %cst_191 {dimension_numbers = #tpu.dot_dimension_numbers<[1], [0], [0], [1], [0, 0, 1, 1], [], []>} : vector<4x256xbf16>, vector<256x128xbf16>, vector<4x128xf32> -> vector<4x128xf32>
    %379 = vector.broadcast %376 : vector<1x128xf32> to vector<4x128xf32>
    %380 = arith.addf %378, %379 : vector<4x128xf32>
    %381 = arith.addf %325, %380 : vector<4x128xf32>
    %382 = tpu.concatenate %123, %252, %381 in 0 : vector<8x128xf32>, vector<8x128xf32>, vector<4x128xf32> -> vector<20x128xf32>
    %c0_192 = arith.constant 0 : index
    %c0_193 = arith.constant 0 : index
    %383 = vector.load %arg21[%c0_192, %c0_193] : memref<128x128xbf16, #tpu.memory_space<vmem>>, vector<128x128xbf16>
    %c0_194 = arith.constant 0 : index
    %c0_195 = arith.constant 0 : index
    %384 = vector.load %arg22[%c0_194, %c0_195] : memref<1x128xf32, #tpu.memory_space<vmem>>, vector<1x128xf32>
    %385 = arith.truncf %382 : vector<20x128xf32> to vector<20x128xbf16>
    %cst_196 = arith.constant dense<0.000000e+00> : vector<20x128xf32>
    %386 = tpu.matmul %385, %383, %cst_196 {dimension_numbers = #tpu.dot_dimension_numbers<[1], [0], [0], [1], [0, 0, 1, 1], [], []>} : vector<20x128xbf16>, vector<128x128xbf16>, vector<20x128xf32> -> vector<20x128xf32>
    %387 = vector.broadcast %384 : vector<1x128xf32> to vector<20x128xf32>
    %388 = arith.addf %386, %387 : vector<20x128xf32>
    %c3 = arith.constant 3 : index
    %c0_197 = arith.constant 0 : index
    %c0_198 = arith.constant 0 : index
    %389 = vector.load %arg5[%c3, %c0_197, %c0_198] : memref<4x1x128xf32, #tpu.memory_space<vmem>>, vector<1x1x128xf32>
    %390 = vector.shape_cast %389 : vector<1x1x128xf32> to vector<1x128xf32>
    %c3_199 = arith.constant 3 : index
    %c0_200 = arith.constant 0 : index
    %c0_201 = arith.constant 0 : index
    %391 = vector.load %arg6[%c3_199, %c0_200, %c0_201] : memref<4x1x128xf32, #tpu.memory_space<vmem>>, vector<1x1x128xf32>
    %392 = vector.shape_cast %391 : vector<1x1x128xf32> to vector<1x128xf32>
    %cst_202 = arith.constant dense<0.000000e+00> : vector<20xf32>
    %393 = vector.multi_reduction <add>, %388, %cst_202 [1] : vector<20x128xf32> to vector<20xf32>
    %394 = vector.shape_cast %393 : vector<20xf32> to vector<20x1xf32>
    %cst_203 = arith.constant 1.280000e+02 : f32
    %395 = vector.broadcast %cst_203 : f32 to vector<20x1xf32>
    %396 = arith.divf %394, %395 : vector<20x1xf32>
    %397 = vector.broadcast %396 : vector<20x1xf32> to vector<20x128xf32>
    %398 = arith.subf %388, %397 : vector<20x128xf32>
    %399 = arith.mulf %398, %398 : vector<20x128xf32>
    %cst_204 = arith.constant dense<0.000000e+00> : vector<20xf32>
    %400 = vector.multi_reduction <add>, %399, %cst_204 [1] : vector<20x128xf32> to vector<20xf32>
    %401 = vector.shape_cast %400 : vector<20xf32> to vector<20x1xf32>
    %cst_205 = arith.constant 1.280000e+02 : f32
    %402 = vector.broadcast %cst_205 : f32 to vector<20x1xf32>
    %403 = arith.divf %401, %402 : vector<20x1xf32>
    %404 = vector.broadcast %396 : vector<20x1xf32> to vector<20x128xf32>
    %405 = arith.subf %388, %404 : vector<20x128xf32>
    %cst_206 = arith.constant 9.99999974E-6 : f32
    %406 = vector.broadcast %cst_206 : f32 to vector<20x1xf32>
    %407 = arith.addf %403, %406 : vector<20x1xf32>
    %408 = math.rsqrt %407 : vector<20x1xf32>
    %409 = vector.broadcast %408 : vector<20x1xf32> to vector<20x128xf32>
    %410 = arith.mulf %405, %409 : vector<20x128xf32>
    %411 = vector.broadcast %390 : vector<1x128xf32> to vector<20x128xf32>
    %412 = arith.mulf %410, %411 : vector<20x128xf32>
    %413 = vector.broadcast %392 : vector<1x128xf32> to vector<20x128xf32>
    %414 = arith.addf %412, %413 : vector<20x128xf32>
    %c3_207 = arith.constant 3 : index
    %c0_208 = arith.constant 0 : index
    %c0_209 = arith.constant 0 : index
    %415 = vector.load %arg7[%c3_207, %c0_208, %c0_209] : memref<4x128x384xbf16, #tpu.memory_space<vmem>>, vector<1x128x384xbf16>
    %416 = vector.shape_cast %415 : vector<1x128x384xbf16> to vector<128x384xbf16>
    %c3_210 = arith.constant 3 : index
    %c0_211 = arith.constant 0 : index
    %c0_212 = arith.constant 0 : index
    %417 = vector.load %arg8[%c3_210, %c0_211, %c0_212] : memref<4x1x384xf32, #tpu.memory_space<vmem>>, vector<1x1x384xf32>
    %418 = vector.shape_cast %417 : vector<1x1x384xf32> to vector<1x384xf32>
    %c3_213 = arith.constant 3 : index
    %c0_214 = arith.constant 0 : index
    %c0_215 = arith.constant 0 : index
    %419 = vector.load %arg9[%c3_213, %c0_214, %c0_215] : memref<4x128x128xbf16, #tpu.memory_space<vmem>>, vector<1x128x128xbf16>
    %420 = vector.shape_cast %419 : vector<1x128x128xbf16> to vector<128x128xbf16>
    %c3_216 = arith.constant 3 : index
    %c0_217 = arith.constant 0 : index
    %c0_218 = arith.constant 0 : index
    %421 = vector.load %arg10[%c3_216, %c0_217, %c0_218] : memref<4x1x128xf32, #tpu.memory_space<vmem>>, vector<1x1x128xf32>
    %422 = vector.shape_cast %421 : vector<1x1x128xf32> to vector<1x128xf32>
    %423 = arith.truncf %414 : vector<20x128xf32> to vector<20x128xbf16>
    %cst_219 = arith.constant dense<0.000000e+00> : vector<20x384xf32>
    %424 = tpu.matmul %423, %416, %cst_219 {dimension_numbers = #tpu.dot_dimension_numbers<[1], [0], [0], [1], [0, 0, 1, 1], [], []>} : vector<20x128xbf16>, vector<128x384xbf16>, vector<20x384xf32> -> vector<20x384xf32>
    %425 = vector.broadcast %418 : vector<1x384xf32> to vector<20x384xf32>
    %426 = arith.addf %424, %425 : vector<20x384xf32>
    %427 = arith.truncf %426 : vector<20x384xf32> to vector<20x384xbf16>
    %428 = vector.extract_strided_slice %427 {offsets = [0, 0], sizes = [20, 128], strides = [1, 1]} : vector<20x384xbf16> to vector<20x128xbf16>
    %429 = vector.shape_cast %428 : vector<20x128xbf16> to vector<20x4x32xbf16>
    %430 = vector.extract_strided_slice %427 {offsets = [0, 128], sizes = [20, 128], strides = [1, 1]} : vector<20x384xbf16> to vector<20x128xbf16>
    %431 = vector.shape_cast %430 : vector<20x128xbf16> to vector<20x4x32xbf16>
    %432 = vector.extract_strided_slice %427 {offsets = [0, 256], sizes = [20, 128], strides = [1, 1]} : vector<20x384xbf16> to vector<20x128xbf16>
    %433 = vector.shape_cast %432 : vector<20x128xbf16> to vector<20x4x32xbf16>
    "tpu.trace_start"() <{level = 10 : i32, message = "qhd,khd->hqk"}> : () -> ()
    %cst_220 = arith.constant dense<0.000000e+00> : vector<4x20x20xf32>
    %434 = tpu.matmul %429, %431, %cst_220 {dimension_numbers = #tpu.dot_dimension_numbers<[2], [2], [0], [0], [0, 1, 0, 0, 1, 0], [1], [1]>} : vector<20x4x32xbf16>, vector<20x4x32xbf16>, vector<4x20x20xf32> -> vector<4x20x20xf32>
    "tpu.trace_stop"() : () -> ()
    %cst_221 = arith.constant 0.176776692 : f32
    %435 = vector.broadcast %cst_221 : f32 to vector<4x20x20xf32>
    %436 = arith.mulf %434, %435 : vector<4x20x20xf32>
    %cst_222 = arith.constant dense<0xFF800000> : vector<4x20xf32>
    %437 = vector.multi_reduction <maximumf>, %436, %cst_222 [2] : vector<4x20x20xf32> to vector<4x20xf32>
    %438 = vector.shape_cast %437 : vector<4x20xf32> to vector<4x20x1xf32>
    %439 = vector.broadcast %438 : vector<4x20x1xf32> to vector<4x20x20xf32>
    %440 = arith.subf %436, %439 : vector<4x20x20xf32>
    %441 = math.exp %440 : vector<4x20x20xf32>
    %cst_223 = arith.constant dense<0.000000e+00> : vector<4x20xf32>
    %442 = vector.multi_reduction <add>, %441, %cst_223 [2] : vector<4x20x20xf32> to vector<4x20xf32>
    %443 = vector.shape_cast %442 : vector<4x20xf32> to vector<4x20x1xf32>
    %444 = vector.broadcast %443 : vector<4x20x1xf32> to vector<4x20x20xf32>
    %445 = arith.divf %441, %444 : vector<4x20x20xf32>
    %446 = arith.truncf %445 : vector<4x20x20xf32> to vector<4x20x20xbf16>
    "tpu.trace_start"() <{level = 10 : i32, message = "hqk,khd->qhd"}> : () -> ()
    %cst_224 = arith.constant dense<0.000000e+00> : vector<4x32x20xf32>
    %447 = tpu.matmul %433, %446, %cst_224 {dimension_numbers = #tpu.dot_dimension_numbers<[0], [2], [2], [1], [0, 1, 0, 2, 1, 1], [1], [0]>} : vector<20x4x32xbf16>, vector<4x20x20xbf16>, vector<4x32x20xf32> -> vector<4x32x20xf32>
    %448 = tpu.transpose %447, [2, 0, 1] : vector<4x32x20xf32> -> vector<20x4x32xf32>
    "tpu.trace_stop"() : () -> ()
    %449 = vector.shape_cast %448 : vector<20x4x32xf32> to vector<20x128xf32>
    %450 = arith.truncf %449 : vector<20x128xf32> to vector<20x128xbf16>
    %cst_225 = arith.constant dense<0.000000e+00> : vector<20x128xf32>
    %451 = tpu.matmul %450, %420, %cst_225 {dimension_numbers = #tpu.dot_dimension_numbers<[1], [0], [0], [1], [0, 0, 1, 1], [], []>} : vector<20x128xbf16>, vector<128x128xbf16>, vector<20x128xf32> -> vector<20x128xf32>
    %452 = vector.broadcast %422 : vector<1x128xf32> to vector<20x128xf32>
    %453 = arith.addf %451, %452 : vector<20x128xf32>
    %454 = arith.addf %388, %453 : vector<20x128xf32>
    %c3_226 = arith.constant 3 : index
    %c0_227 = arith.constant 0 : index
    %c0_228 = arith.constant 0 : index
    %455 = vector.load %arg11[%c3_226, %c0_227, %c0_228] : memref<4x1x128xf32, #tpu.memory_space<vmem>>, vector<1x1x128xf32>
    %456 = vector.shape_cast %455 : vector<1x1x128xf32> to vector<1x128xf32>
    %c3_229 = arith.constant 3 : index
    %c0_230 = arith.constant 0 : index
    %c0_231 = arith.constant 0 : index
    %457 = vector.load %arg12[%c3_229, %c0_230, %c0_231] : memref<4x1x128xf32, #tpu.memory_space<vmem>>, vector<1x1x128xf32>
    %458 = vector.shape_cast %457 : vector<1x1x128xf32> to vector<1x128xf32>
    %cst_232 = arith.constant dense<0.000000e+00> : vector<20xf32>
    %459 = vector.multi_reduction <add>, %454, %cst_232 [1] : vector<20x128xf32> to vector<20xf32>
    %460 = vector.shape_cast %459 : vector<20xf32> to vector<20x1xf32>
    %cst_233 = arith.constant 1.280000e+02 : f32
    %461 = vector.broadcast %cst_233 : f32 to vector<20x1xf32>
    %462 = arith.divf %460, %461 : vector<20x1xf32>
    %463 = vector.broadcast %462 : vector<20x1xf32> to vector<20x128xf32>
    %464 = arith.subf %454, %463 : vector<20x128xf32>
    %465 = arith.mulf %464, %464 : vector<20x128xf32>
    %cst_234 = arith.constant dense<0.000000e+00> : vector<20xf32>
    %466 = vector.multi_reduction <add>, %465, %cst_234 [1] : vector<20x128xf32> to vector<20xf32>
    %467 = vector.shape_cast %466 : vector<20xf32> to vector<20x1xf32>
    %cst_235 = arith.constant 1.280000e+02 : f32
    %468 = vector.broadcast %cst_235 : f32 to vector<20x1xf32>
    %469 = arith.divf %467, %468 : vector<20x1xf32>
    %470 = vector.broadcast %462 : vector<20x1xf32> to vector<20x128xf32>
    %471 = arith.subf %454, %470 : vector<20x128xf32>
    %cst_236 = arith.constant 9.99999974E-6 : f32
    %472 = vector.broadcast %cst_236 : f32 to vector<20x1xf32>
    %473 = arith.addf %469, %472 : vector<20x1xf32>
    %474 = math.rsqrt %473 : vector<20x1xf32>
    %475 = vector.broadcast %474 : vector<20x1xf32> to vector<20x128xf32>
    %476 = arith.mulf %471, %475 : vector<20x128xf32>
    %477 = vector.broadcast %456 : vector<1x128xf32> to vector<20x128xf32>
    %478 = arith.mulf %476, %477 : vector<20x128xf32>
    %479 = vector.broadcast %458 : vector<1x128xf32> to vector<20x128xf32>
    %480 = arith.addf %478, %479 : vector<20x128xf32>
    %c3_237 = arith.constant 3 : index
    %c0_238 = arith.constant 0 : index
    %c0_239 = arith.constant 0 : index
    %481 = vector.load %arg13[%c3_237, %c0_238, %c0_239] : memref<4x128x256xbf16, #tpu.memory_space<vmem>>, vector<1x128x256xbf16>
    %482 = vector.shape_cast %481 : vector<1x128x256xbf16> to vector<128x256xbf16>
    %c3_240 = arith.constant 3 : index
    %c0_241 = arith.constant 0 : index
    %c0_242 = arith.constant 0 : index
    %483 = vector.load %arg14[%c3_240, %c0_241, %c0_242] : memref<4x1x256xf32, #tpu.memory_space<vmem>>, vector<1x1x256xf32>
    %484 = vector.shape_cast %483 : vector<1x1x256xf32> to vector<1x256xf32>
    %485 = arith.truncf %480 : vector<20x128xf32> to vector<20x128xbf16>
    %cst_243 = arith.constant dense<0.000000e+00> : vector<20x256xf32>
    %486 = tpu.matmul %485, %482, %cst_243 {dimension_numbers = #tpu.dot_dimension_numbers<[1], [0], [0], [1], [0, 0, 1, 1], [], []>} : vector<20x128xbf16>, vector<128x256xbf16>, vector<20x256xf32> -> vector<20x256xf32>
    %487 = vector.broadcast %484 : vector<1x256xf32> to vector<20x256xf32>
    %488 = arith.addf %486, %487 : vector<20x256xf32>
    %489 = arith.mulf %488, %488 : vector<20x256xf32>
    %490 = arith.mulf %488, %489 : vector<20x256xf32>
    %cst_244 = arith.constant 4.471500e-02 : f32
    %491 = vector.broadcast %cst_244 : f32 to vector<20x256xf32>
    %492 = arith.mulf %491, %490 : vector<20x256xf32>
    %493 = arith.addf %488, %492 : vector<20x256xf32>
    %cst_245 = arith.constant 0.797884583 : f32
    %494 = vector.broadcast %cst_245 : f32 to vector<20x256xf32>
    %495 = arith.mulf %494, %493 : vector<20x256xf32>
    %496 = math.tanh %495 : vector<20x256xf32>
    %cst_246 = arith.constant 1.000000e+00 : f32
    %497 = vector.broadcast %cst_246 : f32 to vector<20x256xf32>
    %498 = arith.addf %497, %496 : vector<20x256xf32>
    %cst_247 = arith.constant 5.000000e-01 : f32
    %499 = vector.broadcast %cst_247 : f32 to vector<20x256xf32>
    %500 = arith.mulf %499, %498 : vector<20x256xf32>
    %501 = arith.mulf %488, %500 : vector<20x256xf32>
    %c3_248 = arith.constant 3 : index
    %c0_249 = arith.constant 0 : index
    %c0_250 = arith.constant 0 : index
    %502 = vector.load %arg15[%c3_248, %c0_249, %c0_250] : memref<4x256x128xbf16, #tpu.memory_space<vmem>>, vector<1x256x128xbf16>
    %503 = vector.shape_cast %502 : vector<1x256x128xbf16> to vector<256x128xbf16>
    %c3_251 = arith.constant 3 : index
    %c0_252 = arith.constant 0 : index
    %c0_253 = arith.constant 0 : index
    %504 = vector.load %arg16[%c3_251, %c0_252, %c0_253] : memref<4x1x128xf32, #tpu.memory_space<vmem>>, vector<1x1x128xf32>
    %505 = vector.shape_cast %504 : vector<1x1x128xf32> to vector<1x128xf32>
    %506 = arith.truncf %501 : vector<20x256xf32> to vector<20x256xbf16>
    %cst_254 = arith.constant dense<0.000000e+00> : vector<20x128xf32>
    %507 = tpu.matmul %506, %503, %cst_254 {dimension_numbers = #tpu.dot_dimension_numbers<[1], [0], [0], [1], [0, 0, 1, 1], [], []>} : vector<20x256xbf16>, vector<256x128xbf16>, vector<20x128xf32> -> vector<20x128xf32>
    %508 = vector.broadcast %505 : vector<1x128xf32> to vector<20x128xf32>
    %509 = arith.addf %507, %508 : vector<20x128xf32>
    %510 = arith.addf %454, %509 : vector<20x128xf32>
    %c0_255 = arith.constant 0 : index
    %c0_256 = arith.constant 0 : index
    %c0_257 = arith.constant 0 : index
    %511 = vector.load %arg4[%c0_255, %c0_256, %c0_257] : memref<1x8x128xf32, #tpu.memory_space<vmem>>, vector<1x8x128xf32>
    %512 = vector.shape_cast %511 : vector<1x8x128xf32> to vector<8x128xf32>
    %513 = tpu.iota {dimensions = array<i32: 0>} : vector<8x8xi32>
    %514 = tpu.iota {dimensions = array<i32: 1>} : vector<8x8xi32>
    %515 = arith.cmpi sle, %514, %513 : vector<8x8xi32>
    %c0_258 = arith.constant 0 : index
    %c0_259 = arith.constant 0 : index
    %516 = vector.load %arg23[%c0_258, %c0_259] : memref<1x128xf32, #tpu.memory_space<vmem>>, vector<1x128xf32>
    %c0_260 = arith.constant 0 : index
    %c0_261 = arith.constant 0 : index
    %517 = vector.load %arg24[%c0_260, %c0_261] : memref<1x128xf32, #tpu.memory_space<vmem>>, vector<1x128xf32>
    %cst_262 = arith.constant dense<0.000000e+00> : vector<8xf32>
    %518 = vector.multi_reduction <add>, %512, %cst_262 [1] : vector<8x128xf32> to vector<8xf32>
    %519 = vector.shape_cast %518 : vector<8xf32> to vector<8x1xf32>
    %cst_263 = arith.constant 1.280000e+02 : f32
    %520 = vector.broadcast %cst_263 : f32 to vector<8x1xf32>
    %521 = arith.divf %519, %520 : vector<8x1xf32>
    %522 = vector.broadcast %521 : vector<8x1xf32> to vector<8x128xf32>
    %523 = arith.subf %512, %522 : vector<8x128xf32>
    %524 = arith.mulf %523, %523 : vector<8x128xf32>
    %cst_264 = arith.constant dense<0.000000e+00> : vector<8xf32>
    %525 = vector.multi_reduction <add>, %524, %cst_264 [1] : vector<8x128xf32> to vector<8xf32>
    %526 = vector.shape_cast %525 : vector<8xf32> to vector<8x1xf32>
    %cst_265 = arith.constant 1.280000e+02 : f32
    %527 = vector.broadcast %cst_265 : f32 to vector<8x1xf32>
    %528 = arith.divf %526, %527 : vector<8x1xf32>
    %529 = vector.broadcast %521 : vector<8x1xf32> to vector<8x128xf32>
    %530 = arith.subf %512, %529 : vector<8x128xf32>
    %cst_266 = arith.constant 9.99999974E-6 : f32
    %531 = vector.broadcast %cst_266 : f32 to vector<8x1xf32>
    %532 = arith.addf %528, %531 : vector<8x1xf32>
    %533 = math.rsqrt %532 : vector<8x1xf32>
    %534 = vector.broadcast %533 : vector<8x1xf32> to vector<8x128xf32>
    %535 = arith.mulf %530, %534 : vector<8x128xf32>
    %536 = vector.broadcast %516 : vector<1x128xf32> to vector<8x128xf32>
    %537 = arith.mulf %535, %536 : vector<8x128xf32>
    %538 = vector.broadcast %517 : vector<1x128xf32> to vector<8x128xf32>
    %539 = arith.addf %537, %538 : vector<8x128xf32>
    %c0_267 = arith.constant 0 : index
    %c0_268 = arith.constant 0 : index
    %540 = vector.load %arg25[%c0_267, %c0_268] : memref<128x384xbf16, #tpu.memory_space<vmem>>, vector<128x384xbf16>
    %c0_269 = arith.constant 0 : index
    %c0_270 = arith.constant 0 : index
    %541 = vector.load %arg26[%c0_269, %c0_270] : memref<1x384xf32, #tpu.memory_space<vmem>>, vector<1x384xf32>
    %c0_271 = arith.constant 0 : index
    %c0_272 = arith.constant 0 : index
    %542 = vector.load %arg27[%c0_271, %c0_272] : memref<128x128xbf16, #tpu.memory_space<vmem>>, vector<128x128xbf16>
    %c0_273 = arith.constant 0 : index
    %c0_274 = arith.constant 0 : index
    %543 = vector.load %arg28[%c0_273, %c0_274] : memref<1x128xf32, #tpu.memory_space<vmem>>, vector<1x128xf32>
    %544 = arith.truncf %539 : vector<8x128xf32> to vector<8x128xbf16>
    %cst_275 = arith.constant dense<0.000000e+00> : vector<8x384xf32>
    %545 = tpu.matmul %544, %540, %cst_275 {dimension_numbers = #tpu.dot_dimension_numbers<[1], [0], [0], [1], [0, 0, 1, 1], [], []>} : vector<8x128xbf16>, vector<128x384xbf16>, vector<8x384xf32> -> vector<8x384xf32>
    %546 = vector.broadcast %541 : vector<1x384xf32> to vector<8x384xf32>
    %547 = arith.addf %545, %546 : vector<8x384xf32>
    %548 = arith.truncf %547 : vector<8x384xf32> to vector<8x384xbf16>
    %549 = vector.extract_strided_slice %548 {offsets = [0, 0], sizes = [8, 128], strides = [1, 1]} : vector<8x384xbf16> to vector<8x128xbf16>
    %550 = vector.shape_cast %549 : vector<8x128xbf16> to vector<8x4x32xbf16>
    %551 = vector.extract_strided_slice %548 {offsets = [0, 128], sizes = [8, 128], strides = [1, 1]} : vector<8x384xbf16> to vector<8x128xbf16>
    %552 = vector.shape_cast %551 : vector<8x128xbf16> to vector<8x4x32xbf16>
    %553 = vector.extract_strided_slice %548 {offsets = [0, 256], sizes = [8, 128], strides = [1, 1]} : vector<8x384xbf16> to vector<8x128xbf16>
    %554 = vector.shape_cast %553 : vector<8x128xbf16> to vector<8x4x32xbf16>
    "tpu.trace_start"() <{level = 10 : i32, message = "qhd,khd->hqk"}> : () -> ()
    %cst_276 = arith.constant dense<0.000000e+00> : vector<4x8x8xf32>
    %555 = tpu.matmul %550, %552, %cst_276 {dimension_numbers = #tpu.dot_dimension_numbers<[2], [2], [0], [0], [0, 1, 0, 0, 1, 0], [1], [1]>} : vector<8x4x32xbf16>, vector<8x4x32xbf16>, vector<4x8x8xf32> -> vector<4x8x8xf32>
    "tpu.trace_stop"() : () -> ()
    %cst_277 = arith.constant 0.176776692 : f32
    %556 = vector.broadcast %cst_277 : f32 to vector<4x8x8xf32>
    %557 = arith.mulf %555, %556 : vector<4x8x8xf32>
    %558 = vector.shape_cast %515 : vector<8x8xi1> to vector<1x8x8xi1>
    %cst_278 = arith.constant -1.000000e+30 : f32
    %559 = vector.shape_cast %558 : vector<1x8x8xi1> to vector<1x8x8xi1>
    %560 = vector.broadcast %559 : vector<1x8x8xi1> to vector<4x8x8xi1>
    %561 = vector.broadcast %cst_278 : f32 to vector<4x8x8xf32>
    %562 = arith.select %560, %557, %561 : vector<4x8x8xi1>, vector<4x8x8xf32>
    %cst_279 = arith.constant dense<0xFF800000> : vector<4x8xf32>
    %563 = vector.multi_reduction <maximumf>, %562, %cst_279 [2] : vector<4x8x8xf32> to vector<4x8xf32>
    %564 = vector.shape_cast %563 : vector<4x8xf32> to vector<4x8x1xf32>
    %565 = vector.broadcast %564 : vector<4x8x1xf32> to vector<4x8x8xf32>
    %566 = arith.subf %562, %565 : vector<4x8x8xf32>
    %567 = math.exp %566 : vector<4x8x8xf32>
    %cst_280 = arith.constant dense<0.000000e+00> : vector<4x8xf32>
    %568 = vector.multi_reduction <add>, %567, %cst_280 [2] : vector<4x8x8xf32> to vector<4x8xf32>
    %569 = vector.shape_cast %568 : vector<4x8xf32> to vector<4x8x1xf32>
    %570 = vector.broadcast %569 : vector<4x8x1xf32> to vector<4x8x8xf32>
    %571 = arith.divf %567, %570 : vector<4x8x8xf32>
    %572 = arith.truncf %571 : vector<4x8x8xf32> to vector<4x8x8xbf16>
    "tpu.trace_start"() <{level = 10 : i32, message = "hqk,khd->qhd"}> : () -> ()
    %cst_281 = arith.constant dense<0.000000e+00> : vector<4x32x8xf32>
    %573 = tpu.matmul %554, %572, %cst_281 {dimension_numbers = #tpu.dot_dimension_numbers<[0], [2], [2], [1], [0, 1, 0, 2, 1, 1], [1], [0]>} : vector<8x4x32xbf16>, vector<4x8x8xbf16>, vector<4x32x8xf32> -> vector<4x32x8xf32>
    %574 = tpu.transpose %573, [2, 0, 1] : vector<4x32x8xf32> -> vector<8x4x32xf32>
    "tpu.trace_stop"() : () -> ()
    %575 = vector.shape_cast %574 : vector<8x4x32xf32> to vector<8x128xf32>
    %576 = arith.truncf %575 : vector<8x128xf32> to vector<8x128xbf16>
    %cst_282 = arith.constant dense<0.000000e+00> : vector<8x128xf32>
    %577 = tpu.matmul %576, %542, %cst_282 {dimension_numbers = #tpu.dot_dimension_numbers<[1], [0], [0], [1], [0, 0, 1, 1], [], []>} : vector<8x128xbf16>, vector<128x128xbf16>, vector<8x128xf32> -> vector<8x128xf32>
    %578 = vector.broadcast %543 : vector<1x128xf32> to vector<8x128xf32>
    %579 = arith.addf %577, %578 : vector<8x128xf32>
    %580 = arith.addf %512, %579 : vector<8x128xf32>
    %c0_283 = arith.constant 0 : index
    %c0_284 = arith.constant 0 : index
    %581 = vector.load %arg29[%c0_283, %c0_284] : memref<1x128xf32, #tpu.memory_space<vmem>>, vector<1x128xf32>
    %c0_285 = arith.constant 0 : index
    %c0_286 = arith.constant 0 : index
    %582 = vector.load %arg30[%c0_285, %c0_286] : memref<1x128xf32, #tpu.memory_space<vmem>>, vector<1x128xf32>
    %cst_287 = arith.constant dense<0.000000e+00> : vector<8xf32>
    %583 = vector.multi_reduction <add>, %580, %cst_287 [1] : vector<8x128xf32> to vector<8xf32>
    %584 = vector.shape_cast %583 : vector<8xf32> to vector<8x1xf32>
    %cst_288 = arith.constant 1.280000e+02 : f32
    %585 = vector.broadcast %cst_288 : f32 to vector<8x1xf32>
    %586 = arith.divf %584, %585 : vector<8x1xf32>
    %587 = vector.broadcast %586 : vector<8x1xf32> to vector<8x128xf32>
    %588 = arith.subf %580, %587 : vector<8x128xf32>
    %589 = arith.mulf %588, %588 : vector<8x128xf32>
    %cst_289 = arith.constant dense<0.000000e+00> : vector<8xf32>
    %590 = vector.multi_reduction <add>, %589, %cst_289 [1] : vector<8x128xf32> to vector<8xf32>
    %591 = vector.shape_cast %590 : vector<8xf32> to vector<8x1xf32>
    %cst_290 = arith.constant 1.280000e+02 : f32
    %592 = vector.broadcast %cst_290 : f32 to vector<8x1xf32>
    %593 = arith.divf %591, %592 : vector<8x1xf32>
    %594 = vector.broadcast %586 : vector<8x1xf32> to vector<8x128xf32>
    %595 = arith.subf %580, %594 : vector<8x128xf32>
    %cst_291 = arith.constant 9.99999974E-6 : f32
    %596 = vector.broadcast %cst_291 : f32 to vector<8x1xf32>
    %597 = arith.addf %593, %596 : vector<8x1xf32>
    %598 = math.rsqrt %597 : vector<8x1xf32>
    %599 = vector.broadcast %598 : vector<8x1xf32> to vector<8x128xf32>
    %600 = arith.mulf %595, %599 : vector<8x128xf32>
    %601 = vector.broadcast %581 : vector<1x128xf32> to vector<8x128xf32>
    %602 = arith.mulf %600, %601 : vector<8x128xf32>
    %603 = vector.broadcast %582 : vector<1x128xf32> to vector<8x128xf32>
    %604 = arith.addf %602, %603 : vector<8x128xf32>
    %c0_292 = arith.constant 0 : index
    %c0_293 = arith.constant 0 : index
    %605 = vector.load %arg31[%c0_292, %c0_293] : memref<128x128xbf16, #tpu.memory_space<vmem>>, vector<128x128xbf16>
    %c0_294 = arith.constant 0 : index
    %c0_295 = arith.constant 0 : index
    %606 = vector.load %arg32[%c0_294, %c0_295] : memref<1x128xf32, #tpu.memory_space<vmem>>, vector<1x128xf32>
    %c0_296 = arith.constant 0 : index
    %c0_297 = arith.constant 0 : index
    %607 = vector.load %arg33[%c0_296, %c0_297] : memref<128x256xbf16, #tpu.memory_space<vmem>>, vector<128x256xbf16>
    %c0_298 = arith.constant 0 : index
    %c0_299 = arith.constant 0 : index
    %608 = vector.load %arg34[%c0_298, %c0_299] : memref<1x256xf32, #tpu.memory_space<vmem>>, vector<1x256xf32>
    %c0_300 = arith.constant 0 : index
    %c0_301 = arith.constant 0 : index
    %609 = vector.load %arg35[%c0_300, %c0_301] : memref<128x128xbf16, #tpu.memory_space<vmem>>, vector<128x128xbf16>
    %c0_302 = arith.constant 0 : index
    %c0_303 = arith.constant 0 : index
    %610 = vector.load %arg36[%c0_302, %c0_303] : memref<1x128xf32, #tpu.memory_space<vmem>>, vector<1x128xf32>
    %611 = arith.truncf %604 : vector<8x128xf32> to vector<8x128xbf16>
    %cst_304 = arith.constant dense<0.000000e+00> : vector<8x128xf32>
    %612 = tpu.matmul %611, %605, %cst_304 {dimension_numbers = #tpu.dot_dimension_numbers<[1], [0], [0], [1], [0, 0, 1, 1], [], []>} : vector<8x128xbf16>, vector<128x128xbf16>, vector<8x128xf32> -> vector<8x128xf32>
    %613 = vector.broadcast %606 : vector<1x128xf32> to vector<8x128xf32>
    %614 = arith.addf %612, %613 : vector<8x128xf32>
    %615 = arith.truncf %614 : vector<8x128xf32> to vector<8x128xbf16>
    %616 = vector.shape_cast %615 : vector<8x128xbf16> to vector<8x4x32xbf16>
    %617 = arith.truncf %510 : vector<20x128xf32> to vector<20x128xbf16>
    %cst_305 = arith.constant dense<0.000000e+00> : vector<20x256xf32>
    %618 = tpu.matmul %617, %607, %cst_305 {dimension_numbers = #tpu.dot_dimension_numbers<[1], [0], [0], [1], [0, 0, 1, 1], [], []>} : vector<20x128xbf16>, vector<128x256xbf16>, vector<20x256xf32> -> vector<20x256xf32>
    %619 = vector.broadcast %608 : vector<1x256xf32> to vector<20x256xf32>
    %620 = arith.addf %618, %619 : vector<20x256xf32>
    %621 = arith.truncf %620 : vector<20x256xf32> to vector<20x256xbf16>
    %622 = vector.extract_strided_slice %621 {offsets = [0, 0], sizes = [20, 128], strides = [1, 1]} : vector<20x256xbf16> to vector<20x128xbf16>
    %623 = vector.shape_cast %622 : vector<20x128xbf16> to vector<20x4x32xbf16>
    %624 = vector.extract_strided_slice %621 {offsets = [0, 128], sizes = [20, 128], strides = [1, 1]} : vector<20x256xbf16> to vector<20x128xbf16>
    %625 = vector.shape_cast %624 : vector<20x128xbf16> to vector<20x4x32xbf16>
    "tpu.trace_start"() <{level = 10 : i32, message = "qhd,khd->hqk"}> : () -> ()
    %cst_306 = arith.constant dense<0.000000e+00> : vector<4x8x20xf32>
    %626 = tpu.matmul %616, %623, %cst_306 {dimension_numbers = #tpu.dot_dimension_numbers<[2], [2], [0], [0], [0, 1, 0, 0, 1, 0], [1], [1]>} : vector<8x4x32xbf16>, vector<20x4x32xbf16>, vector<4x8x20xf32> -> vector<4x8x20xf32>
    "tpu.trace_stop"() : () -> ()
    %cst_307 = arith.constant 0.176776692 : f32
    %627 = vector.broadcast %cst_307 : f32 to vector<4x8x20xf32>
    %628 = arith.mulf %626, %627 : vector<4x8x20xf32>
    %cst_308 = arith.constant dense<0xFF800000> : vector<4x8xf32>
    %629 = vector.multi_reduction <maximumf>, %628, %cst_308 [2] : vector<4x8x20xf32> to vector<4x8xf32>
    %630 = vector.shape_cast %629 : vector<4x8xf32> to vector<4x8x1xf32>
    %631 = vector.broadcast %630 : vector<4x8x1xf32> to vector<4x8x20xf32>
    %632 = arith.subf %628, %631 : vector<4x8x20xf32>
    %633 = math.exp %632 : vector<4x8x20xf32>
    %cst_309 = arith.constant dense<0.000000e+00> : vector<4x8xf32>
    %634 = vector.multi_reduction <add>, %633, %cst_309 [2] : vector<4x8x20xf32> to vector<4x8xf32>
    %635 = vector.shape_cast %634 : vector<4x8xf32> to vector<4x8x1xf32>
    %636 = vector.broadcast %635 : vector<4x8x1xf32> to vector<4x8x20xf32>
    %637 = arith.divf %633, %636 : vector<4x8x20xf32>
    %638 = arith.truncf %637 : vector<4x8x20xf32> to vector<4x8x20xbf16>
    "tpu.trace_start"() <{level = 10 : i32, message = "hqk,khd->qhd"}> : () -> ()
    %cst_310 = arith.constant dense<0.000000e+00> : vector<4x32x8xf32>
    %639 = tpu.matmul %625, %638, %cst_310 {dimension_numbers = #tpu.dot_dimension_numbers<[0], [2], [2], [1], [0, 1, 0, 2, 1, 1], [1], [0]>} : vector<20x4x32xbf16>, vector<4x8x20xbf16>, vector<4x32x8xf32> -> vector<4x32x8xf32>
    %640 = tpu.transpose %639, [2, 0, 1] : vector<4x32x8xf32> -> vector<8x4x32xf32>
    "tpu.trace_stop"() : () -> ()
    %641 = vector.shape_cast %640 : vector<8x4x32xf32> to vector<8x128xf32>
    %642 = arith.truncf %641 : vector<8x128xf32> to vector<8x128xbf16>
    %cst_311 = arith.constant dense<0.000000e+00> : vector<8x128xf32>
    %643 = tpu.matmul %642, %609, %cst_311 {dimension_numbers = #tpu.dot_dimension_numbers<[1], [0], [0], [1], [0, 0, 1, 1], [], []>} : vector<8x128xbf16>, vector<128x128xbf16>, vector<8x128xf32> -> vector<8x128xf32>
    %644 = vector.broadcast %610 : vector<1x128xf32> to vector<8x128xf32>
    %645 = arith.addf %643, %644 : vector<8x128xf32>
    %646 = arith.addf %580, %645 : vector<8x128xf32>
    %c0_312 = arith.constant 0 : index
    %c0_313 = arith.constant 0 : index
    %647 = vector.load %arg37[%c0_312, %c0_313] : memref<1x128xf32, #tpu.memory_space<vmem>>, vector<1x128xf32>
    %c0_314 = arith.constant 0 : index
    %c0_315 = arith.constant 0 : index
    %648 = vector.load %arg38[%c0_314, %c0_315] : memref<1x128xf32, #tpu.memory_space<vmem>>, vector<1x128xf32>
    %cst_316 = arith.constant dense<0.000000e+00> : vector<8xf32>
    %649 = vector.multi_reduction <add>, %646, %cst_316 [1] : vector<8x128xf32> to vector<8xf32>
    %650 = vector.shape_cast %649 : vector<8xf32> to vector<8x1xf32>
    %cst_317 = arith.constant 1.280000e+02 : f32
    %651 = vector.broadcast %cst_317 : f32 to vector<8x1xf32>
    %652 = arith.divf %650, %651 : vector<8x1xf32>
    %653 = vector.broadcast %652 : vector<8x1xf32> to vector<8x128xf32>
    %654 = arith.subf %646, %653 : vector<8x128xf32>
    %655 = arith.mulf %654, %654 : vector<8x128xf32>
    %cst_318 = arith.constant dense<0.000000e+00> : vector<8xf32>
    %656 = vector.multi_reduction <add>, %655, %cst_318 [1] : vector<8x128xf32> to vector<8xf32>
    %657 = vector.shape_cast %656 : vector<8xf32> to vector<8x1xf32>
    %cst_319 = arith.constant 1.280000e+02 : f32
    %658 = vector.broadcast %cst_319 : f32 to vector<8x1xf32>
    %659 = arith.divf %657, %658 : vector<8x1xf32>
    %660 = vector.broadcast %652 : vector<8x1xf32> to vector<8x128xf32>
    %661 = arith.subf %646, %660 : vector<8x128xf32>
    %cst_320 = arith.constant 9.99999974E-6 : f32
    %662 = vector.broadcast %cst_320 : f32 to vector<8x1xf32>
    %663 = arith.addf %659, %662 : vector<8x1xf32>
    %664 = math.rsqrt %663 : vector<8x1xf32>
    %665 = vector.broadcast %664 : vector<8x1xf32> to vector<8x128xf32>
    %666 = arith.mulf %661, %665 : vector<8x128xf32>
    %667 = vector.broadcast %647 : vector<1x128xf32> to vector<8x128xf32>
    %668 = arith.mulf %666, %667 : vector<8x128xf32>
    %669 = vector.broadcast %648 : vector<1x128xf32> to vector<8x128xf32>
    %670 = arith.addf %668, %669 : vector<8x128xf32>
    %c0_321 = arith.constant 0 : index
    %c0_322 = arith.constant 0 : index
    %671 = vector.load %arg39[%c0_321, %c0_322] : memref<128x256xbf16, #tpu.memory_space<vmem>>, vector<128x256xbf16>
    %c0_323 = arith.constant 0 : index
    %c0_324 = arith.constant 0 : index
    %672 = vector.load %arg40[%c0_323, %c0_324] : memref<1x256xf32, #tpu.memory_space<vmem>>, vector<1x256xf32>
    %673 = arith.truncf %670 : vector<8x128xf32> to vector<8x128xbf16>
    %cst_325 = arith.constant dense<0.000000e+00> : vector<8x256xf32>
    %674 = tpu.matmul %673, %671, %cst_325 {dimension_numbers = #tpu.dot_dimension_numbers<[1], [0], [0], [1], [0, 0, 1, 1], [], []>} : vector<8x128xbf16>, vector<128x256xbf16>, vector<8x256xf32> -> vector<8x256xf32>
    %675 = vector.broadcast %672 : vector<1x256xf32> to vector<8x256xf32>
    %676 = arith.addf %674, %675 : vector<8x256xf32>
    %677 = arith.mulf %676, %676 : vector<8x256xf32>
    %678 = arith.mulf %676, %677 : vector<8x256xf32>
    %cst_326 = arith.constant 4.471500e-02 : f32
    %679 = vector.broadcast %cst_326 : f32 to vector<8x256xf32>
    %680 = arith.mulf %679, %678 : vector<8x256xf32>
    %681 = arith.addf %676, %680 : vector<8x256xf32>
    %cst_327 = arith.constant 0.797884583 : f32
    %682 = vector.broadcast %cst_327 : f32 to vector<8x256xf32>
    %683 = arith.mulf %682, %681 : vector<8x256xf32>
    %684 = math.tanh %683 : vector<8x256xf32>
    %cst_328 = arith.constant 1.000000e+00 : f32
    %685 = vector.broadcast %cst_328 : f32 to vector<8x256xf32>
    %686 = arith.addf %685, %684 : vector<8x256xf32>
    %cst_329 = arith.constant 5.000000e-01 : f32
    %687 = vector.broadcast %cst_329 : f32 to vector<8x256xf32>
    %688 = arith.mulf %687, %686 : vector<8x256xf32>
    %689 = arith.mulf %676, %688 : vector<8x256xf32>
    %c0_330 = arith.constant 0 : index
    %c0_331 = arith.constant 0 : index
    %690 = vector.load %arg41[%c0_330, %c0_331] : memref<256x128xbf16, #tpu.memory_space<vmem>>, vector<256x128xbf16>
    %c0_332 = arith.constant 0 : index
    %c0_333 = arith.constant 0 : index
    %691 = vector.load %arg42[%c0_332, %c0_333] : memref<1x128xf32, #tpu.memory_space<vmem>>, vector<1x128xf32>
    %692 = arith.truncf %689 : vector<8x256xf32> to vector<8x256xbf16>
    %cst_334 = arith.constant dense<0.000000e+00> : vector<8x128xf32>
    %693 = tpu.matmul %692, %690, %cst_334 {dimension_numbers = #tpu.dot_dimension_numbers<[1], [0], [0], [1], [0, 0, 1, 1], [], []>} : vector<8x256xbf16>, vector<256x128xbf16>, vector<8x128xf32> -> vector<8x128xf32>
    %694 = vector.broadcast %691 : vector<1x128xf32> to vector<8x128xf32>
    %695 = arith.addf %693, %694 : vector<8x128xf32>
    %696 = arith.addf %646, %695 : vector<8x128xf32>
    %c0_335 = arith.constant 0 : index
    %c0_336 = arith.constant 0 : index
    %697 = vector.load %arg43[%c0_335, %c0_336] : memref<1x128xf32, #tpu.memory_space<vmem>>, vector<1x128xf32>
    %c0_337 = arith.constant 0 : index
    %c0_338 = arith.constant 0 : index
    %698 = vector.load %arg44[%c0_337, %c0_338] : memref<1x128xf32, #tpu.memory_space<vmem>>, vector<1x128xf32>
    %cst_339 = arith.constant dense<0.000000e+00> : vector<8xf32>
    %699 = vector.multi_reduction <add>, %696, %cst_339 [1] : vector<8x128xf32> to vector<8xf32>
    %700 = vector.shape_cast %699 : vector<8xf32> to vector<8x1xf32>
    %cst_340 = arith.constant 1.280000e+02 : f32
    %701 = vector.broadcast %cst_340 : f32 to vector<8x1xf32>
    %702 = arith.divf %700, %701 : vector<8x1xf32>
    %703 = vector.broadcast %702 : vector<8x1xf32> to vector<8x128xf32>
    %704 = arith.subf %696, %703 : vector<8x128xf32>
    %705 = arith.mulf %704, %704 : vector<8x128xf32>
    %cst_341 = arith.constant dense<0.000000e+00> : vector<8xf32>
    %706 = vector.multi_reduction <add>, %705, %cst_341 [1] : vector<8x128xf32> to vector<8xf32>
    %707 = vector.shape_cast %706 : vector<8xf32> to vector<8x1xf32>
    %cst_342 = arith.constant 1.280000e+02 : f32
    %708 = vector.broadcast %cst_342 : f32 to vector<8x1xf32>
    %709 = arith.divf %707, %708 : vector<8x1xf32>
    %710 = vector.broadcast %702 : vector<8x1xf32> to vector<8x128xf32>
    %711 = arith.subf %696, %710 : vector<8x128xf32>
    %cst_343 = arith.constant 9.99999974E-6 : f32
    %712 = vector.broadcast %cst_343 : f32 to vector<8x1xf32>
    %713 = arith.addf %709, %712 : vector<8x1xf32>
    %714 = math.rsqrt %713 : vector<8x1xf32>
    %715 = vector.broadcast %714 : vector<8x1xf32> to vector<8x128xf32>
    %716 = arith.mulf %711, %715 : vector<8x128xf32>
    %717 = vector.broadcast %697 : vector<1x128xf32> to vector<8x128xf32>
    %718 = arith.mulf %716, %717 : vector<8x128xf32>
    %719 = vector.broadcast %698 : vector<1x128xf32> to vector<8x128xf32>
    %720 = arith.addf %718, %719 : vector<8x128xf32>
    %c0_344 = arith.constant 0 : index
    %c0_345 = arith.constant 0 : index
    %721 = vector.load %arg45[%c0_344, %c0_345] : memref<128x256xbf16, #tpu.memory_space<vmem>>, vector<128x256xbf16>
    %c0_346 = arith.constant 0 : index
    %c0_347 = arith.constant 0 : index
    %722 = vector.load %arg46[%c0_346, %c0_347] : memref<1x256xf32, #tpu.memory_space<vmem>>, vector<1x256xf32>
    %723 = arith.truncf %720 : vector<8x128xf32> to vector<8x128xbf16>
    %cst_348 = arith.constant dense<0.000000e+00> : vector<8x256xf32>
    %724 = tpu.matmul %723, %721, %cst_348 {dimension_numbers = #tpu.dot_dimension_numbers<[1], [0], [0], [1], [0, 0, 1, 1], [], []>} : vector<8x128xbf16>, vector<128x256xbf16>, vector<8x256xf32> -> vector<8x256xf32>
    %725 = vector.broadcast %722 : vector<1x256xf32> to vector<8x256xf32>
    %726 = arith.addf %724, %725 : vector<8x256xf32>
    %c0_349 = arith.constant 0 : index
    %c0_350 = arith.constant 0 : index
    %c0_351 = arith.constant 0 : index
    %727 = vector.load %arg47[%c0_349, %c0_350, %c0_351] : memref<1x8x256xf32, #tpu.memory_space<vmem>>, vector<1x8x256xf32>
    %728 = vector.shape_cast %727 : vector<1x8x256xf32> to vector<8x256xf32>
    %729 = vector.shape_cast %726 : vector<8x256xf32> to vector<1x8x256xf32>
    tpu.vector_store %arg47[%c0_349, %c0_350, %c0_351], %729 {strides = array<i32>} : memref<1x8x256xf32, #tpu.memory_space<vmem>>, vector<1x8x256xf32>,
    return
  }
  func.func @transform_0(%arg0: i32) -> (i32, i32, i32) {
    %c0_i32 = arith.constant 0 : i32
    %c0_i32_0 = arith.constant 0 : i32
    %c0_i32_1 = arith.constant 0 : i32
    return %arg0, %c0_i32, %c0_i32_0 : i32, i32, i32
  }
  func.func @transform_1(%arg0: i32) -> (i32, i32, i32) {
    %c0_i32 = arith.constant 0 : i32
    %c0_i32_0 = arith.constant 0 : i32
    %c0_i32_1 = arith.constant 0 : i32
    return %arg0, %c0_i32, %c0_i32_0 : i32, i32, i32
  }
  func.func @transform_2(%arg0: i32) -> (i32, i32, i32) {
    %c0_i32 = arith.constant 0 : i32
    %c0_i32_0 = arith.constant 0 : i32
    %c0_i32_1 = arith.constant 0 : i32
    return %arg0, %c0_i32, %c0_i32_0 : i32, i32, i32
  }
  func.func @transform_3(%arg0: i32) -> (i32, i32, i32) {
    %c0_i32 = arith.constant 0 : i32
    %c0_i32_0 = arith.constant 0 : i32
    %c0_i32_1 = arith.constant 0 : i32
    return %arg0, %c0_i32, %c0_i32_0 : i32, i32, i32
  }
  func.func @transform_4(%arg0: i32) -> (i32, i32, i32) {
    %c0_i32 = arith.constant 0 : i32
    %c0_i32_0 = arith.constant 0 : i32
    %c0_i32_1 = arith.constant 0 : i32
    %c0_i32_2 = arith.constant 0 : i32
    return %c0_i32, %c0_i32_0, %c0_i32_1 : i32, i32, i32
  }
  func.func @transform_5(%arg0: i32) -> (i32, i32, i32) {
    %c0_i32 = arith.constant 0 : i32
    %c0_i32_0 = arith.constant 0 : i32
    %c0_i32_1 = arith.constant 0 : i32
    %c0_i32_2 = arith.constant 0 : i32
    return %c0_i32, %c0_i32_0, %c0_i32_1 : i32, i32, i32
  }
  func.func @transform_6(%arg0: i32) -> (i32, i32, i32) {
    %c0_i32 = arith.constant 0 : i32
    %c0_i32_0 = arith.constant 0 : i32
    %c0_i32_1 = arith.constant 0 : i32
    %c0_i32_2 = arith.constant 0 : i32
    return %c0_i32, %c0_i32_0, %c0_i32_1 : i32, i32, i32
  }
  func.func @transform_7(%arg0: i32) -> (i32, i32, i32) {
    %c0_i32 = arith.constant 0 : i32
    %c0_i32_0 = arith.constant 0 : i32
    %c0_i32_1 = arith.constant 0 : i32
    %c0_i32_2 = arith.constant 0 : i32
    return %c0_i32, %c0_i32_0, %c0_i32_1 : i32, i32, i32
  }
  func.func @transform_8(%arg0: i32) -> (i32, i32, i32) {
    %c0_i32 = arith.constant 0 : i32
    %c0_i32_0 = arith.constant 0 : i32
    %c0_i32_1 = arith.constant 0 : i32
    %c0_i32_2 = arith.constant 0 : i32
    return %c0_i32, %c0_i32_0, %c0_i32_1 : i32, i32, i32
  }
  func.func @transform_9(%arg0: i32) -> (i32, i32, i32) {
    %c0_i32 = arith.constant 0 : i32
    %c0_i32_0 = arith.constant 0 : i32
    %c0_i32_1 = arith.constant 0 : i32
    %c0_i32_2 = arith.constant 0 : i32
    return %c0_i32, %c0_i32_0, %c0_i32_1 : i32, i32, i32
  }
  func.func @transform_10(%arg0: i32) -> (i32, i32, i32) {
    %c0_i32 = arith.constant 0 : i32
    %c0_i32_0 = arith.constant 0 : i32
    %c0_i32_1 = arith.constant 0 : i32
    %c0_i32_2 = arith.constant 0 : i32
    return %c0_i32, %c0_i32_0, %c0_i32_1 : i32, i32, i32
  }
  func.func @transform_11(%arg0: i32) -> (i32, i32, i32) {
    %c0_i32 = arith.constant 0 : i32
    %c0_i32_0 = arith.constant 0 : i32
    %c0_i32_1 = arith.constant 0 : i32
    %c0_i32_2 = arith.constant 0 : i32
    return %c0_i32, %c0_i32_0, %c0_i32_1 : i32, i32, i32
  }
  func.func @transform_12(%arg0: i32) -> (i32, i32, i32) {
    %c0_i32 = arith.constant 0 : i32
    %c0_i32_0 = arith.constant 0 : i32
    %c0_i32_1 = arith.constant 0 : i32
    %c0_i32_2 = arith.constant 0 : i32
    return %c0_i32, %c0_i32_0, %c0_i32_1 : i32, i32, i32
  }
  func.func @transform_13(%arg0: i32) -> (i32, i32, i32) {
    %c0_i32 = arith.constant 0 : i32
    %c0_i32_0 = arith.constant 0 : i32
    %c0_i32_1 = arith.constant 0 : i32
    %c0_i32_2 = arith.constant 0 : i32
    return %c0_i32, %c0_i32_0, %c0_i32_1 : i32, i32, i32
  }
  func.func @transform_14(%arg0: i32) -> (i32, i32, i32) {
    %c0_i32 = arith.constant 0 : i32
    %c0_i32_0 = arith.constant 0 : i32
    %c0_i32_1 = arith.constant 0 : i32
    %c0_i32_2 = arith.constant 0 : i32
    return %c0_i32, %c0_i32_0, %c0_i32_1 : i32, i32, i32
  }
  func.func @transform_15(%arg0: i32) -> (i32, i32, i32) {
    %c0_i32 = arith.constant 0 : i32
    %c0_i32_0 = arith.constant 0 : i32
    %c0_i32_1 = arith.constant 0 : i32
    %c0_i32_2 = arith.constant 0 : i32
    return %c0_i32, %c0_i32_0, %c0_i32_1 : i32, i32, i32
  }
  func.func @transform_16(%arg0: i32) -> (i32, i32) {
    %c0_i32 = arith.constant 0 : i32
    %c0_i32_0 = arith.constant 0 : i32
    %c0_i32_1 = arith.constant 0 : i32
    return %c0_i32, %c0_i32_0 : i32, i32
  }
  func.func @transform_17(%arg0: i32) -> (i32, i32) {
    %c0_i32 = arith.constant 0 : i32
    %c0_i32_0 = arith.constant 0 : i32
    %c0_i32_1 = arith.constant 0 : i32
    return %c0_i32, %c0_i32_0 : i32, i32
  }
  func.func @transform_18(%arg0: i32) -> (i32, i32) {
    %c0_i32 = arith.constant 0 : i32
    %c0_i32_0 = arith.constant 0 : i32
    %c0_i32_1 = arith.constant 0 : i32
    return %c0_i32, %c0_i32_0 : i32, i32
  }
  func.func @transform_19(%arg0: i32) -> (i32, i32) {
    %c0_i32 = arith.constant 0 : i32
    %c0_i32_0 = arith.constant 0 : i32
    %c0_i32_1 = arith.constant 0 : i32
    return %c0_i32, %c0_i32_0 : i32, i32
  }
  func.func @transform_20(%arg0: i32) -> (i32, i32) {
    %c0_i32 = arith.constant 0 : i32
    %c0_i32_0 = arith.constant 0 : i32
    %c0_i32_1 = arith.constant 0 : i32
    return %c0_i32, %c0_i32_0 : i32, i32
  }
  func.func @transform_21(%arg0: i32) -> (i32, i32) {
    %c0_i32 = arith.constant 0 : i32
    %c0_i32_0 = arith.constant 0 : i32
    %c0_i32_1 = arith.constant 0 : i32
    return %c0_i32, %c0_i32_0 : i32, i32
  }
  func.func @transform_22(%arg0: i32) -> (i32, i32) {
    %c0_i32 = arith.constant 0 : i32
    %c0_i32_0 = arith.constant 0 : i32
    %c0_i32_1 = arith.constant 0 : i32
    return %c0_i32, %c0_i32_0 : i32, i32
  }
  func.func @transform_23(%arg0: i32) -> (i32, i32) {
    %c0_i32 = arith.constant 0 : i32
    %c0_i32_0 = arith.constant 0 : i32
    %c0_i32_1 = arith.constant 0 : i32
    return %c0_i32, %c0_i32_0 : i32, i32
  }
  func.func @transform_24(%arg0: i32) -> (i32, i32) {
    %c0_i32 = arith.constant 0 : i32
    %c0_i32_0 = arith.constant 0 : i32
    %c0_i32_1 = arith.constant 0 : i32
    return %c0_i32, %c0_i32_0 : i32, i32
  }
  func.func @transform_25(%arg0: i32) -> (i32, i32) {
    %c0_i32 = arith.constant 0 : i32
    %c0_i32_0 = arith.constant 0 : i32
    %c0_i32_1 = arith.constant 0 : i32
    return %c0_i32, %c0_i32_0 : i32, i32
  }
  func.func @transform_26(%arg0: i32) -> (i32, i32) {
    %c0_i32 = arith.constant 0 : i32
    %c0_i32_0 = arith.constant 0 : i32
    %c0_i32_1 = arith.constant 0 : i32
    return %c0_i32, %c0_i32_0 : i32, i32
  }
  func.func @transform_27(%arg0: i32) -> (i32, i32) {
    %c0_i32 = arith.constant 0 : i32
    %c0_i32_0 = arith.constant 0 : i32
    %c0_i32_1 = arith.constant 0 : i32
    return %c0_i32, %c0_i32_0 : i32, i32
  }
  func.func @transform_28(%arg0: i32) -> (i32, i32) {
    %c0_i32 = arith.constant 0 : i32
    %c0_i32_0 = arith.constant 0 : i32
    %c0_i32_1 = arith.constant 0 : i32
    return %c0_i32, %c0_i32_0 : i32, i32
  }
  func.func @transform_29(%arg0: i32) -> (i32, i32) {
    %c0_i32 = arith.constant 0 : i32
    %c0_i32_0 = arith.constant 0 : i32
    %c0_i32_1 = arith.constant 0 : i32
    return %c0_i32, %c0_i32_0 : i32, i32
  }
  func.func @transform_30(%arg0: i32) -> (i32, i32) {
    %c0_i32 = arith.constant 0 : i32
    %c0_i32_0 = arith.constant 0 : i32
    %c0_i32_1 = arith.constant 0 : i32
    return %c0_i32, %c0_i32_0 : i32, i32
  }
  func.func @transform_31(%arg0: i32) -> (i32, i32) {
    %c0_i32 = arith.constant 0 : i32
    %c0_i32_0 = arith.constant 0 : i32
    %c0_i32_1 = arith.constant 0 : i32
    return %c0_i32, %c0_i32_0 : i32, i32
  }
  func.func @transform_32(%arg0: i32) -> (i32, i32) {
    %c0_i32 = arith.constant 0 : i32
    %c0_i32_0 = arith.constant 0 : i32
    %c0_i32_1 = arith.constant 0 : i32
    return %c0_i32, %c0_i32_0 : i32, i32
  }
  func.func @transform_33(%arg0: i32) -> (i32, i32) {
    %c0_i32 = arith.constant 0 : i32
    %c0_i32_0 = arith.constant 0 : i32
    %c0_i32_1 = arith.constant 0 : i32
    return %c0_i32, %c0_i32_0 : i32, i32
  }
  func.func @transform_34(%arg0: i32) -> (i32, i32) {
    %c0_i32 = arith.constant 0 : i32
    %c0_i32_0 = arith.constant 0 : i32
    %c0_i32_1 = arith.constant 0 : i32
    return %c0_i32, %c0_i32_0 : i32, i32
  }
  func.func @transform_35(%arg0: i32) -> (i32, i32) {
    %c0_i32 = arith.constant 0 : i32
    %c0_i32_0 = arith.constant 0 : i32
    %c0_i32_1 = arith.constant 0 : i32
    return %c0_i32, %c0_i32_0 : i32, i32
  }
  func.func @transform_36(%arg0: i32) -> (i32, i32) {
    %c0_i32 = arith.constant 0 : i32
    %c0_i32_0 = arith.constant 0 : i32
    %c0_i32_1 = arith.constant 0 : i32
    return %c0_i32, %c0_i32_0 : i32, i32
  }
  func.func @transform_37(%arg0: i32) -> (i32, i32) {
    %c0_i32 = arith.constant 0 : i32
    %c0_i32_0 = arith.constant 0 : i32
    %c0_i32_1 = arith.constant 0 : i32
    return %c0_i32, %c0_i32_0 : i32, i32
  }
  func.func @transform_38(%arg0: i32) -> (i32, i32) {
    %c0_i32 = arith.constant 0 : i32
    %c0_i32_0 = arith.constant 0 : i32
    %c0_i32_1 = arith.constant 0 : i32
    return %c0_i32, %c0_i32_0 : i32, i32
  }
  func.func @transform_39(%arg0: i32) -> (i32, i32) {
    %c0_i32 = arith.constant 0 : i32
    %c0_i32_0 = arith.constant 0 : i32
    %c0_i32_1 = arith.constant 0 : i32
    return %c0_i32, %c0_i32_0 : i32, i32
  }
  func.func @transform_40(%arg0: i32) -> (i32, i32) {
    %c0_i32 = arith.constant 0 : i32
    %c0_i32_0 = arith.constant 0 : i32
    %c0_i32_1 = arith.constant 0 : i32
    return %c0_i32, %c0_i32_0 : i32, i32
  }
  func.func @transform_41(%arg0: i32) -> (i32, i32) {
    %c0_i32 = arith.constant 0 : i32
    %c0_i32_0 = arith.constant 0 : i32
    %c0_i32_1 = arith.constant 0 : i32
    return %c0_i32, %c0_i32_0 : i32, i32
  }
  func.func @transform_42(%arg0: i32) -> (i32, i32) {
    %c0_i32 = arith.constant 0 : i32
    %c0_i32_0 = arith.constant 0 : i32
    %c0_i32_1 = arith.constant 0 : i32
    return %c0_i32, %c0_i32_0 : i32, i32
  }
  func.func @transform_43(%arg0: i32) -> (i32, i32) {
    %c0_i32 = arith.constant 0 : i32
    %c0_i32_0 = arith.constant 0 : i32
    %c0_i32_1 = arith.constant 0 : i32
    return %c0_i32, %c0_i32_0 : i32, i32
  }
  func.func @transform_44(%arg0: i32) -> (i32, i32) {
    %c0_i32 = arith.constant 0 : i32
    %c0_i32_0 = arith.constant 0 : i32
    %c0_i32_1 = arith.constant 0 : i32
    return %c0_i32, %c0_i32_0 : i32, i32
  }
  func.func @transform_45(%arg0: i32) -> (i32, i32) {
    %c0_i32 = arith.constant 0 : i32
    %c0_i32_0 = arith.constant 0 : i32
    %c0_i32_1 = arith.constant 0 : i32
    return %c0_i32, %c0_i32_0 : i32, i32
  }
  func.func @transform_46(%arg0: i32) -> (i32, i32, i32) {
    %c0_i32 = arith.constant 0 : i32
    %c0_i32_0 = arith.constant 0 : i32
    %c0_i32_1 = arith.constant 0 : i32
    return %arg0, %c0_i32, %c0_i32_0 : i32, i32, i32
  }
}

</mosaic_0001>

<bundles_post_ra>
// kernel: multimodal_forward.1
= control target key start
LH: loop header
LB: loop body
LE: loop exit
PB: predicated region body
PF: predicated region fallthrough
CT: control target
= control target key end

     0   :  { %s17104_s6 = smov 1   ;;  %s17105_s10 = smov 2   ;;  %s19081_s0 = inlined_call_operand.smem [shape: u32[47], index: -1, kind: input, shape index: {}] }
   0x1   :  { %s17216_s5 = sld [smem:[%s19081_s0]]   ;;  %s17106_s14 = smov 3  }
   0x2   :  { %s17221_s9 = sld [smem:[%s19081_s0 + %s17104_s6]]   ;;  %s17107_s18 = smov 4  }
   0x3   :  { %s17226_s13 = sld [smem:[%s19081_s0 + %s17105_s10]]   ;;  %s17108_s22 = smov 5  }
   0x4   :  { %s17231_s17 = sld [smem:[%s19081_s0 + %s17106_s14]]   ;;  %s17109_s26 = smov 6  }
   0x5   :  { %s17236_s21 = sld [smem:[%s19081_s0 + %s17107_s18]]   ;;  %s17110_s30 = smov 7  }
   0x6   :  { %s17241_s25 = sld [smem:[%s19081_s0 + %s17108_s22]]   ;;  %s17111_s4 = smov 8  }
   0x7   :  { %19102 = sst [smem:[#allocation80_spill]] %s17216_s5  ;;  %s17112_s10 = smov 9  }
   0x8   :  { %19103 = sst [smem:[#allocation81_spill]] %s17221_s9  ;;  %s17113_s15 = smov 10  }
   0x9   :  { %19104 = sst [smem:[#allocation82_spill]] %s17226_s13  ;;  %s17114_s20 = smov 11  }
   0xa   :  { %19105 = sst [smem:[#allocation83_spill]] %s17231_s17  ;;  %s17116_s1 = smov 13  }
   0xb   :  { %19106 = sst [smem:[#allocation84_spill]] %s17236_s21  ;;  %s17117_s7 = smov 14  }
   0xc   :  { %19107 = sst [smem:[#allocation85_spill]] %s17241_s25  ;;  %s17119_s22 = smov 16  }
   0xd   :  { %s17246_s29 = sld [smem:[%s19081_s0 + %s17109_s26]]   ;;  %s17115_s26 = smov 12  }
   0xe   :  { %s17251_s3 = sld [smem:[%s19081_s0 + %s17110_s30]]   ;;  %s17120_s28 = smov 17  }
   0xf   :  { %s17256_s8 = sld [smem:[%s19081_s0 + %s17111_s4]]  }
  0x10   :  { %s17261_s14 = sld [smem:[%s19081_s0 + %s17112_s10]]  }
  0x11   :  { %s17266_s19 = sld [smem:[%s19081_s0 + %s17113_s15]]   ;;  %s17118_s15 = smov 15  }
  0x12   :  { %s17271_s24 = sld [smem:[%s19081_s0 + %s17114_s20]]  }
  0x13   :  { %19108 = sst [smem:[#allocation86_spill]] %s17246_s29 }
  0x14   :  { %19109 = sst [smem:[#allocation87_spill]] %s17251_s3 }
  0x15   :  { %19110 = sst [smem:[#allocation88_spill]] %s17256_s8 }
  0x16   :  { %s17276_s30 = sld [smem:[%s19081_s0 + %s17115_s26]]  }
  0x17   :  { %19111 = sst [smem:[#allocation89_spill]] %s17266_s19 }
  0x18   :  { %s17281_s6 = sld [smem:[%s19081_s0 + %s17116_s1]]  }
  0x19   :  { %s17286_s12 = sld [smem:[%s19081_s0 + %s17117_s7]]   ;;  %s17121_s7 = smov 18  }
  0x1a   :  { %s17291_s20 = sld [smem:[%s19081_s0 + %s17118_s15]]   ;;  %s17122_s15 = smov 19  }
  0x1b   :  { %s17296_s27 = sld [smem:[%s19081_s0 + %s17119_s22]]   ;;  %s17123_s22 = smov 20  }
  0x1c   :  { %19112 = sst [smem:[#allocation90_spill]] %s17276_s30 }
  0x1d   :  { %s17301_s4 = sld [smem:[%s19081_s0 + %s17120_s28]]   ;;  %s17124_s28 = smov 21  }
  0x1e   :  { %19113 = sst [smem:[#allocation91_spill]] %s17281_s6 }
  0x1f   :  { %s17306_s17 = sld [smem:[%s19081_s0 + %s17121_s7]]   ;;  %s17125_s7 = smov 22  }
  0x20   :  { %19114 = sst [smem:[#allocation92_spill]] %s17291_s20 }
  0x21   :  { %s17311_s13 = sld [smem:[%s19081_s0 + %s17122_s15]]   ;;  %s17126_s15 = smov 23  }
  0x22   :  { %s17316_s9 = sld [smem:[%s19081_s0 + %s17123_s22]]   ;;  %s17127_s22 = smov 24  }
  0x23   :  { %19115 = sst [smem:[#allocation93_spill]] %s17301_s4 }
  0x24   :  { %s17321_s30 = sld [smem:[%s19081_s0 + %s17124_s28]]   ;;  %s17128_s28 = smov 25  }
  0x25   :  { %s17326_s8 = sld [smem:[%s19081_s0 + %s17125_s7]]   ;;  %s17129_s7 = smov 26  }
  0x26   :  { %s17331_s29 = sld [smem:[%s19081_s0 + %s17126_s15]]   ;;  %s17130_s15 = smov 27  }
  0x27   :  { %19116 = sst [smem:[#allocation94_spill]] %s17311_s13 }
  0x28   :  { %19117 = sst [smem:[#allocation95_spill]] %s17316_s9 }
  0x29   :  { %s17336_s5 = sld [smem:[%s19081_s0 + %s17127_s22]]   ;;  %s17131_s22 = smov 28  }
  0x2a   :  { %19118 = sst [smem:[#allocation96_spill]] %s17321_s30 }
  0x2b   :  { %19119 = sst [smem:[#allocation97_spill]] %s17326_s8 }
  0x2c   :  { %s17341_s30 = sld [smem:[%s19081_s0 + %s17128_s28]]   ;;  %s17132_s28 = smov 29  }
  0x2d   :  { %s17346_s8 = sld [smem:[%s19081_s0 + %s17129_s7]]   ;;  %s17133_s7 = smov 30  }
  0x2e   :  { %s17351_s13 = sld [smem:[%s19081_s0 + %s17130_s15]]   ;;  %s17134_s15 = smov 31  }
  0x2f   :  { %19120 = sst [smem:[#allocation98_spill]] %s17336_s5 }
  0x30   :  { %s17356_s5 = sld [smem:[%s19081_s0 + %s17131_s22]]   ;;  %s17135_s22 = smov 32  }
  0x31   :  { %s17361_s4 = sld [smem:[%s19081_s0 + %s17132_s28]]   ;;  %s17136_s28 = smov 33  }
  0x32   :  { %s17371_s20 = sld [smem:[%s19081_s0 + %s17134_s15]]   ;;  %s17138_s15 = smov 35  }
  0x33   :  { %19121 = sst [smem:[#allocation99_spill]] %s17346_s8 }
  0x34   :  { %s17366_s8 = sld [smem:[%s19081_s0 + %s17133_s7]]   ;;  %s17137_s7 = smov 34  }
  0x35   :  { %s17381_s6 = sld [smem:[%s19081_s0 + %s17136_s28]]   ;;  %s17140_s28 = smov 37  }
  0x36   :  { %19122 = sst [smem:[#allocation100_spill]] %s17356_s5 }
  0x37   :  { %19123 = sst [smem:[#allocation101_spill]] %s17361_s4 }
  0x38   :  { %s17376_s5 = sld [smem:[%s19081_s0 + %s17135_s22]]   ;;  %s17139_s22 = smov 36  }
  0x39   :  { %s17391_s19 = sld [smem:[%s19081_s0 + %s17138_s15]]   ;;  %s17142_s15 = smov 39  }
  0x3a   :  { %19124 = sst [smem:[#allocation102_spill]] %s17366_s8 }
  0x3b   :  { %19126 = sst [smem:[#allocation104_spill]] %s17381_s6 }
  0x3c   :  { %s17386_s8 = sld [smem:[%s19081_s0 + %s17137_s7]]   ;;  %s17141_s7 = smov 38  }
  0x3d   :  { %s17401_s3 = sld [smem:[%s19081_s0 + %s17140_s28]]   ;;  %s17144_s28 = smov 41  }
  0x3e   :  { %19125 = sst [smem:[#allocation103_spill]] %s17376_s5 }
  0x3f   :  { %s17396_s5 = sld [smem:[%s19081_s0 + %s17139_s22]]   ;;  %s17143_s22 = smov 40  }
  0x40   :  { %s17411_s21 = sld [smem:[%s19081_s0 + %s17142_s15]]   ;;  %s17146_s15 = smov 43  }
  0x42   :  { %19127 = sst [smem:[#allocation105_spill]] %s17386_s8 }
  0x43   :  { %19129 = sst [smem:[#allocation107_spill]] %s17401_s3 }
  0x44   :  { %s17406_s8 = sld [smem:[%s19081_s0 + %s17141_s7]]   ;;  %s17145_s7 = smov 42  }
  0x45   :  { %19128 = sst [smem:[#allocation106_spill]] %s17396_s5 }
  0x46   :  { %19131 = sst [smem:[#allocation109_spill]] %s17411_s21 }
  0x47   :  { %s17416_s5 = sld [smem:[%s19081_s0 + %s17143_s22]]   ;;  %s17147_s22 = smov 44  }
  0x48   :  { %s17421_s3 = sld [smem:[%s19081_s0 + %s17144_s28]]   ;;  %s17148_s28 = smov 45  }
  0x49   :  { %s17431_s21 = sld [smem:[%s19081_s0 + %s17146_s15]]  }
  0x4a   :  { %19130 = sst [smem:[#allocation108_spill]] %s17406_s8 }
  0x4b   :  { %s17426_s8 = sld [smem:[%s19081_s0 + %s17145_s7]]   ;;  %s17149_s7 = smov 46  }
  0x4d   :  { %19132 = sst [smem:[#allocation110_spill]] %s17416_s5 }
  0x4e   :  { %19133 = sst [smem:[#allocation111_spill]] %s17421_s3 }
  0x4f   :  { %s17436_s5 = sld [smem:[%s19081_s0 + %s17147_s22]]  }
  0x50   :  { %s17441_s3 = sld [smem:[%s19081_s0 + %s17148_s28]]  }
  0x51   :  { %19134 = sst [smem:[#allocation112_spill]] %s17426_s8 }
  0x52   :  { %s17446_s8 = sld [smem:[%s19081_s0 + %s17149_s7]]  }
  0x53   :  { %98 = vsyncpa [#allocation3], 0 }
  0x54   :  { %99 = vsyncpa [#allocation6], 0 }
  0x55   :  { %100 = vsyncpa [#allocation9], 0 }
  0x56   :  { %101 = vsyncpa [#allocation12], 0 }
  0x57   :  { %102 = vsyncpa [#allocation15], 0 }
  0x58   :  { %103 = vsyncpa [#allocation18], 0 }
  0x59   :  { %104 = vsyncpa [#allocation21], 0 }
  0x5a   :  { %105 = vsyncpa [#allocation24], 0 }
  0x5b   :  { %106 = vsyncpa [#allocation27], 0 }
  0x5c   :  { %107 = vsyncpa [#allocation30], 0 }
  0x5d   :  { %108 = vsyncpa [#allocation33], 0 }
  0x5e   :  { %109 = vsyncpa [#allocation36], 0 }
  0x5f   :  { %110 = vsyncpa [#allocation39], 0 }
  0x60   :  { %111 = vsyncpa [#allocation42], 0 }
  0x61   :  { %112 = vsyncpa [#allocation45], 0 }
  0x62   :  { %113 = vsyncpa [#allocation48], 0 }
  0x63   :  { %114 = vsyncpa [#allocation51], 0 }
  0x64   :  { %115 = vsyncpa [#allocation54], 0 }
  0x65   :  { %116 = vsyncpa [#allocation57], 0 }
  0x66   :  { %117 = vsyncpa [#allocation4], 0 }
  0x67   :  { %119 = vsyncpa [#allocation4 + $0x1], 0  ;;  %s17448_s0 = smov 0   ;;  %s17450_s15 = smov 0  }
  0x68   :  { %s17452_s16 = smov 0   ;;  %s17454_s18 = smov 0  }
  0x69 LB: > { %19135 = sst [smem:[#allocation113_spill]] %s17090_s0  ;;  %s17469_s22 = sadd.s32 4294967295, %s17102_s18   ;;  %s17102_s18 = sphi %s17454_s18, %s19186_s18   ;;  %s17098_s16 = sphi %s17452_s16, %s19188_s16   ;;  %s17094_s15 = sphi %s17450_s15, %s19190_s15   ;;  %s17090_s0 = sphi %s17448_s0, %s19189_s0  }
  0x6a   : > { %19136 = sst [smem:[#allocation114_spill]] %s17098_s16  ;;  %s13179_s23 = sadd.s32 4294967294, %s17102_s18  }
  0x6b   : > { %s17473_s26 = sadd.s32 1, %s17102_s18   ;;  %s1118_s28 = sadd.s32 1, %s17098_s16 }
  0x6c   : > { %19137 = sst [smem:[#allocation115_spill]] %s17473_s26  ;;  %s1115_s1 = ssub.s32 %s17102_s18, %s17473_s26 }
  0x6d   : > { %p1128_p0 = scmp.ne.s32.totalorder %s17098_s16, %s17094_s15  ;;  %p1116_p1 = scmp.eq.s32.totalorder %s1115_s1, 0 }
  0x6e   : > { %p1129_p2 = scmp.eq.s32.totalorder %s17469_s22, 1  ;;  %p1134_p3 = scmp.ne.s32.totalorder %s17094_s15, %s17090_s0 }
  0x6f   : > { %p1135_p4 = scmp.eq.s32.totalorder %s13179_s23, 1  ;;  %p13180_p7 = scmp.ge.s32.totalorder %s17102_s18, 1 }
  0x70   : > { %s17484_s2 = scalar_select %p1116_p1, %s17098_s16, %s1118_s28  }
  0x71   : > { %p17486_p5 = por %p1129_p2, %p1128_p0  ;;  %p17490_p6 = por %p1135_p4, %p1134_p3 }
  0x72   : > { %19138 = sst [smem:[#allocation116_spill]] %s17484_s2  ;;  %p1142_p8 = scmp.lt.s32.totalorder %s17102_s18, 3 }
  0x73   : > { %s19139_s7 = scalar_select %p17486_p5, 1, 0 }
  0x74   : > { %s19140_s10 = scalar_select %p17490_p6, 1, 0 }
  0x75   : > { %p17496_p9 = pnand %p13180_p7, %p1142_p8 }
  0x76   : > { %19141 = sst [smem:[#allocation117_spill]] %s19140_s10  ;;  %p15174_p10 = scmp.eq.s32.totalorder (!%p17496_p9), %s17469_s22, 0 }
  0x77   : > { %1146 = sbr.rel (%p17496_p9) target bundleno = 555 (0x22b), region = 12  ;;  %s17150_s23 = smov (!%p17496_p9), [#allocation5]  }
  0x78   : > { %s1167_s28 = sshll.u32 (!%p17496_p9), %s17150_s23, 4  ;;  %s17151_s1 = smov (!%p17496_p9), [#allocation8]   ;;  %s1168_s28 = int_to_ptr.vmem [resolvable:$true] %s1167_s28 }
  0x79   : > { %s1199_s2 = sshll.u32 (!%p17496_p9), %s17151_s1, 4  ;;  %s16088_s16 = scalar_lea.vmem (!%p17496_p9), %s1168_s28, 64  ;;  %s1200_s2 = int_to_ptr.vmem [resolvable:$true] %s1199_s2 }
  0x7a   : > { %p16089_p11 = scmp.ne.s32.totalorder (!%p17496_p9), %s1168_s28, %s16088_s16  ;;  %p16095_p0 = scmp.lt.s32.totalorder (!%p17496_p9), %s1168_s28, %s1168_s28 }
  0x7b   : > { %p16096_p1 = scmp.lt.s32.totalorder (!%p17496_p9), %s16088_s16, %s16088_s16 }
  0x7c   : > { %p16090_p12 = pnand %p16089_p11, %p15174_p10 }
  0x7d   : > { %p16097_p2 = por %p16096_p1, %p16095_p0 }
  0x7e   : > { %p16091_p13 = pneg %p16090_p12 }
  0x80   : > { %p16098_p3 = pnand %p16097_p2, %p16091_p13 }
  0x82   : > { %16101 = shalt.err (!%p16098_p3)
}
  0x83   : > { %s19090_s26 = smov 16   ;;  %s19143_s25 = sld [smem:[#allocation85_spill]] }
  0x84   : > { %s19092_s10 = smov 1   ;;  %s16112_s23 = scalar_lea.vmem %s1200_s2, 64 }
  0x85   : > { %p16113_p4 = scmp.ne.s32.totalorder %s1200_s2, %s16112_s23  ;;  %p16119_p11 = scmp.lt.s32.totalorder %s1200_s2, %s1200_s2 }
  0x86   : > { %p16120_p12 = scmp.lt.s32.totalorder %s16112_s23, %s16112_s23 }
  0x87   : > { %p16114_p7 = pnand %p16113_p4, %p15174_p10 }
  0x88   : > { %p16121_p13 = por %p16120_p12, %p16119_p11 }
  0x89   : > { %15023 = dma.hbm_to_vmem [thread:$0]  (%p15174_p10), %s19143_s25, 64, %s1168_s28, [#allocation6], %s19090_s26, %s19090_s26, %s19092_s10  }
  0x8a   : > { %p16115_p8 = pneg %p16114_p7 }
  0x8c   : > { %p16122_p0 = pnand %p16121_p13, %p16115_p8 }
  0x8e   : > { %16125 = shalt.err (!%p16122_p0)
}
  0x8f   : > { %15027 = dma.hbm_to_vmem [thread:$0]  (%p15174_p10), %s17261_s14, 64, %s1200_s2, [#allocation9], %s19090_s26, %s19090_s26, %s19092_s10  }
  0x90   : > { %s17154_s16 = smov [#allocation11]   ;;  %s17155_s1 = smov [#allocation14]  }
  0x91   : > { %s1225_s28 = sshll.u32 %s17154_s16, 4  ;;  %s1254_s25 = sshll.u32 %s17155_s1, 4  ;;  %s1226_s28 = int_to_ptr.vmem [resolvable:$true] %s1225_s28  ;;  %s1255_s25 = int_to_ptr.vmem [resolvable:$true] %s1254_s25 }
  0x92   : > { %s16136_s0 = scalar_lea.vmem %s1226_s28, 64  ;;  %p16143_p4 = scmp.lt.s32.totalorder %s1226_s28, %s1226_s28 }
  0x93   : > { %p16137_p1 = scmp.ne.s32.totalorder %s1226_s28, %s16136_s0  ;;  %p16144_p7 = scmp.lt.s32.totalorder %s16136_s0, %s16136_s0 }
  0x95   : > { %p16138_p2 = pnand %p16137_p1, %p15174_p10  ;;  %p16145_p8 = por %p16144_p7, %p16143_p4 }
  0x97   : > { %p16139_p3 = pneg %p16138_p2 }
  0x99   : > { %p16146_p11 = pnand %p16145_p8, %p16139_p3 }
  0x9b   : > { %16149 = shalt.err (!%p16146_p11)
}
  0x9c   : > { %15031 = dma.hbm_to_vmem [thread:$0]  (%p15174_p10), %s17271_s24, 64, %s1226_s28, [#allocation12], %s19090_s26, %s19090_s26, %s19092_s10  }
  0x9d   : > { %s16160_s2 = scalar_lea.vmem %s1255_s25, 8192  ;;  %p16167_p1 = scmp.lt.s32.totalorder %s1255_s25, %s1255_s25 }
  0x9e   : > { %p16161_p12 = scmp.ne.s32.totalorder %s1255_s25, %s16160_s2  ;;  %p16168_p2 = scmp.lt.s32.totalorder %s16160_s2, %s16160_s2 }
  0xa0   : > { %p16162_p13 = pnand %p16161_p12, %p15174_p10  ;;  %p16169_p6 = por %p16168_p2, %p16167_p1 }
  0xa2   : > { %p16163_p0 = pneg %p16162_p13 }
  0xa4   : > { %p16170_p4 = pnand %p16169_p6, %p16163_p0 }
  0xa6   : > { %16173 = shalt.err (!%p16170_p4)
}
  0xa7   : > { %s19094_s0 = smov 64   ;;  %s19096_s23 = smov 4  }
  0xa8   : > { %15035 = dma.hbm_to_vmem [thread:$0]  (%p15174_p10), %s17286_s12, 8192, %s1255_s25, [#allocation15], %s19094_s0, %s19094_s0, %s19096_s23  }
  0xa9   : > { %s17158_s16 = smov [#allocation17]   ;;  %s17159_s1 = smov [#allocation20]  }
  0xaa   : > { %s1280_s28 = sshll.u32 %s17158_s16, 4  ;;  %s1304_s26 = sshll.u32 %s17159_s1, 4  ;;  %s1281_s28 = int_to_ptr.vmem [resolvable:$true] %s1280_s28  ;;  %s1305_s26 = int_to_ptr.vmem [resolvable:$true] %s1304_s26 }
  0xab   : > { %s16184_s10 = scalar_lea.vmem %s1281_s28, 512  ;;  %p16191_p8 = scmp.lt.s32.totalorder %s1281_s28, %s1281_s28 }
  0xac   : > { %p16185_p3 = scmp.ne.s32.totalorder %s1281_s28, %s16184_s10  ;;  %p16192_p11 = scmp.lt.s32.totalorder %s16184_s10, %s16184_s10 }
  0xae   : > { %p16186_p6 = pnand %p16185_p3, %p15174_p10  ;;  %p16193_p12 = por %p16192_p11, %p16191_p8 }
  0xb0   : > { %p16187_p7 = pneg %p16186_p6 }
  0xb2   : > { %p16194_p13 = pnand %p16193_p12, %p16187_p7 }
  0xb4   : > { %16197 = shalt.err (!%p16194_p13)
}
  0xb5   : > { %15039 = dma.hbm_to_vmem [thread:$0]  (%p15174_p10), %s17296_s27, 512, %s1281_s28, [#allocation18], %s19094_s0, %s19094_s0, %s19096_s23  }
  0xb6   : > { %s16208_s25 = scalar_lea.vmem %s1305_s26, 1536  ;;  %p16215_p4 = scmp.lt.s32.totalorder %s1305_s26, %s1305_s26 }
  0xb7   : > { %p16209_p0 = scmp.ne.s32.totalorder %s1305_s26, %s16208_s25  ;;  %p16216_p3 = scmp.lt.s32.totalorder %s16208_s25, %s16208_s25 }
  0xb9   : > { %p16210_p1 = pnand %p16209_p0, %p15174_p10  ;;  %p16217_p6 = por %p16216_p3, %p16215_p4 }
  0xbb   : > { %p16211_p2 = pneg %p16210_p1 }
  0xbd   : > { %p16218_p8 = pnand %p16217_p6, %p16211_p2 }
  0xbf   : > { %16221 = shalt.err (!%p16218_p8)
}
  0xc0   : > { %15043 = dma.hbm_to_vmem [thread:$0]  (%p15174_p10), %s17306_s17, 1536, %s1305_s26, [#allocation21], %s19094_s0, %s19094_s0, %s19096_s23  }
  0xc1   : > { %s17160_s10 = smov [#allocation23]   ;;  %s17161_s16 = smov [#allocation26]  }
  0xc2   : > { %s1328_s2 = sshll.u32 %s17160_s10, 4  ;;  %s1356_s28 = sshll.u32 %s17161_s16, 4  ;;  %s1329_s2 = int_to_ptr.vmem [resolvable:$true] %s1328_s2  ;;  %s1357_s28 = int_to_ptr.vmem [resolvable:$true] %s1356_s28 }
  0xc3   : > { %s16232_s1 = scalar_lea.vmem %s1329_s2, 1024  ;;  %p16239_p13 = scmp.lt.s32.totalorder %s1329_s2, %s1329_s2 }
  0xc4   : > { %p16233_p7 = scmp.ne.s32.totalorder %s1329_s2, %s16232_s1  ;;  %p16240_p0 = scmp.lt.s32.totalorder %s16232_s1, %s16232_s1 }
  0xc6   : > { %p16234_p11 = pnand %p16233_p7, %p15174_p10  ;;  %p16241_p1 = por %p16240_p0, %p16239_p13 }
  0xc8   : > { %p16235_p12 = pneg %p16234_p11 }
  0xca   : > { %p16242_p2 = pnand %p16241_p1, %p16235_p12 }
  0xcc   : > { %16245 = shalt.err (!%p16242_p2)
}
  0xcd   : > { %s19144_s9 = sld [smem:[#allocation95_spill]]  ;;  %s16256_s26 = scalar_lea.vmem %s1357_s28, 16 }
  0xce   : > { %p16257_p4 = scmp.ne.s32.totalorder %s1357_s28, %s16256_s26  ;;  %s16262_s25 = scalar_lea.vmem %s1357_s28, 32 }
  0xcf   : > { %p16263_p8 = scmp.lt.s32.totalorder %s1357_s28, %s1357_s28  ;;  %p16264_p7 = scmp.lt.s32.totalorder %s16262_s25, %s16256_s26 }
  0xd0   : > { %p16258_p3 = pnand %p16257_p4, %p15174_p10 }
  0xd1   : > { %p16265_p11 = por %p16264_p7, %p16263_p8 }
  0xd2   : > { %p16259_p6 = pneg %p16258_p3 }
  0xd3   : > { %15047 = dma.hbm_to_vmem [thread:$0]  (%p15174_p10), %s19144_s9, 1024, %s1329_s2, [#allocation24], %s19094_s0, %s19094_s0, %s19096_s23  }
  0xd4   : > { %p16266_p12 = pnand %p16265_p11, %p16259_p6 }
  0xd6   : > { %16269 = shalt.err (!%p16266_p12)
}
  0xd7   : > { %15051 = dma.hbm_to_vmem [thread:$0]  (%p15174_p10), %s17331_s29, 16, %s1357_s28, [#allocation27]  }
  0xd8   : > { %s17162_s10 = smov [#allocation29]   ;;  %s17163_s2 = smov [#allocation32]  }
  0xd9   : > { %s1380_s16 = sshll.u32 %s17162_s10, 4  ;;  %s1404_s1 = sshll.u32 %s17163_s2, 4  ;;  %s1381_s16 = int_to_ptr.vmem [resolvable:$true] %s1380_s16  ;;  %s1405_s1 = int_to_ptr.vmem [resolvable:$true] %s1404_s1 }
  0xda   : > { %s16280_s0 = scalar_lea.vmem %s1381_s16, 48  ;;  %s16286_s23 = scalar_lea.vmem %s1381_s16, 64 }
  0xdb   : > { %p16281_p13 = scmp.ne.s32.totalorder %s1381_s16, %s16280_s0  ;;  %p16287_p2 = scmp.lt.s32.totalorder %s1381_s16, %s1381_s16 }
  0xdc   : > { %p16288_p4 = scmp.lt.s32.totalorder %s16286_s23, %s16280_s0 }
  0xdd   : > { %p16282_p0 = pnand %p16281_p13, %p15174_p10 }
  0xde   : > { %p16289_p3 = por %p16288_p4, %p16287_p2 }
  0xdf   : > { %p16283_p1 = pneg %p16282_p0 }
  0xe1   : > { %p16290_p6 = pnand %p16289_p3, %p16283_p1 }
  0xe3   : > { %16293 = shalt.err (!%p16290_p6)
}
  0xe4   : > { %15055 = dma.hbm_to_vmem [thread:$0]  (%p15174_p10), %s17341_s30, 48, %s1381_s16, [#allocation30]  }
  0xe5   : > { %s16304_s28 = scalar_lea.vmem %s1405_s1, 16  ;;  %s16310_s26 = scalar_lea.vmem %s1405_s1, 32 }
  0xe6   : > { %p16305_p8 = scmp.ne.s32.totalorder %s1405_s1, %s16304_s28  ;;  %p16311_p12 = scmp.lt.s32.totalorder %s1405_s1, %s1405_s1 }
  0xe7   : > { %p16312_p13 = scmp.lt.s32.totalorder %s16310_s26, %s16304_s28 }
  0xe8   : > { %p16306_p7 = pnand %p16305_p8, %p15174_p10 }
  0xe9   : > { %p16313_p0 = por %p16312_p13, %p16311_p12 }
  0xea   : > { %p16307_p11 = pneg %p16306_p7 }
  0xec   : > { %p16314_p5 = pnand %p16313_p0, %p16307_p11 }
  0xee   : > { %16317 = shalt.err (!%p16314_p5)
}
  0xef   : > { %15059 = dma.hbm_to_vmem [thread:$0]  (%p15174_p10), %s17351_s13, 16, %s1405_s1, [#allocation33]  }
  0xf0   : > { %s17164_s0 = smov [#allocation35]   ;;  %s17165_s25 = smov [#allocation38]  }
  0xf1   : > { %s1426_s23 = sshll.u32 %s17164_s0, 4  ;;  %s1450_s10 = sshll.u32 %s17165_s25, 4  ;;  %s1427_s23 = int_to_ptr.vmem [resolvable:$true] %s1426_s23  ;;  %s1451_s10 = int_to_ptr.vmem [resolvable:$true] %s1450_s10 }
  0xf2   : > { %s16328_s16 = scalar_lea.vmem %s1427_s23, 16  ;;  %s16334_s2 = scalar_lea.vmem %s1427_s23, 32 }
  0xf3   : > { %p16329_p1 = scmp.ne.s32.totalorder %s1427_s23, %s16328_s16  ;;  %p16335_p3 = scmp.lt.s32.totalorder %s1427_s23, %s1427_s23 }
  0xf4   : > { %p16336_p6 = scmp.lt.s32.totalorder %s16334_s2, %s16328_s16 }
  0xf5   : > { %p16330_p2 = pnand %p16329_p1, %p15174_p10 }
  0xf6   : > { %p16337_p8 = por %p16336_p6, %p16335_p3 }
  0xf7   : > { %p16331_p4 = pneg %p16330_p2 }
  0xf9   : > { %p16338_p5 = pnand %p16337_p8, %p16331_p4 }
  0xfb   : > { %16341 = shalt.err (!%p16338_p5)
}
  0xfc   : > { %s19145_s4 = sld [smem:[#allocation101_spill]]  ;;  %s16352_s1 = scalar_lea.vmem %s1451_s10, 16 }
  0xfd   : > { %p16353_p7 = scmp.ne.s32.totalorder %s1451_s10, %s16352_s1  ;;  %s16358_s28 = scalar_lea.vmem %s1451_s10, 32 }
  0xfe   : > { %p16359_p13 = scmp.lt.s32.totalorder %s1451_s10, %s1451_s10  ;;  %p16360_p0 = scmp.lt.s32.totalorder %s16358_s28, %s16352_s1 }
  0xff   : > { %p16354_p11 = pnand %p16353_p7, %p15174_p10 }
 0x100   : > { %p16361_p1 = por %p16360_p0, %p16359_p13 }
 0x101   : > { %p16355_p12 = pneg %p16354_p11 }
 0x102   : > { %15063 = dma.hbm_to_vmem [thread:$0]  (%p15174_p10), %s19145_s4, 16, %s1427_s23, [#allocation36]  }
 0x103   : > { %p16362_p2 = pnand %p16361_p1, %p16355_p12 }
 0x105   : > { %16365 = shalt.err (!%p16362_p2)
}
 0x106   : > { %15067 = dma.hbm_to_vmem [thread:$0]  (%p15174_p10), %s17371_s20, 16, %s1451_s10, [#allocation39]  }
 0x107   : > { %s17166_s26 = smov [#allocation41]   ;;  %s17167_s23 = smov [#allocation44]  }
 0x108   : > { %s1474_s0 = sshll.u32 %s17166_s26, 4  ;;  %s1498_s25 = sshll.u32 %s17167_s23, 4  ;;  %s1475_s0 = int_to_ptr.vmem [resolvable:$true] %s1474_s0  ;;  %s1499_s25 = int_to_ptr.vmem [resolvable:$true] %s1498_s25 }
 0x109   : > { %s16376_s16 = scalar_lea.vmem %s1475_s0, 32  ;;  %p16383_p8 = scmp.lt.s32.totalorder %s1475_s0, %s1475_s0 }
 0x10a   : > { %p16377_p4 = scmp.ne.s32.totalorder %s1475_s0, %s16376_s16  ;;  %p16384_p5 = scmp.lt.s32.totalorder %s16376_s16, %s16376_s16 }
 0x10c   : > { %p16378_p3 = pnand %p16377_p4, %p15174_p10  ;;  %p16385_p7 = por %p16384_p5, %p16383_p8 }
 0x10e   : > { %p16379_p6 = pneg %p16378_p3 }
 0x110   : > { %p16386_p11 = pnand %p16385_p7, %p16379_p6 }
 0x112   : > { %16389 = shalt.err (!%p16386_p11)
}
 0x113   : > { %s19146_s6 = sld [smem:[#allocation104_spill]]  ;;  %s16400_s10 = scalar_lea.vmem %s1499_s25, 16 }
 0x114   : > { %p16401_p12 = scmp.ne.s32.totalorder %s1499_s25, %s16400_s10  ;;  %s16406_s2 = scalar_lea.vmem %s1499_s25, 32 }
 0x115   : > { %p16407_p1 = scmp.lt.s32.totalorder %s1499_s25, %s1499_s25  ;;  %p16408_p2 = scmp.lt.s32.totalorder %s16406_s2, %s16400_s10 }
 0x116   : > { %p16402_p13 = pnand %p16401_p12, %p15174_p10 }
 0x117   : > { %p16409_p4 = por %p16408_p2, %p16407_p1 }
 0x118   : > { %p16403_p0 = pneg %p16402_p13 }
 0x119   : > { %15071 = dma.hbm_to_vmem [thread:$0]  (%p15174_p10), %s19146_s6, 32, %s1475_s0, [#allocation42]  }
 0x11a   : > { %p16410_p3 = pnand %p16409_p4, %p16403_p0 }
 0x11c   : > { %16413 = shalt.err (!%p16410_p3)
}
 0x11d   : > { %15075 = dma.hbm_to_vmem [thread:$0]  (%p15174_p10), %s17391_s19, 16, %s1499_s25, [#allocation45]  }
 0x11e   : > { %s17168_s1 = smov [#allocation47]   ;;  %s17169_s26 = smov [#allocation50]  }
 0x11f   : > { %s1520_s28 = sshll.u32 %s17168_s1, 4  ;;  %s1544_s0 = sshll.u32 %s17169_s26, 4  ;;  %s1521_s28 = int_to_ptr.vmem [resolvable:$true] %s1520_s28  ;;  %s1545_s0 = int_to_ptr.vmem [resolvable:$true] %s1544_s0 }
 0x120   : > { %s16424_s23 = scalar_lea.vmem %s1521_s28, 16  ;;  %s16430_s16 = scalar_lea.vmem %s1521_s28, 32 }
 0x121   : > { %p16425_p6 = scmp.ne.s32.totalorder %s1521_s28, %s16424_s23  ;;  %p16431_p7 = scmp.lt.s32.totalorder %s1521_s28, %s1521_s28 }
 0x122   : > { %p16432_p11 = scmp.lt.s32.totalorder %s16430_s16, %s16424_s23 }
 0x123   : > { %p16426_p8 = pnand %p16425_p6, %p15174_p10 }
 0x124   : > { %p16433_p12 = por %p16432_p11, %p16431_p7 }
 0x125   : > { %p16427_p5 = pneg %p16426_p8 }
 0x127   : > { %p16434_p13 = pnand %p16433_p12, %p16427_p5 }
 0x129   : > { %16437 = shalt.err (!%p16434_p13)
}
 0x12a   : > { %s19147_s10 = sld [smem:[#allocation107_spill]]  ;;  %s16448_s25 = scalar_lea.vmem %s1545_s0, 32 }
 0x12b   : > { %p16449_p0 = scmp.ne.s32.totalorder %s1545_s0, %s16448_s25  ;;  %p16455_p4 = scmp.lt.s32.totalorder %s1545_s0, %s1545_s0 }
 0x12c   : > { %p16456_p3 = scmp.lt.s32.totalorder %s16448_s25, %s16448_s25 }
 0x12d   : > { %p16450_p1 = pnand %p16449_p0, %p15174_p10 }
 0x12e   : > { %p16457_p6 = por %p16456_p3, %p16455_p4 }
 0x12f   : > { %p16451_p2 = pneg %p16450_p1 }
 0x130   : > { %15079 = dma.hbm_to_vmem [thread:$0]  (%p15174_p10), %s19147_s10, 16, %s1521_s28, [#allocation48]  }
 0x131   : > { %p16458_p8 = pnand %p16457_p6, %p16451_p2 }
 0x133   : > { %16461 = shalt.err (!%p16458_p8)
}
 0x134   : > { %s19148_s2 = sld [smem:[#allocation109_spill]]  ;;  %s17170_s1 = smov [#allocation53]  }
 0x135   : > { %s1568_s26 = sshll.u32 %s17170_s1, 4  ;;  %s17171_s28 = smov [#allocation56]   ;;  %s1569_s26 = int_to_ptr.vmem [resolvable:$true] %s1568_s26 }
 0x136   : > { %s1590_s23 = sshll.u32 %s17171_s28, 4  ;;  %s16472_s16 = scalar_lea.vmem %s1569_s26, 16  ;;  %s1591_s23 = int_to_ptr.vmem [resolvable:$true] %s1590_s23 }
 0x137   : > { %p16473_p5 = scmp.ne.s32.totalorder %s1569_s26, %s16472_s16  ;;  %s16478_s10 = scalar_lea.vmem %s1569_s26, 32 }
 0x138   : > { %p16479_p12 = scmp.lt.s32.totalorder %s1569_s26, %s1569_s26  ;;  %p16480_p13 = scmp.lt.s32.totalorder %s16478_s10, %s16472_s16 }
 0x139   : > { %p16474_p7 = pnand %p16473_p5, %p15174_p10 }
 0x13a   : > { %15083 = dma.hbm_to_vmem [thread:$0]  (%p15174_p10), %s19148_s2, 32, %s1545_s0, [#allocation51]  }
 0x13b   : > { %p16475_p11 = pneg %p16474_p7  ;;  %p16481_p0 = por %p16480_p13, %p16479_p12 }
 0x13d   : > { %p16482_p1 = pnand %p16481_p0, %p16475_p11 }
 0x13f   : > { %16485 = shalt.err (!%p16482_p1)
}
 0x140   : > { %s19149_s25 = sld [smem:[#allocation111_spill]]  ;;  %s16496_s0 = scalar_lea.vmem %s1591_s23, 16 }
 0x141   : > { %p16497_p2 = scmp.ne.s32.totalorder %s1591_s23, %s16496_s0  ;;  %s16502_s2 = scalar_lea.vmem %s1591_s23, 32 }
 0x142   : > { %p16503_p6 = scmp.lt.s32.totalorder %s1591_s23, %s1591_s23  ;;  %p16504_p8 = scmp.lt.s32.totalorder %s16502_s2, %s16496_s0 }
 0x143   : > { %p16498_p4 = pnand %p16497_p2, %p15174_p10 }
 0x144   : > { %p16505_p5 = por %p16504_p8, %p16503_p6 }
 0x145   : > { %p16499_p3 = pneg %p16498_p4 }
 0x146   : > { %15087 = dma.hbm_to_vmem [thread:$0]  (%p15174_p10), %s19149_s25, 16, %s1569_s26, [#allocation54]  }
 0x147   : > { %p16506_p7 = pnand %p16505_p5, %p16499_p3 }
 0x149   : > { %16509 = shalt.err (!%p16506_p7)
}
 0x14a   : > { %15091 = dma.hbm_to_vmem [thread:$0]  (%p15174_p10), %s17431_s21, 16, %s1591_s23, [#allocation57]  }
 0x14b   : > { %s17172_s1 = smov [#allocation2]   ;;  %s17173_s26 = smov [#allocation7]  }
 0x14c   : > { %s1154_s28 = sshll.u32 %s17172_s1, 4  ;;  %s1183_s16 = sshll.u32 %s17173_s26, 4  ;;  %s1155_s28 = int_to_ptr.vmem [resolvable:$true] %s1154_s28  ;;  %s1184_s16 = int_to_ptr.vmem [resolvable:$true] %s1183_s16 }
 0x14d   : > { %s16520_s10 = scalar_lea.vmem %s1155_s28, 64  ;;  %p16527_p0 = scmp.lt.s32.totalorder %s1155_s28, %s1155_s28 }
 0x14e   : > { %p16521_p11 = scmp.ne.s32.totalorder %s1155_s28, %s16520_s10  ;;  %p16528_p1 = scmp.lt.s32.totalorder %s16520_s10, %s16520_s10 }
 0x150   : > { %p16522_p12 = pnand %p16521_p11, %p15174_p10  ;;  %p16529_p2 = por %p16528_p1, %p16527_p0 }
 0x152   : > { %p16523_p13 = pneg %p16522_p12 }
 0x154   : > { %p16530_p4 = pnand %p16529_p2, %p16523_p13 }
 0x156   : > { %16533 = shalt.err (!%p16530_p4)
}
 0x157   : > { %s19150_s25 = smov 1   ;;  %s19151_s23 = smov 16  }
 0x158   : > { %s19152_s0 = sld [smem:[#allocation84_spill]]  ;;  %s16544_s2 = scalar_lea.vmem %s1184_s16, 192 }
 0x159   : > { %p16545_p3 = scmp.ne.s32.totalorder %s1184_s16, %s16544_s2  ;;  %p16551_p5 = scmp.lt.s32.totalorder %s1184_s16, %s1184_s16 }
 0x15a   : > { %p16552_p7 = scmp.lt.s32.totalorder %s16544_s2, %s16544_s2 }
 0x15b   : > { %p16546_p6 = pnand %p16545_p3, %p15174_p10 }
 0x15c   : > { %p16553_p11 = por %p16552_p7, %p16551_p5 }
 0x15d   : > { %p16547_p8 = pneg %p16546_p6 }
 0x15e   : > { %15021 = dma.hbm_to_vmem [thread:$0]  (%p15174_p10), %s19152_s0, 64, %s1155_s28, [#allocation3], %s19151_s23, %s19151_s23, %s19150_s25  }
 0x15f   : > { %p16554_p12 = pnand %p16553_p11, %p16547_p8 }
 0x161   : > { %16557 = shalt.err (!%p16554_p12)
}
 0x162   : > { %s17174_s1 = smov 48   ;;  %s19153_s26 = sld [smem:[#allocation87_spill]] }
 0x163   : > { %s17175_s10 = smov 3   ;;  %s17176_s4 = smov [#allocation10]  }
 0x164   : > { %s1212_s6 = sshll.u32 %s17176_s4, 4  ;;  %s17177_s28 = smov [#allocation13]   ;;  %s1213_s6 = int_to_ptr.vmem [resolvable:$true] %s1212_s6 }
 0x165   : > { %s1241_s0 = sshll.u32 %s17177_s28, 4  ;;  %s16568_s9 = scalar_lea.vmem %s1213_s6, 64  ;;  %s1242_s0 = int_to_ptr.vmem [resolvable:$true] %s1241_s0 }
 0x166   : > { %p16569_p13 = scmp.ne.s32.totalorder %s1213_s6, %s16568_s9  ;;  %p16575_p2 = scmp.lt.s32.totalorder %s1213_s6, %s1213_s6 }
 0x167   : > { %p16576_p4 = scmp.lt.s32.totalorder %s16568_s9, %s16568_s9 }
 0x168   : > { %15025 = dma.hbm_to_vmem [thread:$0]  (%p15174_p10), %s19153_s26, 192, %s1184_s16, [#allocation6], %s17174_s1, %s17174_s1, %s17175_s10  }
 0x169   : > { %p16570_p0 = pnand %p16569_p13, %p15174_p10  ;;  %p16577_p3 = por %p16576_p4, %p16575_p2 }
 0x16b   : > { %p16571_p1 = pneg %p16570_p0 }
 0x16d   : > { %p16578_p6 = pnand %p16577_p3, %p16571_p1 }
 0x16f   : > { %16581 = shalt.err (!%p16578_p6)
}
 0x170   : > { %s19154_s4 = sld [smem:[#allocation89_spill]]  ;;  %s16592_s16 = scalar_lea.vmem %s1242_s0, 128 }
 0x171   : > { %p16593_p8 = scmp.ne.s32.totalorder %s1242_s0, %s16592_s16  ;;  %p16599_p11 = scmp.lt.s32.totalorder %s1242_s0, %s1242_s0 }
 0x172   : > { %p16600_p12 = scmp.lt.s32.totalorder %s16592_s16, %s16592_s16 }
 0x173   : > { %p16594_p5 = pnand %p16593_p8, %p15174_p10 }
 0x174   : > { %p16601_p13 = por %p16600_p12, %p16599_p11 }
 0x175   : > { %p16595_p7 = pneg %p16594_p5 }
 0x176   : > { %15029 = dma.hbm_to_vmem [thread:$0]  (%p15174_p10), %s19154_s4, 64, %s1213_s6, [#allocation9], %s19151_s23, %s19151_s23, %s19150_s25  }
 0x177   : > { %p16602_p0 = pnand %p16601_p13, %p16595_p7 }
 0x179   : > { %16605 = shalt.err (!%p16602_p0)
}
 0x17a   : > { %s17178_s9 = smov 32   ;;  %s19155_s2 = sld [smem:[#allocation91_spill]] }
 0x17b   : > { %s17179_s1 = smov 2   ;;  %s17180_s26 = smov [#allocation16]  }
 0x17c   : > { %s1267_s10 = sshll.u32 %s17180_s26, 4  ;;  %s17181_s6 = smov [#allocation19]   ;;  %s1268_s10 = int_to_ptr.vmem [resolvable:$true] %s1267_s10 }
 0x17d   : > { %s1294_s28 = sshll.u32 %s17181_s6, 4  ;;  %s16616_s4 = scalar_lea.vmem %s1268_s10, 64  ;;  %s1295_s28 = int_to_ptr.vmem [resolvable:$true] %s1294_s28 }
 0x17e   : > { %p16617_p1 = scmp.ne.s32.totalorder %s1268_s10, %s16616_s4  ;;  %p16623_p3 = scmp.lt.s32.totalorder %s1268_s10, %s1268_s10 }
 0x17f   : > { %p16624_p6 = scmp.lt.s32.totalorder %s16616_s4, %s16616_s4 }
 0x180   : > { %15033 = dma.hbm_to_vmem [thread:$0]  (%p15174_p10), %s19155_s2, 128, %s1242_s0, [#allocation12], %s17178_s9, %s17178_s9, %s17179_s1  }
 0x181   : > { %p16618_p2 = pnand %p16617_p1, %p15174_p10  ;;  %p16625_p8 = por %p16624_p6, %p16623_p3 }
 0x183   : > { %p16619_p4 = pneg %p16618_p2 }
 0x185   : > { %p16626_p5 = pnand %p16625_p8, %p16619_p4 }
 0x187   : > { %16629 = shalt.err (!%p16626_p5)
}
 0x188   : > { %s19156_s0 = sld [smem:[#allocation92_spill]]  ;;  %s16640_s16 = scalar_lea.vmem %s1295_s28, 128 }
 0x189   : > { %p16641_p7 = scmp.ne.s32.totalorder %s1295_s28, %s16640_s16  ;;  %p16647_p13 = scmp.lt.s32.totalorder %s1295_s28, %s1295_s28 }
 0x18a   : > { %p16648_p0 = scmp.lt.s32.totalorder %s16640_s16, %s16640_s16 }
 0x18b   : > { %p16642_p11 = pnand %p16641_p7, %p15174_p10 }
 0x18c   : > { %p16649_p1 = por %p16648_p0, %p16647_p13 }
 0x18d   : > { %p16643_p12 = pneg %p16642_p11 }
 0x18e   : > { %15037 = dma.hbm_to_vmem [thread:$0]  (%p15174_p10), %s19156_s0, 64, %s1268_s10, [#allocation15], %s19151_s23, %s19151_s23, %s19150_s25  }
 0x18f   : > { %p16650_p2 = pnand %p16649_p1, %p16643_p12 }
 0x191   : > { %16653 = shalt.err (!%p16650_p2)
}
 0x192   : > { %s19157_s9 = sld [smem:[#allocation93_spill]]  ;;  %s17182_s2 = smov [#allocation22]  }
 0x193   : > { %s1318_s1 = sshll.u32 %s17182_s2, 4  ;;  %s17183_s26 = smov [#allocation25]   ;;  %s1319_s1 = int_to_ptr.vmem [resolvable:$true] %s1318_s1 }
 0x194   : > { %s1345_s6 = sshll.u32 %s17183_s26, 4  ;;  %s16664_s25 = scalar_lea.vmem %s1319_s1, 64  ;;  %s1346_s6 = int_to_ptr.vmem [resolvable:$true] %s1345_s6 }
 0x195   : > { %p16665_p4 = scmp.ne.s32.totalorder %s1319_s1, %s16664_s25  ;;  %p16671_p8 = scmp.lt.s32.totalorder %s1319_s1, %s1319_s1 }
 0x196   : > { %p16672_p5 = scmp.lt.s32.totalorder %s16664_s25, %s16664_s25 }
 0x197   : > { %p16666_p3 = pnand %p16665_p4, %p15174_p10 }
 0x198   : > { %15041 = dma.hbm_to_vmem [thread:$0]  (%p15174_p10), %s19157_s9, 128, %s1295_s28, [#allocation18]  }
 0x199   : > { %p16667_p6 = pneg %p16666_p3  ;;  %p16673_p7 = por %p16672_p5, %p16671_p8 }
 0x19b   : > { %p16674_p11 = pnand %p16673_p7, %p16667_p6 }
 0x19d   : > { %16677 = shalt.err (!%p16674_p11)
}
 0x19e   : > { %s19158_s23 = sld [smem:[#allocation94_spill]]  ;;  %s16688_s10 = scalar_lea.vmem %s1346_s6, 16 }
 0x19f   : > { %p16689_p12 = scmp.ne.s32.totalorder %s1346_s6, %s16688_s10  ;;  %s16694_s28 = scalar_lea.vmem %s1346_s6, 32 }
 0x1a0   : > { %p16695_p1 = scmp.lt.s32.totalorder %s1346_s6, %s1346_s6  ;;  %p16696_p2 = scmp.lt.s32.totalorder %s16694_s28, %s16688_s10 }
 0x1a1   : > { %p16690_p13 = pnand %p16689_p12, %p15174_p10 }
 0x1a2   : > { %p16697_p4 = por %p16696_p2, %p16695_p1 }
 0x1a3   : > { %p16691_p0 = pneg %p16690_p13 }
 0x1a4   : > { %15045 = dma.hbm_to_vmem [thread:$0]  (%p15174_p10), %s19158_s23, 64, %s1319_s1, [#allocation21]  }
 0x1a5   : > { %p16698_p3 = pnand %p16697_p4, %p16691_p0 }
 0x1a7   : > { %16701 = shalt.err (!%p16698_p3)
}
 0x1a8   : > { %s19159_s4 = sld [smem:[#allocation97_spill]]  ;;  %s17184_s0 = smov [#allocation28]  }
 0x1a9   : > { %s1366_s16 = sshll.u32 %s17184_s0, 4  ;;  %s1367_s16 = int_to_ptr.vmem [resolvable:$true] %s1366_s16 }
 0x1aa   : > { %s16712_s9 = scalar_lea.vmem %s1367_s16, 3072  ;;  %p16719_p7 = scmp.lt.s32.totalorder %s1367_s16, %s1367_s16 }
 0x1ab   : > { %p16713_p6 = scmp.ne.s32.totalorder %s1367_s16, %s16712_s9  ;;  %p16720_p11 = scmp.lt.s32.totalorder %s16712_s9, %s16712_s9 }
 0x1ad   : > { %p16714_p8 = pnand %p16713_p6, %p15174_p10  ;;  %p16721_p12 = por %p16720_p11, %p16719_p7 }
 0x1ae   : > { %15049 = dma.hbm_to_vmem [thread:$0]  (%p15174_p10), %s19159_s4, 16, %s1346_s6, [#allocation24]  }
 0x1af   : > { %p16715_p5 = pneg %p16714_p8 }
 0x1b1   : > { %p16722_p13 = pnand %p16721_p12, %p16715_p5 }
 0x1b3   : > { %16725 = shalt.err (!%p16722_p13)
}
 0x1b4   : > { %s17185_s2 = smov 192   ;;  %s19160_s1 = sld [smem:[#allocation98_spill]] }
 0x1b5   : > { %s17186_s26 = smov 12   ;;  %s17187_s6 = smov [#allocation31]  }
 0x1b6   : > { %s1390_s25 = sshll.u32 %s17187_s6, 4  ;;  %s17188_s23 = smov [#allocation34]   ;;  %s1391_s25 = int_to_ptr.vmem [resolvable:$true] %s1390_s25 }
 0x1b7   : > { %s1415_s10 = sshll.u32 %s17188_s23, 4  ;;  %s16736_s28 = scalar_lea.vmem %s1391_s25, 1024  ;;  %s1416_s10 = int_to_ptr.vmem [resolvable:$true] %s1415_s10 }
 0x1b8   : > { %p16737_p0 = scmp.ne.s32.totalorder %s1391_s25, %s16736_s28  ;;  %p16743_p4 = scmp.lt.s32.totalorder %s1391_s25, %s1391_s25 }
 0x1b9   : > { %p16744_p3 = scmp.lt.s32.totalorder %s16736_s28, %s16736_s28 }
 0x1ba   : > { %15053 = dma.hbm_to_vmem [thread:$0]  (%p15174_p10), %s19160_s1, 3072, %s1367_s16, [#allocation27], %s17185_s2, %s17185_s2, %s17186_s26  }
 0x1bb   : > { %p16738_p1 = pnand %p16737_p0, %p15174_p10  ;;  %p16745_p6 = por %p16744_p3, %p16743_p4 }
 0x1bd   : > { %p16739_p2 = pneg %p16738_p1 }
 0x1bf   : > { %p16746_p8 = pnand %p16745_p6, %p16739_p2 }
 0x1c1   : > { %16749 = shalt.err (!%p16746_p8)
}
 0x1c2   : > { %s19161_s4 = smov 4   ;;  %s19162_s0 = smov 64  }
 0x1c3   : > { %s19163_s16 = sld [smem:[#allocation99_spill]]  ;;  %s16760_s9 = scalar_lea.vmem %s1416_s10, 16 }
 0x1c4   : > { %p16761_p5 = scmp.ne.s32.totalorder %s1416_s10, %s16760_s9  ;;  %s16766_s2 = scalar_lea.vmem %s1416_s10, 32 }
 0x1c5   : > { %p16767_p12 = scmp.lt.s32.totalorder %s1416_s10, %s1416_s10  ;;  %p16768_p13 = scmp.lt.s32.totalorder %s16766_s2, %s16760_s9 }
 0x1c6   : > { %p16762_p7 = pnand %p16761_p5, %p15174_p10 }
 0x1c7   : > { %p16769_p0 = por %p16768_p13, %p16767_p12 }
 0x1c8   : > { %p16763_p11 = pneg %p16762_p7 }
 0x1c9   : > { %15057 = dma.hbm_to_vmem [thread:$0]  (%p15174_p10), %s19163_s16, 1024, %s1391_s25, [#allocation30], %s19162_s0, %s19162_s0, %s19161_s4  }
 0x1ca   : > { %p16770_p1 = pnand %p16769_p0, %p16763_p11 }
 0x1cc   : > { %16773 = shalt.err (!%p16770_p1)
}
 0x1cd   : > { %s19164_s1 = sld [smem:[#allocation100_spill]]  ;;  %s17189_s26 = smov [#allocation37]  }
 0x1ce   : > { %s1436_s6 = sshll.u32 %s17189_s26, 4  ;;  %s17190_s25 = smov [#allocation40]   ;;  %s1437_s6 = int_to_ptr.vmem [resolvable:$true] %s1436_s6 }
 0x1cf   : > { %s1460_s23 = sshll.u32 %s17190_s25, 4  ;;  %s16784_s28 = scalar_lea.vmem %s1437_s6, 1024  ;;  %s1461_s23 = int_to_ptr.vmem [resolvable:$true] %s1460_s23 }
 0x1d0   : > { %p16785_p2 = scmp.ne.s32.totalorder %s1437_s6, %s16784_s28  ;;  %p16791_p6 = scmp.lt.s32.totalorder %s1437_s6, %s1437_s6 }
 0x1d1   : > { %p16792_p8 = scmp.lt.s32.totalorder %s16784_s28, %s16784_s28 }
 0x1d2   : > { %p16786_p4 = pnand %p16785_p2, %p15174_p10 }
 0x1d3   : > { %15061 = dma.hbm_to_vmem [thread:$0]  (%p15174_p10), %s19164_s1, 16, %s1416_s10, [#allocation33]  }
 0x1d4   : > { %p16787_p3 = pneg %p16786_p4  ;;  %p16793_p5 = por %p16792_p8, %p16791_p6 }
 0x1d6   : > { %p16794_p7 = pnand %p16793_p5, %p16787_p3 }
 0x1d8   : > { %16797 = shalt.err (!%p16794_p7)
}
 0x1d9   : > { %s19165_s10 = sld [smem:[#allocation102_spill]]  ;;  %s16808_s16 = scalar_lea.vmem %s1461_s23, 2048 }
 0x1da   : > { %p16809_p11 = scmp.ne.s32.totalorder %s1461_s23, %s16808_s16  ;;  %p16815_p0 = scmp.lt.s32.totalorder %s1461_s23, %s1461_s23 }
 0x1db   : > { %p16816_p1 = scmp.lt.s32.totalorder %s16808_s16, %s16808_s16 }
 0x1dc   : > { %p16810_p12 = pnand %p16809_p11, %p15174_p10 }
 0x1dd   : > { %p16817_p2 = por %p16816_p1, %p16815_p0 }
 0x1de   : > { %p16811_p13 = pneg %p16810_p12 }
 0x1df   : > { %15065 = dma.hbm_to_vmem [thread:$0]  (%p15174_p10), %s19165_s10, 1024, %s1437_s6, [#allocation36], %s19162_s0, %s19162_s0, %s19161_s4  }
 0x1e0   : > { %p16818_p4 = pnand %p16817_p2, %p16811_p13 }
 0x1e2   : > { %16821 = shalt.err (!%p16818_p4)
}
 0x1e3   : > { %s19099_s9 = smov 128   ;;  %s19166_s2 = sld [smem:[#allocation103_spill]] }
 0x1e4   : > { %s19101_s1 = smov 8   ;;  %s17193_s26 = smov [#allocation43]  }
 0x1e5   : > { %s1484_s6 = sshll.u32 %s17193_s26, 4  ;;  %s17194_s25 = smov [#allocation46]   ;;  %s1485_s6 = int_to_ptr.vmem [resolvable:$true] %s1484_s6 }
 0x1e6   : > { %s1509_s28 = sshll.u32 %s17194_s25, 4  ;;  %s16832_s10 = scalar_lea.vmem %s1485_s6, 1024  ;;  %s1510_s28 = int_to_ptr.vmem [resolvable:$true] %s1509_s28 }
 0x1e7   : > { %p16833_p3 = scmp.ne.s32.totalorder %s1485_s6, %s16832_s10  ;;  %p16839_p5 = scmp.lt.s32.totalorder %s1485_s6, %s1485_s6 }
 0x1e8   : > { %p16840_p7 = scmp.lt.s32.totalorder %s16832_s10, %s16832_s10 }
 0x1e9   : > { %15069 = dma.hbm_to_vmem [thread:$0]  (%p15174_p10), %s19166_s2, 2048, %s1461_s23, [#allocation39], %s19099_s9, %s19099_s9, %s19101_s1  }
 0x1ea   : > { %p16834_p6 = pnand %p16833_p3, %p15174_p10  ;;  %p16841_p11 = por %p16840_p7, %p16839_p5 }
 0x1ec   : > { %p16835_p8 = pneg %p16834_p6 }
 0x1ee   : > { %p16842_p12 = pnand %p16841_p11, %p16835_p8 }
 0x1f0   : > { %16845 = shalt.err (!%p16842_p12)
}
 0x1f1   : > { %s19167_s23 = sld [smem:[#allocation105_spill]]  ;;  %s16856_s16 = scalar_lea.vmem %s1510_s28, 16 }
 0x1f2   : > { %p16857_p13 = scmp.ne.s32.totalorder %s1510_s28, %s16856_s16  ;;  %s16862_s2 = scalar_lea.vmem %s1510_s28, 32 }
 0x1f3   : > { %p16863_p2 = scmp.lt.s32.totalorder %s1510_s28, %s1510_s28  ;;  %p16864_p4 = scmp.lt.s32.totalorder %s16862_s2, %s16856_s16 }
 0x1f4   : > { %p16858_p0 = pnand %p16857_p13, %p15174_p10 }
 0x1f5   : > { %p16865_p3 = por %p16864_p4, %p16863_p2 }
 0x1f6   : > { %p16859_p1 = pneg %p16858_p0 }
 0x1f7   : > { %15073 = dma.hbm_to_vmem [thread:$0]  (%p15174_p10), %s19167_s23, 1024, %s1485_s6, [#allocation42], %s19162_s0, %s19162_s0, %s19161_s4  }
 0x1f8   : > { %p16866_p6 = pnand %p16865_p3, %p16859_p1 }
 0x1fa   : > { %16869 = shalt.err (!%p16866_p6)
}
 0x1fb   : > { %s19168_s26 = sld [smem:[#allocation106_spill]]  ;;  %s17195_s25 = smov [#allocation49]  }
 0x1fc   : > { %s1530_s10 = sshll.u32 %s17195_s25, 4  ;;  %s17196_s6 = smov [#allocation52]   ;;  %s1531_s10 = int_to_ptr.vmem [resolvable:$true] %s1530_s10 }
 0x1fd   : > { %s1554_s23 = sshll.u32 %s17196_s6, 4  ;;  %s16880_s9 = scalar_lea.vmem %s1531_s10, 2048  ;;  %s1555_s23 = int_to_ptr.vmem [resolvable:$true] %s1554_s23 }
 0x1fe   : > { %p16881_p8 = scmp.ne.s32.totalorder %s1531_s10, %s16880_s9  ;;  %p16887_p11 = scmp.lt.s32.totalorder %s1531_s10, %s1531_s10 }
 0x1ff   : > { %p16888_p12 = scmp.lt.s32.totalorder %s16880_s9, %s16880_s9 }
 0x200   : > { %p16882_p5 = pnand %p16881_p8, %p15174_p10 }
 0x201   : > { %15077 = dma.hbm_to_vmem [thread:$0]  (%p15174_p10), %s19168_s26, 16, %s1510_s28, [#allocation45]  }
 0x202   : > { %p16883_p7 = pneg %p16882_p5  ;;  %p16889_p13 = por %p16888_p12, %p16887_p11 }
 0x204   : > { %p16890_p0 = pnand %p16889_p13, %p16883_p7 }
 0x206   : > { %16893 = shalt.err (!%p16890_p0)
}
 0x207   : > { %s19169_s16 = smov 128   ;;  %s19170_s28 = sld [smem:[#allocation108_spill]] }
 0x208   : > { %s16904_s2 = scalar_lea.vmem %s1555_s23, 2048  ;;  %p16911_p3 = scmp.lt.s32.totalorder %s1555_s23, %s1555_s23 }
 0x209   : > { %p16905_p1 = scmp.ne.s32.totalorder %s1555_s23, %s16904_s2  ;;  %p16912_p6 = scmp.lt.s32.totalorder %s16904_s2, %s16904_s2 }
 0x20b   : > { %p16906_p2 = pnand %p16905_p1, %p15174_p10  ;;  %p16913_p8 = por %p16912_p6, %p16911_p3 }
 0x20d   : > { %15081 = dma.hbm_to_vmem [thread:$0]  (%p15174_p10), %s19170_s28, 2048, %s1531_s10, [#allocation48], %s19169_s16, %s19169_s16, %s19101_s1  }
 0x20e   : > { %p16907_p4 = pneg %p16906_p2 }
 0x210   : > { %p16914_p5 = pnand %p16913_p8, %p16907_p4 }
 0x212   : > { %16917 = shalt.err (!%p16914_p5)
}
 0x213   : > { %s19171_s9 = sld [smem:[#allocation110_spill]]  ;;  %s17197_s26 = smov [#allocation55]  }
 0x214   : > { %s1579_s25 = sshll.u32 %s17197_s26, 4  ;;  %s17198_s10 = smov [#allocation58]   ;;  %s1580_s25 = int_to_ptr.vmem [resolvable:$true] %s1579_s25 }
 0x215   : > { %s1600_s6 = sshll.u32 %s17198_s10, 4  ;;  %s16928_s28 = scalar_lea.vmem %s1580_s25, 16  ;;  %s1601_s6 = int_to_ptr.vmem [resolvable:$true] %s1600_s6 }
 0x216   : > { %p16929_p7 = scmp.ne.s32.totalorder %s1580_s25, %s16928_s28  ;;  %s16934_s2 = scalar_lea.vmem %s1580_s25, 32 }
 0x217   : > { %p16935_p13 = scmp.lt.s32.totalorder %s1580_s25, %s1580_s25  ;;  %p16936_p0 = scmp.lt.s32.totalorder %s16934_s2, %s16928_s28 }
 0x218   : > { %p16930_p11 = pnand %p16929_p7, %p15174_p10 }
 0x219   : > { %15085 = dma.hbm_to_vmem [thread:$0]  (%p15174_p10), %s19171_s9, 2048, %s1555_s23, [#allocation51], %s19162_s0, %s19162_s0, %s19161_s4  }
 0x21a   : > { %p16931_p12 = pneg %p16930_p11  ;;  %p16937_p1 = por %p16936_p0, %p16935_p13 }
 0x21c   : > { %p16938_p2 = pnand %p16937_p1, %p16931_p12 }
 0x21e   : > { %16941 = shalt.err (!%p16938_p2)
}
 0x21f   : > { %s19172_s1 = sld [smem:[#allocation112_spill]]  ;;  %s16952_s4 = scalar_lea.vmem %s1601_s6, 2048 }
 0x220   : > { %p16953_p4 = scmp.ne.s32.totalorder %s1601_s6, %s16952_s4  ;;  %p16959_p8 = scmp.lt.s32.totalorder %s1601_s6, %s1601_s6 }
 0x221   : > { %p16960_p5 = scmp.lt.s32.totalorder %s16952_s4, %s16952_s4 }
 0x222   : > { %p16954_p3 = pnand %p16953_p4, %p15174_p10 }
 0x223   : > { %p16961_p7 = por %p16960_p5, %p16959_p8 }
 0x224   : > { %p16955_p6 = pneg %p16954_p3 }
 0x225   : > { %15089 = dma.hbm_to_vmem [thread:$0]  (%p15174_p10), %s19172_s1, 16, %s1580_s25, [#allocation54]  }
 0x226   : > { %p16962_p11 = pnand %p16961_p7, %p16955_p6 }
 0x228   : > { %16965 = shalt.err (!%p16962_p11)
}
 0x229   : > { %s19173_s0 = smov 8  }
 0x22a   : > { %15093 = dma.hbm_to_vmem [thread:$0]  (%p15174_p10), %s17436_s5, 2048, %s1601_s6, [#allocation57], %s19169_s16, %s19169_s16, %s19173_s0  }
 0x22b PF: > { %1648 = sbr.rel (%p17496_p9) target bundleno = 15796 (0x3db4), region = 204  ;;  %p15211_p12 = scmp.eq.s32.totalorder (!%p17496_p9), %s17469_s22, 0 }
 0x230   : > { %17009 = dma.done.wait (%p15211_p12), [#allocation3], 64  }
 0x231   : > { %17011 = vsyncadd (%p15211_p12), [#allocation3], 4294967232 }
 0x232   : > { %17013 = dma.done.wait (%p15211_p12), [#allocation6], 256  }
 0x233   : > { %17015 = vsyncadd (%p15211_p12), [#allocation6], 4294967040 }
 0x234   : > { %17017 = dma.done.wait (%p15211_p12), [#allocation9], 128  }
 0x235   : > { %17019 = vsyncadd (%p15211_p12), [#allocation9], 4294967168 }
 0x236   : > { %17021 = dma.done.wait (%p15211_p12), [#allocation12], 192  }
 0x237   : > { %17023 = vsyncadd (%p15211_p12), [#allocation12], 4294967104 }
 0x238   : > { %17025 = dma.done.wait (%p15211_p12), [#allocation15], 8256  }
 0x239   : > { %17027 = vsyncadd (%p15211_p12), [#allocation15], 4294959040 }
 0x23a   : > { %17029 = dma.done.wait (%p15211_p12), [#allocation18], 640  }
 0x23b   : > { %17031 = vsyncadd (%p15211_p12), [#allocation18], 4294966656 }
 0x23c   : > { %17033 = dma.done.wait (%p15211_p12), [#allocation21], 1600  }
 0x23d   : > { %17035 = vsyncadd (%p15211_p12), [#allocation21], 4294965696 }
 0x23e   : > { %17037 = dma.done.wait (%p15211_p12), [#allocation24], 1040  }
 0x23f   : > { %17039 = vsyncadd (%p15211_p12), [#allocation24], 4294966256 }
 0x240   : > { %17041 = dma.done.wait (%p15211_p12), [#allocation27], 3088  }
 0x241   : > { %17043 = vsyncadd (%p15211_p12), [#allocation27], 4294964208 }
 0x242   : > { %17045 = dma.done.wait (%p15211_p12), [#allocation30], 1072  }
 0x243   : > { %17047 = vsyncadd (%p15211_p12), [#allocation30], 4294966224 }
 0x244   : > { %17049 = dma.done.wait (%p15211_p12), [#allocation33], 32  }
 0x245   : > { %17051 = vsyncadd (%p15211_p12), [#allocation33], 4294967264 }
 0x246   : > { %17053 = dma.done.wait (%p15211_p12), [#allocation36], 1040  }
 0x247   : > { %17055 = vsyncadd (%p15211_p12), [#allocation36], 4294966256 }
 0x248   : > { %17057 = dma.done.wait (%p15211_p12), [#allocation39], 2064  }
 0x249   : > { %17059 = vsyncadd (%p15211_p12), [#allocation39], 4294965232 }
 0x24a   : > { %17061 = dma.done.wait (%p15211_p12), [#allocation42], 1056  }
 0x24b   : > { %17063 = vsyncadd (%p15211_p12), [#allocation42], 4294966240 }
 0x24c   : > { %17065 = dma.done.wait (%p15211_p12), [#allocation45], 32  }
 0x24d   : > { %17067 = vsyncadd (%p15211_p12), [#allocation45], 4294967264 }
 0x24e   : > { %17069 = dma.done.wait (%p15211_p12), [#allocation48], 2064  }
 0x24f   : > { %17071 = vsyncadd (%p15211_p12), [#allocation48], 4294965232 }
 0x250   : > { %17073 = dma.done.wait (%p15211_p12), [#allocation51], 2080  }
 0x251   : > { %17075 = vsyncadd (%p15211_p12), [#allocation51], 4294965216 }
 0x252   : > { %17077 = dma.done.wait (%p15211_p12), [#allocation54], 32  }
 0x253   : > { %17079 = vsyncadd (%p15211_p12), [#allocation54], 4294967264 }
 0x254   : > { %17081 = dma.done.wait (%p15211_p12), [#allocation57], 2064  }
 0x255   : > { %17083 = vsyncadd (%p15211_p12), [#allocation57], 4294965232  ;;  %s19174_s11 = sld [smem:[#allocation80_spill]]  ;;  %p1914_p9 = scmp.lt.s32.totalorder %s17469_s22, 1  ;;  %v17199_v3 = vmov 0.0   ;;  %v17200_v25 = vmov 0   ;;  %v2013_v41 = vlaneseq }
 0x256   : > { %s19175_s1 = sld [smem:[#allocation86_spill]]  ;;  %14376 = vmatprep.subr.bf16.mxu1 %v17199_v3  ;;  %2188 = vmatprep.mubr.bf16.mxu0 %v17200_v25  ;;  %vm17201_vm0 = vmmov 0   ;;  %v13263_v35 = vld [vmem:[#allocation2] ss:$0 sm:$0xff]  ;;  %v13264_v37 = vld [vmem:[#allocation5] ss:$0 sm:$0xff] }
 0x257   : > { %s1915_s23 = scalar_select %p1914_p9, %s17469_s22, 1  ;;  %14392 = vmatprep.mubr.msk.bf16.mxu1 %vm17201_vm0, %v17199_v3  ;;  %v17869_v42 = vshrl.u32 %v2013_v41, 7  ;;  %v17874_v44 = vld [vmem:[#allocation7] sm:$0x7]  ;;  %vm2331_vm1 = vcmask 261120   ;;  %vm2508_vm2 = vcmask 64512  }
 0x258   : > { %s17202_s26 = smov 32   ;;  %s17203_s25 = smov 96   ;;  %vm3130_vm3 = vcmask 523264   ;;  %vm3132_vm4 = vcmask 785408   ;;  %vm5508_vm5 = vcmask 1043456   ;;  %vm6086_vm6 = vcmask 27648  }
 0x259   : > { %s17820_s16 = sshll.u32 %s1915_s23, 3  ;;  %v17872_v43 = vsub.s32 1, %v17869_v42  ;;  %v17881_v48 = vsub.s32 0, %v17869_v42  ;;  %s17204_s10 = smov 64   ;;  %vm6199_vm7 = vcmask 31744   ;;  %vm7956_vm8 = vcmask 158720  }
 0x25a   : > { %s19176_s6 = sld [smem:[#allocation88_spill]]  ;;  %vm7949_vm9 = vcmask 162816   ;;  %p19182_p13 = scmp.ne.s32.totalorder %s19139_s7, 0 }
 0x25b   : > { %s17824_s9 = scalar_lea.vmem %s19174_s11, %s17820_s16  ;;  %v2020_v45 = vrot.slane %v17874_v44, %v17872_v43  ;;  %v2016_v54 = vrot.slane %v17874_v44, %v17881_v48  ;;  %s19177_s28 = sld [smem:[#allocation90_spill]] }
 0x25c   : > { %v1932_v0 = vld [vmem:[%s17824_s9] sm:$0xff]  ;;  %v15399_v1 = vld [vmem:[%s19175_s1 + $0xac] ss:$12 sps:$4 sm:$0xff]   ;;  %v15401_v2 = vld [vmem:[%s19175_s1 + $0xa8] ss:$12 sps:$4 sm:$0xff]   ;;  %s19178_s2 = sld [smem:[#allocation81_spill]] }
 0x25d   : > { %1935 = vadd.xlane.f32.xlu0 %v1932_v0  ;;  %v15402_v4 = vld [vmem:[%s19175_s1 + $0xb0] ss:$12 sps:$4 sm:$0xff]   ;;  %v15403_v5 = vld [vmem:[%s19175_s1 + $0x94] ss:$12 sps:$4 sm:$0xff]   ;;  %2156 = vmatprep.subr.bf16.mxu0 %v15399_v1  ;;  %v15406_v7 = vld [vmem:[%s19175_s1 + $0x98] ss:$12 sps:$4 sm:$0xff]  }
 0x25e   : > { %v15405_v6 = vld [vmem:[%s19175_s1 + $0x90] ss:$12 sps:$4 sm:$0xff]   ;;  %2157 = vmatpush1.bf16.msra.mxu0 %v15401_v2  ;;  %14377 = vmatpush3.bf16.msra.mxu1 %v15402_v4  ;;  %v15409_v13 = vld [vmem:[%s19175_s1 + $0x78] ss:$12 sps:$4 sm:$0xff]   ;;  %v15410_v14 = vld [vmem:[%s19175_s1 + $0x80] ss:$12 sps:$4 sm:$0xff]  }
 0x25f   : > { %2158 = vmatprep.subr.bf16.mxu0 %v15403_v5  ;;  %14378 = vmatprep.subr.bf16.mxu1 %v17199_v3  ;;  %v15407_v12 = vld [vmem:[%s19175_s1 + $0x7c] ss:$12 sps:$4 sm:$0xff]   ;;  %v15411_v15 = vld [vmem:[%s19175_s1 + $0x64] ss:$12 sps:$4 sm:$0xff]   ;;  %v15413_v16 = vld [vmem:[%s19175_s1 + $0x60] ss:$12 sps:$4 sm:$0xff]  }
 0x260   : > { %v15414_v17 = vld [vmem:[%s19175_s1 + $0x68] ss:$12 sps:$4 sm:$0xff]   ;;  %v15415_v18 = vld [vmem:[%s19175_s1 + $0x4c] ss:$12 sps:$4 sm:$0xff]   ;;  %v15418_v20 = vld [vmem:[%s19175_s1 + $0x50] ss:$12 sps:$4 sm:$0xff]  }
 0x261   : > { %v15417_v19 = vld [vmem:[%s19175_s1 + $0x48] ss:$12 sps:$4 sm:$0xff]   ;;  %v15421_v22 = vld [vmem:[%s19175_s1 + $0x30] ss:$12 sps:$4 sm:$0xff]   ;;  %v15422_v23 = vld [vmem:[%s19175_s1 + $0x38] ss:$12 sps:$4 sm:$0xff]  }
 0x262   : > { %2159 = vmatpush1.bf16.msra.mxu0 %v15405_v6  ;;  %14379 = vmatpush3.bf16.msra.mxu1 %v15406_v7  ;;  %v15419_v21 = vld [vmem:[%s19175_s1 + $0x34] ss:$12 sps:$4 sm:$0xff]   ;;  %v15423_v24 = vld [vmem:[%s19175_s1 + $0x1c] ss:$12 sps:$4 sm:$0xff]   ;;  %v15425_v26 = vld [vmem:[%s19175_s1 + $0x18] ss:$12 sps:$4 sm:$0xff]   ;;  %s1921_s4 = scalar_lea.vmem %s19178_s2, %s17820_s16 }
 0x263   : > { %14380 = vmatprep.subr.bf16.mxu1 %v17199_v3  ;;  %2160 = vmatprep.subr.bf16.mxu0 %v15407_v12  ;;  %v15426_v27 = vld [vmem:[%s19175_s1 + $0x20] ss:$12 sps:$4 sm:$0xff]   ;;  %v15427_v28 = vld [vmem:[%s19175_s1 + $0x4] ss:$12 sps:$4 sm:$0xff]   ;;  %v15430_v30 = vld [vmem:[%s19175_s1 + $0x8] ss:$12 sps:$4 sm:$0xff]  }
 0x264   : > { %v15429_v29 = vld [vmem:[%s19175_s1] ss:$12 sps:$4 sm:$0xff]   ;;  %s19179_s0 = sld [smem:[#allocation82_spill]] }
 0x265   : > { %s19180_s23 = sld [smem:[#allocation96_spill]] }
 0x266   : > { %2161 = vmatpush1.bf16.msra.mxu0 %v15409_v13  ;;  %14381 = vmatpush3.bf16.msra.mxu1 %v15410_v14 }
 0x267   : > { %14382 = vmatprep.subr.bf16.mxu1 %v17199_v3  ;;  %2162 = vmatprep.subr.bf16.mxu0 %v15411_v15 }
 0x26a   : > { %2163 = vmatpush1.bf16.msra.mxu0 %v15413_v16  ;;  %14383 = vmatpush3.bf16.msra.mxu1 %v15414_v17  ;;  %s1926_s11 = scalar_lea.vmem %s19179_s0, %s17820_s16 }
 0x26b   : > { %2164 = vmatprep.subr.bf16.mxu0 %v15415_v18  ;;  %14384 = vmatprep.subr.bf16.mxu1 %v17199_v3 }
 0x26e   : > { %2165 = vmatpush1.bf16.msra.mxu0 %v15417_v19  ;;  %14385 = vmatpush3.bf16.msra.mxu1 %v15418_v20 }
 0x26f   : > { %2166 = vmatprep.subr.bf16.mxu0 %v15419_v21  ;;  %14386 = vmatprep.subr.bf16.mxu1 %v17199_v3 }
 0x272   : > { %2167 = vmatpush1.bf16.msra.mxu0 %v15421_v22  ;;  %14387 = vmatpush3.bf16.msra.mxu1 %v15422_v23 }
 0x273   : > { %2168 = vmatprep.subr.bf16.mxu0 %v15423_v24  ;;  %14388 = vmatprep.subr.bf16.mxu1 %v17199_v3 }
 0x276   : > { %2169 = vmatpush1.bf16.msra.mxu0 %v15425_v26  ;;  %14389 = vmatpush3.bf16.msra.mxu1 %v15426_v27 }
 0x277   : > { %2170 = vmatprep.subr.bf16.mxu0 %v15427_v28  ;;  %14390 = vmatprep.subr.bf16.mxu1 %v17199_v3 }
 0x27a   : > { %2171 = vmatpush1.bf16.msra.mxu0 %v15429_v29  ;;  %14391 = vmatpush3.bf16.msra.mxu1 %v15430_v30 }
 0x27b   : > { %14396 = vmatprep.subr.bf16.mxu0 %v17199_v3  ;;  %14404 = vmatprep.subr.bf16.mxu1 %v17199_v3 }
 0x2e6   : > { %v1936_v8 = vpop.xlane.xlu0 %1935 }
 0x2e7   : > { %v1938_v9 = vmul.f32 0.0078125, %v1936_v8 }
 0x2e9   : > { %v1939_v10 = vsub.f32 %v1932_v0, %v1938_v9 }
 0x2eb   : > { %v1940_v11 = vmul.f32 %v1939_v10, %v1939_v10 }
 0x2ed   : > { %1941 = vadd.xlane.f32.xlu0 %v1940_v11 }
 0x376   : > { %v1942_v31 = vpop.xlane.xlu0 %1941 }
 0x377   : > { %v1943_v32 = vmul.f32 0.0078125, %v1942_v31 }
 0x379   : > { %v1944_v33 = vadd.f32 1e-05, %v1943_v32 }
 0x37b   : > { %15888 = vrsqrt.f32 %v1944_v33 }
 0x388   : > { %v15889_v34 = vpop.eup %15888 }
 0x389   : > { %v1946_v36 = vmul.f32 %v15889_v34, %v1939_v10  ;;  %v17910_v34 = vsub.s32 2, %v17869_v42 }
 0x38b   : > { %v1953_v38 = vmul.f32 %v13263_v35, %v1946_v36 }
 0x38d   : > { %v1960_v39 = vadd.f32 %v13264_v37, %v1953_v38  ;;  %v2024_v37 = vrot.slane %v17874_v44, %v17910_v34 }
 0x38f   : > { %v2011_v40 = vpack.c.bf16 %v1960_v39, %v1960_v39 }
 0x391   : > { %2189 = vmatmul.mubr.bf16.vlgmr.msra.gmra.mxu0 %v2011_v40  ;;  %14393 = vmatmul.mubr.bf16.vlgmr.msra.gmra.mxu1 %v2011_v40 }
 0x392   : > { %14400 = vmatprep.mubr.msk.bf16.mxu0 %vm17201_vm0, %v17199_v3  ;;  %14408 = vmatprep.mubr.msk.bf16.mxu1 %vm17201_vm0, %v17199_v3 }
 0x451   : > { %v2190_v46 = vpop.f32.mrf.mxu0  ;;  %v17878_v47 = vpop.f32.mrf.mxu1 }
 0x452   : > { %v2191_v58 = vadd.f32 %v2190_v46, %v2016_v54  ;;  %v2232_v38 = vadd.f32 %v17878_v47, %v2024_v37 }
 0x453   : > { %v2192_v49 = vpop.f32.mrf.mxu0  ;;  %v14394_v50 = vpop.f32.mrf.mxu1 }
 0x454   : > { %v2193_v51 = vadd.f32 %v2192_v49, %v2020_v45  ;;  %v2237_v59 = vpack.c.bf16 %v2191_v58, %v2191_v58  ;;  %v2239_v39 = vpack.c.bf16 %v2232_v38, %v2232_v38 }
 0x455   : > { %v2194_v52 = vpop.f32.mrf.mxu0  ;;  %v2234_v53 = vpop.f32.mrf.mxu1 }
 0x456   : > { %v2238_v55 = vpack.c.bf16 %v2193_v51, %v2193_v51 }
 0x457   : > { %v2195_v56 = vpop.f32.mrf.mxu0  ;;  %v14395_v57 = vpop.f32.mrf.mxu1 }
 0x458   : > { %2254 = vrot.lane.b32.xlu0 %v2238_v55, %s17202_s26  ;;  %2248 = vrot.lane.b32.xlu1 %v2238_v55, %s17203_s25 }
 0x45c   : > { %2251 = vrot.lane.b32.xlu1 %v2238_v55, %s17204_s10 }
 0x460   : > { %2241 = vrot.lane.b32.xlu1 %v2237_v59, %s17203_s25 }
 0x464   : > { %2243 = vrot.lane.b32.xlu1 %v2237_v59, %s17204_s10 }
 0x468   : > { %2245 = vrot.lane.b32.xlu1 %v2237_v59, %s17202_s26 }
 0x48b   : > { %2267 = vxpose.xlu1.c.b16.start.end [1/1] (short) (narrow) %v2238_v55, 32 }
 0x4ca   : > { %v2249_v60 = vpop.permute.xlu1 %2248  ;;  %v2255_v62 = vpop.permute.xlu0 %2254 }
 0x4cb   : > { %2283 = vxpose.xlu0.c.b16.start.end [1/1] (short) (narrow) %v2249_v60, 32 }
 0x4ce   : > { %v2252_v61 = vpop.permute.xlu1 %2251 }
 0x4cf   : > { %2299 = vxpose.xlu1.c.b16.start.end [1/1] (short) (narrow) %v2252_v61, 32 }
 0x4d0   : > { %2315 = vxpose.xlu0.c.b16.start.end [1/1] (short) (narrow) %v2255_v62, 32 }
 0x4d2   : > { %v2242_v63 = vpop.permute.xlu1 %2241 }
 0x4d6   : > { %v2244_v0 = vpop.permute.xlu1 %2243 }
 0x4da   : > { %v2246_v1 = vpop.permute.xlu1 %2245 }
 0x4ed   : > { %v2275_v2 = vpop.trf.xlu1 }
 0x4f1   : > { %v2276_v4 = vpop.trf.xlu1 }
 0x4f2   : > { %14397 = vmatpush3.bf16.msra.mxu0 %v2276_v4 }
 0x4f3   : > { %14398 = vmatprep.subr.bf16.mxu0 %v17199_v3 }
 0x4f6   : > { %14399 = vmatpush3.bf16.msra.mxu0 %v2275_v2 }
 0x4f7   : > { %14412 = vmatprep.subr.bf16.mxu0 %v17199_v3 }
 0x4f9   : > { %14401 = vmatmul.mubr.msk.bf16.vlgmr.msra.gmra.mxu0 %vm2331_vm1, %v2237_v59 }
 0x4fa   : > { %14416 = vmatprep.mubr.msk.bf16.mxu0 %vm17201_vm0, %v17199_v3 }
 0x52d   : > { %v2291_v5 = vpop.trf.xlu0 }
 0x531   : > { %v2292_v6 = vpop.trf.xlu0  ;;  %v2307_v7 = vpop.trf.xlu1 }
 0x532   : > { %14405 = vmatpush3.bf16.msra.mxu1 %v2292_v6 }
 0x533   : > { %14406 = vmatprep.subr.bf16.mxu1 %v17199_v3 }
 0x535   : > { %v2323_v8 = vpop.trf.xlu0  ;;  %v2308_v9 = vpop.trf.xlu1 }
 0x536   : > { %14407 = vmatpush3.bf16.msra.mxu1 %v2291_v5  ;;  %14413 = vmatpush3.bf16.msra.mxu0 %v2308_v9 }
 0x537   : > { %14420 = vmatprep.subr.bf16.mxu1 %v17199_v3  ;;  %14414 = vmatprep.subr.bf16.mxu0 %v17199_v3 }
 0x539   : > { %v2324_v10 = vpop.trf.xlu0  ;;  %14409 = vmatmul.mubr.msk.bf16.vlgmr.msra.gmra.mxu1 %vm2331_vm1, %v2242_v63 }
 0x53a   : > { %14415 = vmatpush3.bf16.msra.mxu0 %v2307_v7  ;;  %14421 = vmatpush3.bf16.msra.mxu1 %v2324_v10 }
 0x53b   : > { %14422 = vmatprep.subr.bf16.mxu1 %v17199_v3  ;;  %14424 = vmatprep.mubr.msk.bf16.mxu1 %vm17201_vm0, %v17199_v3 }
 0x53d   : > { %14417 = vmatmul.mubr.msk.bf16.vlgmr.msra.gmra.mxu0 %vm2331_vm1, %v2244_v0 }
 0x53e   : > { %14423 = vmatpush3.bf16.msra.mxu1 %v2323_v8 }
 0x541   : > { %14425 = vmatmul.mubr.msk.bf16.vlgmr.msra.gmra.mxu1 %vm2331_vm1, %v2246_v1 }
 0x5b9   : > { %v2369_v11 = vpop.f32.mrf.mxu0 }
 0x5ba   : > { %v2504_v12 = vmul.f32 0.17677669, %v2369_v11 }
 0x5bb   : > { %v14402_v13 = vpop.f32.mrf.mxu0 }
 0x5bc   : > { %v2509_v14 = vsel %vm2508_vm2, %v2504_v12, -inf }
 0x5bd   : > { %2510 = vmax.xlane.f32.xlu1 %v2509_v14  ;;  %v2372_v15 = vpop.f32.mrf.mxu0 }
 0x5bf   : > { %v14403_v16 = vpop.f32.mrf.mxu0 }
 0x5f9   : > { %v2412_v17 = vpop.f32.mrf.mxu1 }
 0x5fa   : > { %v2505_v18 = vmul.f32 0.17677669, %v2412_v17 }
 0x5fb   : > { %v14410_v19 = vpop.f32.mrf.mxu1 }
 0x5fc   : > { %v2512_v20 = vsel %vm2508_vm2, %v2505_v18, -inf }
 0x5fd   : > { %2513 = vmax.xlane.f32.xlu0 %v2512_v20  ;;  %v2415_v21 = vpop.f32.mrf.mxu1  ;;  %v2455_v22 = vpop.f32.mrf.mxu0 }
 0x5fe   : > { %v2506_v23 = vmul.f32 0.17677669, %v2455_v22 }
 0x5ff   : > { %v14411_v24 = vpop.f32.mrf.mxu1  ;;  %v14418_v26 = vpop.f32.mrf.mxu0 }
 0x600   : > { %v2515_v27 = vsel %vm2508_vm2, %v2506_v23, -inf }
 0x601   : > { %v2498_v28 = vpop.f32.mrf.mxu1  ;;  %2516 = vmax.xlane.f32.xlu1 %v2515_v27  ;;  %v2458_v29 = vpop.f32.mrf.mxu0 }
 0x602   : > { %v2507_v30 = vmul.f32 0.17677669, %v2498_v28 }
 0x603   : > { %v14419_v31 = vpop.f32.mrf.mxu0  ;;  %v14426_v32 = vpop.f32.mrf.mxu1 }
 0x604   : > { %v2518_v33 = vsel %vm2508_vm2, %v2507_v30, -inf }
 0x605   : > { %v2501_v35 = vpop.f32.mrf.mxu1  ;;  %2519 = vmax.xlane.f32.xlu1 %v2518_v33 }
 0x607   : > { %v14427_v36 = vpop.f32.mrf.mxu1 }
 0x613   : > { %2258 = vrot.lane.b32.xlu0 %v2239_v39, %s17203_s25 }
 0x617   : > { %2264 = vrot.lane.b32.xlu0 %v2239_v39, %s17202_s26 }
 0x646   : > { %v2511_v40 = vpop.xlane.xlu1 %2510 }
 0x647   : > { %v2521_v45 = vsub.f32 %v2504_v12, %v2511_v40 }
 0x649   : > { %v2525_v46 = vmul.f32 1.442695, %v2521_v45 }
 0x64b   : > { %15890 = vpow2.f32 %v2525_v46 }
 0x658   : > { %v15891_v49 = vpop.eup %15890 }
 0x659   : > { %v2533_v50 = vsel %vm2508_vm2, %v15891_v49, 0.0 }
 0x65a   : > { %2534 = vadd.xlane.f32.xlu1 %v2533_v50 }
 0x686   : > { %v2514_v51 = vpop.xlane.xlu0 %2513 }
 0x687   : > { %v2522_v52 = vsub.f32 %v2505_v18, %v2514_v51 }
 0x689   : > { %v2527_v53 = vmul.f32 1.442695, %v2522_v52 }
 0x68a   : > { %v2517_v54 = vpop.xlane.xlu1 %2516  ;;  %v2259_v6 = vpop.permute.xlu0 %2258 }
 0x68b   : > { %15892 = vpow2.f32 %v2527_v53  ;;  %v2523_v44 = vsub.f32 %v2506_v23, %v2517_v54 }
 0x68d   : > { %v2529_v47 = vmul.f32 1.442695, %v2523_v44 }
 0x68e   : > { %v2520_v59 = vpop.xlane.xlu1 %2519  ;;  %v2265_v7 = vpop.permute.xlu0 %2264 }
 0x68f   : > { %15894 = vpow2.f32 %v2529_v47  ;;  %v2524_v60 = vsub.f32 %v2507_v30, %v2520_v59  ;;  %v15431_v47 = vld [vmem:[%s19176_s6 + $0x38] sm:$0xff]   ;;  %v15436_v59 = vld [vmem:[%s19176_s6 + $0x10] sm:$0xff]  }
 0x691   : > { %v2531_v61 = vmul.f32 1.442695, %v2524_v60 }
 0x693   : > { %15896 = vpow2.f32 %v2531_v61  ;;  %v17205_v61 = vmov 1983009808  }
 0x698   : > { %v15893_v55 = vpop.eup %15892 }
 0x699   : > { %v2536_v56 = vsel %vm2508_vm2, %v15893_v55, 0.0 }
 0x69a   : > { %2537 = vadd.xlane.f32.xlu1 %v2536_v56  ;;  %v15433_v56 = vld [vmem:[%s19176_s6 + $0x28] sm:$0xff]  }
 0x69c   : > { %v15895_v57 = vpop.eup %15894 }
 0x69d   : > { %v2539_v58 = vsel %vm2508_vm2, %v15895_v57, 0.0 }
 0x69e   : > { %2540 = vadd.xlane.f32.xlu0 %v2539_v58  ;;  %v15435_v58 = vld [vmem:[%s19176_s6 + $0x18] sm:$0xff]  }
 0x6a0   : > { %v15897_v62 = vpop.eup %15896 }
 0x6a1   : > { %v2542_v63 = vsel %vm2508_vm2, %v15897_v62, 0.0 }
 0x6ab   : > { %2261 = vrot.lane.b32.xlu1 %v2239_v39, %s17204_s10 }
 0x6cb   : > { %2557 = vxpose.xlu0.c.b16.start.end [1/1] (short) (narrow) %v2239_v39, 32 }
 0x6cf   : > { %2543 = vadd.xlane.f32.xlu1 %v2542_v63  ;;  %v17206_v63 = vmov 1934713408  }
 0x6e3   : > { %v2535_v0 = vpop.xlane.xlu1 %2534 }
 0x6e4   : > { %15898 = vrcp.f32 %v2535_v0  ;;  %v3016_v0 = vunpack.c.l.s4 %v17206_v63 }
 0x6f1   : > { %v15899_v1 = vpop.eup %15898 }
 0x6f2   : > { %v2546_v2 = vmul.f32 %v15899_v1, %v15891_v49 }
 0x6f4   : > { %v2553_v4 = vpack.c.bf16 %v2546_v2, %v2546_v2 }
 0x6f6   : > { %14992 = vmatprep.subr.msk.bf16.mxu0 %vm2508_vm2, %v2553_v4  ;;  %v2628_v5 = vsel %vm2508_vm2, %v2553_v4, 0 }
 0x6f7   : > { %14429 = vmatpush3.bf16.xpose.msra.mxu0 %v2628_v5  ;;  %v3017_v5 = vunpack.c.0.s8 %v3016_v0  ;;  %v16076_v0 = vld [vmem:[%s17824_s9] sm:$0xff]  ;;  %s19181_s9 = sld [smem:[#allocation83_spill]] }
 0x6fc   : > { %2573 = vxpose.xlu1.c.b16.start.end [1/1] (short) (narrow) %v2259_v6, 32 }
 0x6fd   : > { %s18696_s2 = scalar_lea.vmem %s19181_s9, %s17820_s16  ;;  %s1911_s16 = sand.u32 1, %s17094_s15  }
 0x723   : > { %v2538_v8 = vpop.xlane.xlu1 %2537 }
 0x724   : > { %15900 = vrcp.f32 %v2538_v8 }
 0x727   : > { %v2541_v9 = vpop.xlane.xlu0 %2540  ;;  %v2262_v10 = vpop.permute.xlu1 %2261 }
 0x728   : > { %15902 = vrcp.f32 %v2541_v9  ;;  %2589 = vxpose.xlu0.c.b16.start.end [1/1] (short) (narrow) %v2262_v10, 32 }
 0x72d   : > { %2605 = vxpose.xlu0.c.b16.start.end [1/1] (short) (narrow) %v2265_v7, 32  ;;  %v2565_v11 = vpop.trf.xlu0 }
 0x72e   : > { %14430 = vmatprep.mubr.msk.bf16.mxu0 %vm2508_vm2, %v2565_v11 }
 0x731   : > { %v15901_v12 = vpop.eup %15900  ;;  %v2566_v13 = vpop.trf.xlu0 }
 0x732   : > { %v2548_v14 = vmul.f32 %v15901_v12, %v15893_v55  ;;  %14431 = vmatmul.mubr.msk.bf16.vlgmr.msra.gmra.mxu0 %vm2508_vm2, %v2566_v13  ;;  %v15432_v55 = vld [vmem:[%s19176_s6 + $0x30] sm:$0xff]   ;;  %v17958_v12 = vsub.s32 %v3017_v5, %v17869_v42 }
 0x733   : > { %v15439_v5 = vld [vmem:[%s19177_s28 + $0x70] ss:$8 sps:$4 sm:$0xff]  }
 0x734   : > { %v2554_v15 = vpack.c.bf16 %v2548_v14, %v2548_v14 }
 0x735   : > { %v15903_v16 = vpop.eup %15902 }
 0x736   : > { %14993 = vmatprep.subr.msk.bf16.mxu1 %vm2508_vm2, %v2554_v15  ;;  %v2686_v17 = vsel %vm2508_vm2, %v2554_v15, 0  ;;  %v2550_v18 = vmul.f32 %v15903_v16, %v15895_v57  ;;  %v15434_v57 = vld [vmem:[%s19176_s6 + $0x20] sm:$0xff]  }
 0x737   : > { %14435 = vmatpush3.bf16.xpose.msra.mxu1 %v2686_v17  ;;  %v15437_v17 = vld [vmem:[%s19176_s6 + $0x8] sm:$0xff]  }
 0x738   : > { %v2555_v19 = vpack.c.bf16 %v2550_v18, %v2550_v18 }
 0x73a   : > { %14994 = vmatprep.subr.msk.bf16.mxu0 %vm2508_vm2, %v2555_v19  ;;  %v2744_v20 = vsel %vm2508_vm2, %v2555_v19, 0 }
 0x73b   : > { %14441 = vmatpush3.bf16.xpose.msra.mxu0 %v2744_v20 }
 0x73c   : > { %14452 = vmatprep.subr.bf16.mxu0 %v17199_v3 }
 0x758   : > { %v2544_v21 = vpop.xlane.xlu1 %2543 }
 0x759   : > { %15904 = vrcp.f32 %v2544_v21 }
 0x75e   : > { %v2581_v22 = vpop.trf.xlu1 }
 0x75f   : > { %14436 = vmatprep.mubr.msk.bf16.mxu1 %vm2508_vm2, %v2581_v22 }
 0x762   : > { %v2582_v23 = vpop.trf.xlu1 }
 0x763   : > { %14437 = vmatmul.mubr.msk.bf16.vlgmr.msra.gmra.mxu1 %vm2508_vm2, %v2582_v23 }
 0x766   : > { %v15905_v24 = vpop.eup %15904 }
 0x767   : > { %v2552_v26 = vmul.f32 %v15905_v24, %v15897_v62  ;;  %v2984_v62 = vunpack.c.l.s4 %v17205_v61 }
 0x769   : > { %v2556_v27 = vpack.c.bf16 %v2552_v26, %v2552_v26  ;;  %v2985_v2 = vunpack.c.0.s8 %v2984_v62 }
 0x76b   : > { %14995 = vmatprep.subr.msk.bf16.mxu1 %vm2508_vm2, %v2556_v27  ;;  %v2802_v28 = vsel %vm2508_vm2, %v2556_v27, 0  ;;  %v17955_v6 = vsub.s32 %v2985_v2, %v17869_v42  ;;  %v15438_v27 = vld [vmem:[%s19176_s6] sm:$0xff]  }
 0x76c   : > { %14447 = vmatpush3.bf16.xpose.msra.mxu1 %v2802_v28 }
 0x78a   : > { %v2597_v29 = vpop.trf.xlu0 }
 0x78b   : > { %14442 = vmatprep.mubr.msk.bf16.mxu0 %vm2508_vm2, %v2597_v29 }
 0x78e   : > { %v2598_v30 = vpop.trf.xlu0 }
 0x78f   : > { %14443 = vmatmul.mubr.msk.bf16.vlgmr.msra.gmra.mxu0 %vm2508_vm2, %v2598_v30 }
 0x790   : > { %14468 = vmatprep.mubr.msk.bf16.mxu0 %vm17201_vm0, %v17199_v3  ;;  %14453 = vmatpush3.bf16.msra.mxu0 %v15431_v47 }
 0x791   : > { %14454 = vmatprep.subr.bf16.mxu0 %v17199_v3 }
 0x792   : > { %v2613_v31 = vpop.trf.xlu0 }
 0x793   : > { %14448 = vmatprep.mubr.msk.bf16.mxu1 %vm2508_vm2, %v2613_v31 }
 0x794   : > { %14455 = vmatpush3.bf16.msra.mxu0 %v15432_v55 }
 0x795   : > { %14456 = vmatprep.subr.bf16.mxu0 %v17199_v3 }
 0x796   : > { %v2614_v32 = vpop.trf.xlu0 }
 0x797   : > { %14449 = vmatmul.mubr.msk.bf16.vlgmr.msra.gmra.mxu1 %vm2508_vm2, %v2614_v32 }
 0x798   : > { %3398 = vmatprep.mubr.bf16.mxu1 %v17200_v25  ;;  %14457 = vmatpush3.bf16.msra.mxu0 %v15433_v56 }
 0x799   : > { %14458 = vmatprep.subr.bf16.mxu0 %v17199_v3 }
 0x79c   : > { %14459 = vmatpush3.bf16.msra.mxu0 %v15434_v57 }
 0x79d   : > { %14460 = vmatprep.subr.bf16.mxu0 %v17199_v3 }
 0x7a0   : > { %14461 = vmatpush3.bf16.msra.mxu0 %v15435_v58 }
 0x7a1   : > { %14462 = vmatprep.subr.bf16.mxu0 %v17199_v3 }
 0x7a4   : > { %14463 = vmatpush3.bf16.msra.mxu0 %v15436_v59 }
 0x7a5   : > { %14464 = vmatprep.subr.bf16.mxu0 %v17199_v3 }
 0x7a8   : > { %14465 = vmatpush3.bf16.msra.mxu0 %v15437_v17  ;;  %v15450_v17 = vld [vmem:[%s19177_s28 + $0x44] ss:$8 sps:$4 sm:$0xff]  }
 0x7a9   : > { %14466 = vmatprep.subr.bf16.mxu0 %v17199_v3 }
 0x7ac   : > { %14467 = vmatpush3.bf16.msra.mxu0 %v15438_v27  ;;  %v15460_v27 = vld [vmem:[%s19177_s28] ss:$8 sps:$4 sm:$0xff]  }
 0x7f2   : > { %v14432_v33 = vpop.f32.mrf.mxu0 }
 0x7f4   : > { %v2664_v35 = vpop.f32.mrf.mxu0 }
 0x7f5   : > { %2853 = vxpose.xlu1.b32.start [1/4] (short) (narrow) %v2664_v35, 8 }
 0x7f6   : > { %v14433_v36 = vpop.f32.mrf.mxu0 }
 0x7f8   : > { %v2667_v37 = vpop.f32.mrf.mxu0 }
 0x7f9   : > { %2854 = vxpose.xlu1.b32.cont [2/4] (short) (narrow) %v2667_v37, 8 }
 0x7fd   : > { %2855 = vxpose.xlu1.b32.cont [3/4] (short) (narrow) %v14432_v33, 8 }
 0x801   : > { %2856 = vxpose.xlu1.b32.end [4/4] (short) (narrow) %v14433_v36, 8 }
 0x823   : > { %v14438_v38 = vpop.f32.mrf.mxu1 }
 0x825   : > { %v2722_v39 = vpop.f32.mrf.mxu1 }
 0x826   : > { %2885 = vxpose.xlu0.b32.start [1/4] (short) (narrow) %v2722_v39, 8 }
 0x827   : > { %v14439_v40 = vpop.f32.mrf.mxu1 }
 0x829   : > { %v2725_v45 = vpop.f32.mrf.mxu1 }
 0x82a   : > { %2886 = vxpose.xlu0.b32.cont [2/4] (short) (narrow) %v2725_v45, 8 }
 0x82e   : > { %2887 = vxpose.xlu0.b32.cont [3/4] (short) (narrow) %v14438_v38, 8 }
 0x832   : > { %2888 = vxpose.xlu0.b32.end [4/4] (short) (narrow) %v14439_v40, 8 }
 0x84f   : > { %v14444_v46 = vpop.f32.mrf.mxu0 }
 0x851   : > { %v2780_v49 = vpop.f32.mrf.mxu0 }
 0x852   : > { %2917 = vxpose.xlu0.b32.start [1/4] (short) (narrow) %v2780_v49, 8 }
 0x853   : > { %v14445_v50 = vpop.f32.mrf.mxu0 }
 0x855   : > { %v2783_v51 = vpop.f32.mrf.mxu0 }
 0x856   : > { %2918 = vxpose.xlu0.b32.cont [2/4] (short) (narrow) %v2783_v51, 8 }
 0x857   : > { %v14450_v52 = vpop.f32.mrf.mxu1 }
 0x859   : > { %v2838_v53 = vpop.f32.mrf.mxu1 }
 0x85a   : > { %2919 = vxpose.xlu0.b32.cont [3/4] (short) (narrow) %v14444_v46, 8  ;;  %2949 = vxpose.xlu1.b32.start [1/4] (short) (narrow) %v2838_v53, 8 }
 0x85b   : > { %v14451_v54 = vpop.f32.mrf.mxu1 }
 0x85d   : > { %v2841_v44 = vpop.f32.mrf.mxu1 }
 0x85e   : > { %2920 = vxpose.xlu0.b32.end [4/4] (short) (narrow) %v14445_v50, 8  ;;  %2950 = vxpose.xlu1.b32.cont [2/4] (short) (narrow) %v2841_v44, 8 }
 0x862   : > { %2951 = vxpose.xlu1.b32.cont [3/4] (short) (narrow) %v14450_v52, 8 }
 0x866   : > { %2952 = vxpose.xlu1.b32.end [4/4] (short) (narrow) %v14451_v54, 8 }
 0x871   : > { %v2869_v1 = vpop.trf.xlu1 }
 0x8a2   : > { %v2901_v60 = vpop.trf.xlu0 }
 0x8ce   : > { %v2933_v4 = vpop.trf.xlu0 }
 0x8cf   : > { %v2981_v7 = vcombine.low %v2869_v1, %v2933_v4  ;;  %v2982_v8 = vcombine.high %v2869_v1, %v2933_v4 }
 0x8d1   : > { %v2989_v13 = vrot.slane %v2981_v7, %v17955_v6  ;;  %v2996_v14 = vrot.slane %v2982_v8, %v17955_v6  ;;  %v15441_v7 = vld [vmem:[%s19177_s28 + $0x74] ss:$8 sps:$4 sm:$0xff]   ;;  %v15444_v8 = vld [vmem:[%s19177_s28 + $0x64] ss:$8 sps:$4 sm:$0xff]  }
 0x8d2   : > { %3366 = vmatprep.subr.bf16.mxu1 %v15441_v7 }
 0x8d3   : > { %3367 = vmatpush1.bf16.msra.mxu1 %v15439_v5 }
 0x8d4   : > { %3368 = vmatprep.subr.bf16.mxu1 %v15444_v8 }
 0x8d6   : > { %v2965_v9 = vpop.trf.xlu1 }
 0x8d7   : > { %v2997_v10 = vcombine.low %v2901_v60, %v2965_v9  ;;  %v2998_v11 = vcombine.high %v2901_v60, %v2965_v9  ;;  %v13303_v60 = vld [vmem:[#allocation8] ss:$0 sm:$0xff]  ;;  %v15442_v9 = vld [vmem:[%s19177_s28 + $0x60] ss:$8 sps:$4 sm:$0xff]  }
 0x8d8   : > { %3369 = vmatpush1.bf16.msra.mxu1 %v15442_v9 }
 0x8d9   : > { %v3005_v15 = vrot.slane %v2997_v10, %v17955_v6  ;;  %v3012_v16 = vrot.slane %v2998_v11, %v17955_v6 }
 0x8db   : > { %v3013_v18 = vcombine.low %v2989_v13, %v3005_v15  ;;  %v3014_v19 = vcombine.high %v2989_v13, %v3005_v15  ;;  %v3029_v20 = vcombine.low %v2996_v14, %v3012_v16  ;;  %v3030_v21 = vcombine.high %v2996_v14, %v3012_v16  ;;  %v15447_v15 = vld [vmem:[%s19177_s28 + $0x54] ss:$8 sps:$4 sm:$0xff]   ;;  %v15445_v16 = vld [vmem:[%s19177_s28 + $0x50] ss:$8 sps:$4 sm:$0xff]  }
 0x8dc   : > { %3370 = vmatprep.subr.bf16.mxu1 %v15447_v15 }
 0x8dd   : > { %v3021_v22 = vrot.slane %v3013_v18, %v17958_v12  ;;  %v3028_v23 = vrot.slane %v3014_v19, %v17958_v12  ;;  %v3037_v24 = vrot.slane %v3029_v20, %v17958_v12  ;;  %v3044_v26 = vrot.slane %v3030_v21, %v17958_v12  ;;  %3371 = vmatpush1.bf16.msra.mxu1 %v15445_v16  ;;  %v15448_v18 = vld [vmem:[%s19177_s28 + $0x40] ss:$8 sps:$4 sm:$0xff]   ;;  %v15453_v19 = vld [vmem:[%s19177_s28 + $0x34] ss:$8 sps:$4 sm:$0xff]   ;;  %v15451_v20 = vld [vmem:[%s19177_s28 + $0x30] ss:$8 sps:$4 sm:$0xff]  }
 0x8de   : > { %3372 = vmatprep.subr.bf16.mxu1 %v15450_v17  ;;  %v15456_v21 = vld [vmem:[%s19177_s28 + $0x24] ss:$8 sps:$4 sm:$0xff]  }
 0x8df   : > { %v3049_v28 = vcombine.low %v3021_v22, %v3028_v23  ;;  %v13301_v29 = vcombine.high %v3021_v22, %v3028_v23  ;;  %v3065_v30 = vcombine.low %v3037_v24, %v3044_v26  ;;  %v13302_v31 = vcombine.high %v3037_v24, %v3044_v26  ;;  %v15454_v22 = vld [vmem:[%s19177_s28 + $0x20] ss:$8 sps:$4 sm:$0xff]   ;;  %v15459_v23 = vld [vmem:[%s19177_s28 + $0x14] ss:$8 sps:$4 sm:$0xff]   ;;  %v15457_v24 = vld [vmem:[%s19177_s28 + $0x10] ss:$8 sps:$4 sm:$0xff]  }
 0x8e0   : > { %v15462_v26 = vld [vmem:[%s19177_s28 + $0x4] ss:$8 sps:$4 sm:$0xff]  }
 0x8e1   : > { %v3056_v32 = vrot.slane %v3049_v28, %v17955_v6  ;;  %v3064_v33 = vrot.slane %v13301_v29, %v17955_v6  ;;  %v3072_v35 = vrot.slane %v3065_v30, %v17955_v6  ;;  %v3080_v36 = vrot.slane %v13302_v31, %v17955_v6  ;;  %3373 = vmatpush1.bf16.msra.mxu1 %v15448_v18 }
 0x8e2   : > { %3374 = vmatprep.subr.bf16.mxu1 %v15453_v19 }
 0x8e3   : > { %v3082_v37 = vcombine.high %v3056_v32, %v3064_v33  ;;  %v3098_v38 = vcombine.high %v3072_v35, %v3080_v36  ;;  %v3081_v39 = vcombine.low %v3056_v32, %v3064_v33  ;;  %v3097_v40 = vcombine.low %v3072_v35, %v3080_v36  ;;  %v13312_v32 = vld [vmem:[#allocation10] ss:$0 sm:$0xff]  ;;  %v13313_v35 = vld [vmem:[#allocation11] ss:$0 sm:$0xff] }
 0x8e5   : > { %v3096_v45 = vrot.slane %v3082_v37, %v17958_v12  ;;  %v3112_v46 = vrot.slane %v3098_v38, %v17958_v12  ;;  %v3089_v49 = vrot.slane %v3081_v39, %v17958_v12  ;;  %v3105_v50 = vrot.slane %v3097_v40, %v17958_v12  ;;  %3375 = vmatpush1.bf16.msra.mxu1 %v15451_v20  ;;  %v15463_v38 = vld [vmem:[#allocation17 + $0x18] sm:$0xff]   ;;  %v15464_v40 = vld [vmem:[#allocation17 + $0x10] sm:$0xff]  }
 0x8e6   : > { %3376 = vmatprep.subr.bf16.mxu1 %v15456_v21 }
 0x8e7   : > { %v3115_v51 = vcombine.low %v3096_v45, %v3112_v46  ;;  %v3114_v52 = vcombine.high %v3089_v49, %v3105_v50  ;;  %v3113_v53 = vcombine.low %v3089_v49, %v3105_v50  ;;  %v3116_v54 = vcombine.high %v3096_v45, %v3112_v46  ;;  %v15465_v45 = vld [vmem:[#allocation17 + $0x8] sm:$0xff]   ;;  %v3603_v46 = vld [vmem:[%s1921_s4] sm:$0xff]  ;;  %v15466_v49 = vld [vmem:[#allocation17] sm:$0xff]  }
 0x8e8   : > { %v3613_v50 = vpack.c.bf16 %v3603_v46, %v3603_v46  ;;  %v15483_v46 = vld [vmem:[%s19175_s1 + $0x168] ss:$12 sps:$4 sm:$0xff]  }
 0x8e9   : > { %3122 = vrot.lane.b32.xlu1 %v3115_v51, %s17204_s10  ;;  %3118 = vrot.lane.b32.xlu0 %v3114_v52, %s17202_s26  ;;  %v15467_v51 = vld [vmem:[#allocation14 + $0x78] sm:$0xff]  }
 0x8ea   : > { %3377 = vmatpush1.bf16.msra.mxu1 %v15454_v22  ;;  %v15468_v52 = vld [vmem:[#allocation14 + $0x38] sm:$0xff]   ;;  %14025 = vmatprep.subr.bf16.mxu0 %v15467_v51 }
 0x8eb   : > { %3378 = vmatprep.subr.bf16.mxu1 %v15459_v23  ;;  %v15489_v51 = vld [vmem:[%s19175_s1 + $0x154] ss:$12 sps:$4 sm:$0xff]  }
 0x8ed   : > { %3126 = vrot.lane.b32.xlu1 %v3116_v54, %s17203_s25  ;;  %v15470_v54 = vld [vmem:[#allocation14 + $0x30] sm:$0xff]  }
 0x8ee   : > { %3379 = vmatpush1.bf16.msra.mxu1 %v15457_v24  ;;  %v3612_v24 = vld [vmem:[#allocation19] sm:$0xff] }
 0x8ef   : > { %3380 = vmatprep.subr.bf16.mxu1 %v15462_v26 }
 0x8f2   : > { %3381 = vmatpush1.bf16.msra.mxu1 %v15460_v27 }
 0x8f3   : > { %14472 = vmatprep.subr.bf16.mxu1 %v17199_v3 }
 0x95b   : > { %v3123_v44 = vpop.permute.xlu1 %3122  ;;  %v3119_v47 = vpop.permute.xlu0 %3118 }
 0x95c   : > { %v3129_v55 = vsel %vm2331_vm1, %v3113_v53, %v3119_v47  ;;  %v15469_v53 = vld [vmem:[#allocation14 + $0x70] sm:$0xff]   ;;  %v15472_v47 = vld [vmem:[#allocation14 + $0x28] sm:$0xff]  }
 0x95d   : > { %v3131_v57 = vsel %vm3130_vm3, %v3129_v55, %v3123_v44  ;;  %v15471_v44 = vld [vmem:[#allocation14 + $0x68] sm:$0xff]   ;;  %v15473_v55 = vld [vmem:[#allocation14 + $0x60] sm:$0xff]  }
 0x95f   : > { %v3127_v56 = vpop.permute.xlu1 %3126 }
 0x960   : > { %v3133_v58 = vsel %vm3132_vm4, %v3131_v57, %v3127_v56  ;;  %v15474_v56 = vld [vmem:[#allocation14 + $0x20] sm:$0xff]   ;;  %v15475_v57 = vld [vmem:[#allocation14 + $0x58] sm:$0xff]  }
 0x961   : > { %v3134_v59 = vpack.c.bf16 %v3133_v58, %v3133_v58  ;;  %v15476_v58 = vld [vmem:[#allocation14 + $0x18] sm:$0xff]  }
 0x963   : > { %14469 = vmatmul.mubr.bf16.vlgmr.msra.gmra.mxu0 %v3134_v59  ;;  %v15477_v59 = vld [vmem:[#allocation14 + $0x50] sm:$0xff]  }
 0x964   : > { %14026 = vmatpush3.bf16.msra.mxu0 %v15468_v52  ;;  %v15487_v52 = vld [vmem:[%s19175_s1 + $0x150] ss:$12 sps:$4 sm:$0xff]  }
 0x965   : > { %14027 = vmatprep.subr.bf16.mxu0 %v15469_v53 }
 0x968   : > { %14028 = vmatpush3.bf16.msra.mxu0 %v15470_v54 }
 0x969   : > { %14029 = vmatprep.subr.bf16.mxu0 %v15471_v44 }
 0x96c   : > { %14030 = vmatpush3.bf16.msra.mxu0 %v15472_v47 }
 0x96d   : > { %14031 = vmatprep.subr.bf16.mxu0 %v15473_v55  ;;  %v15490_v55 = vld [vmem:[%s19175_s1 + $0x158] ss:$12 sps:$4 sm:$0xff]  }
 0x970   : > { %14032 = vmatpush3.bf16.msra.mxu0 %v15474_v56  ;;  %v15493_v56 = vld [vmem:[%s19175_s1 + $0x13c] ss:$12 sps:$4 sm:$0xff]  }
 0x971   : > { %14033 = vmatprep.subr.bf16.mxu0 %v15475_v57  ;;  %v15491_v57 = vld [vmem:[%s19175_s1 + $0x138] ss:$12 sps:$4 sm:$0xff]  }
 0x974   : > { %14034 = vmatpush3.bf16.msra.mxu0 %v15476_v58  ;;  %v15494_v58 = vld [vmem:[%s19175_s1 + $0x140] ss:$12 sps:$4 sm:$0xff]  }
 0x975   : > { %14035 = vmatprep.subr.bf16.mxu0 %v15477_v59  ;;  %v15495_v59 = vld [vmem:[%s19175_s1 + $0x120] ss:$12 sps:$4 sm:$0xff]  }
 0xa23   : > { %v3223_v61 = vpop.f32.mrf.mxu0 }
 0xa24   : > { %v3224_v62 = vadd.f32 %v13303_v60, %v3223_v61  ;;  %v15478_v60 = vld [vmem:[#allocation14 + $0x10] sm:$0xff]   ;;  %v15479_v61 = vld [vmem:[#allocation14 + $0x48] sm:$0xff]  }
 0xa25   : > { %v14470_v63 = vpop.f32.mrf.mxu0  ;;  %14036 = vmatpush3.bf16.msra.mxu0 %v15478_v60  ;;  %v15497_v60 = vld [vmem:[%s19175_s1 + $0x124] ss:$12 sps:$4 sm:$0xff]  }
 0xa26   : > { %v17986_v1 = vadd.f32 %v16076_v0, %v3224_v62  ;;  %v15480_v62 = vld [vmem:[#allocation14 + $0x8] sm:$0xff]   ;;  %14037 = vmatprep.subr.bf16.mxu0 %v15479_v61  ;;  %v15481_v63 = vld [vmem:[#allocation14 + $0x40] sm:$0xff]  }
 0xa27   : > { %v3226_v2 = vpop.f32.mrf.mxu0  ;;  %v15482_v0 = vld [vmem:[#allocation14] sm:$0xff]  }
 0xa28   : > { %3232 = vadd.xlane.f32.xlu1 %v17986_v1  ;;  %v3273_v2 = vld [vmem:[#allocation13] sm:$0x3]  ;;  %v15498_v61 = vld [vmem:[%s19175_s1 + $0x128] ss:$12 sps:$4 sm:$0xff]  }
 0xa29   : > { %v14471_v4 = vpop.f32.mrf.mxu0  ;;  %14038 = vmatpush3.bf16.msra.mxu0 %v15480_v62  ;;  %v3283_v5 = vrot.slane %v3273_v2, %v17872_v43  ;;  %v15501_v62 = vld [vmem:[%s19175_s1 + $0x10c] ss:$12 sps:$4 sm:$0xff]  }
 0xa2a   : > { %14039 = vmatprep.subr.bf16.mxu0 %v15481_v63  ;;  %v3279_v4 = vrot.slane %v3273_v2, %v17881_v48  ;;  %v15499_v63 = vld [vmem:[%s19175_s1 + $0x108] ss:$12 sps:$4 sm:$0xff]  }
 0xa2b   : > { %v15505_v2 = vld [vmem:[%s19175_s1 + $0xf4] ss:$12 sps:$4 sm:$0xff]  }
 0xa2d   : > { %14040 = vmatpush3.bf16.msra.mxu0 %v15482_v0  ;;  %v15502_v0 = vld [vmem:[%s19175_s1 + $0x110] ss:$12 sps:$4 sm:$0xff]  }
 0xa2e   : > { %14484 = vmatprep.subr.bf16.mxu0 %v17199_v3 }
 0xab1   : > { %v3233_v10 = vpop.xlane.xlu1 %3232 }
 0xab2   : > { %v3234_v11 = vmul.f32 0.0078125, %v3233_v10 }
 0xab4   : > { %v3235_v13 = vsub.f32 %v17986_v1, %v3234_v11 }
 0xab6   : > { %v3236_v14 = vmul.f32 %v3235_v13, %v3235_v13 }
 0xab8   : > { %3237 = vadd.xlane.f32.xlu0 %v3236_v14 }
 0xb41   : > { %v3238_v28 = vpop.xlane.xlu0 %3237 }
 0xb42   : > { %v3239_v29 = vmul.f32 0.0078125, %v3238_v28 }
 0xb44   : > { %v3240_v30 = vadd.f32 1e-05, %v3239_v29 }
 0xb46   : > { %15906 = vrsqrt.f32 %v3240_v30 }
 0xb53   : > { %v15907_v31 = vpop.eup %15906 }
 0xb54   : > { %v3242_v33 = vmul.f32 %v15907_v31, %v3235_v13 }
 0xb56   : > { %v3249_v36 = vmul.f32 %v13312_v32, %v3242_v33 }
 0xb58   : > { %v3256_v37 = vadd.f32 %v13313_v35, %v3249_v36 }
 0xb5a   : > { %v3274_v39 = vpack.c.bf16 %v3256_v37, %v3256_v37 }
 0xb5c   : > { %3399 = vmatmul.mubr.bf16.vlgmr.msra.gmra.mxu1 %v3274_v39 }
 0xb5d   : > { %14473 = vmatpush3.bf16.msra.mxu1 %v15463_v38  ;;  %14480 = vmatprep.mubr.msk.bf16.mxu1 %vm17201_vm0, %v17199_v3 }
 0xb5e   : > { %14474 = vmatprep.subr.bf16.mxu1 %v17199_v3 }
 0xb61   : > { %14475 = vmatpush3.bf16.msra.mxu1 %v15464_v40 }
 0xb62   : > { %14476 = vmatprep.subr.bf16.mxu1 %v17199_v3 }
 0xb65   : > { %14477 = vmatpush3.bf16.msra.mxu1 %v15465_v45 }
 0xb66   : > { %14478 = vmatprep.subr.bf16.mxu1 %v17199_v3 }
 0xb69   : > { %14479 = vmatpush3.bf16.msra.mxu1 %v15466_v49  ;;  %v15485_v49 = vld [vmem:[%s19175_s1 + $0x16c] ss:$12 sps:$4 sm:$0xff]  }
 0xb6a   : > { %3909 = vmatprep.subr.bf16.mxu1 %v15485_v49 }
 0xb6c   : > { %14481 = vmatmul.mubr.msk.bf16.vlgmr.msra.gmra.mxu1 %vm3130_vm3, %v3613_v50  ;;  %v15486_v50 = vld [vmem:[%s19175_s1 + $0x170] ss:$12 sps:$4 sm:$0xff]  }
 0xb6d   : > { %3941 = vmatprep.mubr.bf16.mxu1 %v17200_v25  ;;  %3910 = vmatpush1.bf16.msra.mxu1 %v15483_v46 }
 0xb6e   : > { %3911 = vmatprep.subr.bf16.mxu1 %v15489_v51 }
 0xb71   : > { %3912 = vmatpush1.bf16.msra.mxu1 %v15487_v52 }
 0xb72   : > { %3913 = vmatprep.subr.bf16.mxu1 %v15493_v56 }
 0xb75   : > { %3914 = vmatpush1.bf16.msra.mxu1 %v15491_v57 }
 0xb76   : > { %3915 = vmatprep.subr.bf16.mxu1 %v15497_v60 }
 0xb79   : > { %3916 = vmatpush1.bf16.msra.mxu1 %v15495_v59 }
 0xb7a   : > { %3917 = vmatprep.subr.bf16.mxu1 %v15501_v62 }
 0xb7d   : > { %3918 = vmatpush1.bf16.msra.mxu1 %v15499_v63 }
 0xb7e   : > { %3919 = vmatprep.subr.bf16.mxu1 %v15505_v2 }
 0xc1c   : > { %v3400_v7 = vpop.f32.mrf.mxu1 }
 0xc1d   : > { %v3401_v8 = vadd.f32 %v3400_v7, %v3279_v4  ;;  %v15503_v4 = vld [vmem:[%s19175_s1 + $0xf0] ss:$12 sps:$4 sm:$0xff]  }
 0xc1e   : > { %v3402_v9 = vpop.f32.mrf.mxu1  ;;  %v15509_v7 = vld [vmem:[%s19175_s1 + $0xdc] ss:$12 sps:$4 sm:$0xff]   ;;  %3920 = vmatpush1.bf16.msra.mxu1 %v15503_v4 }
 0xc1f   : > { %v3407_v10 = vmul.f32 %v3401_v8, %v3401_v8  ;;  %v3403_v11 = vadd.f32 %v3402_v9, %v3283_v5  ;;  %v15506_v5 = vld [vmem:[%s19175_s1 + $0xf8] ss:$12 sps:$4 sm:$0xff]   ;;  %v15510_v9 = vld [vmem:[%s19175_s1 + $0xe0] ss:$12 sps:$4 sm:$0xff]   ;;  %3921 = vmatprep.subr.bf16.mxu1 %v15509_v7 }
 0xc20   : > { %v3404_v13 = vpop.f32.mrf.mxu1 }
 0xc21   : > { %v3409_v14 = vmul.f32 %v3407_v10, %v3401_v8  ;;  %v3408_v15 = vmul.f32 %v3403_v11, %v3403_v11  ;;  %v15513_v10 = vld [vmem:[%s19175_s1 + $0xc4] ss:$12 sps:$4 sm:$0xff]   ;;  %v15514_v13 = vld [vmem:[%s19175_s1 + $0xc8] ss:$12 sps:$4 sm:$0xff]  }
 0xc22   : > { %v3405_v16 = vpop.f32.mrf.mxu1 }
 0xc23   : > { %v3411_v17 = vmul.f32 0.044715, %v3409_v14  ;;  %v3410_v18 = vmul.f32 %v3408_v15, %v3403_v11 }
 0xc25   : > { %v3413_v19 = vadd.f32 %v3411_v17, %v3401_v8  ;;  %v3412_v20 = vmul.f32 0.044715, %v3410_v18 }
 0xc27   : > { %v3415_v21 = vmul.f32 0.7978846, %v3413_v19  ;;  %v3414_v22 = vadd.f32 %v3412_v20, %v3403_v11 }
 0xc29   : > { %15908 = vtanh.f32 %v3415_v21  ;;  %v3416_v23 = vmul.f32 0.7978846, %v3414_v22 }
 0xc2b   : > { %15910 = vtanh.f32 %v3416_v23  ;;  %v13352_v23 = vld [vmem:[#allocation2 + $0x1] ss:$0 sm:$0xff] }
 0xc2c   : > { %v3675_v26 = vpop.f32.mrf.mxu1 }
 0xc2d   : > { %v18019_v27 = vadd.f32 %v3675_v26, %v3612_v24  ;;  %v13353_v26 = vld [vmem:[#allocation5 + $0x1] ss:$0 sm:$0xff] }
 0xc2e   : > { %v14482_v28 = vpop.f32.mrf.mxu1 }
 0xc2f   : > { %3685 = vadd.xlane.f32.xlu0 %v18019_v27 }
 0xc30   : > { %v3678_v29 = vpop.f32.mrf.mxu1 }
 0xc32   : > { %v14483_v30 = vpop.f32.mrf.mxu1 }
 0xc36   : > { %v15909_v31 = vpop.eup %15908 }
 0xc37   : > { %v3419_v32 = vadd.f32 1.0, %v15909_v31  ;;  %v18064_v31 = vld [vmem:[#allocation7 + $0x3] sm:$0x7] }
 0xc38   : > { %v15911_v33 = vpop.eup %15910 }
 0xc39   : > { %v3420_v35 = vadd.f32 1.0, %v15911_v33  ;;  %v3421_v36 = vmul.f32 0.5, %v3419_v32  ;;  %v3773_v32 = vrot.slane %v18064_v31, %v17872_v43 }
 0xc3b   : > { %v3422_v37 = vmul.f32 0.5, %v3420_v35  ;;  %v3423_v38 = vmul.f32 %v3421_v36, %v3401_v8  ;;  %v15507_v8 = vld [vmem:[%s19175_s1 + $0xd8] ss:$12 sps:$4 sm:$0xff]   ;;  %v3769_v36 = vrot.slane %v18064_v31, %v17881_v48 }
 0xc3c   : > { %3922 = vmatpush1.bf16.msra.mxu1 %v15507_v8 }
 0xc3d   : > { %v3424_v39 = vmul.f32 %v3422_v37, %v3403_v11  ;;  %v3458_v45 = vpack.c.bf16 %v3423_v38, %v3423_v38  ;;  %v15511_v11 = vld [vmem:[%s19175_s1 + $0xc0] ss:$12 sps:$4 sm:$0xff]   ;;  %3923 = vmatprep.subr.bf16.mxu1 %v15513_v10 }
 0xc3f   : > { %v3459_v40 = vpack.c.bf16 %v3424_v39, %v3424_v39 }
 0xc40   : > { %3924 = vmatpush1.bf16.msra.mxu1 %v15511_v11 }
 0xc41   : > { %3594 = vmatprep.mubr.bf16.mxu0 %v3459_v40  ;;  %14504 = vmatprep.subr.bf16.mxu1 %v17199_v3 }
 0xc42   : > { %3595 = vmatmul.mubr.bf16.vlgmr.msra.gmra.mxu0 %v3458_v45 }
 0xc43   : > { %14500 = vmatprep.mubr.msk.bf16.mxu0 %vm17201_vm0, %v17199_v3  ;;  %14485 = vmatpush3.bf16.msra.mxu0 %v15486_v50 }
 0xc44   : > { %14486 = vmatprep.subr.bf16.mxu0 %v17199_v3 }
 0xc47   : > { %14487 = vmatpush3.bf16.msra.mxu0 %v15490_v55 }
 0xc48   : > { %14488 = vmatprep.subr.bf16.mxu0 %v17199_v3 }
 0xc4b   : > { %14489 = vmatpush3.bf16.msra.mxu0 %v15494_v58 }
 0xc4c   : > { %14490 = vmatprep.subr.bf16.mxu0 %v17199_v3 }
 0xc4f   : > { %14491 = vmatpush3.bf16.msra.mxu0 %v15498_v61 }
 0xc50   : > { %14492 = vmatprep.subr.bf16.mxu0 %v17199_v3 }
 0xc53   : > { %14493 = vmatpush3.bf16.msra.mxu0 %v15502_v0 }
 0xc54   : > { %14494 = vmatprep.subr.bf16.mxu0 %v17199_v3 }
 0xc57   : > { %14495 = vmatpush3.bf16.msra.mxu0 %v15506_v5 }
 0xc58   : > { %14496 = vmatprep.subr.bf16.mxu0 %v17199_v3 }
 0xc5b   : > { %14497 = vmatpush3.bf16.msra.mxu0 %v15510_v9 }
 0xc5c   : > { %14498 = vmatprep.subr.bf16.mxu0 %v17199_v3 }
 0xc5f   : > { %14499 = vmatpush3.bf16.msra.mxu0 %v15514_v13 }
 0xc60   : > { %14520 = vmatprep.subr.bf16.mxu0 %v17199_v3 }
 0xcb8   : > { %v3686_v53 = vpop.xlane.xlu0 %3685 }
 0xcb9   : > { %v3687_v54 = vmul.f32 0.0078125, %v3686_v53 }
 0xcbb   : > { %v3688_v44 = vsub.f32 %v18019_v27, %v3687_v54 }
 0xcbd   : > { %v3689_v47 = vmul.f32 %v3688_v44, %v3688_v44 }
 0xcbf   : > { %3690 = vadd.xlane.f32.xlu1 %v3689_v47 }
 0xd02   : > { %v14041_v14 = vpop.f32.mrf.mxu0 }
 0xd04   : > { %v14042_v15 = vpop.f32.mrf.mxu0 }
 0xd05   : > { %v18058_v16 = vadd.f32 %v14042_v15, %v14041_v14 }
 0xd06   : > { %v14044_v17 = vpop.f32.mrf.mxu0 }
 0xd08   : > { %v14045_v18 = vpop.f32.mrf.mxu0 }
 0xd48   : > { %v3691_v19 = vpop.xlane.xlu1 %3690 }
 0xd49   : > { %v3692_v20 = vmul.f32 0.0078125, %v3691_v19 }
 0xd4b   : > { %v3693_v21 = vadd.f32 1e-05, %v3692_v20 }
 0xd4d   : > { %15912 = vrsqrt.f32 %v3693_v21 }
 0xd5a   : > { %v15913_v22 = vpop.eup %15912 }
 0xd5b   : > { %v3695_v24 = vmul.f32 %v15913_v22, %v3688_v44 }
 0xd5d   : > { %v3702_v28 = vmul.f32 %v13352_v23, %v3695_v24 }
 0xd5f   : > { %v3709_v29 = vadd.f32 %v13353_v26, %v3702_v28 }
 0xd61   : > { %v3764_v30 = vpack.c.bf16 %v3709_v29, %v3709_v29 }
 0xd63   : > { %3942 = vmatmul.mubr.bf16.vlgmr.msra.gmra.mxu1 %v3764_v30  ;;  %14501 = vmatmul.mubr.bf16.vlgmr.msra.gmra.mxu0 %v3764_v30 }
 0xd64   : > { %14508 = vmatprep.mubr.msk.bf16.mxu1 %vm17201_vm0, %v17199_v3  ;;  %14524 = vmatprep.mubr.msk.bf16.mxu0 %vm17201_vm0, %v17199_v3 }
 0xe23   : > { %v3943_v33 = vpop.f32.mrf.mxu1  ;;  %v18068_v35 = vpop.f32.mrf.mxu0 }
 0xe24   : > { %v3944_v46 = vadd.f32 %v3943_v33, %v3769_v36  ;;  %v3777_v33 = vrot.slane %v18064_v31, %v17910_v34 }
 0xe25   : > { %v3945_v37 = vpop.f32.mrf.mxu1  ;;  %v14502_v38 = vpop.f32.mrf.mxu0 }
 0xe26   : > { %v3946_v39 = vadd.f32 %v3945_v37, %v3773_v32  ;;  %v3990_v52 = vpack.c.bf16 %v3944_v46, %v3944_v46  ;;  %v3985_v36 = vadd.f32 %v18068_v35, %v3777_v33 }
 0xe27   : > { %v3947_v40 = vpop.f32.mrf.mxu1  ;;  %v3987_v45 = vpop.f32.mrf.mxu0 }
 0xe28   : > { %v3991_v49 = vpack.c.bf16 %v3946_v39, %v3946_v39  ;;  %v3992_v37 = vpack.c.bf16 %v3985_v36, %v3985_v36 }
 0xe29   : > { %v3948_v50 = vpop.f32.mrf.mxu1  ;;  %v14503_v51 = vpop.f32.mrf.mxu0 }
 0xe2a   : > { %4004 = vrot.lane.b32.xlu1 %v3991_v49, %s17204_s10  ;;  %4001 = vrot.lane.b32.xlu0 %v3991_v49, %s17203_s25 }
 0xe2e   : > { %4007 = vrot.lane.b32.xlu1 %v3991_v49, %s17202_s26  ;;  %3994 = vrot.lane.b32.xlu0 %v3990_v52, %s17203_s25 }
 0xe32   : > { %3996 = vrot.lane.b32.xlu0 %v3990_v52, %s17204_s10 }
 0xe36   : > { %3998 = vrot.lane.b32.xlu0 %v3990_v52, %s17202_s26 }
 0xe51   : > { %4020 = vxpose.xlu1.c.b16.start.end [1/1] (short) (narrow) %v3991_v49, 32 }
 0xe9c   : > { %v4005_v53 = vpop.permute.xlu1 %4004  ;;  %v4002_v54 = vpop.permute.xlu0 %4001 }
 0xe9d   : > { %4052 = vxpose.xlu1.c.b16.start.end [1/1] (short) (narrow) %v4005_v53, 32  ;;  %4036 = vxpose.xlu0.c.b16.start.end [1/1] (short) (narrow) %v4002_v54, 32 }
 0xea0   : > { %v4008_v44 = vpop.permute.xlu1 %4007  ;;  %v3995_v56 = vpop.permute.xlu0 %3994 }
 0xea2   : > { %4068 = vxpose.xlu1.c.b16.start.end [1/1] (short) (narrow) %v4008_v44, 32 }
 0xea4   : > { %v3997_v57 = vpop.permute.xlu0 %3996 }
 0xea8   : > { %v3999_v58 = vpop.permute.xlu0 %3998 }
 0xeb3   : > { %v4028_v47 = vpop.trf.xlu1 }
 0xeb7   : > { %v4029_v55 = vpop.trf.xlu1 }
 0xeb8   : > { %14505 = vmatpush3.bf16.msra.mxu1 %v4029_v55 }
 0xeb9   : > { %14506 = vmatprep.subr.bf16.mxu1 %v17199_v3 }
 0xebc   : > { %14507 = vmatpush3.bf16.msra.mxu1 %v4028_v47 }
 0xebd   : > { %14512 = vmatprep.subr.bf16.mxu1 %v17199_v3 }
 0xebf   : > { %14509 = vmatmul.mubr.msk.bf16.vlgmr.msra.gmra.mxu1 %vm2331_vm1, %v3990_v52 }
 0xec0   : > { %14516 = vmatprep.mubr.msk.bf16.mxu1 %vm17201_vm0, %v17199_v3 }
 0xeff   : > { %v4060_v59 = vpop.trf.xlu1  ;;  %v4044_v60 = vpop.trf.xlu0 }
 0xf03   : > { %v4061_v61 = vpop.trf.xlu1  ;;  %v4045_v62 = vpop.trf.xlu0 }
 0xf04   : > { %14513 = vmatpush3.bf16.msra.mxu1 %v4045_v62  ;;  %14521 = vmatpush3.bf16.msra.mxu0 %v4061_v61 }
 0xf05   : > { %14514 = vmatprep.subr.bf16.mxu1 %v17199_v3  ;;  %14522 = vmatprep.subr.bf16.mxu0 %v17199_v3 }
 0xf07   : > { %v4076_v63 = vpop.trf.xlu1 }
 0xf08   : > { %14515 = vmatpush3.bf16.msra.mxu1 %v4044_v60  ;;  %14523 = vmatpush3.bf16.msra.mxu0 %v4060_v59 }
 0xf09   : > { %14528 = vmatprep.subr.bf16.mxu1 %v17199_v3 }
 0xf0b   : > { %v4077_v0 = vpop.trf.xlu1  ;;  %14517 = vmatmul.mubr.msk.bf16.vlgmr.msra.gmra.mxu1 %vm2331_vm1, %v3995_v56  ;;  %14525 = vmatmul.mubr.msk.bf16.vlgmr.msra.gmra.mxu0 %vm2331_vm1, %v3997_v57 }
 0xf0c   : > { %14529 = vmatpush3.bf16.msra.mxu1 %v4077_v0  ;;  %14532 = vmatprep.mubr.msk.bf16.mxu1 %vm17201_vm0, %v17199_v3 }
 0xf0d   : > { %14530 = vmatprep.subr.bf16.mxu1 %v17199_v3 }
 0xf10   : > { %14531 = vmatpush3.bf16.msra.mxu1 %v4076_v63 }
 0xf13   : > { %14533 = vmatmul.mubr.msk.bf16.vlgmr.msra.gmra.mxu1 %vm2331_vm1, %v3999_v58 }
 0xf7f   : > { %v4121_v2 = vpop.f32.mrf.mxu1 }
 0xf80   : > { %v4256_v4 = vmul.f32 0.17677669, %v4121_v2 }
 0xf81   : > { %v14510_v5 = vpop.f32.mrf.mxu1 }
 0xf82   : > { %v4260_v7 = vsel %vm2508_vm2, %v4256_v4, -inf }
 0xf83   : > { %4261 = vmax.xlane.f32.xlu0 %v4260_v7  ;;  %v4124_v8 = vpop.f32.mrf.mxu1 }
 0xf85   : > { %v14511_v9 = vpop.f32.mrf.mxu1 }
 0xfcb   : > { %v4164_v10 = vpop.f32.mrf.mxu1  ;;  %v4207_v11 = vpop.f32.mrf.mxu0 }
 0xfcc   : > { %v4257_v13 = vmul.f32 0.17677669, %v4164_v10  ;;  %v4258_v14 = vmul.f32 0.17677669, %v4207_v11 }
 0xfcd   : > { %v14518_v15 = vpop.f32.mrf.mxu1  ;;  %v14526_v17 = vpop.f32.mrf.mxu0 }
 0xfce   : > { %v4263_v18 = vsel %vm2508_vm2, %v4257_v13, -inf  ;;  %v4266_v19 = vsel %vm2508_vm2, %v4258_v14, -inf }
 0xfcf   : > { %4264 = vmax.xlane.f32.xlu1 %v4263_v18  ;;  %v4167_v20 = vpop.f32.mrf.mxu1  ;;  %4267 = vmax.xlane.f32.xlu0 %v4266_v19  ;;  %v4210_v21 = vpop.f32.mrf.mxu0 }
 0xfd1   : > { %v14519_v22 = vpop.f32.mrf.mxu1  ;;  %v14527_v23 = vpop.f32.mrf.mxu0 }
 0xfd3   : > { %v4250_v24 = vpop.f32.mrf.mxu1 }
 0xfd4   : > { %v4259_v26 = vmul.f32 0.17677669, %v4250_v24 }
 0xfd5   : > { %v14534_v28 = vpop.f32.mrf.mxu1 }
 0xfd6   : > { %v4269_v29 = vsel %vm2508_vm2, %v4259_v26, -inf }
 0xfd7   : > { %4270 = vmax.xlane.f32.xlu1 %v4269_v29  ;;  %v4253_v30 = vpop.f32.mrf.mxu1 }
 0xfd9   : > { %v14535_v32 = vpop.f32.mrf.mxu1 }
 0xfe5   : > { %4011 = vrot.lane.b32.xlu0 %v3992_v37, %s17203_s25 }
 0xfe9   : > { %4017 = vrot.lane.b32.xlu0 %v3992_v37, %s17202_s26 }
0x100c   : > { %v4262_v38 = vpop.xlane.xlu0 %4261 }
0x100d   : > { %v4272_v39 = vsub.f32 %v4256_v4, %v4262_v38 }
0x100f   : > { %v4276_v40 = vmul.f32 1.442695, %v4272_v39 }
0x1011   : > { %15914 = vpow2.f32 %v4276_v40 }
0x101e   : > { %v15915_v45 = vpop.eup %15914 }
0x101f   : > { %v4284_v46 = vsel %vm2508_vm2, %v15915_v45, 0.0 }
0x1020   : > { %4285 = vadd.xlane.f32.xlu1 %v4284_v46 }
0x1058   : > { %v4265_v49 = vpop.xlane.xlu1 %4264  ;;  %v4268_v50 = vpop.xlane.xlu0 %4267 }
0x1059   : > { %v4273_v51 = vsub.f32 %v4257_v13, %v4265_v49  ;;  %v4274_v52 = vsub.f32 %v4258_v14, %v4268_v50 }
0x105b   : > { %v4278_v31 = vmul.f32 1.442695, %v4273_v51  ;;  %v4280_v53 = vmul.f32 1.442695, %v4274_v52 }
0x105c   : > { %v4012_v2 = vpop.permute.xlu0 %4011 }
0x105d   : > { %15916 = vpow2.f32 %v4278_v31 }
0x105e   : > { %15918 = vpow2.f32 %v4280_v53 }
0x1060   : > { %v4271_v55 = vpop.xlane.xlu1 %4270  ;;  %v4018_v4 = vpop.permute.xlu0 %4017 }
0x1061   : > { %v4275_v56 = vsub.f32 %v4259_v26, %v4271_v55  ;;  %v15515_v55 = vld [vmem:[%s19176_s6 + $0x78] sm:$0xff]  }
0x1063   : > { %v4282_v57 = vmul.f32 1.442695, %v4275_v56  ;;  %v15516_v56 = vld [vmem:[%s19176_s6 + $0x70] sm:$0xff]  }
0x1065   : > { %15920 = vpow2.f32 %v4282_v57  ;;  %v15517_v57 = vld [vmem:[%s19176_s6 + $0x68] sm:$0xff]  }
0x106a   : > { %v15917_v35 = vpop.eup %15916 }
0x106b   : > { %v15919_v54 = vpop.eup %15918  ;;  %v4287_v44 = vsel %vm2508_vm2, %v15917_v35, 0.0 }
0x106c   : > { %4288 = vadd.xlane.f32.xlu1 %v4287_v44  ;;  %v4290_v47 = vsel %vm2508_vm2, %v15919_v54, 0.0 }
0x106d   : > { %4291 = vadd.xlane.f32.xlu0 %v4290_v47 }
0x1072   : > { %v15921_v58 = vpop.eup %15920 }
0x1073   : > { %v4293_v59 = vsel %vm2508_vm2, %v15921_v58, 0.0 }
0x107d   : > { %4014 = vrot.lane.b32.xlu1 %v3992_v37, %s17204_s10 }
0x109a   : > { %4308 = vxpose.xlu0.c.b16.start.end [1/1] (short) (narrow) %v3992_v37, 32 }
0x10a1   : > { %4294 = vadd.xlane.f32.xlu1 %v4293_v59  ;;  %v15519_v59 = vld [vmem:[%s19176_s6 + $0x58] sm:$0xff]  }
0x10a9   : > { %v4286_v60 = vpop.xlane.xlu1 %4285 }
0x10aa   : > { %15922 = vrcp.f32 %v4286_v60  ;;  %v15520_v60 = vld [vmem:[%s19176_s6 + $0x50] sm:$0xff]  }
0x10b7   : > { %v15923_v61 = vpop.eup %15922 }
0x10b8   : > { %v4297_v62 = vmul.f32 %v15923_v61, %v15915_v45 }
0x10ba   : > { %v4304_v63 = vpack.c.bf16 %v4297_v62, %v4297_v62 }
0x10bc   : > { %14996 = vmatprep.subr.msk.bf16.mxu0 %vm2508_vm2, %v4304_v63  ;;  %v4379_v0 = vsel %vm2508_vm2, %v4304_v63, 0 }
0x10bd   : > { %14537 = vmatpush3.bf16.xpose.msra.mxu0 %v4379_v0 }
0x10ce   : > { %4324 = vxpose.xlu1.c.b16.start.end [1/1] (short) (narrow) %v4012_v2, 32 }
0x10f5   : > { %v4289_v5 = vpop.xlane.xlu1 %4288 }
0x10f6   : > { %15924 = vrcp.f32 %v4289_v5  ;;  %v4292_v7 = vpop.xlane.xlu0 %4291 }
0x10f7   : > { %15926 = vrcp.f32 %v4292_v7 }
0x10f9   : > { %v4015_v8 = vpop.permute.xlu1 %4014 }
0x10fa   : > { %4340 = vxpose.xlu0.c.b16.start.end [1/1] (short) (narrow) %v4015_v8, 32 }
0x10fc   : > { %v4316_v9 = vpop.trf.xlu0 }
0x10fd   : > { %14538 = vmatprep.mubr.msk.bf16.mxu0 %vm2508_vm2, %v4316_v9 }
0x10ff   : > { %4356 = vxpose.xlu0.c.b16.start.end [1/1] (short) (narrow) %v4018_v4, 32 }
0x1100   : > { %v4317_v10 = vpop.trf.xlu0 }
0x1101   : > { %14539 = vmatmul.mubr.msk.bf16.vlgmr.msra.gmra.mxu0 %vm2508_vm2, %v4317_v10 }
0x1103   : > { %v15925_v11 = vpop.eup %15924 }
0x1104   : > { %v15927_v13 = vpop.eup %15926  ;;  %v4299_v14 = vmul.f32 %v15925_v11, %v15917_v35 }
0x1105   : > { %v4301_v15 = vmul.f32 %v15927_v13, %v15919_v54 }
0x1106   : > { %v4305_v17 = vpack.c.bf16 %v4299_v14, %v4299_v14 }
0x1107   : > { %v4306_v18 = vpack.c.bf16 %v4301_v15, %v4301_v15 }
0x1108   : > { %14997 = vmatprep.subr.msk.bf16.mxu1 %vm2508_vm2, %v4305_v17  ;;  %v4437_v19 = vsel %vm2508_vm2, %v4305_v17, 0 }
0x1109   : > { %14998 = vmatprep.subr.msk.bf16.mxu0 %vm2508_vm2, %v4306_v18  ;;  %14543 = vmatpush3.bf16.xpose.msra.mxu1 %v4437_v19  ;;  %v4495_v20 = vsel %vm2508_vm2, %v4306_v18, 0  ;;  %v15521_v18 = vld [vmem:[%s19176_s6 + $0x48] sm:$0xff]  }
0x110a   : > { %14549 = vmatpush3.bf16.xpose.msra.mxu0 %v4495_v20 }
0x110b   : > { %14560 = vmatprep.subr.bf16.mxu0 %v17199_v3 }
0x112a   : > { %v4295_v21 = vpop.xlane.xlu1 %4294 }
0x112b   : > { %15928 = vrcp.f32 %v4295_v21 }
0x1130   : > { %v4332_v22 = vpop.trf.xlu1 }
0x1131   : > { %14544 = vmatprep.mubr.msk.bf16.mxu1 %vm2508_vm2, %v4332_v22 }
0x1134   : > { %v4333_v23 = vpop.trf.xlu1 }
0x1135   : > { %14545 = vmatmul.mubr.msk.bf16.vlgmr.msra.gmra.mxu1 %vm2508_vm2, %v4333_v23 }
0x1138   : > { %v15929_v24 = vpop.eup %15928 }
0x1139   : > { %v4303_v26 = vmul.f32 %v15929_v24, %v15921_v58  ;;  %v15518_v58 = vld [vmem:[%s19176_s6 + $0x60] sm:$0xff]  }
0x113b   : > { %v4307_v28 = vpack.c.bf16 %v4303_v26, %v4303_v26 }
0x113d   : > { %14999 = vmatprep.subr.msk.bf16.mxu1 %vm2508_vm2, %v4307_v28  ;;  %v4553_v29 = vsel %vm2508_vm2, %v4307_v28, 0 }
0x113e   : > { %14555 = vmatpush3.bf16.xpose.msra.mxu1 %v4553_v29  ;;  %v15522_v29 = vld [vmem:[%s19176_s6 + $0x40] sm:$0xff]  }
0x115c   : > { %v4348_v30 = vpop.trf.xlu0 }
0x115d   : > { %14550 = vmatprep.mubr.msk.bf16.mxu0 %vm2508_vm2, %v4348_v30 }
0x1160   : > { %v4349_v32 = vpop.trf.xlu0 }
0x1161   : > { %14551 = vmatmul.mubr.msk.bf16.vlgmr.msra.gmra.mxu0 %vm2508_vm2, %v4349_v32 }
0x1162   : > { %14576 = vmatprep.mubr.msk.bf16.mxu0 %vm17201_vm0, %v17199_v3  ;;  %14561 = vmatpush3.bf16.msra.mxu0 %v15515_v55 }
0x1163   : > { %14562 = vmatprep.subr.bf16.mxu0 %v17199_v3 }
0x1164   : > { %v4364_v33 = vpop.trf.xlu0 }
0x1165   : > { %14556 = vmatprep.mubr.msk.bf16.mxu1 %vm2508_vm2, %v4364_v33 }
0x1166   : > { %14563 = vmatpush3.bf16.msra.mxu0 %v15516_v56 }
0x1167   : > { %14564 = vmatprep.subr.bf16.mxu0 %v17199_v3 }
0x1168   : > { %v4365_v36 = vpop.trf.xlu0 }
0x1169   : > { %14557 = vmatmul.mubr.msk.bf16.vlgmr.msra.gmra.mxu1 %vm2508_vm2, %v4365_v36 }
0x116a   : > { %5151 = vmatprep.mubr.bf16.mxu1 %v17200_v25  ;;  %14565 = vmatpush3.bf16.msra.mxu0 %v15517_v57 }
0x116b   : > { %14566 = vmatprep.subr.bf16.mxu0 %v17199_v3 }
0x116e   : > { %14567 = vmatpush3.bf16.msra.mxu0 %v15518_v58  ;;  %v13440_v58 = vld [vmem:[#allocation8 + $0x1] ss:$0 sm:$0xff] }
0x116f   : > { %14568 = vmatprep.subr.bf16.mxu0 %v17199_v3 }
0x1172   : > { %14569 = vmatpush3.bf16.msra.mxu0 %v15519_v59 }
0x1173   : > { %14570 = vmatprep.subr.bf16.mxu0 %v17199_v3 }
0x1176   : > { %14571 = vmatpush3.bf16.msra.mxu0 %v15520_v60 }
0x1177   : > { %14572 = vmatprep.subr.bf16.mxu0 %v17199_v3 }
0x117a   : > { %14573 = vmatpush3.bf16.msra.mxu0 %v15521_v18  ;;  %v15535_v18 = vld [vmem:[%s19177_s28 + $0xb0] ss:$8 sps:$4 sm:$0xff]  }
0x117b   : > { %14574 = vmatprep.subr.bf16.mxu0 %v17199_v3 }
0x117e   : > { %14575 = vmatpush3.bf16.msra.mxu0 %v15522_v29 }
0x11c1   : > { %v14540_v37 = vpop.f32.mrf.mxu0 }
0x11c3   : > { %v4415_v38 = vpop.f32.mrf.mxu0 }
0x11c4   : > { %4604 = vxpose.xlu1.b32.start [1/4] (short) (narrow) %v4415_v38, 8 }
0x11c5   : > { %v14541_v39 = vpop.f32.mrf.mxu0 }
0x11c7   : > { %v4418_v40 = vpop.f32.mrf.mxu0 }
0x11c8   : > { %4605 = vxpose.xlu1.b32.cont [2/4] (short) (narrow) %v4418_v40, 8 }
0x11cc   : > { %4606 = vxpose.xlu1.b32.cont [3/4] (short) (narrow) %v14540_v37, 8 }
0x11d0   : > { %4607 = vxpose.xlu1.b32.end [4/4] (short) (narrow) %v14541_v39, 8 }
0x11f5   : > { %v14546_v45 = vpop.f32.mrf.mxu1 }
0x11f7   : > { %v4473_v46 = vpop.f32.mrf.mxu1 }
0x11f8   : > { %4636 = vxpose.xlu0.b32.start [1/4] (short) (narrow) %v4473_v46, 8 }
0x11f9   : > { %v14547_v49 = vpop.f32.mrf.mxu1 }
0x11fb   : > { %v4476_v50 = vpop.f32.mrf.mxu1 }
0x11fc   : > { %4637 = vxpose.xlu0.b32.cont [2/4] (short) (narrow) %v4476_v50, 8 }
0x1200   : > { %4638 = vxpose.xlu0.b32.cont [3/4] (short) (narrow) %v14546_v45, 8 }
0x1204   : > { %4639 = vxpose.xlu0.b32.end [4/4] (short) (narrow) %v14547_v49, 8 }
0x1221   : > { %v14552_v51 = vpop.f32.mrf.mxu0 }
0x1223   : > { %v4531_v52 = vpop.f32.mrf.mxu0 }
0x1224   : > { %4668 = vxpose.xlu0.b32.start [1/4] (short) (narrow) %v4531_v52, 8 }
0x1225   : > { %v14553_v31 = vpop.f32.mrf.mxu0 }
0x1227   : > { %v4534_v53 = vpop.f32.mrf.mxu0 }
0x1228   : > { %4669 = vxpose.xlu0.b32.cont [2/4] (short) (narrow) %v4534_v53, 8 }
0x1229   : > { %v14558_v35 = vpop.f32.mrf.mxu1 }
0x122b   : > { %v4589_v54 = vpop.f32.mrf.mxu1 }
0x122c   : > { %4700 = vxpose.xlu1.b32.start [1/4] (short) (narrow) %v4589_v54, 8  ;;  %4670 = vxpose.xlu0.b32.cont [3/4] (short) (narrow) %v14552_v51, 8 }
0x122d   : > { %v14559_v44 = vpop.f32.mrf.mxu1 }
0x122f   : > { %v4592_v47 = vpop.f32.mrf.mxu1 }
0x1230   : > { %4701 = vxpose.xlu1.b32.cont [2/4] (short) (narrow) %v4592_v47, 8  ;;  %4671 = vxpose.xlu0.b32.end [4/4] (short) (narrow) %v14553_v31, 8 }
0x1234   : > { %4702 = vxpose.xlu1.b32.cont [3/4] (short) (narrow) %v14558_v35, 8 }
0x1238   : > { %4703 = vxpose.xlu1.b32.end [4/4] (short) (narrow) %v14559_v44, 8 }
0x1240   : > { %v4620_v62 = vpop.trf.xlu1 }
0x1274   : > { %v4652_v61 = vpop.trf.xlu0 }
0x12a0   : > { %v4684_v63 = vpop.trf.xlu0 }
0x12a1   : > { %v4732_v0 = vcombine.low %v4620_v62, %v4684_v63  ;;  %v4733_v2 = vcombine.high %v4620_v62, %v4684_v63 }
0x12a3   : > { %v4740_v8 = vrot.slane %v4732_v0, %v17955_v6  ;;  %v4747_v9 = vrot.slane %v4733_v2, %v17955_v6  ;;  %v15523_v2 = vld [vmem:[%s19177_s28 + $0xf0] ss:$8 sps:$4 sm:$0xff]  }
0x12a8   : > { %v4716_v4 = vpop.trf.xlu1 }
0x12a9   : > { %v4748_v5 = vcombine.low %v4652_v61, %v4716_v4  ;;  %v4749_v7 = vcombine.high %v4652_v61, %v4716_v4  ;;  %v15525_v4 = vld [vmem:[%s19177_s28 + $0xf4] ss:$8 sps:$4 sm:$0xff]  }
0x12aa   : > { %5119 = vmatprep.subr.bf16.mxu1 %v15525_v4  ;;  %v15567_v4 = vld [vmem:[#allocation14 + $0xa0] sm:$0xff]  }
0x12ab   : > { %v4756_v10 = vrot.slane %v4748_v5, %v17955_v6  ;;  %v4763_v11 = vrot.slane %v4749_v7, %v17955_v6  ;;  %v15528_v5 = vld [vmem:[%s19177_s28 + $0xe4] ss:$8 sps:$4 sm:$0xff]   ;;  %5120 = vmatpush1.bf16.msra.mxu1 %v15523_v2  ;;  %v15526_v7 = vld [vmem:[%s19177_s28 + $0xe0] ss:$8 sps:$4 sm:$0xff]  }
0x12ac   : > { %5121 = vmatprep.subr.bf16.mxu1 %v15528_v5  ;;  %v15566_v2 = vld [vmem:[#allocation14 + $0xe0] sm:$0xff]   ;;  %v15568_v5 = vld [vmem:[#allocation14 + $0xd8] sm:$0xff]  }
0x12ad   : > { %v4764_v13 = vcombine.low %v4740_v8, %v4756_v10  ;;  %v4765_v14 = vcombine.high %v4740_v8, %v4756_v10  ;;  %v4780_v15 = vcombine.low %v4747_v9, %v4763_v11  ;;  %v4781_v17 = vcombine.high %v4747_v9, %v4763_v11  ;;  %v15531_v11 = vld [vmem:[%s19177_s28 + $0xd4] ss:$8 sps:$4 sm:$0xff]  }
0x12af   : > { %v4772_v19 = vrot.slane %v4764_v13, %v17958_v12  ;;  %v4779_v20 = vrot.slane %v4765_v14, %v17958_v12  ;;  %v4788_v21 = vrot.slane %v4780_v15, %v17958_v12  ;;  %v4795_v22 = vrot.slane %v4781_v17, %v17958_v12  ;;  %5122 = vmatpush1.bf16.msra.mxu1 %v15526_v7  ;;  %v15529_v13 = vld [vmem:[%s19177_s28 + $0xd0] ss:$8 sps:$4 sm:$0xff]   ;;  %v15532_v14 = vld [vmem:[%s19177_s28 + $0xc0] ss:$8 sps:$4 sm:$0xff]   ;;  %v15534_v15 = vld [vmem:[%s19177_s28 + $0xc4] ss:$8 sps:$4 sm:$0xff]  }
0x12b0   : > { %5123 = vmatprep.subr.bf16.mxu1 %v15531_v11  ;;  %v15537_v17 = vld [vmem:[%s19177_s28 + $0xb4] ss:$8 sps:$4 sm:$0xff]   ;;  %v15569_v7 = vld [vmem:[#allocation14 + $0x98] sm:$0xff]   ;;  %v15574_v11 = vld [vmem:[#allocation14 + $0xc0] sm:$0xff]  }
0x12b1   : > { %v4800_v23 = vcombine.low %v4772_v19, %v4779_v20  ;;  %v13438_v24 = vcombine.high %v4772_v19, %v4779_v20  ;;  %v4816_v26 = vcombine.low %v4788_v21, %v4795_v22  ;;  %v13439_v28 = vcombine.high %v4788_v21, %v4795_v22  ;;  %v15540_v19 = vld [vmem:[%s19177_s28 + $0xa4] ss:$8 sps:$4 sm:$0xff]   ;;  %v15538_v20 = vld [vmem:[%s19177_s28 + $0xa0] ss:$8 sps:$4 sm:$0xff]   ;;  %v15543_v21 = vld [vmem:[%s19177_s28 + $0x94] ss:$8 sps:$4 sm:$0xff]  }
0x12b2   : > { %v15541_v22 = vld [vmem:[%s19177_s28 + $0x90] ss:$8 sps:$4 sm:$0xff]  }
0x12b3   : > { %v4807_v30 = vrot.slane %v4800_v23, %v17955_v6  ;;  %v4815_v32 = vrot.slane %v13438_v24, %v17955_v6  ;;  %v4823_v33 = vrot.slane %v4816_v26, %v17955_v6  ;;  %v4831_v36 = vrot.slane %v13439_v28, %v17955_v6  ;;  %5124 = vmatpush1.bf16.msra.mxu1 %v15529_v13  ;;  %v15546_v23 = vld [vmem:[%s19177_s28 + $0x84] ss:$8 sps:$4 sm:$0xff]   ;;  %v15544_v24 = vld [vmem:[%s19177_s28 + $0x80] ss:$8 sps:$4 sm:$0xff]  }
0x12b4   : > { %5125 = vmatprep.subr.bf16.mxu1 %v15534_v15  ;;  %v15575_v13 = vld [vmem:[#allocation14 + $0x80] sm:$0xff]  }
0x12b5   : > { %v4833_v37 = vcombine.high %v4807_v30, %v4815_v32  ;;  %v4849_v38 = vcombine.high %v4823_v33, %v4831_v36  ;;  %v4832_v39 = vcombine.low %v4807_v30, %v4815_v32  ;;  %v4848_v40 = vcombine.low %v4823_v33, %v4831_v36  ;;  %v5358_v30 = vld [vmem:[%s1926_s11] sm:$0xff]  ;;  %v13449_v33 = vld [vmem:[#allocation10 + $0x1] ss:$0 sm:$0xff]  ;;  %s12670_s11 = scalar_lea.sflag [#allocation4], %s1911_s16 }
0x12b7   : > { %v4847_v45 = vrot.slane %v4833_v37, %v17958_v12  ;;  %v4863_v46 = vrot.slane %v4849_v38, %v17958_v12  ;;  %v4840_v49 = vrot.slane %v4832_v39, %v17958_v12  ;;  %v4856_v50 = vrot.slane %v4848_v40, %v17958_v12  ;;  %5126 = vmatpush1.bf16.msra.mxu1 %v15532_v14  ;;  %v13450_v37 = vld [vmem:[#allocation11 + $0x1] ss:$0 sm:$0xff]  ;;  %v5026_v14 = vld [vmem:[#allocation13 + $0x2] sm:$0x3] }
0x12b8   : > { %5127 = vmatprep.subr.bf16.mxu1 %v15537_v17  ;;  %v5385_v38 = vcombine.high %v5358_v30, %v5358_v30  ;;  %v5032_v15 = vrot.slane %v5026_v14, %v17881_v48  ;;  %v5036_v17 = vrot.slane %v5026_v14, %v17872_v43  ;;  %v15591_v14 = vld [vmem:[%s19175_s1 + $0x1e8] ss:$12 sps:$4 sm:$0xff]  }
0x12b9   : > { %v4866_v51 = vcombine.low %v4847_v45, %v4863_v46  ;;  %v4865_v52 = vcombine.high %v4840_v49, %v4856_v50  ;;  %v4864_v31 = vcombine.low %v4840_v49, %v4856_v50  ;;  %v4867_v53 = vcombine.high %v4847_v45, %v4863_v46  ;;  %v15547_v45 = vld [vmem:[#allocation20 + $0x38] sm:$0xff]   ;;  %v15548_v50 = vld [vmem:[#allocation20 + $0x30] sm:$0xff]  }
0x12ba   : > { %v5388_v46 = vpack.c.bf16 %v5385_v38, %v5385_v38 }
0x12bb   : > { %4873 = vrot.lane.b32.xlu1 %v4866_v51, %s17204_s10  ;;  %4869 = vrot.lane.b32.xlu0 %v4865_v52, %s17202_s26  ;;  %v15549_v51 = vld [vmem:[#allocation20 + $0x28] sm:$0xff]   ;;  %v15550_v52 = vld [vmem:[#allocation20 + $0x20] sm:$0xff]  }
0x12bc   : > { %5128 = vmatpush1.bf16.msra.mxu1 %v15535_v18 }
0x12bd   : > { %5129 = vmatprep.subr.bf16.mxu1 %v15540_v19 }
0x12bf   : > { %4877 = vrot.lane.b32.xlu1 %v4867_v53, %s17203_s25  ;;  %v15552_v53 = vld [vmem:[#allocation20 + $0x10] sm:$0xff]  }
0x12c0   : > { %5130 = vmatpush1.bf16.msra.mxu1 %v15538_v20 }
0x12c1   : > { %5131 = vmatprep.subr.bf16.mxu1 %v15543_v21 }
0x12c4   : > { %5132 = vmatpush1.bf16.msra.mxu1 %v15541_v22 }
0x12c5   : > { %5133 = vmatprep.subr.bf16.mxu1 %v15546_v23 }
0x12c8   : > { %5134 = vmatpush1.bf16.msra.mxu1 %v15544_v24 }
0x12c9   : > { %5464 = vmatprep.subr.bf16.mxu1 %v17200_v25 }
0x132d   : > { %v4874_v35 = vpop.permute.xlu1 %4873  ;;  %v4870_v54 = vpop.permute.xlu0 %4869 }
0x132e   : > { %v4880_v44 = vsel %vm2331_vm1, %v4864_v31, %v4870_v54  ;;  %v15551_v31 = vld [vmem:[#allocation20 + $0x18] sm:$0xff]   ;;  %v15554_v54 = vld [vmem:[#allocation20] sm:$0xff]  }
0x132f   : > { %v4881_v55 = vsel %vm3130_vm3, %v4880_v44, %v4874_v35  ;;  %v15553_v35 = vld [vmem:[#allocation20 + $0x8] sm:$0xff]   ;;  %v15555_v44 = vld [vmem:[#allocation20 + $0x58] sm:$0xff]  }
0x1331   : > { %v4878_v47 = vpop.permute.xlu1 %4877 }
0x1332   : > { %v4882_v56 = vsel %vm3132_vm4, %v4881_v55, %v4878_v47  ;;  %v15556_v47 = vld [vmem:[#allocation20 + $0x50] sm:$0xff]   ;;  %v15557_v55 = vld [vmem:[#allocation20 + $0x48] sm:$0xff]  }
0x1333   : > { %v4883_v57 = vpack.c.bf16 %v4882_v56, %v4882_v56  ;;  %v15558_v56 = vld [vmem:[#allocation20 + $0x40] sm:$0xff]  }
0x1335   : > { %14577 = vmatmul.mubr.bf16.vlgmr.msra.gmra.mxu0 %v4883_v57  ;;  %v5387_v57 = vpack.c.bf16 %v5358_v30, %v5358_v30 }
0x13f5   : > { %v4972_v59 = vpop.f32.mrf.mxu0 }
0x13f6   : > { %v4973_v60 = vadd.f32 %v13440_v58, %v4972_v59  ;;  %v15560_v58 = vld [vmem:[#allocation14 + $0xf8] sm:$0xff]  }
0x13f7   : > { %v14578_v61 = vpop.f32.mrf.mxu0  ;;  %v15561_v59 = vld [vmem:[#allocation14 + $0xb8] sm:$0xff]   ;;  %14094 = vmatprep.subr.bf16.mxu0 %v15560_v58  ;;  %v15576_v58 = vld [vmem:[%s19175_s1 + $0x228] ss:$12 sps:$4 sm:$0xff]  }
0x13f8   : > { %v18164_v62 = vadd.f32 %v4973_v60, %v18019_v27  ;;  %14095 = vmatpush3.bf16.msra.mxu0 %v15561_v59  ;;  %v15562_v60 = vld [vmem:[#allocation14 + $0xf0] sm:$0xff]  }
0x13f9   : > { %v4975_v63 = vpop.f32.mrf.mxu0  ;;  %v15563_v61 = vld [vmem:[#allocation14 + $0xb0] sm:$0xff]   ;;  %14096 = vmatprep.subr.bf16.mxu0 %v15562_v60 }
0x13fa   : > { %4983 = vadd.xlane.f32.xlu1 %v18164_v62  ;;  %v15564_v63 = vld [vmem:[#allocation14 + $0xe8] sm:$0xff]   ;;  %v15578_v59 = vld [vmem:[%s19175_s1 + $0x22c] ss:$12 sps:$4 sm:$0xff]  }
0x13fb   : > { %v14579_v0 = vpop.f32.mrf.mxu0  ;;  %v15579_v60 = vld [vmem:[%s19175_s1 + $0x230] ss:$12 sps:$4 sm:$0xff]  }
0x13fc   : > { %14097 = vmatpush3.bf16.msra.mxu0 %v15563_v61  ;;  %v15565_v0 = vld [vmem:[#allocation14 + $0xa8] sm:$0xff]  }
0x13fd   : > { %14098 = vmatprep.subr.bf16.mxu0 %v15564_v63  ;;  %v15582_v61 = vld [vmem:[%s19175_s1 + $0x214] ss:$12 sps:$4 sm:$0xff]   ;;  %v15583_v63 = vld [vmem:[%s19175_s1 + $0x218] ss:$12 sps:$4 sm:$0xff]  }
0x1400   : > { %14099 = vmatpush3.bf16.msra.mxu0 %v15565_v0  ;;  %v15580_v0 = vld [vmem:[%s19175_s1 + $0x210] ss:$12 sps:$4 sm:$0xff]  }
0x1401   : > { %14100 = vmatprep.subr.bf16.mxu0 %v15566_v2 }
0x1404   : > { %14101 = vmatpush3.bf16.msra.mxu0 %v15567_v4 }
0x1405   : > { %14102 = vmatprep.subr.bf16.mxu0 %v15568_v5 }
0x1408   : > { %14103 = vmatpush3.bf16.msra.mxu0 %v15569_v7 }
0x1483   : > { %v4984_v27 = vpop.xlane.xlu1 %4983 }
0x1484   : > { %v4985_v8 = vmul.f32 0.0078125, %v4984_v27  ;;  %v15570_v27 = vld [vmem:[#allocation14 + $0xd0] sm:$0xff]  }
0x1485   : > { %14104 = vmatprep.subr.bf16.mxu0 %v15570_v27 }
0x1486   : > { %v4986_v9 = vsub.f32 %v18164_v62, %v4985_v8  ;;  %v15571_v8 = vld [vmem:[#allocation14 + $0x90] sm:$0xff]  }
0x1487   : > { %14105 = vmatpush3.bf16.msra.mxu0 %v15571_v8  ;;  %v15586_v8 = vld [vmem:[%s19175_s1 + $0x1fc] ss:$12 sps:$4 sm:$0xff]  }
0x1488   : > { %v4987_v10 = vmul.f32 %v4986_v9, %v4986_v9 }
0x148a   : > { %4988 = vadd.xlane.f32.xlu0 %v4987_v10  ;;  %v15573_v10 = vld [vmem:[#allocation14 + $0x88] sm:$0xff]  }
0x1513   : > { %v4989_v26 = vpop.xlane.xlu0 %4988 }
0x1514   : > { %v4990_v28 = vmul.f32 0.0078125, %v4989_v26 }
0x1516   : > { %v4991_v29 = vadd.f32 1e-05, %v4990_v28 }
0x1518   : > { %15930 = vrsqrt.f32 %v4991_v29 }
0x1525   : > { %v15931_v32 = vpop.eup %15930 }
0x1526   : > { %v4993_v36 = vmul.f32 %v15931_v32, %v4986_v9  ;;  %v15572_v9 = vld [vmem:[#allocation14 + $0xc8] sm:$0xff]  }
0x1527   : > { %14106 = vmatprep.subr.bf16.mxu0 %v15572_v9  ;;  %v15584_v9 = vld [vmem:[%s19175_s1 + $0x1f8] ss:$12 sps:$4 sm:$0xff]  }
0x1528   : > { %v5000_v39 = vmul.f32 %v13449_v33, %v4993_v36  ;;  %14107 = vmatpush3.bf16.msra.mxu0 %v15573_v10  ;;  %v15587_v10 = vld [vmem:[%s19175_s1 + $0x200] ss:$12 sps:$4 sm:$0xff]  }
0x1529   : > { %14108 = vmatprep.subr.bf16.mxu0 %v15574_v11  ;;  %v15588_v11 = vld [vmem:[%s19175_s1 + $0x1e0] ss:$12 sps:$4 sm:$0xff]  }
0x152a   : > { %v5007_v40 = vadd.f32 %v13450_v37, %v5000_v39 }
0x152c   : > { %v5027_v49 = vpack.c.bf16 %v5007_v40, %v5007_v40  ;;  %14109 = vmatpush3.bf16.msra.mxu0 %v15575_v13  ;;  %v15590_v13 = vld [vmem:[%s19175_s1 + $0x1e4] ss:$12 sps:$4 sm:$0xff]  }
0x152d   : > { %5735 = vmatprep.subr.bf16.mxu0 %v15578_v59 }
0x152e   : > { %5152 = vmatmul.mubr.bf16.vlgmr.msra.gmra.mxu1 %v5027_v49 }
0x152f   : > { %5465 = vmatpush1.bf16.msra.mxu1 %v15547_v45  ;;  %13512 = vmatprep.mubr.msk.bf16.mxu1 %vm3130_vm3, %v5388_v46 }
0x1530   : > { %5466 = vmatprep.subr.bf16.mxu1 %v17200_v25 }
0x1533   : > { %5467 = vmatpush1.bf16.msra.mxu1 %v15548_v50 }
0x1534   : > { %5468 = vmatprep.subr.bf16.mxu1 %v17200_v25 }
0x1537   : > { %5469 = vmatpush1.bf16.msra.mxu1 %v15549_v51 }
0x1538   : > { %5470 = vmatprep.subr.bf16.mxu1 %v17200_v25 }
0x153b   : > { %5471 = vmatpush1.bf16.msra.mxu1 %v15550_v52 }
0x153c   : > { %5472 = vmatprep.subr.bf16.mxu1 %v17200_v25 }
0x153f   : > { %5473 = vmatpush1.bf16.msra.mxu1 %v15551_v31 }
0x1540   : > { %5474 = vmatprep.subr.bf16.mxu1 %v17200_v25 }
0x1543   : > { %5475 = vmatpush1.bf16.msra.mxu1 %v15552_v53 }
0x1544   : > { %5476 = vmatprep.subr.bf16.mxu1 %v17200_v25 }
0x1547   : > { %5477 = vmatpush1.bf16.msra.mxu1 %v15553_v35  ;;  %v5383_v35 = vld [vmem:[#allocation22] sm:$0xf] }
0x1548   : > { %5478 = vmatprep.subr.bf16.mxu1 %v17200_v25 }
0x154b   : > { %5479 = vmatpush1.bf16.msra.mxu1 %v15554_v54 }
0x154c   : > { %5488 = vmatprep.subr.bf16.mxu1 %v17200_v25 }
0x154f   : > { %5489 = vmatpush2.bf16.msra.mxu1 %v15555_v44 }
0x1550   : > { %5490 = vmatprep.subr.bf16.mxu1 %v17200_v25 }
0x1553   : > { %5491 = vmatpush2.bf16.msra.mxu1 %v15556_v47 }
0x1554   : > { %5492 = vmatprep.subr.bf16.mxu1 %v17200_v25 }
0x1557   : > { %5493 = vmatpush2.bf16.msra.mxu1 %v15557_v55 }
0x1558   : > { %5494 = vmatprep.subr.bf16.mxu1 %v17200_v25 }
0x155b   : > { %5495 = vmatpush2.bf16.msra.mxu1 %v15558_v56 }
0x155c   : > { %14580 = vmatprep.subr.bf16.mxu1 %v17199_v3 }
0x155e   : > { %5497 = vmatmul.mubr.bf16.vlgmr.msra.gmra.mxu1 %v5387_v57 }
0x155f   : > { %14596 = vmatprep.mubr.msk.bf16.mxu1 %vm17201_vm0, %v17199_v3  ;;  %14581 = vmatpush3.bf16.msra.mxu1 %v15579_v60 }
0x1560   : > { %14582 = vmatprep.subr.bf16.mxu1 %v17199_v3 }
0x1563   : > { %14583 = vmatpush3.bf16.msra.mxu1 %v15583_v63 }
0x1564   : > { %14584 = vmatprep.subr.bf16.mxu1 %v17199_v3 }
0x1567   : > { %14585 = vmatpush3.bf16.msra.mxu1 %v15587_v10 }
0x1568   : > { %14586 = vmatprep.subr.bf16.mxu1 %v17199_v3 }
0x156b   : > { %14587 = vmatpush3.bf16.msra.mxu1 %v15591_v14 }
0x156c   : > { %14588 = vmatprep.subr.bf16.mxu1 %v17199_v3 }
0x15ee   : > { %v5153_v18 = vpop.f32.mrf.mxu1 }
0x15ef   : > { %v5154_v19 = vadd.f32 %v5153_v18, %v5032_v15  ;;  %v15594_v15 = vld [vmem:[%s19175_s1 + $0x1cc] ss:$12 sps:$4 sm:$0xff]   ;;  %v15595_v18 = vld [vmem:[%s19175_s1 + $0x1d0] ss:$12 sps:$4 sm:$0xff]  }
0x15f0   : > { %v5155_v20 = vpop.f32.mrf.mxu1  ;;  %14589 = vmatpush3.bf16.msra.mxu1 %v15595_v18 }
0x15f1   : > { %v5160_v21 = vmul.f32 %v5154_v19, %v5154_v19  ;;  %v5156_v22 = vadd.f32 %v5155_v20, %v5036_v17  ;;  %v15592_v17 = vld [vmem:[%s19175_s1 + $0x1c8] ss:$12 sps:$4 sm:$0xff]   ;;  %v15596_v20 = vld [vmem:[%s19175_s1 + $0x1b0] ss:$12 sps:$4 sm:$0xff]   ;;  %14590 = vmatprep.subr.bf16.mxu1 %v17199_v3 }
0x15f2   : > { %v5157_v23 = vpop.f32.mrf.mxu1 }
0x15f3   : > { %v5162_v24 = vmul.f32 %v5160_v21, %v5154_v19  ;;  %v5161_v26 = vmul.f32 %v5156_v22, %v5156_v22  ;;  %v15599_v21 = vld [vmem:[%s19175_s1 + $0x1b8] ss:$12 sps:$4 sm:$0xff]  }
0x15f4   : > { %v5158_v28 = vpop.f32.mrf.mxu1  ;;  %14591 = vmatpush3.bf16.msra.mxu1 %v15599_v21  ;;  %v15600_v23 = vld [vmem:[%s19175_s1 + $0x198] ss:$12 sps:$4 sm:$0xff]  }
0x15f5   : > { %v5164_v29 = vmul.f32 0.044715, %v5162_v24  ;;  %v5163_v30 = vmul.f32 %v5161_v26, %v5156_v22  ;;  %v15603_v24 = vld [vmem:[%s19175_s1 + $0x1a0] ss:$12 sps:$4 sm:$0xff]   ;;  %14592 = vmatprep.subr.bf16.mxu1 %v17199_v3  ;;  %v15606_v26 = vld [vmem:[%s19175_s1 + $0x184] ss:$12 sps:$4 sm:$0xff]  }
0x15f6   : > { %v15604_v28 = vld [vmem:[%s19175_s1 + $0x180] ss:$12 sps:$4 sm:$0xff]  }
0x15f7   : > { %v5166_v32 = vadd.f32 %v5164_v29, %v5154_v19  ;;  %v5165_v33 = vmul.f32 0.044715, %v5163_v30  ;;  %v15607_v29 = vld [vmem:[%s19175_s1 + $0x188] ss:$12 sps:$4 sm:$0xff]  }
0x15f8   : > { %14593 = vmatpush3.bf16.msra.mxu1 %v15603_v24  ;;  %v13330_v30 = vld [vmem:[#allocation16] ss:$0 sm:$0xff] }
0x15f9   : > { %v5168_v36 = vmul.f32 0.7978846, %v5166_v32  ;;  %v5167_v37 = vadd.f32 %v5165_v33, %v5156_v22  ;;  %14594 = vmatprep.subr.bf16.mxu1 %v17199_v3  ;;  %v13483_v33 = vld [vmem:[#allocation16 + $0x1] ss:$0 sm:$0xff] }
0x15fb   : > { %15932 = vtanh.f32 %v5168_v36  ;;  %v5169_v38 = vmul.f32 0.7978846, %v5167_v37  ;;  %v3597_v37 = vadd.f32 %v18058_v16, %v13330_v30 }
0x15fc   : > { %14595 = vmatpush3.bf16.msra.mxu1 %v15607_v29 }
0x15fd   : > { %15934 = vtanh.f32 %v5169_v38  ;;  %14624 = vmatprep.subr.bf16.mxu1 %v17199_v3 }
0x1608   : > { %v15933_v39 = vpop.eup %15932 }
0x1609   : > { %v5172_v40 = vadd.f32 1.0, %v15933_v39 }
0x160a   : > { %v15935_v45 = vpop.eup %15934 }
0x160b   : > { %v5173_v46 = vadd.f32 1.0, %v15935_v45  ;;  %v5174_v49 = vmul.f32 0.5, %v5172_v40 }
0x160d   : > { %v5175_v50 = vmul.f32 0.5, %v5173_v46  ;;  %v5176_v51 = vmul.f32 %v5174_v49, %v5154_v19  ;;  %v15598_v19 = vld [vmem:[%s19175_s1 + $0x1b4] ss:$12 sps:$4 sm:$0xff]   ;;  %v18250_v46 = vadd.f32 %v3597_v37, %v17986_v1  ;;  %v18262_v1 = vld [vmem:[#allocation7 + $0x6] sm:$0x7] }
0x160e   : > { %v5595_v59 = vrot.slane %v18262_v1, %v17881_v48 }
0x160f   : > { %v5177_v52 = vmul.f32 %v5175_v50, %v5156_v22  ;;  %v5213_v53 = vpack.c.bf16 %v5176_v51, %v5176_v51  ;;  %v15602_v22 = vld [vmem:[%s19175_s1 + $0x19c] ss:$12 sps:$4 sm:$0xff]  }
0x1611   : > { %v5214_v31 = vpack.c.bf16 %v5177_v52, %v5177_v52 }
0x1613   : > { %5349 = vmatprep.mubr.bf16.mxu0 %v5214_v31 }
0x1614   : > { %5350 = vmatmul.mubr.bf16.vlgmr.msra.gmra.mxu0 %v5213_v53 }
0x1615   : > { %5767 = vmatprep.mubr.bf16.mxu0 %v17200_v25  ;;  %5736 = vmatpush1.bf16.msra.mxu0 %v15576_v58 }
0x1616   : > { %5737 = vmatprep.subr.bf16.mxu0 %v15582_v61 }
0x1619   : > { %5738 = vmatpush1.bf16.msra.mxu0 %v15580_v0 }
0x161a   : > { %5739 = vmatprep.subr.bf16.mxu0 %v15586_v8 }
0x161d   : > { %5740 = vmatpush1.bf16.msra.mxu0 %v15584_v9 }
0x161e   : > { %v5498_v54 = vpop.f32.mrf.mxu1  ;;  %5741 = vmatprep.subr.bf16.mxu0 %v15590_v13 }
0x161f   : > { %v18205_v44 = vadd.f32 %v5498_v54, %v5383_v35  ;;  %v13513_v35 = vld [vmem:[#allocation2 + $0x2] ss:$0 sm:$0xff]  ;;  %v13514_v54 = vld [vmem:[#allocation5 + $0x2] ss:$0 sm:$0xff] }
0x1620   : > { %v5500_v47 = vpop.f32.mrf.mxu1 }
0x1621   : > { %v5509_v55 = vsel %vm5508_vm5, %v18205_v44, 0.0  ;;  %5742 = vmatpush1.bf16.msra.mxu0 %v15588_v11 }
0x1622   : > { %v5501_v56 = vpop.f32.mrf.mxu1  ;;  %5510 = vadd.xlane.f32.xlu0 %v5509_v55  ;;  %5743 = vmatprep.subr.bf16.mxu0 %v15594_v15 }
0x1624   : > { %v5502_v57 = vpop.f32.mrf.mxu1 }
0x1625   : > { %5744 = vmatpush1.bf16.msra.mxu0 %v15592_v17 }
0x1626   : > { %5745 = vmatprep.subr.bf16.mxu0 %v15598_v19 }
0x1629   : > { %5746 = vmatpush1.bf16.msra.mxu0 %v15596_v20 }
0x162a   : > { %5747 = vmatprep.subr.bf16.mxu0 %v15602_v22 }
0x162d   : > { %5748 = vmatpush1.bf16.msra.mxu0 %v15600_v23 }
0x162e   : > { %5749 = vmatprep.subr.bf16.mxu0 %v15606_v26 }
0x1631   : > { %5750 = vmatpush1.bf16.msra.mxu0 %v15604_v28 }
0x1632   : > { %14600 = vmatprep.subr.bf16.mxu0 %v17199_v3 }
0x16ab   : > { %v5511_v2 = vpop.xlane.xlu0 %5510 }
0x16ac   : > { %v5512_v4 = vmul.f32 0.0078125, %v5511_v2 }
0x16ae   : > { %v18218_v5 = vsub.f32 %v18205_v44, %v5512_v4 }
0x16b0   : > { %v5514_v7 = vmul.f32 %v18218_v5, %v18218_v5 }
0x16b2   : > { %v5515_v27 = vsel %vm5508_vm5, %v5514_v7, 0.0 }
0x16b3   : > { %5516 = vadd.xlane.f32.xlu1 %v5515_v27 }
0x16d4   : > { %v14110_v32 = vpop.f32.mrf.mxu0 }
0x16d6   : > { %v14111_v36 = vpop.f32.mrf.mxu0 }
0x16d7   : > { %v14112_v38 = vadd.f32 %v14111_v36, %v14110_v32 }
0x16d8   : > { %v14113_v39 = vpop.f32.mrf.mxu0 }
0x16d9   : > { %v5352_v40 = vadd.f32 %v14112_v38, %v13483_v33 }
0x16da   : > { %v14114_v45 = vpop.f32.mrf.mxu0 }
0x16db   : > { %v18253_v49 = vadd.f32 %v5352_v40, %v18164_v62  ;;  %v5599_v62 = vrot.slane %v18262_v1, %v17872_v43 }
0x16dd   : > { %v7137_v50 = vpack.c.bf16 %v18253_v49, %v18250_v46  ;;  %v15650_v46 = vld [vmem:[#allocation14 + $0x150] sm:$0xff]  }
0x16de   : > { %v15651_v49 = vld [vmem:[#allocation14 + $0x110] sm:$0xff]  }
0x173c   : > { %v5517_v51 = vpop.xlane.xlu1 %5516 }
0x173d   : > { %v5518_v52 = vmul.f32 0.0078125, %v5517_v51 }
0x173f   : > { %v5519_v31 = vadd.f32 1e-05, %v5518_v52 }
0x1741   : > { %15936 = vrsqrt.f32 %v5519_v31 }
0x174e   : > { %v15937_v53 = vpop.eup %15936 }
0x174f   : > { %v5521_v16 = vmul.f32 %v15937_v53, %v18218_v5 }
0x1751   : > { %v5528_v47 = vmul.f32 %v13513_v35, %v5521_v16 }
0x1753   : > { %v5535_v55 = vadd.f32 %v13514_v54, %v5528_v47 }
0x1755   : > { %v5590_v56 = vpack.c.bf16 %v5535_v55, %v5535_v55 }
0x1757   : > { %5768 = vmatmul.mubr.bf16.vlgmr.msra.gmra.mxu0 %v5590_v56  ;;  %14597 = vmatmul.mubr.bf16.vlgmr.msra.gmra.mxu1 %v5590_v56 }
0x1758   : > { %14604 = vmatprep.mubr.msk.bf16.mxu0 %vm17201_vm0, %v17199_v3  ;;  %14628 = vmatprep.mubr.msk.bf16.mxu1 %vm17201_vm0, %v17199_v3 }
0x1817   : > { %v5769_v57 = vpop.f32.mrf.mxu0  ;;  %v18266_v58 = vpop.f32.mrf.mxu1 }
0x1818   : > { %v5770_v4 = vadd.f32 %v5769_v57, %v5595_v59  ;;  %v5603_v59 = vrot.slane %v18262_v1, %v17910_v34 }
0x1819   : > { %v5771_v60 = vpop.f32.mrf.mxu0  ;;  %v14598_v61 = vpop.f32.mrf.mxu1 }
0x181a   : > { %v5772_v63 = vadd.f32 %v5771_v60, %v5599_v62  ;;  %v5816_v8 = vpack.c.bf16 %v5770_v4, %v5770_v4  ;;  %v5811_v60 = vadd.f32 %v18266_v58, %v5603_v59 }
0x181b   : > { %v5773_v0 = vpop.f32.mrf.mxu0  ;;  %v5813_v2 = vpop.f32.mrf.mxu1 }
0x181c   : > { %v5817_v5 = vpack.c.bf16 %v5772_v63, %v5772_v63  ;;  %v5818_v61 = vpack.c.bf16 %v5811_v60, %v5811_v60 }
0x181d   : > { %v5774_v7 = vpop.f32.mrf.mxu0  ;;  %v14599_v27 = vpop.f32.mrf.mxu1 }
0x181e   : > { %5830 = vrot.lane.b32.xlu1 %v5817_v5, %s17204_s10  ;;  %5827 = vrot.lane.b32.xlu0 %v5817_v5, %s17203_s25 }
0x1822   : > { %5833 = vrot.lane.b32.xlu1 %v5817_v5, %s17202_s26  ;;  %5820 = vrot.lane.b32.xlu0 %v5816_v8, %s17203_s25 }
0x1826   : > { %5822 = vrot.lane.b32.xlu0 %v5816_v8, %s17204_s10 }
0x182a   : > { %5824 = vrot.lane.b32.xlu0 %v5816_v8, %s17202_s26 }
0x1845   : > { %5846 = vxpose.xlu1.c.b16.start.end [1/1] (short) (narrow) %v5817_v5, 32 }
0x1890   : > { %v5831_v9 = vpop.permute.xlu1 %5830  ;;  %v5828_v10 = vpop.permute.xlu0 %5827 }
0x1891   : > { %5878 = vxpose.xlu1.c.b16.start.end [1/1] (short) (narrow) %v5831_v9, 32  ;;  %5862 = vxpose.xlu0.c.b16.start.end [1/1] (short) (narrow) %v5828_v10, 32 }
0x1894   : > { %v5834_v11 = vpop.permute.xlu1 %5833  ;;  %v5821_v15 = vpop.permute.xlu0 %5820 }
0x1896   : > { %5894 = vxpose.xlu1.c.b16.start.end [1/1] (short) (narrow) %v5834_v11, 32 }
0x1898   : > { %v5823_v17 = vpop.permute.xlu0 %5822 }
0x189c   : > { %v5825_v18 = vpop.permute.xlu0 %5824 }
0x18a7   : > { %v5854_v13 = vpop.trf.xlu1 }
0x18ab   : > { %v5855_v14 = vpop.trf.xlu1 }
0x18ac   : > { %14601 = vmatpush3.bf16.msra.mxu0 %v5855_v14 }
0x18ad   : > { %14602 = vmatprep.subr.bf16.mxu0 %v17199_v3 }
0x18b0   : > { %14603 = vmatpush3.bf16.msra.mxu0 %v5854_v13 }
0x18b1   : > { %14608 = vmatprep.subr.bf16.mxu0 %v17199_v3 }
0x18b3   : > { %14605 = vmatmul.mubr.msk.bf16.vlgmr.msra.gmra.mxu0 %vm2331_vm1, %v5816_v8 }
0x18b4   : > { %14612 = vmatprep.mubr.msk.bf16.mxu0 %vm17201_vm0, %v17199_v3 }
0x18f3   : > { %v5886_v19 = vpop.trf.xlu1  ;;  %v5870_v20 = vpop.trf.xlu0 }
0x18f7   : > { %v5887_v21 = vpop.trf.xlu1  ;;  %v5871_v22 = vpop.trf.xlu0 }
0x18f8   : > { %14609 = vmatpush3.bf16.msra.mxu0 %v5871_v22 }
0x18f9   : > { %14610 = vmatprep.subr.bf16.mxu0 %v17199_v3 }
0x18fb   : > { %v5902_v23 = vpop.trf.xlu1 }
0x18fc   : > { %14611 = vmatpush3.bf16.msra.mxu0 %v5870_v20 }
0x18fd   : > { %14616 = vmatprep.subr.bf16.mxu0 %v17199_v3 }
0x18ff   : > { %v5903_v24 = vpop.trf.xlu1  ;;  %14613 = vmatmul.mubr.msk.bf16.vlgmr.msra.gmra.mxu0 %vm2331_vm1, %v5821_v15 }
0x1900   : > { %14617 = vmatpush3.bf16.msra.mxu0 %v5887_v21  ;;  %14625 = vmatpush3.bf16.msra.mxu1 %v5903_v24 }
0x1901   : > { %14618 = vmatprep.subr.bf16.mxu0 %v17199_v3  ;;  %14626 = vmatprep.subr.bf16.mxu1 %v17199_v3 }
0x1902   : > { %14620 = vmatprep.mubr.msk.bf16.mxu0 %vm17201_vm0, %v17199_v3 }
0x1904   : > { %14619 = vmatpush3.bf16.msra.mxu0 %v5886_v19  ;;  %14627 = vmatpush3.bf16.msra.mxu1 %v5902_v23 }
0x1907   : > { %14621 = vmatmul.mubr.msk.bf16.vlgmr.msra.gmra.mxu0 %vm2331_vm1, %v5823_v17  ;;  %14629 = vmatmul.mubr.msk.bf16.vlgmr.msra.gmra.mxu1 %vm2331_vm1, %v5825_v18 }
0x1973   : > { %v5947_v26 = vpop.f32.mrf.mxu0 }
0x1974   : > { %v6082_v28 = vmul.f32 0.17677669, %v5947_v26 }
0x1975   : > { %v14606_v29 = vpop.f32.mrf.mxu0 }
0x1976   : > { %v6087_v30 = vsel %vm6086_vm6, %v6082_v28, -inf }
0x1977   : > { %6088 = vmax.xlane.f32.xlu0 %v6087_v30  ;;  %v5950_v32 = vpop.f32.mrf.mxu0 }
0x1979   : > { %v14607_v33 = vpop.f32.mrf.mxu0 }
0x19bf   : > { %v5990_v36 = vpop.f32.mrf.mxu0 }
0x19c0   : > { %v6083_v37 = vmul.f32 0.17677669, %v5990_v36 }
0x19c1   : > { %v14614_v38 = vpop.f32.mrf.mxu0 }
0x19c2   : > { %v6090_v39 = vsel %vm6086_vm6, %v6083_v37, -inf }
0x19c3   : > { %6091 = vmax.xlane.f32.xlu1 %v6090_v39  ;;  %v5993_v40 = vpop.f32.mrf.mxu0 }
0x19c5   : > { %v14615_v45 = vpop.f32.mrf.mxu0 }
0x19c7   : > { %v6033_v51 = vpop.f32.mrf.mxu0  ;;  %v6076_v52 = vpop.f32.mrf.mxu1 }
0x19c8   : > { %v6084_v31 = vmul.f32 0.17677669, %v6033_v51  ;;  %v6085_v53 = vmul.f32 0.17677669, %v6076_v52 }
0x19c9   : > { %v14622_v35 = vpop.f32.mrf.mxu0  ;;  %v14630_v16 = vpop.f32.mrf.mxu1 }
0x19ca   : > { %v6096_v54 = vsel %vm6086_vm6, %v6085_v53, -inf  ;;  %v6093_v47 = vsel %vm6086_vm6, %v6084_v31, -inf }
0x19cb   : > { %v6079_v55 = vpop.f32.mrf.mxu1  ;;  %6097 = vmax.xlane.f32.xlu1 %v6096_v54  ;;  %6094 = vmax.xlane.f32.xlu0 %v6093_v47  ;;  %v6036_v56 = vpop.f32.mrf.mxu0 }
0x19cd   : > { %v14623_v62 = vpop.f32.mrf.mxu0  ;;  %v14631_v57 = vpop.f32.mrf.mxu1 }
0x19e1   : > { %5837 = vrot.lane.b32.xlu0 %v5818_v61, %s17203_s25 }
0x19e5   : > { %5843 = vrot.lane.b32.xlu0 %v5818_v61, %s17202_s26 }
0x1a00   : > { %v6089_v63 = vpop.xlane.xlu0 %6088 }
0x1a01   : > { %v6099_v0 = vsub.f32 %v6082_v28, %v6089_v63 }
0x1a03   : > { %v6103_v2 = vmul.f32 1.442695, %v6099_v0 }
0x1a05   : > { %15938 = vpow2.f32 %v6103_v2 }
0x1a12   : > { %v15939_v4 = vpop.eup %15938 }
0x1a13   : > { %v6111_v5 = vsel %vm6086_vm6, %v15939_v4, 0.0 }
0x1a14   : > { %6112 = vadd.xlane.f32.xlu1 %v6111_v5 }
0x1a4c   : > { %v6092_v7 = vpop.xlane.xlu1 %6091 }
0x1a4d   : > { %v6100_v27 = vsub.f32 %v6083_v37, %v6092_v7 }
0x1a4f   : > { %v6105_v8 = vmul.f32 1.442695, %v6100_v27 }
0x1a51   : > { %15940 = vpow2.f32 %v6105_v8 }
0x1a54   : > { %v6095_v1 = vpop.xlane.xlu0 %6094  ;;  %v6098_v15 = vpop.xlane.xlu1 %6097 }
0x1a55   : > { %v6101_v9 = vsub.f32 %v6084_v31, %v6095_v1  ;;  %v6102_v17 = vsub.f32 %v6085_v53, %v6098_v15 }
0x1a57   : > { %v6107_v58 = vmul.f32 1.442695, %v6101_v9  ;;  %v6109_v18 = vmul.f32 1.442695, %v6102_v17  ;;  %v15608_v17 = vld [vmem:[%s19176_s6 + $0xb8] sm:$0xff]  }
0x1a58   : > { %v5838_v28 = vpop.permute.xlu0 %5837 }
0x1a59   : > { %15942 = vpow2.f32 %v6107_v58 }
0x1a5a   : > { %15944 = vpow2.f32 %v6109_v18  ;;  %v15609_v18 = vld [vmem:[%s19176_s6 + $0xb0] sm:$0xff]  }
0x1a5c   : > { %v5844_v32 = vpop.permute.xlu0 %5843 }
0x1a5e   : > { %v15941_v10 = vpop.eup %15940 }
0x1a5f   : > { %v6114_v11 = vsel %vm6086_vm6, %v15941_v10, 0.0 }
0x1a60   : > { %6115 = vadd.xlane.f32.xlu1 %v6114_v11 }
0x1a66   : > { %v15943_v13 = vpop.eup %15942 }
0x1a67   : > { %v6117_v14 = vsel %vm6086_vm6, %v15943_v13, 0.0  ;;  %v15945_v19 = vpop.eup %15944 }
0x1a68   : > { %6118 = vadd.xlane.f32.xlu0 %v6117_v14  ;;  %v6120_v20 = vsel %vm6086_vm6, %v15945_v19, 0.0 }
0x1a71   : > { %5840 = vrot.lane.b32.xlu1 %v5818_v61, %s17204_s10 }
0x1a95   : > { %6121 = vadd.xlane.f32.xlu1 %v6120_v20  ;;  %6135 = vxpose.xlu0.c.b16.start.end [1/1] (short) (narrow) %v5818_v61, 32  ;;  %v15611_v20 = vld [vmem:[%s19176_s6 + $0xa0] sm:$0xff]  }
0x1a9d   : > { %v6113_v21 = vpop.xlane.xlu1 %6112 }
0x1a9e   : > { %15946 = vrcp.f32 %v6113_v21  ;;  %v15612_v21 = vld [vmem:[%s19176_s6 + $0x98] sm:$0xff]  }
0x1aab   : > { %v15947_v22 = vpop.eup %15946 }
0x1aac   : > { %v6124_v23 = vmul.f32 %v15947_v22, %v15939_v4  ;;  %v15613_v22 = vld [vmem:[%s19176_s6 + $0x90] sm:$0xff]  }
0x1aae   : > { %v6131_v24 = vpack.c.bf16 %v6124_v23, %v6124_v23 }
0x1ab0   : > { %15000 = vmatprep.subr.msk.bf16.mxu0 %vm6199_vm7, %v6131_v24  ;;  %v6207_v26 = vsel %vm6199_vm7, %v6131_v24, 0 }
0x1ab1   : > { %14633 = vmatpush3.bf16.xpose.msra.mxu0 %v6207_v26 }
0x1ac2   : > { %6151 = vxpose.xlu1.c.b16.start.end [1/1] (short) (narrow) %v5838_v28, 32 }
0x1ae9   : > { %v6116_v29 = vpop.xlane.xlu1 %6115 }
0x1aea   : > { %15948 = vrcp.f32 %v6116_v29 }
0x1aed   : > { %v5841_v30 = vpop.permute.xlu1 %5840 }
0x1aee   : > { %6167 = vxpose.xlu0.c.b16.start.end [1/1] (short) (narrow) %v5841_v30, 32 }
0x1af1   : > { %v6119_v33 = vpop.xlane.xlu0 %6118 }
0x1af2   : > { %15950 = vrcp.f32 %v6119_v33 }
0x1af3   : > { %6183 = vxpose.xlu0.c.b16.start.end [1/1] (short) (narrow) %v5844_v32, 32 }
0x1af7   : > { %v15949_v36 = vpop.eup %15948  ;;  %v6143_v38 = vpop.trf.xlu0 }
0x1af8   : > { %v6126_v37 = vmul.f32 %v15949_v36, %v15941_v10  ;;  %14634 = vmatprep.mubr.msk.bf16.mxu0 %vm6199_vm7, %v6143_v38  ;;  %v15614_v36 = vld [vmem:[%s19176_s6 + $0x88] sm:$0xff]  }
0x1afa   : > { %v6132_v39 = vpack.c.bf16 %v6126_v37, %v6126_v37 }
0x1afb   : > { %v6144_v45 = vpop.trf.xlu0 }
0x1afc   : > { %15001 = vmatprep.subr.msk.bf16.mxu1 %vm6199_vm7, %v6132_v39  ;;  %v6265_v40 = vsel %vm6199_vm7, %v6132_v39, 0  ;;  %14635 = vmatmul.mubr.msk.bf16.vlgmr.msra.gmra.mxu0 %vm6199_vm7, %v6144_v45  ;;  %v15615_v45 = vld [vmem:[%s19176_s6 + $0x80] sm:$0xff]  }
0x1afd   : > { %14639 = vmatpush3.bf16.xpose.msra.mxu1 %v6265_v40 }
0x1aff   : > { %v15951_v51 = vpop.eup %15950 }
0x1b00   : > { %v6128_v52 = vmul.f32 %v15951_v51, %v15943_v13 }
0x1b02   : > { %v6133_v31 = vpack.c.bf16 %v6128_v52, %v6128_v52 }
0x1b04   : > { %15002 = vmatprep.subr.msk.bf16.mxu0 %vm6199_vm7, %v6133_v31  ;;  %v6323_v53 = vsel %vm6199_vm7, %v6133_v31, 0 }
0x1b05   : > { %14645 = vmatpush3.bf16.xpose.msra.mxu0 %v6323_v53 }
0x1b06   : > { %14656 = vmatprep.subr.bf16.mxu0 %v17199_v3 }
0x1b1e   : > { %v6122_v35 = vpop.xlane.xlu1 %6121 }
0x1b1f   : > { %15952 = vrcp.f32 %v6122_v35 }
0x1b24   : > { %v6159_v16 = vpop.trf.xlu1 }
0x1b25   : > { %14640 = vmatprep.mubr.msk.bf16.mxu1 %vm6199_vm7, %v6159_v16 }
0x1b28   : > { %v6160_v54 = vpop.trf.xlu1 }
0x1b29   : > { %14641 = vmatmul.mubr.msk.bf16.vlgmr.msra.gmra.mxu1 %vm6199_vm7, %v6160_v54 }
0x1b2c   : > { %v15953_v47 = vpop.eup %15952 }
0x1b2d   : > { %v6130_v55 = vmul.f32 %v15953_v47, %v15945_v19  ;;  %v15610_v19 = vld [vmem:[%s19176_s6 + $0xa8] sm:$0xff]  }
0x1b2f   : > { %v6134_v56 = vpack.c.bf16 %v6130_v55, %v6130_v55 }
0x1b31   : > { %15003 = vmatprep.subr.msk.bf16.mxu1 %vm6199_vm7, %v6134_v56  ;;  %v6381_v62 = vsel %vm6199_vm7, %v6134_v56, 0 }
0x1b32   : > { %14651 = vmatpush3.bf16.xpose.msra.mxu1 %v6381_v62 }
0x1b50   : > { %v6175_v57 = vpop.trf.xlu0 }
0x1b51   : > { %14646 = vmatprep.mubr.msk.bf16.mxu0 %vm6199_vm7, %v6175_v57 }
0x1b54   : > { %v6176_v59 = vpop.trf.xlu0 }
0x1b55   : > { %14647 = vmatmul.mubr.msk.bf16.vlgmr.msra.gmra.mxu0 %vm6199_vm7, %v6176_v59 }
0x1b56   : > { %14672 = vmatprep.mubr.msk.bf16.mxu0 %vm17201_vm0, %v17199_v3  ;;  %14657 = vmatpush3.bf16.msra.mxu0 %v15608_v17 }
0x1b57   : > { %14658 = vmatprep.subr.bf16.mxu0 %v17199_v3 }
0x1b58   : > { %v6191_v60 = vpop.trf.xlu0 }
0x1b59   : > { %14652 = vmatprep.mubr.msk.bf16.mxu1 %vm6199_vm7, %v6191_v60 }
0x1b5a   : > { %14659 = vmatpush3.bf16.msra.mxu0 %v15609_v18 }
0x1b5b   : > { %14660 = vmatprep.subr.bf16.mxu0 %v17199_v3 }
0x1b5c   : > { %v6192_v61 = vpop.trf.xlu0 }
0x1b5d   : > { %14653 = vmatmul.mubr.msk.bf16.vlgmr.msra.gmra.mxu1 %vm6199_vm7, %v6192_v61 }
0x1b5e   : > { %6913 = vmatprep.mubr.bf16.mxu1 %v17200_v25  ;;  %14661 = vmatpush3.bf16.msra.mxu0 %v15610_v19  ;;  %v15624_v19 = vld [vmem:[%s19177_s28 + $0x154] ss:$8 sps:$4 sm:$0xff]  }
0x1b5f   : > { %14662 = vmatprep.subr.bf16.mxu0 %v17199_v3 }
0x1b62   : > { %14663 = vmatpush3.bf16.msra.mxu0 %v15611_v20  ;;  %v15622_v20 = vld [vmem:[%s19177_s28 + $0x150] ss:$8 sps:$4 sm:$0xff]  }
0x1b63   : > { %14664 = vmatprep.subr.bf16.mxu0 %v17199_v3 }
0x1b66   : > { %14665 = vmatpush3.bf16.msra.mxu0 %v15612_v21  ;;  %v15625_v21 = vld [vmem:[%s19177_s28 + $0x140] ss:$8 sps:$4 sm:$0xff]  }
0x1b67   : > { %14666 = vmatprep.subr.bf16.mxu0 %v17199_v3 }
0x1b6a   : > { %14667 = vmatpush3.bf16.msra.mxu0 %v15613_v22  ;;  %v15627_v22 = vld [vmem:[%s19177_s28 + $0x144] ss:$8 sps:$4 sm:$0xff]  }
0x1b6b   : > { %14668 = vmatprep.subr.bf16.mxu0 %v17199_v3 }
0x1b6e   : > { %14669 = vmatpush3.bf16.msra.mxu0 %v15614_v36 }
0x1b6f   : > { %14670 = vmatprep.subr.bf16.mxu0 %v17199_v3 }
0x1b72   : > { %14671 = vmatpush3.bf16.msra.mxu0 %v15615_v45 }
0x1bbc   : > { %v14636_v63 = vpop.f32.mrf.mxu0 }
0x1bbe   : > { %v6243_v0 = vpop.f32.mrf.mxu0 }
0x1bbf   : > { %6432 = vxpose.xlu1.b32.start [1/4] (short) (narrow) %v6243_v0, 8 }
0x1bc0   : > { %v14637_v2 = vpop.f32.mrf.mxu0 }
0x1bc2   : > { %v6246_v4 = vpop.f32.mrf.mxu0 }
0x1bc3   : > { %6433 = vxpose.xlu1.b32.cont [2/4] (short) (narrow) %v6246_v4, 8 }
0x1bc7   : > { %6434 = vxpose.xlu1.b32.cont [3/4] (short) (narrow) %v14636_v63, 8 }
0x1bcb   : > { %6435 = vxpose.xlu1.b32.end [4/4] (short) (narrow) %v14637_v2, 8  ;;  %v13600_v2 = vld [vmem:[#allocation8 + $0x2] ss:$0 sm:$0xff] }
0x1be9   : > { %v14642_v5 = vpop.f32.mrf.mxu1 }
0x1beb   : > { %v6301_v7 = vpop.f32.mrf.mxu1 }
0x1bec   : > { %6464 = vxpose.xlu0.b32.start [1/4] (short) (narrow) %v6301_v7, 8 }
0x1bed   : > { %v14643_v27 = vpop.f32.mrf.mxu1 }
0x1bef   : > { %v6304_v8 = vpop.f32.mrf.mxu1 }
0x1bf0   : > { %6465 = vxpose.xlu0.b32.cont [2/4] (short) (narrow) %v6304_v8, 8 }
0x1bf4   : > { %6466 = vxpose.xlu0.b32.cont [3/4] (short) (narrow) %v14642_v5, 8 }
0x1bf8   : > { %6467 = vxpose.xlu0.b32.end [4/4] (short) (narrow) %v14643_v27, 8 }
0x1c15   : > { %v14648_v1 = vpop.f32.mrf.mxu0 }
0x1c17   : > { %v6359_v9 = vpop.f32.mrf.mxu0 }
0x1c18   : > { %6496 = vxpose.xlu0.b32.start [1/4] (short) (narrow) %v6359_v9, 8 }
0x1c19   : > { %v14649_v58 = vpop.f32.mrf.mxu0 }
0x1c1b   : > { %v6362_v10 = vpop.f32.mrf.mxu0 }
0x1c1c   : > { %6497 = vxpose.xlu0.b32.cont [2/4] (short) (narrow) %v6362_v10, 8  ;;  %v15618_v10 = vld [vmem:[%s19177_s28 + $0x174] ss:$8 sps:$4 sm:$0xff]  }
0x1c1d   : > { %v14654_v11 = vpop.f32.mrf.mxu1  ;;  %6881 = vmatprep.subr.bf16.mxu1 %v15618_v10 }
0x1c1f   : > { %v6417_v13 = vpop.f32.mrf.mxu1 }
0x1c20   : > { %6528 = vxpose.xlu1.b32.start [1/4] (short) (narrow) %v6417_v13, 8  ;;  %6498 = vxpose.xlu0.b32.cont [3/4] (short) (narrow) %v14648_v1, 8  ;;  %v15619_v13 = vld [vmem:[%s19177_s28 + $0x160] ss:$8 sps:$4 sm:$0xff]  }
0x1c21   : > { %v14655_v14 = vpop.f32.mrf.mxu1 }
0x1c23   : > { %v6420_v15 = vpop.f32.mrf.mxu1 }
0x1c24   : > { %6529 = vxpose.xlu1.b32.cont [2/4] (short) (narrow) %v6420_v15, 8  ;;  %6499 = vxpose.xlu0.b32.end [4/4] (short) (narrow) %v14649_v58, 8  ;;  %v15616_v58 = vld [vmem:[%s19177_s28 + $0x170] ss:$8 sps:$4 sm:$0xff]  }
0x1c25   : > { %6882 = vmatpush1.bf16.msra.mxu1 %v15616_v58 }
0x1c28   : > { %6530 = vxpose.xlu1.b32.cont [3/4] (short) (narrow) %v14654_v11, 8  ;;  %v15621_v11 = vld [vmem:[%s19177_s28 + $0x164] ss:$8 sps:$4 sm:$0xff]  }
0x1c29   : > { %6883 = vmatprep.subr.bf16.mxu1 %v15621_v11 }
0x1c2a   : > { %6884 = vmatpush1.bf16.msra.mxu1 %v15619_v13 }
0x1c2b   : > { %6885 = vmatprep.subr.bf16.mxu1 %v15624_v19 }
0x1c2c   : > { %6531 = vxpose.xlu1.b32.end [4/4] (short) (narrow) %v14655_v14, 8 }
0x1c2e   : > { %6886 = vmatpush1.bf16.msra.mxu1 %v15622_v20 }
0x1c2f   : > { %6887 = vmatprep.subr.bf16.mxu1 %v15627_v22 }
0x1c32   : > { %6888 = vmatpush1.bf16.msra.mxu1 %v15625_v21 }
0x1c3b   : > { %v6448_v24 = vpop.trf.xlu1 }
0x1c68   : > { %v6480_v23 = vpop.trf.xlu0 }
0x1c94   : > { %v6512_v26 = vpop.trf.xlu0 }
0x1c95   : > { %v6560_v28 = vcombine.low %v6448_v24, %v6512_v26  ;;  %v15628_v24 = vld [vmem:[%s19177_s28 + $0x130] ss:$8 sps:$4 sm:$0xff]   ;;  %v15633_v26 = vld [vmem:[%s19177_s28 + $0x124] ss:$8 sps:$4 sm:$0xff]  }
0x1c97   : > { %v6567_v32 = vrot.slane %v6560_v28, %v17955_v6  ;;  %v15631_v28 = vld [vmem:[%s19177_s28 + $0x120] ss:$8 sps:$4 sm:$0xff]  }
0x1c9c   : > { %v6544_v29 = vpop.trf.xlu1 }
0x1c9d   : > { %v6568_v30 = vcombine.low %v6480_v23, %v6544_v29  ;;  %v15630_v23 = vld [vmem:[%s19177_s28 + $0x134] ss:$8 sps:$4 sm:$0xff]  }
0x1c9e   : > { %6889 = vmatprep.subr.bf16.mxu1 %v15630_v23  ;;  %v15636_v29 = vld [vmem:[%s19177_s28 + $0x114] ss:$8 sps:$4 sm:$0xff]  }
0x1c9f   : > { %v6575_v33 = vrot.slane %v6568_v30, %v17955_v6  ;;  %6890 = vmatpush1.bf16.msra.mxu1 %v15628_v24  ;;  %v15634_v30 = vld [vmem:[%s19177_s28 + $0x110] ss:$8 sps:$4 sm:$0xff]  }
0x1ca0   : > { %6891 = vmatprep.subr.bf16.mxu1 %v15633_v26 }
0x1ca1   : > { %v6576_v37 = vcombine.low %v6567_v32, %v6575_v33  ;;  %v6577_v38 = vcombine.high %v6567_v32, %v6575_v33  ;;  %v15639_v32 = vld [vmem:[%s19177_s28 + $0x104] ss:$8 sps:$4 sm:$0xff]   ;;  %v15637_v33 = vld [vmem:[%s19177_s28 + $0x100] ss:$8 sps:$4 sm:$0xff]  }
0x1ca3   : > { %v6584_v39 = vrot.slane %v6576_v37, %v17958_v12  ;;  %v6591_v40 = vrot.slane %v6577_v38, %v17958_v12  ;;  %6892 = vmatpush1.bf16.msra.mxu1 %v15631_v28 }
0x1ca4   : > { %6893 = vmatprep.subr.bf16.mxu1 %v15636_v29 }
0x1ca5   : > { %v6594_v51 = vcombine.low %v6584_v39, %v6591_v40  ;;  %v13599_v52 = vcombine.high %v6584_v39, %v6591_v40  ;;  %v13609_v40 = vld [vmem:[#allocation10 + $0x2] ss:$0 sm:$0xff] }
0x1ca7   : > { %v6601_v31 = vrot.slane %v6594_v51, %v17955_v6  ;;  %v6609_v53 = vrot.slane %v13599_v52, %v17955_v6  ;;  %6894 = vmatpush1.bf16.msra.mxu1 %v15634_v30  ;;  %v13610_v51 = vld [vmem:[#allocation11 + $0x2] ss:$0 sm:$0xff] }
0x1ca8   : > { %6895 = vmatprep.subr.bf16.mxu1 %v15639_v32 }
0x1ca9   : > { %v6611_v35 = vcombine.high %v6601_v31, %v6609_v53  ;;  %v6610_v16 = vcombine.low %v6601_v31, %v6609_v53 }
0x1cab   : > { %v6625_v54 = vrot.slane %v6611_v35, %v17958_v12  ;;  %v6618_v47 = vrot.slane %v6610_v16, %v17958_v12  ;;  %6896 = vmatpush1.bf16.msra.mxu1 %v15637_v33  ;;  %v15640_v35 = vld [vmem:[#allocation14 + $0x178] sm:$0xff]  }
0x1cac   : > { %v15641_v16 = vld [vmem:[#allocation14 + $0x138] sm:$0xff]   ;;  %14158 = vmatprep.subr.bf16.mxu0 %v15640_v35  ;;  %v13643_v35 = vld [vmem:[#allocation16 + $0x2] ss:$0 sm:$0xff] }
0x1cad   : > { %6633 = vrot.lane.b32.xlu1 %v6625_v54, %s17204_s10  ;;  %v6626_v55 = vcombine.high %v6618_v47, %v17199_v3  ;;  %v6627_v56 = vcombine.high %v6625_v54, %v17199_v3  ;;  %v15642_v54 = vld [vmem:[#allocation14 + $0x170] sm:$0xff]  }
0x1caf   : > { %6629 = vrot.lane.b32.xlu0 %v6626_v55, %s17202_s26  ;;  %v15644_v55 = vld [vmem:[#allocation14 + $0x168] sm:$0xff]  }
0x1cb1   : > { %6637 = vrot.lane.b32.xlu1 %v6627_v56, %s17203_s25  ;;  %v15645_v56 = vld [vmem:[#allocation14 + $0x128] sm:$0xff]  }
0x1d1f   : > { %v6634_v62 = vpop.permute.xlu1 %6633 }
0x1d21   : > { %v6630_v57 = vpop.permute.xlu0 %6629 }
0x1d22   : > { %v6640_v59 = vsel %vm2331_vm1, %v6618_v47, %v6630_v57  ;;  %v15643_v47 = vld [vmem:[#allocation14 + $0x130] sm:$0xff]   ;;  %v15647_v57 = vld [vmem:[#allocation14 + $0x120] sm:$0xff]  }
0x1d23   : > { %v6638_v60 = vpop.permute.xlu1 %6637  ;;  %v6641_v61 = vsel %vm3130_vm3, %v6640_v59, %v6634_v62  ;;  %v15646_v62 = vld [vmem:[#allocation14 + $0x160] sm:$0xff]   ;;  %v15648_v59 = vld [vmem:[#allocation14 + $0x158] sm:$0xff]  }
0x1d24   : > { %v6642_v63 = vsel %vm3132_vm4, %v6641_v61, %v6638_v60  ;;  %v15649_v60 = vld [vmem:[#allocation14 + $0x118] sm:$0xff]   ;;  %v15653_v61 = vld [vmem:[#allocation14 + $0x108] sm:$0xff]  }
0x1d25   : > { %v6643_v0 = vpack.c.bf16 %v6642_v63, %v6642_v63  ;;  %v15654_v63 = vld [vmem:[#allocation14 + $0x140] sm:$0xff]  }
0x1d27   : > { %14673 = vmatmul.mubr.bf16.vlgmr.msra.gmra.mxu0 %v6643_v0  ;;  %v15655_v0 = vld [vmem:[#allocation14 + $0x100] sm:$0xff]  }
0x1d28   : > { %14159 = vmatpush3.bf16.msra.mxu0 %v15641_v16 }
0x1d29   : > { %14160 = vmatprep.subr.bf16.mxu0 %v15642_v54 }
0x1d2c   : > { %14161 = vmatpush3.bf16.msra.mxu0 %v15643_v47 }
0x1d2d   : > { %14162 = vmatprep.subr.bf16.mxu0 %v15644_v55 }
0x1d30   : > { %14163 = vmatpush3.bf16.msra.mxu0 %v15645_v56 }
0x1d31   : > { %14164 = vmatprep.subr.bf16.mxu0 %v15646_v62 }
0x1d34   : > { %14165 = vmatpush3.bf16.msra.mxu0 %v15647_v57 }
0x1d35   : > { %14166 = vmatprep.subr.bf16.mxu0 %v15648_v59 }
0x1d38   : > { %14167 = vmatpush3.bf16.msra.mxu0 %v15649_v60  ;;  %v13660_v60 = vld [vmem:[%s19180_s23] ss:$0 sm:$0xff] }
0x1d39   : > { %14168 = vmatprep.subr.bf16.mxu0 %v15650_v46 }
0x1d3c   : > { %14169 = vmatpush3.bf16.msra.mxu0 %v15651_v49 }
0x1de7   : > { %v6732_v4 = vpop.f32.mrf.mxu0 }
0x1de8   : > { %v6733_v5 = vadd.f32 %v13600_v2, %v6732_v4  ;;  %v15656_v2 = vld [vmem:[#allocation23 + $0x38] sm:$0xff]   ;;  %v15657_v4 = vld [vmem:[#allocation23 + $0x30] sm:$0xff]  }
0x1de9   : > { %v14674_v7 = vpop.f32.mrf.mxu0  ;;  %14676 = vmatprep.subr.bf16.mxu1 %v15656_v2 }
0x1dea   : > { %v18356_v27 = vadd.f32 %v6733_v5, %v18205_v44  ;;  %v15658_v5 = vld [vmem:[#allocation23 + $0x28] sm:$0xff]   ;;  %v15659_v7 = vld [vmem:[#allocation23 + $0x20] sm:$0xff]  }
0x1deb   : > { %v6735_v8 = vpop.f32.mrf.mxu0 }
0x1dec   : > { %v6743_v1 = vsel %vm5508_vm5, %v18356_v27, 0.0  ;;  %v15660_v8 = vld [vmem:[#allocation23 + $0x18] sm:$0xff]  }
0x1ded   : > { %6744 = vadd.xlane.f32.xlu1 %v6743_v1  ;;  %v14675_v9 = vpop.f32.mrf.mxu0  ;;  %v15661_v1 = vld [vmem:[#allocation23 + $0x10] sm:$0xff]  }
0x1dee   : > { %v6788_v9 = vld [vmem:[#allocation13 + $0x4] sm:$0x3] }
0x1def   : > { %v6794_v58 = vrot.slane %v6788_v9, %v17881_v48  ;;  %v6798_v10 = vrot.slane %v6788_v9, %v17872_v43 }
0x1e76   : > { %v6745_v44 = vpop.xlane.xlu1 %6744 }
0x1e77   : > { %v6746_v14 = vmul.f32 0.0078125, %v6745_v44 }
0x1e79   : > { %v6747_v15 = vsub.f32 %v18356_v27, %v6746_v14 }
0x1e7b   : > { %v6748_v17 = vmul.f32 %v6747_v15, %v6747_v15 }
0x1e7d   : > { %v6749_v18 = vsel %vm5508_vm5, %v6748_v17, 0.0 }
0x1e7e   : > { %6750 = vadd.xlane.f32.xlu0 %v6749_v18 }
0x1f07   : > { %v6751_v36 = vpop.xlane.xlu0 %6750 }
0x1f08   : > { %v6752_v37 = vmul.f32 0.0078125, %v6751_v36 }
0x1f0a   : > { %v6753_v38 = vadd.f32 1e-05, %v6752_v37 }
0x1f0c   : > { %15954 = vrsqrt.f32 %v6753_v38 }
0x1f19   : > { %v15955_v39 = vpop.eup %15954 }
0x1f1a   : > { %v6755_v45 = vmul.f32 %v15955_v39, %v6747_v15 }
0x1f1c   : > { %v6762_v52 = vmul.f32 %v13609_v40, %v6755_v45 }
0x1f1e   : > { %v6769_v31 = vadd.f32 %v13610_v51, %v6762_v52  ;;  %v15662_v52 = vld [vmem:[#allocation23 + $0x8] sm:$0xff]  }
0x1f20   : > { %v6789_v53 = vpack.c.bf16 %v6769_v31, %v6769_v31  ;;  %v15663_v31 = vld [vmem:[#allocation23] sm:$0xff]  }
0x1f22   : > { %6914 = vmatmul.mubr.bf16.vlgmr.msra.gmra.mxu1 %v6789_v53 }
0x1f23   : > { %14692 = vmatprep.mubr.bf16.mxu1 %v7137_v50  ;;  %v15652_v50 = vld [vmem:[#allocation14 + $0x148] sm:$0xff]   ;;  %14677 = vmatpush3.bf16.msra.mxu1 %v15656_v2 }
0x1f24   : > { %14170 = vmatprep.subr.bf16.mxu0 %v15652_v50  ;;  %14678 = vmatprep.subr.bf16.mxu1 %v15657_v4  ;;  %v15664_v2 = vld [vmem:[%s19175_s1 + $0x2e8] ss:$12 sps:$4 sm:$0xff]  }
0x1f25   : > { %14171 = vmatpush3.bf16.msra.mxu0 %v15653_v61 }
0x1f26   : > { %14172 = vmatprep.subr.bf16.mxu0 %v15654_v63 }
0x1f27   : > { %14679 = vmatpush3.bf16.msra.mxu1 %v15657_v4  ;;  %v15666_v4 = vld [vmem:[%s19175_s1 + $0x2ec] ss:$12 sps:$4 sm:$0xff]  }
0x1f28   : > { %14680 = vmatprep.subr.bf16.mxu1 %v15658_v5 }
0x1f29   : > { %14173 = vmatpush3.bf16.msra.mxu0 %v15655_v0 }
0x1f2a   : > { %7498 = vmatprep.subr.bf16.mxu0 %v15666_v4  ;;  %v13670_v4 = vld [vmem:[#allocation5 + $0x3] ss:$0 sm:$0xff] }
0x1f2b   : > { %14681 = vmatpush3.bf16.msra.mxu1 %v15658_v5  ;;  %v15667_v5 = vld [vmem:[%s19175_s1 + $0x2f0] ss:$12 sps:$4 sm:$0xff]  }
0x1f2c   : > { %14682 = vmatprep.subr.bf16.mxu1 %v15659_v7 }
0x1f2f   : > { %14683 = vmatpush3.bf16.msra.mxu1 %v15659_v7 }
0x1f30   : > { %14684 = vmatprep.subr.bf16.mxu1 %v15660_v8 }
0x1f33   : > { %14685 = vmatpush3.bf16.msra.mxu1 %v15660_v8 }
0x1f34   : > { %14686 = vmatprep.subr.bf16.mxu1 %v15661_v1 }
0x1f37   : > { %14687 = vmatpush3.bf16.msra.mxu1 %v15661_v1 }
0x1f38   : > { %14688 = vmatprep.subr.bf16.mxu1 %v15662_v52 }
0x1f3b   : > { %14689 = vmatpush3.bf16.msra.mxu1 %v15662_v52  ;;  %v15695_v52 = vld [vmem:[%s19175_s1 + $0x248] ss:$12 sps:$4 sm:$0xff]  }
0x1f3c   : > { %14690 = vmatprep.subr.bf16.mxu1 %v15663_v31 }
0x1f3f   : > { %14691 = vmatpush3.bf16.msra.mxu1 %v15663_v31  ;;  %v15692_v31 = vld [vmem:[%s19175_s1 + $0x240] ss:$12 sps:$4 sm:$0xff]  }
0x1f40   : > { %14696 = vmatprep.subr.bf16.mxu1 %v15667_v5 }
0x1fe2   : > { %v6915_v11 = vpop.f32.mrf.mxu1 }
0x1fe3   : > { %v6916_v13 = vadd.f32 %v6915_v11, %v6794_v58 }
0x1fe4   : > { %v6917_v44 = vpop.f32.mrf.mxu1 }
0x1fe5   : > { %v6922_v14 = vmul.f32 %v6916_v13, %v6916_v13  ;;  %v6918_v15 = vadd.f32 %v6917_v44, %v6798_v10 }
0x1fe6   : > { %v6919_v17 = vpop.f32.mrf.mxu1 }
0x1fe7   : > { %v6924_v18 = vmul.f32 %v6922_v14, %v6916_v13  ;;  %v6923_v19 = vmul.f32 %v6918_v15, %v6918_v15 }
0x1fe8   : > { %v6920_v20 = vpop.f32.mrf.mxu1 }
0x1fe9   : > { %v6926_v21 = vmul.f32 0.044715, %v6924_v18  ;;  %v6925_v22 = vmul.f32 %v6923_v19, %v6918_v15  ;;  %v15670_v19 = vld [vmem:[%s19175_s1 + $0x2d4] ss:$12 sps:$4 sm:$0xff]   ;;  %v15668_v20 = vld [vmem:[%s19175_s1 + $0x2d0] ss:$12 sps:$4 sm:$0xff]  }
0x1feb   : > { %v6928_v23 = vadd.f32 %v6926_v21, %v6916_v13  ;;  %v6927_v24 = vmul.f32 0.044715, %v6925_v22  ;;  %v15671_v21 = vld [vmem:[%s19175_s1 + $0x2d8] ss:$12 sps:$4 sm:$0xff]   ;;  %v15674_v22 = vld [vmem:[%s19175_s1 + $0x2bc] ss:$12 sps:$4 sm:$0xff]  }
0x1fed   : > { %v6930_v26 = vmul.f32 0.7978846, %v6928_v23  ;;  %v6929_v28 = vadd.f32 %v6927_v24, %v6918_v15  ;;  %v15672_v23 = vld [vmem:[%s19175_s1 + $0x2b8] ss:$12 sps:$4 sm:$0xff]   ;;  %v15675_v24 = vld [vmem:[%s19175_s1 + $0x2c0] ss:$12 sps:$4 sm:$0xff]  }
0x1fef   : > { %15956 = vtanh.f32 %v6930_v26  ;;  %v6931_v29 = vmul.f32 0.7978846, %v6929_v28  ;;  %v15676_v26 = vld [vmem:[%s19175_s1 + $0x2a0] ss:$12 sps:$4 sm:$0xff]   ;;  %v15678_v28 = vld [vmem:[%s19175_s1 + $0x2a4] ss:$12 sps:$4 sm:$0xff]  }
0x1ff1   : > { %15958 = vtanh.f32 %v6931_v29  ;;  %v15679_v29 = vld [vmem:[%s19175_s1 + $0x2a8] ss:$12 sps:$4 sm:$0xff]  }
0x1ffc   : > { %v15957_v30 = vpop.eup %15956 }
0x1ffd   : > { %v6934_v32 = vadd.f32 1.0, %v15957_v30  ;;  %v15682_v30 = vld [vmem:[%s19175_s1 + $0x28c] ss:$12 sps:$4 sm:$0xff]  }
0x1ffe   : > { %v15959_v33 = vpop.eup %15958 }
0x1fff   : > { %v6935_v36 = vadd.f32 1.0, %v15959_v33  ;;  %v6936_v37 = vmul.f32 0.5, %v6934_v32  ;;  %v15683_v32 = vld [vmem:[%s19175_s1 + $0x290] ss:$12 sps:$4 sm:$0xff]   ;;  %v15680_v33 = vld [vmem:[%s19175_s1 + $0x288] ss:$12 sps:$4 sm:$0xff]  }
0x2001   : > { %v6937_v38 = vmul.f32 0.5, %v6935_v36  ;;  %v6938_v39 = vmul.f32 %v6936_v37, %v6916_v13  ;;  %v15686_v36 = vld [vmem:[%s19175_s1 + $0x274] ss:$12 sps:$4 sm:$0xff]   ;;  %v15687_v37 = vld [vmem:[%s19175_s1 + $0x278] ss:$12 sps:$4 sm:$0xff]  }
0x2003   : > { %v6939_v40 = vmul.f32 %v6937_v38, %v6918_v15  ;;  %v6975_v51 = vpack.c.bf16 %v6938_v39, %v6938_v39  ;;  %v15684_v38 = vld [vmem:[%s19175_s1 + $0x270] ss:$12 sps:$4 sm:$0xff]  }
0x2004   : > { %v15690_v39 = vld [vmem:[%s19175_s1 + $0x25c] ss:$12 sps:$4 sm:$0xff]  }
0x2005   : > { %v6976_v45 = vpack.c.bf16 %v6939_v40, %v6939_v40  ;;  %v15691_v40 = vld [vmem:[%s19175_s1 + $0x260] ss:$12 sps:$4 sm:$0xff]  }
0x2007   : > { %7111 = vmatprep.mubr.bf16.mxu0 %v6976_v45  ;;  %v15688_v45 = vld [vmem:[%s19175_s1 + $0x258] ss:$12 sps:$4 sm:$0xff]  }
0x2008   : > { %7112 = vmatmul.mubr.bf16.vlgmr.msra.gmra.mxu0 %v6975_v51  ;;  %v15694_v51 = vld [vmem:[%s19175_s1 + $0x244] ss:$12 sps:$4 sm:$0xff]  }
0x2009   : > { %7530 = vmatprep.mubr.bf16.mxu0 %v17200_v25  ;;  %7499 = vmatpush1.bf16.msra.mxu0 %v15664_v2 }
0x200a   : > { %7500 = vmatprep.subr.bf16.mxu0 %v15670_v19 }
0x200d   : > { %7501 = vmatpush1.bf16.msra.mxu0 %v15668_v20 }
0x200e   : > { %7502 = vmatprep.subr.bf16.mxu0 %v15674_v22 }
0x2011   : > { %7503 = vmatpush1.bf16.msra.mxu0 %v15672_v23 }
0x2012   : > { %7504 = vmatprep.subr.bf16.mxu0 %v15678_v28 }
0x2015   : > { %7505 = vmatpush1.bf16.msra.mxu0 %v15676_v26 }
0x2016   : > { %7506 = vmatprep.subr.bf16.mxu0 %v15682_v30 }
0x2019   : > { %7507 = vmatpush1.bf16.msra.mxu0 %v15680_v33 }
0x201a   : > { %7508 = vmatprep.subr.bf16.mxu0 %v15686_v36 }
0x201d   : > { %7509 = vmatpush1.bf16.msra.mxu0 %v15684_v38 }
0x201e   : > { %7510 = vmatprep.subr.bf16.mxu0 %v15690_v39 }
0x2021   : > { %7511 = vmatpush1.bf16.msra.mxu0 %v15688_v45 }
0x2022   : > { %7512 = vmatprep.subr.bf16.mxu0 %v15694_v51 }
0x2025   : > { %7513 = vmatpush1.bf16.msra.mxu0 %v15692_v31 }
0x20c8   : > { %v14174_v53 = vpop.f32.mrf.mxu0 }
0x20ca   : > { %v14175_v16 = vpop.f32.mrf.mxu0 }
0x20cb   : > { %v14176_v54 = vadd.f32 %v14175_v16, %v14174_v53 }
0x20cc   : > { %v14177_v47 = vpop.f32.mrf.mxu0 }
0x20cd   : > { %v7114_v55 = vadd.f32 %v14176_v54, %v13643_v35 }
0x20ce   : > { %v14178_v56 = vpop.f32.mrf.mxu0 }
0x20cf   : > { %v7119_v62 = vadd.f32 %v7114_v55, %v18356_v27 }
0x20d1   : > { %v7138_v57 = vpack.c.bf16 %v7119_v62, %v7119_v62 }
0x20d3   : > { %14693 = vmatmul.mubr.bf16.vlgmr.msra.gmra.mxu1 %v7138_v57 }
0x20d4   : > { %14697 = vmatpush3.bf16.msra.mxu1 %v15667_v5 }
0x20d5   : > { %14698 = vmatprep.subr.bf16.mxu1 %v15671_v21 }
0x20d8   : > { %14699 = vmatpush3.bf16.msra.mxu1 %v15671_v21 }
0x20d9   : > { %14700 = vmatprep.subr.bf16.mxu1 %v15675_v24 }
0x20dc   : > { %14701 = vmatpush3.bf16.msra.mxu1 %v15675_v24 }
0x20dd   : > { %14702 = vmatprep.subr.bf16.mxu1 %v15679_v29 }
0x20e0   : > { %14703 = vmatpush3.bf16.msra.mxu1 %v15679_v29 }
0x20e1   : > { %14704 = vmatprep.subr.bf16.mxu1 %v15683_v32 }
0x20e4   : > { %14705 = vmatpush3.bf16.msra.mxu1 %v15683_v32 }
0x20e5   : > { %14706 = vmatprep.subr.bf16.mxu1 %v15687_v37 }
0x20e8   : > { %14707 = vmatpush3.bf16.msra.mxu1 %v15687_v37 }
0x20e9   : > { %14708 = vmatprep.subr.bf16.mxu1 %v15691_v40 }
0x20ec   : > { %14709 = vmatpush3.bf16.msra.mxu1 %v15691_v40 }
0x20ed   : > { %14710 = vmatprep.subr.bf16.mxu1 %v15695_v52 }
0x20f0   : > { %14711 = vmatpush3.bf16.msra.mxu1 %v15695_v52 }
0x2193   : > { %v14694_v59 = vpop.f32.mrf.mxu1 }
0x2194   : > { %v18388_v50 = vadd.f32 %v14694_v59, %v13660_v60 }
0x2195   : > { %v7227_v46 = vpop.f32.mrf.mxu1 }
0x2196   : > { %v18386_v49 = vadd.f32 %v13660_v60, %v7227_v46  ;;  %v7249_v27 = vsel %vm5508_vm5, %v18388_v50, 0.0  ;;  %v13669_v46 = vld [vmem:[#allocation2 + $0x3] ss:$0 sm:$0xff] }
0x2197   : > { %v14695_v61 = vpop.f32.mrf.mxu1 }
0x2198   : > { %7245 = vadd.xlane.f32.xlu0 %v18386_v49 }
0x2199   : > { %v7230_v63 = vpop.f32.mrf.mxu1 }
0x219a   : > { %v18391_v0 = vadd.f32 %v13660_v60, %v7230_v63 }
0x219c   : > { %7247 = vadd.xlane.f32.xlu1 %v18391_v0  ;;  %7250 = vadd.xlane.f32.xlu0 %v7249_v27 }
0x2221   : > { %v7246_v7 = vpop.xlane.xlu0 %7245 }
0x2222   : > { %v7252_v8 = vmul.f32 0.0078125, %v7246_v7 }
0x2224   : > { %v18400_v1 = vsub.f32 %v18386_v49, %v7252_v8 }
0x2225   : > { %v7248_v9 = vpop.xlane.xlu1 %7247  ;;  %v7251_v58 = vpop.xlane.xlu0 %7250 }
0x2226   : > { %v7253_v10 = vmul.f32 0.0078125, %v7248_v9  ;;  %v7254_v11 = vmul.f32 0.0078125, %v7251_v58  ;;  %v7258_v13 = vmul.f32 %v18400_v1, %v18400_v1 }
0x2228   : > { %v18405_v44 = vsub.f32 %v18391_v0, %v7253_v10  ;;  %v18408_v14 = vsub.f32 %v18388_v50, %v7254_v11  ;;  %7261 = vadd.xlane.f32.xlu1 %v7258_v13 }
0x222a   : > { %v7259_v15 = vmul.f32 %v18405_v44, %v18405_v44  ;;  %v7260_v17 = vmul.f32 %v18408_v14, %v18408_v14 }
0x222c   : > { %7263 = vadd.xlane.f32.xlu0 %v7259_v15  ;;  %v7265_v18 = vsel %vm5508_vm5, %v7260_v17, 0.0 }
0x222d   : > { %7266 = vadd.xlane.f32.xlu1 %v7265_v18 }
0x22b1   : > { %v7262_v53 = vpop.xlane.xlu1 %7261 }
0x22b2   : > { %v7268_v35 = vmul.f32 0.0078125, %v7262_v53 }
0x22b4   : > { %v7271_v16 = vadd.f32 1e-05, %v7268_v35 }
0x22b5   : > { %v7264_v54 = vpop.xlane.xlu0 %7263 }
0x22b6   : > { %15960 = vrsqrt.f32 %v7271_v16  ;;  %v7269_v47 = vmul.f32 0.0078125, %v7264_v54  ;;  %v7267_v55 = vpop.xlane.xlu1 %7266 }
0x22b7   : > { %v7270_v56 = vmul.f32 0.0078125, %v7267_v55 }
0x22b8   : > { %v7272_v62 = vadd.f32 1e-05, %v7269_v47 }
0x22b9   : > { %v7273_v57 = vadd.f32 1e-05, %v7270_v56 }
0x22ba   : > { %15962 = vrsqrt.f32 %v7272_v62 }
0x22bb   : > { %15964 = vrsqrt.f32 %v7273_v57 }
0x22c3   : > { %v15961_v59 = vpop.eup %15960 }
0x22c4   : > { %v7277_v60 = vmul.f32 %v15961_v59, %v18400_v1  ;;  %v7332_v1 = vld [vmem:[#allocation7 + $0x9] sm:$0x7] }
0x22c5   : > { %v7362_v23 = vrot.slane %v7332_v1, %v17872_v43 }
0x22c6   : > { %v7286_v2 = vmul.f32 %v13669_v46, %v7277_v60 }
0x22c7   : > { %v15963_v61 = vpop.eup %15962 }
0x22c8   : > { %v15965_v63 = vpop.eup %15964  ;;  %v7278_v27 = vmul.f32 %v15963_v61, %v18405_v44  ;;  %v7295_v9 = vadd.f32 %v13670_v4, %v7286_v2  ;;  %v18441_v44 = vrot.slane %v7332_v1, %v17910_v34 }
0x22c9   : > { %v7279_v5 = vmul.f32 %v15965_v63, %v18408_v14  ;;  %v7358_v14 = vrot.slane %v7332_v1, %v17881_v48 }
0x22ca   : > { %v7287_v7 = vmul.f32 %v13669_v46, %v7278_v27 }
0x22cb   : > { %v7288_v8 = vmul.f32 %v13669_v46, %v7279_v5 }
0x22cc   : > { %v7296_v58 = vadd.f32 %v13670_v4, %v7287_v7 }
0x22cd   : > { %v7297_v10 = vadd.f32 %v13670_v4, %v7288_v8 }
0x22ce   : > { %v7352_v11 = vpack.c.bf16 %v7296_v58, %v7295_v9 }
0x22cf   : > { %v7353_v13 = vpack.c.bf16 %v7297_v10, %v7297_v10 }
0x22d0   : > { %7531 = vmatmul.mubr.bf16.vlgmr.msra.gmra.mxu0 %v7352_v11  ;;  %14712 = vmatprep.mubr.bf16.mxu1 %v7352_v11 }
0x22d1   : > { %14713 = vmatmul.mubr.bf16.vlgmr.msra.gmra.mxu1 %v7353_v13  ;;  %7540 = vmatprep.mubr.bf16.mxu0 %v17200_v25 }
0x22d8   : > { %7541 = vmatmul.mubr.bf16.gmra.mxu0 %v7353_v13 }
0x2390   : > { %v7532_v15 = vpop.f32.mrf.mxu0 }
0x2391   : > { %v14714_v17 = vpop.f32.mrf.mxu1  ;;  %v7533_v22 = vadd.f32 %v7532_v15, %v7358_v14 }
0x2392   : > { %v18445_v18 = vadd.f32 %v14714_v17, %v18441_v44  ;;  %v7534_v19 = vpop.f32.mrf.mxu0 }
0x2393   : > { %v7583_v20 = vpop.f32.mrf.mxu1  ;;  %v7535_v33 = vadd.f32 %v7534_v19, %v7362_v23 }
0x2394   : > { %v7536_v21 = vpop.f32.mrf.mxu0  ;;  %v7584_v63 = vadd.f32 %v7583_v20, %v18441_v44 }
0x2395   : > { %v7537_v24 = vadd.f32 %v7536_v21, %v7358_v14  ;;  %v14715_v26 = vpop.f32.mrf.mxu1 }
0x2396   : > { %v7538_v28 = vpop.f32.mrf.mxu0 }
0x2397   : > { %v7597_v29 = vpack.c.bf16 %v7537_v24, %v7533_v22  ;;  %v7539_v30 = vadd.f32 %v7538_v28, %v7362_v23  ;;  %v7586_v46 = vpop.f32.mrf.mxu1 }
0x2398   : > { %v7542_v32 = vpop.f32.mrf.mxu0  ;;  %v7587_v61 = vadd.f32 %v7586_v46, %v18441_v44 }
0x2399   : > { %7609 = vrot.lane.b32.xlu0 %v7597_v29, %s17204_s10  ;;  %7605 = vrot.lane.b32.xlu1 %v7597_v29, %s17203_s25  ;;  %v7598_v37 = vpack.c.bf16 %v7539_v30, %v7535_v33  ;;  %v7543_v40 = vadd.f32 %v7542_v32, %v7358_v14 }
0x239a   : > { %14720 = vmatprep.mubr.msk.bf16.mxu1 %vm2331_vm1, %v7597_v29  ;;  %v7544_v36 = vpop.f32.mrf.mxu0  ;;  %v18466_v27 = vpack.c.bf16 %v7587_v61, %v7584_v63  ;;  %v18515_v61 = vpack.c.bf16 %v18445_v18, %v18445_v18 }
0x239b   : > { %v7545_v45 = vadd.f32 %v7544_v36, %v7362_v23  ;;  %v7600_v51 = vpack.c.bf16 %v7543_v40, %v7543_v40 }
0x239c   : > { %v7546_v38 = vpop.f32.mrf.mxu0 }
0x239d   : > { %7619 = vrot.lane.b32.xlu0 %v7598_v37, %s17203_s25  ;;  %7613 = vrot.lane.b32.xlu1 %v7597_v29, %s17202_s26  ;;  %v7601_v52 = vpack.c.bf16 %v7545_v45, %v7545_v45 }
0x239e   : > { %v7547_v39 = vpop.f32.mrf.mxu0 }
0x23a1   : > { %7631 = vrot.lane.b32.xlu0 %v7598_v37, %s17202_s26  ;;  %7625 = vrot.lane.b32.xlu1 %v7598_v37, %s17204_s10 }
0x23a5   : > { %7607 = vrot.lane.b32.xlu0 %v7600_v51, %s17203_s25  ;;  %7621 = vrot.lane.b32.xlu1 %v7601_v52, %s17203_s25 }
0x23a9   : > { %7633 = vrot.lane.b32.xlu0 %v7601_v52, %s17202_s26  ;;  %7627 = vrot.lane.b32.xlu1 %v7601_v52, %s17204_s10 }
0x23cc   : > { %7657 = vxpose.xlu1.c.b16.start [1/2] (short) (narrow) %v7598_v37, 32 }
0x23d0   : > { %7658 = vxpose.xlu1.c.b16.end [2/2] (short) (narrow) %v7601_v52, 32 }
0x23d4   : > { %7611 = vrot.lane.b32.xlu1 %v7600_v51, %s17204_s10 }
0x240b   : > { %v7610_v31 = vpop.permute.xlu0 %7609  ;;  %v7606_v53 = vpop.permute.xlu1 %7605 }
0x240c   : > { %14728 = vmatprep.mubr.msk.bf16.mxu0 %vm2331_vm1, %v7606_v53 }
0x240f   : > { %v7620_v35 = vpop.permute.xlu0 %7619  ;;  %v7614_v16 = vpop.permute.xlu1 %7613 }
0x2410   : > { %7673 = vxpose.xlu0.c.b16.start [1/2] (short) (narrow) %v7620_v35, 32 }
0x2413   : > { %v7626_v54 = vpop.permute.xlu1 %7625  ;;  %v7632_v57 = vpop.permute.xlu0 %7631 }
0x2414   : > { %7689 = vxpose.xlu1.c.b16.start [1/2] (short) (narrow) %v7626_v54, 32 }
0x2417   : > { %v7622_v47 = vpop.permute.xlu1 %7621  ;;  %v7608_v59 = vpop.permute.xlu0 %7607 }
0x2418   : > { %7674 = vxpose.xlu0.c.b16.end [2/2] (short) (narrow) %v7622_v47, 32 }
0x241b   : > { %v7628_v55 = vpop.permute.xlu1 %7627  ;;  %v7634_v60 = vpop.permute.xlu0 %7633 }
0x241c   : > { %7690 = vxpose.xlu1.c.b16.end [2/2] (short) (narrow) %v7628_v55, 32 }
0x2421   : > { %7615 = vrot.lane.b32.xlu0 %v7600_v51, %s17202_s26 }
0x242e   : > { %v7665_v56 = vpop.trf.xlu1 }
0x2432   : > { %v7666_v62 = vpop.trf.xlu1 }
0x2433   : > { %14716 = vmatprep.subr.bf16.mxu1 %v7666_v62 }
0x2434   : > { %14717 = vmatpush3.bf16.msra.mxu1 %v7666_v62 }
0x2435   : > { %14718 = vmatprep.subr.bf16.mxu1 %v7665_v56 }
0x2438   : > { %14719 = vmatpush3.bf16.msra.mxu1 %v7665_v56 }
0x243b   : > { %14721 = vmatmul.mubr.msk.bf16.vlgmr.msra.gmra.mxu1 %vm2331_vm1, %v7600_v51 }
0x243c   : > { %14736 = vmatprep.mubr.msk.bf16.mxu1 %vm2331_vm1, %v7610_v31 }
0x243f   : > { %7705 = vxpose.xlu0.c.b16.start [1/2] (short) (narrow) %v7632_v57, 32 }
0x2443   : > { %7706 = vxpose.xlu0.c.b16.end [2/2] (short) (narrow) %v7634_v60, 32 }
0x2446   : > { %v7612_v2 = vpop.permute.xlu1 %7611 }
0x244c   : > { %7639 = vrot.lane.b32.xlu0 %v18466_v27, %s17203_s25 }
0x2476   : > { %v7681_v4 = vpop.trf.xlu0 }
0x247a   : > { %v7682_v5 = vpop.trf.xlu0  ;;  %v7697_v7 = vpop.trf.xlu1 }
0x247b   : > { %14724 = vmatprep.subr.bf16.mxu0 %v7682_v5 }
0x247c   : > { %14725 = vmatpush3.bf16.msra.mxu0 %v7682_v5 }
0x247d   : > { %14726 = vmatprep.subr.bf16.mxu0 %v7681_v4 }
0x247e   : > { %v7698_v8 = vpop.trf.xlu1 }
0x247f   : > { %14732 = vmatprep.subr.bf16.mxu1 %v7698_v8 }
0x2480   : > { %14727 = vmatpush3.bf16.msra.mxu0 %v7681_v4  ;;  %14733 = vmatpush3.bf16.msra.mxu1 %v7698_v8 }
0x2481   : > { %14734 = vmatprep.subr.bf16.mxu1 %v7697_v7 }
0x2483   : > { %14729 = vmatmul.mubr.msk.bf16.vlgmr.msra.gmra.mxu0 %vm2331_vm1, %v7608_v59 }
0x2484   : > { %14735 = vmatpush3.bf16.msra.mxu1 %v7697_v7  ;;  %14744 = vmatprep.mubr.msk.bf16.mxu0 %vm2331_vm1, %v7614_v16 }
0x2487   : > { %14737 = vmatmul.mubr.msk.bf16.vlgmr.msra.gmra.mxu1 %vm2331_vm1, %v7612_v2 }
0x2493   : > { %v7616_v9 = vpop.permute.xlu0 %7615 }
0x24a1   : > { %v7713_v58 = vpop.trf.xlu0 }
0x24a5   : > { %v7714_v10 = vpop.trf.xlu0 }
0x24a6   : > { %14740 = vmatprep.subr.bf16.mxu0 %v7714_v10 }
0x24a7   : > { %14741 = vmatpush3.bf16.msra.mxu0 %v7714_v10 }
0x24a8   : > { %14742 = vmatprep.subr.bf16.mxu0 %v7713_v58 }
0x24ab   : > { %14743 = vmatpush3.bf16.msra.mxu0 %v7713_v58 }
0x24ae   : > { %14745 = vmatmul.mubr.msk.bf16.vlgmr.msra.gmra.mxu0 %vm2331_vm1, %v7616_v9 }
0x24be   : > { %v18517_v63 = vpop.permute.xlu0 %7639 }
0x24fb   : > { %v14722_v11 = vpop.f32.mrf.mxu1 }
0x24fc   : > { %v7939_v13 = vmul.f32 0.17677669, %v14722_v11 }
0x24fd   : > { %v7761_v1 = vpop.f32.mrf.mxu1 }
0x24fe   : > { %v7937_v44 = vmul.f32 0.17677669, %v7761_v1  ;;  %v7957_v15 = vsel %vm7956_vm8, %v7939_v13, -inf }
0x24ff   : > { %7958 = vmax.xlane.f32.xlu0 %v7957_v15  ;;  %v14723_v14 = vpop.f32.mrf.mxu1 }
0x2500   : > { %v7950_v20 = vsel %vm7949_vm9, %v7937_v44, -inf }
0x2501   : > { %v7764_v17 = vpop.f32.mrf.mxu1 }
0x2502   : > { %v7938_v19 = vmul.f32 0.17677669, %v7764_v17 }
0x2503   : > { %7951 = vmax.xlane.f32.xlu0 %v7950_v20 }
0x2504   : > { %v7953_v21 = vsel %vm7949_vm9, %v7938_v19, -inf }
0x2505   : > { %7954 = vmax.xlane.f32.xlu1 %v7953_v21 }
0x2543   : > { %v14730_v22 = vpop.f32.mrf.mxu0 }
0x2544   : > { %v18477_v23 = vmul.f32 0.17677669, %v14730_v22 }
0x2545   : > { %v7815_v24 = vpop.f32.mrf.mxu0 }
0x2546   : > { %v7966_v26 = vsel %vm7956_vm8, %v18477_v23, -inf  ;;  %v18483_v36 = vmul.f32 0.17677669, %v7815_v24 }
0x2547   : > { %v14731_v28 = vpop.f32.mrf.mxu0  ;;  %7967 = vmax.xlane.f32.xlu1 %v7966_v26  ;;  %v14738_v29 = vpop.f32.mrf.mxu1 }
0x2548   : > { %v18481_v30 = vmul.f32 0.17677669, %v14738_v29  ;;  %v7960_v31 = vsel %vm7949_vm9, %v18483_v36, -inf }
0x2549   : > { %v7818_v32 = vpop.f32.mrf.mxu0  ;;  %v7869_v33 = vpop.f32.mrf.mxu1 }
0x254a   : > { %v18485_v37 = vmul.f32 0.17677669, %v7818_v32  ;;  %v7975_v38 = vsel %vm7956_vm8, %v18481_v30, -inf  ;;  %v18491_v51 = vmul.f32 0.17677669, %v7869_v33 }
0x254b   : > { %7976 = vmax.xlane.f32.xlu0 %v7975_v38  ;;  %v14739_v39 = vpop.f32.mrf.mxu1 }
0x254c   : > { %v7963_v40 = vsel %vm7949_vm9, %v18485_v37, -inf  ;;  %v7969_v35 = vsel %vm7949_vm9, %v18491_v51, -inf }
0x254d   : > { %7964 = vmax.xlane.f32.xlu1 %v7963_v40  ;;  %v7872_v45 = vpop.f32.mrf.mxu1 }
0x254e   : > { %v18493_v52 = vmul.f32 0.17677669, %v7872_v45 }
0x254f   : > { %7961 = vmax.xlane.f32.xlu0 %v7960_v31 }
0x2550   : > { %v7972_v53 = vsel %vm7949_vm9, %v18493_v52, -inf }
0x2551   : > { %7973 = vmax.xlane.f32.xlu1 %v7972_v53 }
0x2553   : > { %7970 = vmax.xlane.f32.xlu0 %v7969_v35 }
0x256e   : > { %v14746_v16 = vpop.f32.mrf.mxu0 }
0x256f   : > { %v18501_v54 = vmul.f32 0.17677669, %v14746_v16 }
0x2570   : > { %v7923_v47 = vpop.f32.mrf.mxu0 }
0x2571   : > { %v18503_v55 = vmul.f32 0.17677669, %v7923_v47  ;;  %v7984_v56 = vsel %vm7956_vm8, %v18501_v54, -inf }
0x2572   : > { %v14747_v62 = vpop.f32.mrf.mxu0  ;;  %7985 = vmax.xlane.f32.xlu1 %v7984_v56 }
0x2573   : > { %v7978_v57 = vsel %vm7949_vm9, %v18503_v55, -inf }
0x2574   : > { %v7926_v59 = vpop.f32.mrf.mxu0  ;;  %7979 = vmax.xlane.f32.xlu0 %v7978_v57 }
0x2575   : > { %v18509_v60 = vmul.f32 0.17677669, %v7926_v59 }
0x2577   : > { %v7981_v46 = vsel %vm7949_vm9, %v18509_v60, -inf }
0x2578   : > { %7982 = vmax.xlane.f32.xlu1 %v7981_v46 }
0x2588   : > { %v7959_v2 = vpop.xlane.xlu0 %7958 }
0x2589   : > { %7641 = vrot.lane.b32.xlu1 %v18515_v61, %s17203_s25  ;;  %v7989_v4 = vsub.f32 %v7939_v13, %v7959_v2 }
0x258a   : > { %7645 = vrot.lane.b32.xlu0 %v18466_v27, %s17204_s10 }
0x258b   : > { %v8003_v7 = vmul.f32 1.442695, %v7989_v4 }
0x258c   : > { %v7952_v5 = vpop.xlane.xlu0 %7951 }
0x258d   : > { %v7987_v8 = vsub.f32 %v7937_v44, %v7952_v5  ;;  %15966 = vpow2.f32 %v8003_v7 }
0x258e   : > { %v7955_v9 = vpop.xlane.xlu1 %7954 }
0x258f   : > { %v7999_v58 = vmul.f32 1.442695, %v7987_v8  ;;  %v7988_v10 = vsub.f32 %v7938_v19, %v7955_v9 }
0x2591   : > { %15968 = vpow2.f32 %v7999_v58  ;;  %v8001_v18 = vmul.f32 1.442695, %v7988_v10 }
0x2593   : > { %15970 = vpow2.f32 %v8001_v18 }
0x259a   : > { %v18523_v11 = vpop.eup %15966 }
0x259b   : > { %v8029_v1 = vsel %vm7956_vm8, %v18523_v11, 0.0 }
0x259e   : > { %v18527_v15 = vpop.eup %15968 }
0x259f   : > { %v8023_v13 = vsel %vm7949_vm9, %v18527_v15, 0.0 }
0x25a0   : > { %v18531_v14 = vpop.eup %15970 }
0x25a1   : > { %v8026_v44 = vsel %vm7949_vm9, %v18531_v14, 0.0 }
0x25a9   : > { %8030 = vadd.xlane.f32.xlu0 %v8029_v1 }
0x25ad   : > { %8024 = vadd.xlane.f32.xlu1 %v8023_v13 }
0x25b1   : > { %8027 = vadd.xlane.f32.xlu1 %v8026_v44 }
0x25d0   : > { %v7968_v17 = vpop.xlane.xlu1 %7967 }
0x25d1   : > { %v7992_v19 = vsub.f32 %v18477_v23, %v7968_v17 }
0x25d3   : > { %v8009_v20 = vmul.f32 1.442695, %v7992_v19 }
0x25d4   : > { %v7977_v21 = vpop.xlane.xlu0 %7976 }
0x25d5   : > { %15972 = vpow2.f32 %v8009_v20  ;;  %v7995_v22 = vsub.f32 %v18481_v30, %v7977_v21 }
0x25d6   : > { %v7965_v24 = vpop.xlane.xlu1 %7964 }
0x25d7   : > { %v8015_v26 = vmul.f32 1.442695, %v7995_v22  ;;  %v7991_v28 = vsub.f32 %v18485_v37, %v7965_v24 }
0x25d8   : > { %v7962_v29 = vpop.xlane.xlu0 %7961 }
0x25d9   : > { %15974 = vpow2.f32 %v8015_v26  ;;  %v7990_v32 = vsub.f32 %v18483_v36, %v7962_v29  ;;  %v8007_v33 = vmul.f32 1.442695, %v7991_v28 }
0x25da   : > { %v7974_v53 = vpop.xlane.xlu1 %7973 }
0x25db   : > { %v8005_v38 = vmul.f32 1.442695, %v7990_v32  ;;  %v7994_v2 = vsub.f32 %v18493_v52, %v7974_v53 }
0x25dc   : > { %v7971_v35 = vpop.xlane.xlu0 %7970 }
0x25dd   : > { %15976 = vpow2.f32 %v8005_v38  ;;  %v7993_v16 = vsub.f32 %v18491_v51, %v7971_v35  ;;  %v8013_v8 = vmul.f32 1.442695, %v7994_v2 }
0x25de   : > { %15978 = vpow2.f32 %v8007_v33 }
0x25df   : > { %v8011_v57 = vmul.f32 1.442695, %v7993_v16 }
0x25e1   : > { %15980 = vpow2.f32 %v8011_v57 }
0x25e2   : > { %v18539_v39 = vpop.eup %15972 }
0x25e3   : > { %v8038_v23 = vsel %vm7956_vm8, %v18539_v39, 0.0 }
0x25e4   : > { %8039 = vadd.xlane.f32.xlu1 %v8038_v23 }
0x25e6   : > { %v18543_v40 = vpop.eup %15974 }
0x25e7   : > { %v8047_v30 = vsel %vm7956_vm8, %v18543_v40, 0.0 }
0x25e8   : > { %8048 = vadd.xlane.f32.xlu0 %v8047_v30 }
0x25ea   : > { %v18547_v37 = vpop.eup %15976 }
0x25eb   : > { %v8032_v36 = vsel %vm7949_vm9, %v18547_v37, 0.0  ;;  %v18551_v45 = vpop.eup %15978 }
0x25ec   : > { %8033 = vadd.xlane.f32.xlu1 %v8032_v36  ;;  %v8035_v31 = vsel %vm7949_vm9, %v18551_v45, 0.0 }
0x25ee   : > { %v18566_v51 = vpop.eup %15980 }
0x25f0   : > { %8036 = vadd.xlane.f32.xlu1 %v8035_v31 }
0x25fb   : > { %v7986_v47 = vpop.xlane.xlu1 %7985 }
0x25fc   : > { %v7998_v62 = vsub.f32 %v18501_v54, %v7986_v47 }
0x25fd   : > { %v7980_v56 = vpop.xlane.xlu0 %7979 }
0x25fe   : > { %7647 = vrot.lane.b32.xlu0 %v18515_v61, %s17204_s10  ;;  %v7996_v59 = vsub.f32 %v18503_v55, %v7980_v56  ;;  %v8021_v4 = vmul.f32 1.442695, %v7998_v62  ;;  %v8041_v55 = vsel %vm7949_vm9, %v18566_v51, 0.0 }
0x2600   : > { %v8017_v5 = vmul.f32 1.442695, %v7996_v59  ;;  %15982 = vpow2.f32 %v8021_v4 }
0x2601   : > { %7651 = vrot.lane.b32.xlu1 %v18466_v27, %s17202_s26  ;;  %v7983_v46 = vpop.xlane.xlu1 %7982  ;;  %v7646_v44 = vpop.permute.xlu0 %7645 }
0x2602   : > { %7653 = vrot.lane.b32.xlu0 %v18515_v61, %s17202_s26  ;;  %v7997_v7 = vsub.f32 %v18509_v60, %v7983_v46  ;;  %15984 = vpow2.f32 %v8017_v5 }
0x2603   : > { %15986 = vpow2.f32 %v8013_v8 }
0x2604   : > { %v8019_v9 = vmul.f32 1.442695, %v7997_v7 }
0x2605   : > { %v7642_v17 = vpop.permute.xlu1 %7641 }
0x2606   : > { %15988 = vpow2.f32 %v8019_v9 }
0x260d   : > { %v18568_v54 = vpop.eup %15982 }
0x260e   : > { %v8056_v10 = vsel %vm7956_vm8, %v18568_v54, 0.0 }
0x260f   : > { %v18572_v58 = vpop.eup %15984 }
0x2610   : > { %v18574_v52 = vpop.eup %15986  ;;  %v8050_v60 = vsel %vm7949_vm9, %v18572_v58, 0.0 }
0x2611   : > { %v8044_v1 = vsel %vm7949_vm9, %v18574_v52, 0.0 }
0x2613   : > { %v18580_v18 = vpop.eup %15988 }
0x2614   : > { %v8053_v13 = vsel %vm7949_vm9, %v18580_v18, 0.0 }
0x2621   : > { %8042 = vadd.xlane.f32.xlu0 %v8041_v55 }
0x2625   : > { %8051 = vadd.xlane.f32.xlu0 %v8050_v60  ;;  %8057 = vadd.xlane.f32.xlu1 %v8056_v10 }
0x2629   : > { %8045 = vadd.xlane.f32.xlu1 %v8044_v1  ;;  %8054 = vadd.xlane.f32.xlu0 %v8053_v13 }
0x2632   : > { %v8031_v19 = vpop.xlane.xlu0 %8030 }
0x2633   : > { %15990 = vrcp.f32 %v8031_v19 }
0x2636   : > { %v8025_v20 = vpop.xlane.xlu1 %8024 }
0x2637   : > { %15992 = vrcp.f32 %v8025_v20 }
0x263a   : > { %v8028_v21 = vpop.xlane.xlu1 %8027 }
0x263b   : > { %15994 = vrcp.f32 %v8028_v21 }
0x2640   : > { %v15991_v22 = vpop.eup %15990 }
0x2641   : > { %v8064_v24 = vmul.f32 %v15991_v22, %v18523_v11 }
0x2643   : > { %v8084_v26 = vpack.c.bf16 %v8064_v24, %v8064_v24 }
0x2644   : > { %v15993_v29 = vpop.eup %15992 }
0x2645   : > { %15004 = vmatprep.subr.msk.bf16.mxu1 %vm7949_vm9, %v8084_v26  ;;  %v8165_v28 = vsel %vm7949_vm9, %v8084_v26, 0  ;;  %v8060_v33 = vmul.f32 %v15993_v29, %v18527_v15 }
0x2646   : > { %14749 = vmatpush3.bf16.xpose.msra.mxu1 %v8165_v28 }
0x2648   : > { %v15995_v32 = vpop.eup %15994 }
0x2649   : > { %v8062_v38 = vmul.f32 %v15995_v32, %v18531_v14 }
0x264b   : > { %v8083_v23 = vpack.c.bf16 %v8062_v38, %v8060_v33 }
0x264d   : > { %15005 = vmatprep.subr.msk.bf16.mxu1 %vm7949_vm9, %v8083_v23  ;;  %v8162_v30 = vsel %vm7949_vm9, %v8083_v23, 0 }
0x264e   : > { %14751 = vmatpush3.bf16.xpose.msra.mxu1 %v8162_v30 }
0x2656   : > { %8107 = vxpose.xlu1.c.b16.start [1/2] (short) (narrow) %v18517_v63, 32  ;;  %8091 = vxpose.xlu0.c.b16.start [1/2] (short) (narrow) %v18466_v27, 32 }
0x265a   : > { %8092 = vxpose.xlu0.c.b16.end [2/2] (short) (narrow) %v18515_v61, 32  ;;  %8108 = vxpose.xlu1.c.b16.end [2/2] (short) (narrow) %v7642_v17, 32 }
0x265e   : > { %8123 = vxpose.xlu0.c.b16.start [1/2] (short) (narrow) %v7646_v44, 32 }
0x266d   : > { %v8040_v11 = vpop.xlane.xlu1 %8039 }
0x266e   : > { %15996 = vrcp.f32 %v8040_v11 }
0x2671   : > { %v8049_v36 = vpop.xlane.xlu0 %8048 }
0x2672   : > { %15998 = vrcp.f32 %v8049_v36 }
0x2675   : > { %v7648_v15 = vpop.permute.xlu0 %7647  ;;  %v8034_v14 = vpop.xlane.xlu1 %8033 }
0x2676   : > { %8124 = vxpose.xlu0.c.b16.end [2/2] (short) (narrow) %v7648_v15, 32  ;;  %16000 = vrcp.f32 %v8034_v14 }
0x2679   : > { %v8037_v31 = vpop.xlane.xlu1 %8036  ;;  %v7654_v56 = vpop.permute.xlu0 %7653 }
0x267a   : > { %16002 = vrcp.f32 %v8037_v31 }
0x267b   : > { %v15997_v53 = vpop.eup %15996 }
0x267c   : > { %v8070_v35 = vmul.f32 %v15997_v53, %v18539_v39 }
0x267d   : > { %v7652_v63 = vpop.permute.xlu1 %7651 }
0x267e   : > { %8139 = vxpose.xlu1.c.b16.start [1/2] (short) (narrow) %v7652_v63, 32  ;;  %v8086_v27 = vpack.c.bf16 %v8070_v35, %v8070_v35 }
0x267f   : > { %v15999_v16 = vpop.eup %15998 }
0x2680   : > { %15006 = vmatprep.subr.msk.bf16.mxu0 %vm7949_vm9, %v8086_v27  ;;  %v8226_v61 = vsel %vm7949_vm9, %v8086_v27, 0  ;;  %v8076_v47 = vmul.f32 %v15999_v16, %v18543_v40 }
0x2681   : > { %14757 = vmatpush3.bf16.xpose.msra.mxu0 %v8226_v61 }
0x2682   : > { %8140 = vxpose.xlu1.c.b16.end [2/2] (short) (narrow) %v7654_v56, 32  ;;  %v8088_v62 = vpack.c.bf16 %v8076_v47, %v8076_v47 }
0x2683   : > { %v16001_v57 = vpop.eup %16000 }
0x2684   : > { %15008 = vmatprep.subr.msk.bf16.mxu1 %vm7949_vm9, %v8088_v62  ;;  %v8066_v39 = vmul.f32 %v16001_v57, %v18547_v37  ;;  %v8287_v1 = vsel %vm7949_vm9, %v8088_v62, 0  ;;  %v15696_v57 = vld [vmem:[%s19176_s6 + $0xf8] sm:$0xff]  }
0x2687   : > { %v16003_v59 = vpop.eup %16002 }
0x2688   : > { %v8068_v46 = vmul.f32 %v16003_v59, %v18551_v45  ;;  %v15697_v59 = vld [vmem:[%s19176_s6 + $0xf0] sm:$0xff]  }
0x268a   : > { %v8085_v2 = vpack.c.bf16 %v8068_v46, %v8066_v39  ;;  %v15698_v39 = vld [vmem:[%s19176_s6 + $0xe8] sm:$0xff]   ;;  %v15699_v46 = vld [vmem:[%s19176_s6 + $0xe0] sm:$0xff]  }
0x268c   : > { %15007 = vmatprep.subr.msk.bf16.mxu0 %vm7949_vm9, %v8085_v2  ;;  %v8223_v4 = vsel %vm7949_vm9, %v8085_v2, 0  ;;  %v15700_v2 = vld [vmem:[%s19176_s6 + $0xd8] sm:$0xff]  }
0x268d   : > { %14759 = vmatpush3.bf16.xpose.msra.mxu0 %v8223_v4 }
0x26aa   : > { %v8043_v5 = vpop.xlane.xlu0 %8042 }
0x26ae   : > { %v8052_v40 = vpop.xlane.xlu0 %8051  ;;  %v8058_v7 = vpop.xlane.xlu1 %8057 }
0x26af   : > { %16004 = vrcp.f32 %v8058_v7 }
0x26b0   : > { %16006 = vrcp.f32 %v8052_v40 }
0x26b1   : > { %16008 = vrcp.f32 %v8043_v5 }
0x26b2   : > { %v8055_v8 = vpop.xlane.xlu0 %8054  ;;  %v8046_v9 = vpop.xlane.xlu1 %8045 }
0x26b3   : > { %16010 = vrcp.f32 %v8055_v8 }
0x26b4   : > { %16012 = vrcp.f32 %v8046_v9 }
0x26b8   : > { %v8099_v55 = vpop.trf.xlu0  ;;  %v8115_v37 = vpop.trf.xlu1 }
0x26b9   : > { %14752 = vmatprep.mubr.msk.bf16.mxu1 %vm7949_vm9, %v8099_v55  ;;  %14760 = vmatprep.mubr.msk.bf16.mxu0 %vm7949_vm9, %v8115_v37 }
0x26bc   : > { %v8100_v45 = vpop.trf.xlu0  ;;  %v8116_v60 = vpop.trf.xlu1 }
0x26bd   : > { %v16005_v10 = vpop.eup %16004  ;;  %14753 = vmatmul.mubr.msk.bf16.vlgmr.msra.gmra.mxu1 %vm7949_vm9, %v8100_v45  ;;  %14761 = vmatmul.mubr.msk.bf16.vlgmr.msra.gmra.mxu0 %vm7949_vm9, %v8116_v60 }
0x26be   : > { %v16007_v13 = vpop.eup %16006  ;;  %14765 = vmatpush3.bf16.xpose.msra.mxu1 %v8287_v1  ;;  %v8082_v44 = vmul.f32 %v16005_v10, %v18568_v54 }
0x26bf   : > { %v16009_v17 = vpop.eup %16008  ;;  %v8078_v22 = vmul.f32 %v16007_v13, %v18572_v58 }
0x26c0   : > { %v16011_v19 = vpop.eup %16010  ;;  %v8090_v20 = vpack.c.bf16 %v8082_v44, %v8082_v44  ;;  %v8072_v28 = vmul.f32 %v16009_v17, %v18566_v51 }
0x26c1   : > { %v16013_v21 = vpop.eup %16012  ;;  %v8080_v24 = vmul.f32 %v16011_v19, %v18580_v18 }
0x26c2   : > { %15010 = vmatprep.subr.msk.bf16.mxu0 %vm7949_vm9, %v8090_v20  ;;  %v8348_v26 = vsel %vm7949_vm9, %v8090_v20, 0  ;;  %v8074_v29 = vmul.f32 %v16013_v21, %v18574_v52 }
0x26c3   : > { %14773 = vmatpush3.bf16.xpose.msra.mxu0 %v8348_v26  ;;  %v8089_v32 = vpack.c.bf16 %v8080_v24, %v8078_v22 }
0x26c4   : > { %v8087_v33 = vpack.c.bf16 %v8074_v29, %v8072_v28 }
0x26c5   : > { %15011 = vmatprep.subr.msk.bf16.mxu0 %vm7949_vm9, %v8089_v32  ;;  %v8345_v58 = vsel %vm7949_vm9, %v8089_v32, 0 }
0x26c6   : > { %15009 = vmatprep.subr.msk.bf16.mxu1 %vm7949_vm9, %v8087_v33  ;;  %v8284_v54 = vsel %vm7949_vm9, %v8087_v33, 0 }
0x26c7   : > { %14767 = vmatpush3.bf16.xpose.msra.mxu1 %v8284_v54 }
0x26c8   : > { %14780 = vmatprep.subr.bf16.mxu1 %v15696_v57 }
0x26cb   : > { %14775 = vmatpush3.bf16.xpose.msra.mxu0 %v8345_v58 }
0x26d4   : > { %v8131_v18 = vpop.trf.xlu0 }
0x26d5   : > { %14768 = vmatprep.mubr.msk.bf16.mxu1 %vm7949_vm9, %v8131_v18 }
0x26d8   : > { %v8132_v38 = vpop.trf.xlu0 }
0x26d9   : > { %14769 = vmatmul.mubr.msk.bf16.vlgmr.msra.gmra.mxu1 %vm7949_vm9, %v8132_v38 }
0x26da   : > { %14781 = vmatpush3.bf16.msra.mxu1 %v15696_v57 }
0x26db   : > { %14782 = vmatprep.subr.bf16.mxu1 %v15697_v59 }
0x26de   : > { %14783 = vmatpush3.bf16.msra.mxu1 %v15697_v59 }
0x26df   : > { %14784 = vmatprep.subr.bf16.mxu1 %v15698_v39 }
0x26e0   : > { %v8147_v51 = vpop.trf.xlu1 }
0x26e1   : > { %14776 = vmatprep.mubr.msk.bf16.mxu0 %vm7949_vm9, %v8147_v51 }
0x26e2   : > { %14785 = vmatpush3.bf16.msra.mxu1 %v15698_v39 }
0x26e3   : > { %14786 = vmatprep.subr.bf16.mxu1 %v15699_v46 }
0x26e4   : > { %v8148_v52 = vpop.trf.xlu1 }
0x26e5   : > { %14777 = vmatmul.mubr.msk.bf16.vlgmr.msra.gmra.mxu0 %vm7949_vm9, %v8148_v52 }
0x26e6   : > { %9220 = vmatprep.mubr.bf16.mxu0 %v17200_v25  ;;  %14787 = vmatpush3.bf16.msra.mxu1 %v15699_v46 }
0x26e7   : > { %14788 = vmatprep.subr.bf16.mxu1 %v15700_v2 }
0x26ea   : > { %14789 = vmatpush3.bf16.msra.mxu1 %v15700_v2 }
0x277d   : > { %v14754_v23 = vpop.f32.mrf.mxu1  ;;  %v14762_v30 = vpop.f32.mrf.mxu0 }
0x277f   : > { %v8201_v11 = vpop.f32.mrf.mxu1  ;;  %v8262_v36 = vpop.f32.mrf.mxu0 }
0x2780   : > { %8399 = vxpose.xlu0.b32.start [1/4] (short) (narrow) %v8201_v11, 24  ;;  %8431 = vxpose.xlu1.b32.start [1/4] (short) (narrow) %v8262_v36, 24 }
0x2781   : > { %v14755_v15 = vpop.f32.mrf.mxu1  ;;  %v14763_v14 = vpop.f32.mrf.mxu0 }
0x2783   : > { %v8204_v31 = vpop.f32.mrf.mxu1  ;;  %v8265_v53 = vpop.f32.mrf.mxu0 }
0x2784   : > { %8400 = vxpose.xlu0.b32.cont [2/4] (short) (narrow) %v8204_v31, 24  ;;  %8432 = vxpose.xlu1.b32.cont [2/4] (short) (narrow) %v8265_v53, 24 }
0x2788   : > { %8401 = vxpose.xlu0.b32.cont [3/4] (short) (narrow) %v14754_v23, 24  ;;  %8433 = vxpose.xlu1.b32.cont [3/4] (short) (narrow) %v14762_v30, 24 }
0x278c   : > { %8402 = vxpose.xlu0.b32.end [4/4] (short) (narrow) %v14755_v15, 24  ;;  %8434 = vxpose.xlu1.b32.end [4/4] (short) (narrow) %v14763_v14, 24 }
0x2799   : > { %v14770_v35 = vpop.f32.mrf.mxu1 }
0x279b   : > { %v8323_v63 = vpop.f32.mrf.mxu1 }
0x279c   : > { %8463 = vxpose.xlu0.b32.start [1/4] (short) (narrow) %v8323_v63, 24 }
0x279d   : > { %v14771_v27 = vpop.f32.mrf.mxu1 }
0x279f   : > { %v8326_v16 = vpop.f32.mrf.mxu1 }
0x27a0   : > { %8464 = vxpose.xlu0.b32.cont [2/4] (short) (narrow) %v8326_v16, 24 }
0x27a4   : > { %8465 = vxpose.xlu0.b32.cont [3/4] (short) (narrow) %v14770_v35, 24 }
0x27a5   : > { %v14778_v61 = vpop.f32.mrf.mxu0 }
0x27a7   : > { %v8384_v47 = vpop.f32.mrf.mxu0 }
0x27a8   : > { %8495 = vxpose.xlu1.b32.start [1/4] (short) (narrow) %v8384_v47, 24  ;;  %8466 = vxpose.xlu0.b32.end [4/4] (short) (narrow) %v14771_v27, 24 }
0x27a9   : > { %v14779_v56 = vpop.f32.mrf.mxu0 }
0x27ab   : > { %v8387_v62 = vpop.f32.mrf.mxu0 }
0x27ac   : > { %8496 = vxpose.xlu1.b32.cont [2/4] (short) (narrow) %v8387_v62, 24 }
0x27b0   : > { %8497 = vxpose.xlu1.b32.cont [3/4] (short) (narrow) %v14778_v61, 24 }
0x27b4   : > { %8498 = vxpose.xlu1.b32.end [4/4] (short) (narrow) %v14779_v56, 24 }
0x27fc   : > { %v8415_v4 = vpop.trf.xlu0  ;;  %v8447_v40 = vpop.trf.xlu1 }
0x2800   : > { %v8416_v5 = vpop.trf.xlu0  ;;  %v8448_v8 = vpop.trf.xlu1 }
0x2804   : > { %v8417_v7 = vpop.trf.xlu0  ;;  %v8449_v55 = vpop.trf.xlu1 }
0x2818   : > { %v8479_v9 = vpop.trf.xlu0 }
0x2819   : > { %v8527_v37 = vcombine.low %v8415_v4, %v8479_v9  ;;  %v8528_v45 = vcombine.high %v8415_v4, %v8479_v9 }
0x281b   : > { %v8535_v17 = vrot.slane %v8527_v37, %v17955_v6  ;;  %v8542_v19 = vrot.slane %v8528_v45, %v17955_v6 }
0x281c   : > { %v8480_v60 = vpop.trf.xlu0 }
0x281d   : > { %v8595_v44 = vcombine.low %v8416_v5, %v8480_v60  ;;  %v8596_v22 = vcombine.high %v8416_v5, %v8480_v60 }
0x281f   : > { %v8603_v54 = vrot.slane %v8595_v44, %v17955_v6  ;;  %v8610_v30 = vrot.slane %v8596_v22, %v17955_v6 }
0x2820   : > { %v8481_v26 = vpop.trf.xlu0 }
0x2821   : > { %v8663_v11 = vcombine.low %v8417_v7, %v8481_v26 }
0x2824   : > { %v8511_v10 = vpop.trf.xlu1 }
0x2825   : > { %v8543_v1 = vcombine.low %v8447_v40, %v8511_v10  ;;  %v8544_v13 = vcombine.high %v8447_v40, %v8511_v10  ;;  %v8670_v10 = vrot.slane %v8663_v11, %v17955_v6 }
0x2827   : > { %v8551_v20 = vrot.slane %v8543_v1, %v17955_v6  ;;  %v8558_v21 = vrot.slane %v8544_v13, %v17955_v6 }
0x2828   : > { %v8512_v24 = vpop.trf.xlu1 }
0x2829   : > { %v8559_v28 = vcombine.low %v8535_v17, %v8551_v20  ;;  %v8560_v29 = vcombine.high %v8535_v17, %v8551_v20  ;;  %v8575_v32 = vcombine.low %v8542_v19, %v8558_v21  ;;  %v8576_v33 = vcombine.high %v8542_v19, %v8558_v21  ;;  %v15701_v17 = vld [vmem:[%s19176_s6 + $0xd0] sm:$0xff]  }
0x282a   : > { %v8611_v58 = vcombine.low %v8448_v8, %v8512_v24  ;;  %v8612_v18 = vcombine.high %v8448_v8, %v8512_v24  ;;  %14790 = vmatprep.subr.bf16.mxu1 %v15701_v17 }
0x282b   : > { %v8567_v38 = vrot.slane %v8559_v28, %v17958_v12  ;;  %v8574_v51 = vrot.slane %v8560_v29, %v17958_v12  ;;  %v8583_v52 = vrot.slane %v8575_v32, %v17958_v12  ;;  %v8590_v23 = vrot.slane %v8576_v33, %v17958_v12  ;;  %14791 = vmatpush3.bf16.msra.mxu1 %v15701_v17 }
0x282c   : > { %v8619_v36 = vrot.slane %v8611_v58, %v17955_v6  ;;  %v8626_v15 = vrot.slane %v8612_v18, %v17955_v6  ;;  %v8513_v47 = vpop.trf.xlu1  ;;  %v15702_v58 = vld [vmem:[%s19176_s6 + $0xc8] sm:$0xff]  }
0x282d   : > { %v8697_v14 = vcombine.low %v8567_v38, %v8574_v51  ;;  %v13759_v31 = vcombine.high %v8567_v38, %v8574_v51  ;;  %v8713_v53 = vcombine.low %v8583_v52, %v8590_v23  ;;  %v13760_v35 = vcombine.high %v8583_v52, %v8590_v23  ;;  %14792 = vmatprep.subr.bf16.mxu1 %v15702_v58 }
0x282e   : > { %v8627_v63 = vcombine.low %v8603_v54, %v8619_v36  ;;  %v8628_v27 = vcombine.high %v8603_v54, %v8619_v36  ;;  %v8643_v16 = vcombine.low %v8610_v30, %v8626_v15  ;;  %v8644_v61 = vcombine.high %v8610_v30, %v8626_v15 }
0x282f   : > { %v8704_v56 = vrot.slane %v8697_v14, %v17955_v6  ;;  %v8712_v62 = vrot.slane %v13759_v31, %v17955_v6  ;;  %v8720_v57 = vrot.slane %v8713_v53, %v17955_v6  ;;  %v8728_v59 = vrot.slane %v13760_v35, %v17955_v6  ;;  %14793 = vmatpush3.bf16.msra.mxu1 %v15702_v58 }
0x2830   : > { %v8635_v39 = vrot.slane %v8627_v63, %v17958_v12  ;;  %v8642_v46 = vrot.slane %v8628_v27, %v17958_v12  ;;  %v8651_v2 = vrot.slane %v8643_v16, %v17958_v12  ;;  %v8658_v4 = vrot.slane %v8644_v61, %v17958_v12  ;;  %v15703_v16 = vld [vmem:[%s19176_s6 + $0xc0] sm:$0xff]  }
0x2831   : > { %v8671_v5 = vcombine.low %v8449_v55, %v8513_v47  ;;  %v8730_v40 = vcombine.high %v8704_v56, %v8712_v62  ;;  %v8746_v7 = vcombine.high %v8720_v57, %v8728_v59  ;;  %v8729_v8 = vcombine.low %v8704_v56, %v8712_v62  ;;  %14794 = vmatprep.subr.bf16.mxu1 %v15703_v16 }
0x2832   : > { %v8765_v9 = vcombine.low %v8635_v39, %v8642_v46  ;;  %v13761_v37 = vcombine.high %v8635_v39, %v8642_v46  ;;  %v8781_v45 = vcombine.low %v8651_v2, %v8658_v4  ;;  %v13762_v60 = vcombine.high %v8651_v2, %v8658_v4 }
0x2833   : > { %v8678_v1 = vrot.slane %v8671_v5, %v17955_v6  ;;  %v8744_v13 = vrot.slane %v8730_v40, %v17958_v12  ;;  %v8760_v44 = vrot.slane %v8746_v7, %v17958_v12  ;;  %v8737_v26 = vrot.slane %v8729_v8, %v17958_v12  ;;  %14795 = vmatpush3.bf16.msra.mxu1 %v15703_v16 }
0x2834   : > { %v8772_v19 = vrot.slane %v8765_v9, %v17955_v6  ;;  %v8780_v55 = vrot.slane %v13761_v37, %v17955_v6  ;;  %v8788_v20 = vrot.slane %v8781_v45, %v17955_v6  ;;  %v8796_v21 = vrot.slane %v13762_v60, %v17955_v6 }
0x2835   : > { %v8679_v22 = vcombine.low %v8670_v10, %v8678_v1  ;;  %v8680_v24 = vcombine.high %v8670_v10, %v8678_v1  ;;  %v8745_v28 = vcombine.low %v8720_v57, %v8728_v59  ;;  %v8763_v14 = vcombine.low %v8744_v13, %v8760_v44 }
0x2836   : > { %v8798_v29 = vcombine.high %v8772_v19, %v8780_v55  ;;  %v8814_v32 = vcombine.high %v8788_v20, %v8796_v21  ;;  %v8797_v33 = vcombine.low %v8772_v19, %v8780_v55  ;;  %v8813_v54 = vcombine.low %v8788_v20, %v8796_v21 }
0x2837   : > { %v8687_v18 = vrot.slane %v8679_v22, %v17958_v12  ;;  %v8694_v38 = vrot.slane %v8680_v24, %v17958_v12  ;;  %v8753_v51 = vrot.slane %v8745_v28, %v17958_v12  ;;  %v8764_v5 = vcombine.high %v8744_v13, %v8760_v44 }
0x2838   : > { %v8812_v52 = vrot.slane %v8798_v29, %v17958_v12  ;;  %v8828_v23 = vrot.slane %v8814_v32, %v17958_v12  ;;  %v8805_v30 = vrot.slane %v8797_v33, %v17958_v12  ;;  %v8821_v11 = vrot.slane %v8813_v54, %v17958_v12 }
0x2839   : > { %v8833_v36 = vcombine.low %v8687_v18, %v8694_v38  ;;  %v13763_v15 = vcombine.high %v8687_v18, %v8694_v38  ;;  %v8761_v31 = vcombine.low %v8737_v26, %v8753_v51  ;;  %v8762_v35 = vcombine.high %v8737_v26, %v8753_v51  ;;  %v13764_v38 = vld [vmem:[#allocation8 + $0x3] ss:$0 sm:$0xff] }
0x283a   : > { %v8831_v53 = vcombine.low %v8812_v52, %v8828_v23  ;;  %v8830_v63 = vcombine.high %v8805_v30, %v8821_v11  ;;  %v8829_v27 = vcombine.low %v8805_v30, %v8821_v11  ;;  %v8832_v4 = vcombine.high %v8812_v52, %v8828_v23 }
0x283b   : > { %v8840_v61 = vrot.slane %v8833_v36, %v17955_v6  ;;  %v8848_v47 = vrot.slane %v13763_v15, %v17955_v6 }
0x283c   : > { %v15389_v56 = vpack.i.bf16 %v8831_v53, %v8763_v14  ;;  %v15384_v62 = vpack.i.bf16 %v8830_v63, %v8762_v35  ;;  %v15394_v7 = vpack.i.bf16 %v8832_v4, %v8764_v5  ;;  %v9485_v14 = vld [vmem:[%s18696_s2] sm:$0xff]  ;;  %v15704_v35 = vld [vmem:[%s19177_s28 + $0x1f0] ss:$8 sps:$4 sm:$0xff]   ;;  %v15706_v63 = vld [vmem:[%s19177_s28 + $0x1f4] ss:$8 sps:$4 sm:$0xff]  }
0x283d   : > { %v8850_v57 = vcombine.high %v8840_v61, %v8848_v47  ;;  %v8849_v59 = vcombine.low %v8840_v61, %v8848_v47  ;;  %9188 = vmatprep.subr.bf16.mxu0 %v15706_v63 }
0x283e   : > { %15390 = vrot.lane.b32.xlu1 %v15389_v56, %s17204_s10  ;;  %15385 = vrot.lane.b32.xlu0 %v15384_v62, %s17202_s26 }
0x283f   : > { %v8857_v39 = vrot.slane %v8849_v59, %v17958_v12  ;;  %v8864_v46 = vrot.slane %v8850_v57, %v17958_v12  ;;  %9189 = vmatpush1.bf16.msra.mxu0 %v15704_v35 }
0x2841   : > { %v8865_v2 = vcombine.high %v8857_v39, %v17199_v3  ;;  %v8866_v40 = vcombine.high %v8864_v46, %v17199_v3 }
0x2842   : > { %8886 = vrot.lane.b32.xlu0 %v8864_v46, %s17204_s10 }
0x2843   : > { %8874 = vrot.lane.b32.xlu1 %v8865_v2, %s17202_s26 }
0x2846   : > { %8898 = vrot.lane.b32.xlu0 %v8866_v40, %s17203_s25 }
0x2847   : > { %15395 = vrot.lane.b32.xlu1 %v15394_v7, %s17203_s25 }
0x28b0   : > { %v15386_v8 = vpop.permute.xlu0 %15385  ;;  %v15391_v9 = vpop.permute.xlu1 %15390 }
0x28b1   : > { %v15388_v37 = vunpack.i.h.bf16 %v15386_v8  ;;  %v15387_v45 = vunpack.i.l.bf16 %v15386_v8  ;;  %v15393_v1 = vunpack.i.h.bf16 %v15391_v9  ;;  %v15392_v17 = vunpack.i.l.bf16 %v15391_v9  ;;  %v15709_v8 = vld [vmem:[%s19177_s28 + $0x1e4] ss:$8 sps:$4 sm:$0xff]   ;;  %v15707_v9 = vld [vmem:[%s19177_s28 + $0x1e0] ss:$8 sps:$4 sm:$0xff]  }
0x28b2   : > { %9190 = vmatprep.subr.bf16.mxu0 %v15709_v8  ;;  %v15740_v8 = vld [vmem:[#allocation28 + $0x48] ss:$12 sps:$4 sm:$0xff]  }
0x28b3   : > { %v8903_v55 = vsel %vm2331_vm1, %v8761_v31, %v15387_v45  ;;  %v8904_v13 = vsel %vm2331_vm1, %v8829_v27, %v15388_v37  ;;  %9191 = vmatpush1.bf16.msra.mxu0 %v15707_v9  ;;  %v15712_v37 = vld [vmem:[%s19177_s28 + $0x1d4] ss:$8 sps:$4 sm:$0xff]   ;;  %v15710_v45 = vld [vmem:[%s19177_s28 + $0x1d0] ss:$8 sps:$4 sm:$0xff]  }
0x28b4   : > { %v8887_v60 = vpop.permute.xlu0 %8886  ;;  %v8906_v28 = vsel %vm3130_vm3, %v8903_v55, %v15392_v17  ;;  %v8907_v29 = vsel %vm3130_vm3, %v8904_v13, %v15393_v1  ;;  %9192 = vmatprep.subr.bf16.mxu0 %v15712_v37  ;;  %v15718_v1 = vld [vmem:[%s19177_s28 + $0x1b4] ss:$8 sps:$4 sm:$0xff]   ;;  %v15716_v17 = vld [vmem:[%s19177_s28 + $0x1b0] ss:$8 sps:$4 sm:$0xff]   ;;  %v15719_v55 = vld [vmem:[%s19177_s28 + $0x1a0] ss:$8 sps:$4 sm:$0xff]  }
0x28b5   : > { %v8875_v10 = vpop.permute.xlu1 %8874  ;;  %v15724_v13 = vld [vmem:[%s19177_s28 + $0x194] ss:$8 sps:$4 sm:$0xff]  }
0x28b6   : > { %v8905_v19 = vsel %vm2331_vm1, %v8857_v39, %v8875_v10  ;;  %v15713_v10 = vld [vmem:[%s19177_s28 + $0x1c0] ss:$8 sps:$4 sm:$0xff]   ;;  %v15745_v9 = vld [vmem:[#allocation28 + $0x34] ss:$12 sps:$4 sm:$0xff]  }
0x28b7   : > { %v8908_v21 = vsel %vm3130_vm3, %v8905_v19, %v8887_v60  ;;  %9193 = vmatpush1.bf16.msra.mxu0 %v15710_v45  ;;  %v15715_v60 = vld [vmem:[%s19177_s28 + $0x1c4] ss:$8 sps:$4 sm:$0xff]  }
0x28b8   : > { %v8899_v44 = vpop.permute.xlu0 %8898  ;;  %9194 = vmatprep.subr.bf16.mxu0 %v15715_v60  ;;  %v15721_v19 = vld [vmem:[%s19177_s28 + $0x1a4] ss:$8 sps:$4 sm:$0xff]  }
0x28b9   : > { %v15396_v20 = vpop.permute.xlu1 %15395  ;;  %v8911_v26 = vsel %vm3132_vm4, %v8908_v21, %v8899_v44  ;;  %v15722_v44 = vld [vmem:[%s19177_s28 + $0x190] ss:$8 sps:$4 sm:$0xff]   ;;  %v15725_v21 = vld [vmem:[%s19177_s28 + $0x180] ss:$8 sps:$4 sm:$0xff]  }
0x28ba   : > { %v15398_v22 = vunpack.i.h.bf16 %v15396_v20  ;;  %v15397_v24 = vunpack.i.l.bf16 %v15396_v20  ;;  %v8913_v58 = vpack.c.bf16 %v8911_v26, %v8911_v26  ;;  %v15727_v20 = vld [vmem:[%s19177_s28 + $0x184] ss:$8 sps:$4 sm:$0xff]  }
0x28bb   : > { %9195 = vmatpush1.bf16.msra.mxu0 %v15713_v10  ;;  %v15743_v45 = vld [vmem:[#allocation28 + $0x30] ss:$12 sps:$4 sm:$0xff]  }
0x28bc   : > { %v8909_v32 = vsel %vm3132_vm4, %v8906_v28, %v15397_v24  ;;  %v8910_v33 = vsel %vm3132_vm4, %v8907_v29, %v15398_v22  ;;  %9196 = vmatprep.subr.bf16.mxu0 %v15718_v1  ;;  %v15730_v22 = vld [vmem:[#allocation28 + $0xac] ss:$12 sps:$4 sm:$0xff]   ;;  %v15748_v10 = vld [vmem:[#allocation28 + $0x1c] ss:$12 sps:$4 sm:$0xff]  }
0x28bd   : > { %v8912_v54 = vpack.c.bf16 %v8910_v33, %v8909_v32  ;;  %v13824_v1 = vld [vmem:[#allocation25] ss:$0 sm:$0xff] }
0x28bf   : > { %14796 = vmatprep.mubr.bf16.mxu1 %v8912_v54  ;;  %9197 = vmatpush1.bf16.msra.mxu0 %v15716_v17  ;;  %v15746_v17 = vld [vmem:[#allocation28 + $0x18] ss:$12 sps:$4 sm:$0xff]  }
0x28c0   : > { %14797 = vmatmul.mubr.bf16.vlgmr.msra.gmra.mxu1 %v8913_v58  ;;  %9198 = vmatprep.subr.bf16.mxu0 %v15721_v19 }
0x28c3   : > { %9199 = vmatpush1.bf16.msra.mxu0 %v15719_v55  ;;  %v15751_v55 = vld [vmem:[#allocation28 + $0x4] ss:$12 sps:$4 sm:$0xff]  }
0x28c4   : > { %9200 = vmatprep.subr.bf16.mxu0 %v15724_v13  ;;  %v13825_v13 = vld [vmem:[#allocation26] ss:$0 sm:$0xff] }
0x28c7   : > { %9201 = vmatpush1.bf16.msra.mxu0 %v15722_v44  ;;  %v15749_v44 = vld [vmem:[#allocation28] ss:$12 sps:$4 sm:$0xff]  }
0x28c8   : > { %9202 = vmatprep.subr.bf16.mxu0 %v15727_v20 }
0x28cb   : > { %9203 = vmatpush1.bf16.msra.mxu0 %v15725_v21 }
0x28cc   : > { %9713 = vmatprep.subr.bf16.mxu0 %v15730_v22  ;;  %v15753_v22 = vld [vmem:[#allocation14 + $0x1b8] sm:$0xff]  }
0x2980   : > { %v14798_v18 = vpop.f32.mrf.mxu1 }
0x2981   : > { %v9011_v11 = vadd.f32 %v14798_v18, %v13764_v38 }
0x2982   : > { %v9002_v51 = vpop.f32.mrf.mxu1 }
0x2983   : > { %v9003_v52 = vadd.f32 %v13764_v38, %v9002_v51  ;;  %v18704_v53 = vadd.f32 %v9011_v11, %v18388_v50 }
0x2984   : > { %v14799_v23 = vpop.f32.mrf.mxu1 }
0x2985   : > { %v18692_v30 = vadd.f32 %v9003_v52, %v18386_v49  ;;  %v9027_v49 = vsel %vm5508_vm5, %v18704_v53, 0.0  ;;  %v13773_v52 = vld [vmem:[#allocation10 + $0x3] ss:$0 sm:$0xff] }
0x2986   : > { %v9005_v36 = vpop.f32.mrf.mxu1 }
0x2987   : > { %v9006_v15 = vadd.f32 %v13764_v38, %v9005_v36  ;;  %9023 = vadd.xlane.f32.xlu1 %v18692_v30 }
0x2989   : > { %v18701_v31 = vadd.f32 %v9006_v15, %v18391_v0 }
0x298b   : > { %9025 = vadd.xlane.f32.xlu0 %v18701_v31  ;;  %9493 = vadd.xlane.f32.xlu1 %v9485_v14 }
0x298f   : > { %9028 = vadd.xlane.f32.xlu0 %v9027_v49 }
0x2a10   : > { %v9024_v27 = vpop.xlane.xlu1 %9023 }
0x2a11   : > { %v9030_v16 = vmul.f32 0.0078125, %v9024_v27 }
0x2a13   : > { %v9033_v61 = vsub.f32 %v18692_v30, %v9030_v16 }
0x2a14   : > { %v9026_v0 = vpop.xlane.xlu0 %9025  ;;  %v9494_v47 = vpop.xlane.xlu1 %9493 }
0x2a15   : > { %v9031_v56 = vmul.f32 0.0078125, %v9026_v0  ;;  %v9036_v50 = vmul.f32 %v9033_v61, %v9033_v61  ;;  %v9495_v62 = vmul.f32 0.0078125, %v9494_v47  ;;  %v15728_v0 = vld [vmem:[#allocation28 + $0xa8] ss:$12 sps:$4 sm:$0xff]  }
0x2a17   : > { %v9034_v57 = vsub.f32 %v18701_v31, %v9031_v56  ;;  %9039 = vadd.xlane.f32.xlu0 %v9036_v50  ;;  %v18713_v59 = vsub.f32 %v9485_v14, %v9495_v62  ;;  %v13774_v14 = vld [vmem:[#allocation11 + $0x3] ss:$0 sm:$0xff] }
0x2a18   : > { %v9029_v39 = vpop.xlane.xlu0 %9028  ;;  %v15733_v62 = vld [vmem:[#allocation28 + $0x94] ss:$12 sps:$4 sm:$0xff]  }
0x2a19   : > { %v9032_v46 = vmul.f32 0.0078125, %v9029_v39  ;;  %v9037_v2 = vmul.f32 %v9034_v57, %v9034_v57  ;;  %v9497_v5 = vmul.f32 %v18713_v59, %v18713_v59 }
0x2a1b   : > { %v18716_v4 = vsub.f32 %v18704_v53, %v9032_v46  ;;  %9041 = vadd.xlane.f32.xlu1 %v9037_v2  ;;  %v15734_v2 = vld [vmem:[#allocation28 + $0x78] ss:$12 sps:$4 sm:$0xff]  }
0x2a1d   : > { %v9038_v40 = vmul.f32 %v18716_v4, %v18716_v4 }
0x2a1f   : > { %9498 = vadd.xlane.f32.xlu1 %v9497_v5  ;;  %v9043_v7 = vsel %vm5508_vm5, %v9038_v40, 0.0  ;;  %v15739_v40 = vld [vmem:[#allocation28 + $0x64] ss:$12 sps:$4 sm:$0xff]  }
0x2a20   : > { %9044 = vadd.xlane.f32.xlu0 %v9043_v7  ;;  %v15742_v7 = vld [vmem:[#allocation28 + $0x4c] ss:$12 sps:$4 sm:$0xff]  }
0x2aa0   : > { %v9040_v24 = vpop.xlane.xlu0 %9039 }
0x2aa1   : > { %v9046_v26 = vmul.f32 0.0078125, %v9040_v24  ;;  %v15754_v24 = vld [vmem:[#allocation14 + $0x1f0] sm:$0xff]  }
0x2aa3   : > { %v9049_v28 = vadd.f32 1e-05, %v9046_v26  ;;  %v15755_v26 = vld [vmem:[#allocation14 + $0x1b0] sm:$0xff]  }
0x2aa4   : > { %v9042_v29 = vpop.xlane.xlu1 %9041 }
0x2aa5   : > { %16014 = vrsqrt.f32 %v9049_v28  ;;  %v9047_v32 = vmul.f32 0.0078125, %v9042_v29  ;;  %v15756_v28 = vld [vmem:[#allocation14 + $0x1e8] sm:$0xff]  }
0x2aa6   : > { %v15757_v29 = vld [vmem:[#allocation14 + $0x1a8] sm:$0xff]  }
0x2aa7   : > { %v9050_v33 = vadd.f32 1e-05, %v9047_v32  ;;  %v15758_v32 = vld [vmem:[#allocation14 + $0x1e0] sm:$0xff]  }
0x2aa8   : > { %v9499_v11 = vpop.xlane.xlu1 %9498 }
0x2aa9   : > { %16016 = vrsqrt.f32 %v9050_v33  ;;  %v9045_v54 = vpop.xlane.xlu0 %9044  ;;  %v9500_v49 = vmul.f32 0.0078125, %v9499_v11  ;;  %v15759_v33 = vld [vmem:[#allocation14 + $0x1a0] sm:$0xff]  }
0x2aaa   : > { %v9048_v58 = vmul.f32 0.0078125, %v9045_v54  ;;  %v15760_v54 = vld [vmem:[#allocation14 + $0x1d8] sm:$0xff]   ;;  %v15767_v11 = vld [vmem:[#allocation14 + $0x180] sm:$0xff]  }
0x2aab   : > { %v9501_v56 = vadd.f32 1e-05, %v9500_v49 }
0x2aac   : > { %v9051_v18 = vadd.f32 1e-05, %v9048_v58  ;;  %v15761_v58 = vld [vmem:[#allocation14 + $0x198] sm:$0xff]  }
0x2aae   : > { %16018 = vrsqrt.f32 %v9051_v18  ;;  %v15762_v18 = vld [vmem:[#allocation14 + $0x1d0] sm:$0xff]  }
0x2aaf   : > { %16020 = vrsqrt.f32 %v9501_v56 }
0x2ab2   : > { %v16015_v38 = vpop.eup %16014 }
0x2ab3   : > { %v9055_v51 = vmul.f32 %v16015_v38, %v9033_v61  ;;  %v15731_v61 = vld [vmem:[#allocation28 + $0x90] ss:$12 sps:$4 sm:$0xff]  }
0x2ab4   : > { %v15763_v38 = vld [vmem:[#allocation14 + $0x190] sm:$0xff]  }
0x2ab5   : > { %v9064_v15 = vmul.f32 %v13773_v52, %v9055_v51  ;;  %v15764_v51 = vld [vmem:[#allocation14 + $0x1c8] sm:$0xff]  }
0x2ab6   : > { %v16017_v23 = vpop.eup %16016 }
0x2ab7   : > { %v9056_v36 = vmul.f32 %v16017_v23, %v9034_v57  ;;  %v9073_v27 = vadd.f32 %v13774_v14, %v9064_v15  ;;  %v15736_v57 = vld [vmem:[#allocation28 + $0x7c] ss:$12 sps:$4 sm:$0xff]   ;;  %v15766_v23 = vld [vmem:[#allocation14 + $0x1c0] sm:$0xff]  }
0x2ab9   : > { %v9065_v35 = vmul.f32 %v13773_v52, %v9056_v36  ;;  %v9094_v36 = vld [vmem:[#allocation13 + $0x6] sm:$0x3] }
0x2aba   : > { %v9101_v15 = vrot.slane %v9094_v36, %v17881_v48 }
0x2abb   : > { %v16019_v63 = vpop.eup %16018  ;;  %v9074_v16 = vadd.f32 %v13774_v14, %v9065_v35 }
0x2abc   : > { %v9057_v47 = vmul.f32 %v16019_v63, %v18716_v4  ;;  %v15737_v4 = vld [vmem:[#allocation28 + $0x60] ss:$12 sps:$4 sm:$0xff]   ;;  %v16021_v37 = vpop.eup %16020 }
0x2abd   : > { %v9095_v50 = vpack.c.bf16 %v9074_v16, %v9073_v27  ;;  %v9503_v60 = vmul.f32 %v16021_v37, %v18713_v59  ;;  %v15752_v59 = vld [vmem:[#allocation14 + $0x1f8] sm:$0xff]  }
0x2abe   : > { %v9066_v39 = vmul.f32 %v13773_v52, %v9057_v47  ;;  %14242 = vmatprep.subr.bf16.mxu1 %v15752_v59  ;;  %v15765_v52 = vld [vmem:[#allocation14 + $0x188] sm:$0xff]  }
0x2abf   : > { %9221 = vmatmul.mubr.bf16.vlgmr.msra.gmra.mxu0 %v9095_v50  ;;  %v9510_v19 = vmul.f32 %v13824_v1, %v9503_v60  ;;  %14243 = vmatpush3.bf16.msra.mxu1 %v15753_v22 }
0x2ac0   : > { %9714 = vmatpush1.bf16.msra.mxu0 %v15728_v0  ;;  %9230 = vmatprep.mubr.bf16.mxu0 %v17200_v25  ;;  %v9075_v46 = vadd.f32 %v13774_v14, %v9066_v39  ;;  %v9105_v14 = vrot.slane %v9094_v36, %v17872_v43 }
0x2ac1   : > { %9715 = vmatprep.subr.bf16.mxu0 %v15733_v62  ;;  %v9517_v20 = vadd.f32 %v13825_v13, %v9510_v19  ;;  %14244 = vmatprep.subr.bf16.mxu1 %v15754_v24 }
0x2ac2   : > { %v9096_v5 = vpack.c.bf16 %v9075_v46, %v9075_v46 }
0x2ac3   : > { %v18741_v21 = vpack.c.bf16 %v9517_v20, %v9517_v20  ;;  %14245 = vmatpush3.bf16.msra.mxu1 %v15755_v26 }
0x2ac4   : > { %9716 = vmatpush1.bf16.msra.mxu0 %v15731_v61  ;;  %14246 = vmatprep.subr.bf16.mxu1 %v15756_v28 }
0x2ac5   : > { %9717 = vmatprep.subr.bf16.mxu0 %v15736_v57 }
0x2ac7   : > { %9231 = vmatmul.mubr.bf16.gmra.mxu0 %v9096_v5  ;;  %14247 = vmatpush3.bf16.msra.mxu1 %v15757_v29 }
0x2ac8   : > { %9718 = vmatpush1.bf16.msra.mxu0 %v15734_v2  ;;  %9745 = vmatprep.mubr.bf16.mxu0 %v17200_v25 }
0x2ac9   : > { %9719 = vmatprep.subr.bf16.mxu0 %v15739_v40  ;;  %14248 = vmatprep.subr.bf16.mxu1 %v15758_v32 }
0x2acb   : > { %14249 = vmatpush3.bf16.msra.mxu1 %v15759_v33 }
0x2acc   : > { %9720 = vmatpush1.bf16.msra.mxu0 %v15737_v4  ;;  %14250 = vmatprep.subr.bf16.mxu1 %v15760_v54 }
0x2acd   : > { %9721 = vmatprep.subr.bf16.mxu0 %v15742_v7 }
0x2acf   : > { %14251 = vmatpush3.bf16.msra.mxu1 %v15761_v58 }
0x2ad0   : > { %9722 = vmatpush1.bf16.msra.mxu0 %v15740_v8  ;;  %14252 = vmatprep.subr.bf16.mxu1 %v15762_v18 }
0x2ad1   : > { %9723 = vmatprep.subr.bf16.mxu0 %v15745_v9 }
0x2ad3   : > { %14253 = vmatpush3.bf16.msra.mxu1 %v15763_v38 }
0x2ad4   : > { %9724 = vmatpush1.bf16.msra.mxu0 %v15743_v45  ;;  %14254 = vmatprep.subr.bf16.mxu1 %v15764_v51 }
0x2ad5   : > { %9725 = vmatprep.subr.bf16.mxu0 %v15748_v10 }
0x2ad7   : > { %14255 = vmatpush3.bf16.msra.mxu1 %v15765_v52 }
0x2ad8   : > { %9726 = vmatpush1.bf16.msra.mxu0 %v15746_v17  ;;  %14256 = vmatprep.subr.bf16.mxu1 %v15766_v23 }
0x2ad9   : > { %9727 = vmatprep.subr.bf16.mxu0 %v15751_v55 }
0x2adb   : > { %14257 = vmatpush3.bf16.msra.mxu1 %v15767_v11 }
0x2adc   : > { %9728 = vmatpush1.bf16.msra.mxu0 %v15749_v44  ;;  %14800 = vmatprep.subr.bf16.mxu1 %v17199_v3 }
0x2add   : > { %14820 = vmatprep.subr.bf16.mxu0 %v17199_v3 }
0x2adf   : > { %9746 = vmatmul.mubr.bf16.vlgmr.msra.gmra.mxu0 %v18741_v21 }
0x2ae0   : > { %14824 = vmatprep.mubr.msk.bf16.mxu0 %vm17201_vm0, %v17199_v3 }
0x2b7f   : > { %v9222_v49 = vpop.f32.mrf.mxu0 }
0x2b80   : > { %v18750_v35 = vadd.f32 %v9222_v49, %v9101_v15 }
0x2b81   : > { %v9224_v63 = vpop.f32.mrf.mxu0 }
0x2b82   : > { %v9239_v27 = vmul.f32 %v18750_v35, %v18750_v35  ;;  %v18754_v16 = vadd.f32 %v9224_v63, %v9105_v14 }
0x2b83   : > { %v9226_v0 = vpop.f32.mrf.mxu0 }
0x2b84   : > { %v9245_v47 = vmul.f32 %v9239_v27, %v18750_v35  ;;  %v9240_v56 = vmul.f32 %v18754_v16, %v18754_v16  ;;  %v9227_v50 = vadd.f32 %v9226_v0, %v9101_v15 }
0x2b85   : > { %v9228_v62 = vpop.f32.mrf.mxu0 }
0x2b86   : > { %v9251_v39 = vmul.f32 0.044715, %v9245_v47  ;;  %v9246_v61 = vmul.f32 %v9240_v56, %v18754_v16  ;;  %v9241_v57 = vmul.f32 %v9227_v50, %v9227_v50  ;;  %v9229_v46 = vadd.f32 %v9228_v62, %v9105_v14 }
0x2b87   : > { %v9232_v2 = vpop.f32.mrf.mxu0 }
0x2b88   : > { %v9257_v5 = vadd.f32 %v9251_v39, %v18750_v35  ;;  %v9252_v40 = vmul.f32 0.044715, %v9246_v61  ;;  %v9247_v4 = vmul.f32 %v9241_v57, %v9227_v50  ;;  %v9242_v7 = vmul.f32 %v9229_v46, %v9229_v46 }
0x2b89   : > { %v18761_v8 = vadd.f32 %v9232_v2, %v9101_v15  ;;  %v9234_v9 = vpop.f32.mrf.mxu0  ;;  %v18774_v15 = vld [vmem:[#allocation29] sm:$0x7] }
0x2b8a   : > { %v9263_v37 = vmul.f32 0.7978846, %v9257_v5  ;;  %v9258_v45 = vadd.f32 %v9252_v40, %v18754_v16  ;;  %v9253_v60 = vmul.f32 0.044715, %v9247_v4  ;;  %v9248_v10 = vmul.f32 %v9242_v7, %v9229_v46 }
0x2b8b   : > { %v9243_v1 = vmul.f32 %v18761_v8, %v18761_v8  ;;  %v18766_v17 = vadd.f32 %v9234_v9, %v9105_v14  ;;  %v9236_v19 = vpop.f32.mrf.mxu0  ;;  %v9577_v49 = vrot.slane %v18774_v15, %v17872_v43  ;;  %v9573_v39 = vrot.slane %v18774_v15, %v17881_v48 }
0x2b8c   : > { %v9264_v55 = vmul.f32 0.7978846, %v9258_v45  ;;  %v9259_v13 = vadd.f32 %v9253_v60, %v9227_v50  ;;  %v9254_v44 = vmul.f32 0.044715, %v9248_v10  ;;  %16022 = vtanh.f32 %v9263_v37 }
0x2b8d   : > { %v9249_v20 = vmul.f32 %v9243_v1, %v18761_v8  ;;  %v9244_v59 = vmul.f32 %v18766_v17, %v18766_v17  ;;  %v9237_v22 = vpop.f32.mrf.mxu0 }
0x2b8e   : > { %16024 = vtanh.f32 %v9264_v55  ;;  %v9265_v24 = vmul.f32 0.7978846, %v9259_v13  ;;  %v9260_v26 = vadd.f32 %v9254_v44, %v9229_v46  ;;  %v15768_v44 = vld [vmem:[#allocation28 + $0xb0] ss:$12 sps:$4 sm:$0xff]  }
0x2b8f   : > { %v9255_v28 = vmul.f32 0.044715, %v9249_v20  ;;  %v9250_v29 = vmul.f32 %v9244_v59, %v18766_v17 }
0x2b90   : > { %16026 = vtanh.f32 %v9265_v24  ;;  %v9266_v32 = vmul.f32 0.7978846, %v9260_v26  ;;  %v15770_v26 = vld [vmem:[#allocation28 + $0x80] ss:$12 sps:$4 sm:$0xff]  }
0x2b91   : > { %v9261_v33 = vadd.f32 %v9255_v28, %v18761_v8  ;;  %v9256_v54 = vmul.f32 0.044715, %v9250_v29  ;;  %v15772_v29 = vld [vmem:[#allocation28 + $0x50] ss:$12 sps:$4 sm:$0xff]  }
0x2b92   : > { %16028 = vtanh.f32 %v9266_v32  ;;  %v15774_v32 = vld [vmem:[#allocation28 + $0x20] ss:$12 sps:$4 sm:$0xff]  }
0x2b93   : > { %v9267_v58 = vmul.f32 0.7978846, %v9261_v33  ;;  %v9262_v18 = vadd.f32 %v9256_v54, %v18766_v17  ;;  %v15775_v33 = vld [vmem:[#allocation28 + $0x8] ss:$12 sps:$4 sm:$0xff]  }
0x2b95   : > { %16030 = vtanh.f32 %v9267_v58  ;;  %v9268_v38 = vmul.f32 0.7978846, %v9262_v18 }
0x2b97   : > { %16032 = vtanh.f32 %v9268_v38 }
0x2b99   : > { %v16023_v51 = vpop.eup %16022 }
0x2b9a   : > { %v9275_v36 = vadd.f32 1.0, %v16023_v51 }
0x2b9b   : > { %v16025_v52 = vpop.eup %16024 }
0x2b9c   : > { %v9276_v23 = vadd.f32 1.0, %v16025_v52  ;;  %v9281_v62 = vmul.f32 0.5, %v9275_v36 }
0x2b9d   : > { %v16027_v11 = vpop.eup %16026 }
0x2b9e   : > { %v9277_v14 = vadd.f32 1.0, %v16027_v11  ;;  %v9282_v56 = vmul.f32 0.5, %v9276_v23  ;;  %v9287_v10 = vmul.f32 %v9281_v62, %v18750_v35  ;;  %v15769_v35 = vld [vmem:[#allocation28 + $0x98] ss:$12 sps:$4 sm:$0xff]   ;;  %v18805_v11 = vld [vmem:[#allocation16 + $0x3] ss:$0 sm:$0xff] }
0x2b9f   : > { %v16029_v63 = vpop.eup %16028  ;;  %v9747_v27 = vpop.f32.mrf.mxu0 }
0x2ba0   : > { %v9283_v0 = vmul.f32 0.5, %v9277_v14  ;;  %v9278_v47 = vadd.f32 1.0, %v16029_v63  ;;  %v9288_v45 = vmul.f32 %v9282_v56, %v18754_v16  ;;  %v9748_v1 = vadd.f32 %v9747_v27, %v9573_v39 }
0x2ba1   : > { %v9749_v61 = vpop.f32.mrf.mxu0 }
0x2ba2   : > { %v16031_v57 = vpop.eup %16030  ;;  %v9750_v2 = vadd.f32 %v9749_v61, %v9577_v49  ;;  %v9284_v5 = vmul.f32 0.5, %v9278_v47  ;;  %v9289_v40 = vmul.f32 %v9283_v0, %v9227_v50  ;;  %v9794_v22 = vpack.c.bf16 %v9748_v1, %v9748_v1 }
0x2ba3   : > { %v9751_v4 = vpop.f32.mrf.mxu0  ;;  %v9279_v7 = vadd.f32 1.0, %v16031_v57 }
0x2ba4   : > { %v16033_v9 = vpop.eup %16032  ;;  %v9795_v37 = vpack.c.bf16 %v9750_v2, %v9750_v2  ;;  %v9290_v60 = vmul.f32 %v9284_v5, %v9229_v46  ;;  %v9328_v20 = vpack.c.bf16 %v9289_v40, %v9287_v10 }
0x2ba5   : > { %v9752_v19 = vpop.f32.mrf.mxu0  ;;  %v9280_v55 = vadd.f32 1.0, %v16033_v9  ;;  %v9285_v59 = vmul.f32 0.5, %v9279_v7 }
0x2ba6   : > { %9808 = vrot.lane.b32.xlu1 %v9795_v37, %s17204_s10  ;;  %9805 = vrot.lane.b32.xlu0 %v9795_v37, %s17203_s25  ;;  %v9329_v13 = vpack.c.bf16 %v9290_v60, %v9288_v45 }
0x2ba7   : > { %v9286_v50 = vmul.f32 0.5, %v9280_v55  ;;  %v9291_v24 = vmul.f32 %v9285_v59, %v18761_v8  ;;  %v15773_v8 = vld [vmem:[#allocation28 + $0x38] ss:$12 sps:$4 sm:$0xff]   ;;  %v9489_v55 = vand.u32 127, %v2013_v41 }
0x2ba8   : > { %9466 = vmatprep.mubr.bf16.mxu1 %v9329_v13 }
0x2ba9   : > { %9467 = vmatmul.mubr.bf16.vlgmr.msra.gmra.mxu1 %v9328_v20  ;;  %v9292_v16 = vmul.f32 %v9286_v50, %v18766_v17  ;;  %v9330_v28 = vpack.c.bf16 %v9291_v24, %v9291_v24  ;;  %v15771_v17 = vld [vmem:[#allocation28 + $0x68] ss:$12 sps:$4 sm:$0xff]   ;;  %vm9490_vm10 = vcmp.le.s32.totalorder %v9489_v55, %v17869_v42 }
0x2baa   : > { %14801 = vmatpush3.bf16.msra.mxu1 %v15768_v44  ;;  %9811 = vrot.lane.b32.xlu1 %v9795_v37, %s17202_s26 }
0x2bab   : > { %9798 = vrot.lane.b32.xlu0 %v9794_v22, %s17203_s25  ;;  %v9331_v46 = vpack.c.bf16 %v9292_v16, %v9292_v16  ;;  %14802 = vmatprep.subr.bf16.mxu1 %v17199_v3 }
0x2bad   : > { %9474 = vmatprep.mubr.bf16.mxu1 %v9331_v46 }
0x2bae   : > { %14803 = vmatpush3.bf16.msra.mxu1 %v15769_v35 }
0x2baf   : > { %9800 = vrot.lane.b32.xlu0 %v9794_v22, %s17204_s10  ;;  %14804 = vmatprep.subr.bf16.mxu1 %v17199_v3 }
0x2bb1   : > { %9475 = vmatmul.mubr.bf16.gmra.mxu1 %v9330_v28 }
0x2bb2   : > { %14805 = vmatpush3.bf16.msra.mxu1 %v15770_v26  ;;  %14816 = vmatprep.mubr.msk.bf16.mxu1 %vm17201_vm0, %v17199_v3 }
0x2bb3   : > { %14806 = vmatprep.subr.bf16.mxu1 %v17199_v3 }
0x2bb6   : > { %14807 = vmatpush3.bf16.msra.mxu1 %v15771_v17 }
0x2bb7   : > { %14808 = vmatprep.subr.bf16.mxu1 %v17199_v3 }
0x2bba   : > { %14809 = vmatpush3.bf16.msra.mxu1 %v15772_v29 }
0x2bbb   : > { %14810 = vmatprep.subr.bf16.mxu1 %v17199_v3 }
0x2bbe   : > { %14811 = vmatpush3.bf16.msra.mxu1 %v15773_v8 }
0x2bbf   : > { %14812 = vmatprep.subr.bf16.mxu1 %v17199_v3 }
0x2bc2   : > { %14813 = vmatpush3.bf16.msra.mxu1 %v15774_v32 }
0x2bc3   : > { %14814 = vmatprep.subr.bf16.mxu1 %v17199_v3 }
0x2bc6   : > { %14815 = vmatpush3.bf16.msra.mxu1 %v15775_v33 }
0x2bc9   : > { %14817 = vmatmul.mubr.bf16.vlgmr.msra.gmra.mxu1 %v18741_v21 }
0x2bcd   : > { %9824 = vxpose.xlu1.c.b16.start.end [1/1] (short) (narrow) %v9795_v37, 32 }
0x2bd5   : > { %9802 = vrot.lane.b32.xlu1 %v9794_v22, %s17202_s26 }
0x2c18   : > { %v9806_v54 = vpop.permute.xlu0 %9805  ;;  %v9809_v58 = vpop.permute.xlu1 %9808 }
0x2c19   : > { %9840 = vxpose.xlu0.c.b16.start.end [1/1] (short) (narrow) %v9806_v54, 32 }
0x2c1c   : > { %v9812_v18 = vpop.permute.xlu1 %9811 }
0x2c1d   : > { %v9799_v27 = vpop.permute.xlu0 %9798 }
0x2c1e   : > { %9856 = vxpose.xlu0.c.b16.start.end [1/1] (short) (narrow) %v9809_v58, 32 }
0x2c21   : > { %v9801_v5 = vpop.permute.xlu0 %9800 }
0x2c23   : > { %9872 = vxpose.xlu0.c.b16.start.end [1/1] (short) (narrow) %v9812_v18, 32 }
0x2c2f   : > { %v9832_v38 = vpop.trf.xlu1 }
0x2c33   : > { %v9833_v51 = vpop.trf.xlu1 }
0x2c34   : > { %14821 = vmatpush3.bf16.msra.mxu0 %v9833_v51 }
0x2c35   : > { %14822 = vmatprep.subr.bf16.mxu0 %v17199_v3 }
0x2c38   : > { %14823 = vmatpush3.bf16.msra.mxu0 %v9832_v38 }
0x2c39   : > { %14828 = vmatprep.subr.bf16.mxu0 %v17199_v3 }
0x2c3b   : > { %14825 = vmatmul.mubr.msk.bf16.vlgmr.msra.gmra.mxu0 %vm2331_vm1, %v9794_v22 }
0x2c3c   : > { %14832 = vmatprep.mubr.msk.bf16.mxu0 %vm17201_vm0, %v17199_v3 }
0x2c47   : > { %v9803_v19 = vpop.permute.xlu1 %9802 }
0x2c69   : > { %v14258_v21 = vpop.f32.mrf.mxu1 }
0x2c6b   : > { %v14259_v52 = vpop.f32.mrf.mxu1 }
0x2c6c   : > { %v14260_v23 = vadd.f32 %v14259_v52, %v14258_v21 }
0x2c6d   : > { %v14261_v36 = vpop.f32.mrf.mxu1 }
0x2c6e   : > { %v9469_v49 = vadd.f32 %v14260_v23, %v18805_v11 }
0x2c6f   : > { %v14262_v14 = vpop.f32.mrf.mxu1 }
0x2c70   : > { %v14263_v63 = vadd.f32 %v14262_v14, %v14261_v36  ;;  %v18810_v62 = vadd.f32 %v9469_v49, %v18692_v30  ;;  %v9581_v49 = vrot.slane %v18774_v15, %v17910_v34 }
0x2c71   : > { %v14264_v0 = vpop.f32.mrf.mxu1 }
0x2c72   : > { %v9472_v47 = vadd.f32 %v14263_v63, %v18805_v11 }
0x2c73   : > { %v14265_v56 = vpop.f32.mrf.mxu1 }
0x2c74   : > { %v18813_v39 = vadd.f32 %v9472_v47, %v18701_v31  ;;  %v18815_v61 = vadd.f32 %v14265_v56, %v14264_v0 }
0x2c75   : > { %v14267_v57 = vpop.f32.mrf.mxu1 }
0x2c76   : > { %v10970_v2 = vpack.c.bf16 %v18813_v39, %v18810_v62 }
0x2c77   : > { %v14268_v40 = vpop.f32.mrf.mxu1 }
0x2c7b   : > { %v9848_v4 = vpop.trf.xlu0 }
0x2c7f   : > { %v9849_v7 = vpop.trf.xlu0 }
0x2c80   : > { %14829 = vmatpush3.bf16.msra.mxu0 %v9849_v7 }
0x2c81   : > { %14830 = vmatprep.subr.bf16.mxu0 %v17199_v3 }
0x2c83   : > { %v9864_v9 = vpop.trf.xlu0 }
0x2c84   : > { %14831 = vmatpush3.bf16.msra.mxu0 %v9848_v4 }
0x2c85   : > { %14836 = vmatprep.subr.bf16.mxu0 %v17199_v3 }
0x2c87   : > { %v9865_v30 = vpop.trf.xlu0  ;;  %14833 = vmatmul.mubr.msk.bf16.vlgmr.msra.gmra.mxu0 %vm2331_vm1, %v9799_v27 }
0x2c88   : > { %14837 = vmatpush3.bf16.msra.mxu0 %v9865_v30  ;;  %14840 = vmatprep.mubr.msk.bf16.mxu0 %vm17201_vm0, %v17199_v3 }
0x2c89   : > { %v9788_v31 = vpop.f32.mrf.mxu1  ;;  %14838 = vmatprep.subr.bf16.mxu0 %v17199_v3 }
0x2c8a   : > { %v9789_v63 = vadd.f32 %v9788_v31, %v9581_v49 }
0x2c8b   : > { %v14818_v37 = vpop.f32.mrf.mxu1  ;;  %v9880_v45 = vpop.trf.xlu0 }
0x2c8c   : > { %14839 = vmatpush3.bf16.msra.mxu0 %v9864_v9  ;;  %v9796_v27 = vpack.c.bf16 %v9789_v63, %v9789_v63 }
0x2c8d   : > { %v9791_v60 = vpop.f32.mrf.mxu1  ;;  %14844 = vmatprep.subr.bf16.mxu0 %v17199_v3 }
0x2c8f   : > { %v14819_v10 = vpop.f32.mrf.mxu1  ;;  %v9881_v1 = vpop.trf.xlu0  ;;  %14841 = vmatmul.mubr.msk.bf16.vlgmr.msra.gmra.mxu0 %vm2331_vm1, %v9801_v5 }
0x2c90   : > { %14845 = vmatpush3.bf16.msra.mxu0 %v9881_v1  ;;  %14848 = vmatprep.mubr.msk.bf16.mxu0 %vm17201_vm0, %v17199_v3 }
0x2c91   : > { %14846 = vmatprep.subr.bf16.mxu0 %v17199_v3 }
0x2c94   : > { %14847 = vmatpush3.bf16.msra.mxu0 %v9880_v45 }
0x2c97   : > { %14849 = vmatmul.mubr.msk.bf16.vlgmr.msra.gmra.mxu0 %vm2331_vm1, %v9803_v19 }
0x2cfb   : > { %v9925_v13 = vpop.f32.mrf.mxu0 }
0x2cfc   : > { %v10060_v44 = vmul.f32 0.17677669, %v9925_v13 }
0x2cfd   : > { %v14826_v20 = vpop.f32.mrf.mxu0 }
0x2cfe   : > { %v10066_v50 = vsel %vm9490_vm10, %v10060_v44, -1e+30 }
0x2cff   : > { %v9928_v59 = vpop.f32.mrf.mxu0  ;;  %v10070_v22 = vsel %vm2508_vm2, %v10066_v50, -inf }
0x2d00   : > { %10071 = vmax.xlane.f32.xlu1 %v10070_v22 }
0x2d01   : > { %v14827_v16 = vpop.f32.mrf.mxu0 }
0x2d47   : > { %v9968_v35 = vpop.f32.mrf.mxu0 }
0x2d48   : > { %v10061_v46 = vmul.f32 0.17677669, %v9968_v35 }
0x2d49   : > { %v14834_v24 = vpop.f32.mrf.mxu0 }
0x2d4a   : > { %v10067_v26 = vsel %vm9490_vm10, %v10061_v46, -1e+30 }
0x2d4b   : > { %v9971_v41 = vpop.f32.mrf.mxu0  ;;  %v10073_v28 = vsel %vm2508_vm2, %v10067_v26, -inf }
0x2d4c   : > { %10074 = vmax.xlane.f32.xlu0 %v10073_v28 }
0x2d4d   : > { %v14835_v17 = vpop.f32.mrf.mxu0 }
0x2d4f   : > { %v10011_v29 = vpop.f32.mrf.mxu0 }
0x2d50   : > { %v10062_v8 = vmul.f32 0.17677669, %v10011_v29 }
0x2d51   : > { %v14842_v32 = vpop.f32.mrf.mxu0 }
0x2d52   : > { %v10068_v33 = vsel %vm9490_vm10, %v10062_v8, -1e+30 }
0x2d53   : > { %v10014_v54 = vpop.f32.mrf.mxu0  ;;  %v10076_v58 = vsel %vm2508_vm2, %v10068_v33, -inf }
0x2d54   : > { %10077 = vmax.xlane.f32.xlu0 %v10076_v58 }
0x2d55   : > { %v14843_v18 = vpop.f32.mrf.mxu0 }
0x2d57   : > { %v10054_v38 = vpop.f32.mrf.mxu0 }
0x2d58   : > { %v10063_v51 = vmul.f32 0.17677669, %v10054_v38 }
0x2d59   : > { %v14850_v21 = vpop.f32.mrf.mxu0 }
0x2d5a   : > { %v10069_v52 = vsel %vm9490_vm10, %v10063_v51, -1e+30 }
0x2d5b   : > { %v10057_v23 = vpop.f32.mrf.mxu0  ;;  %v10079_v36 = vsel %vm2508_vm2, %v10069_v52, -inf }
0x2d5c   : > { %10080 = vmax.xlane.f32.xlu0 %v10079_v36 }
0x2d5d   : > { %v14851_v14 = vpop.f32.mrf.mxu0 }
0x2d72   : > { %9815 = vrot.lane.b32.xlu0 %v9796_v27, %s17203_s25 }
0x2d76   : > { %9821 = vrot.lane.b32.xlu0 %v9796_v27, %s17202_s26 }
0x2d89   : > { %v10072_v0 = vpop.xlane.xlu1 %10071 }
0x2d8a   : > { %v10082_v47 = vsub.f32 %v10066_v50, %v10072_v0 }
0x2d8c   : > { %v10086_v56 = vmul.f32 1.442695, %v10082_v47 }
0x2d8e   : > { %16034 = vpow2.f32 %v10086_v56 }
0x2d9b   : > { %v16035_v42 = vpop.eup %16034 }
0x2d9c   : > { %v10094_v57 = vsel %vm2508_vm2, %v16035_v42, 0.0 }
0x2d9d   : > { %10095 = vadd.xlane.f32.xlu1 %v10094_v57 }
0x2dd5   : > { %v10075_v5 = vpop.xlane.xlu0 %10074 }
0x2dd6   : > { %v10083_v40 = vsub.f32 %v10067_v26, %v10075_v5 }
0x2dd8   : > { %v10088_v4 = vmul.f32 1.442695, %v10083_v40 }
0x2dda   : > { %16036 = vpow2.f32 %v10088_v4 }
0x2ddd   : > { %v10078_v7 = vpop.xlane.xlu0 %10077 }
0x2dde   : > { %v10084_v34 = vsub.f32 %v10068_v33, %v10078_v7 }
0x2de0   : > { %v10090_v15 = vmul.f32 1.442695, %v10084_v34 }
0x2de2   : > { %16038 = vpow2.f32 %v10090_v15 }
0x2de5   : > { %v10081_v45 = vpop.xlane.xlu0 %10080 }
0x2de6   : > { %v10085_v60 = vsub.f32 %v10069_v52, %v10081_v45  ;;  %v15776_v45 = vld [vmem:[#allocation31 + $0x38] sm:$0xff]  }
0x2de7   : > { %v16037_v9 = vpop.eup %16036 }
0x2de8   : > { %v10097_v30 = vsel %vm2508_vm2, %v16037_v9, 0.0  ;;  %v10092_v10 = vmul.f32 1.442695, %v10085_v60  ;;  %v15777_v60 = vld [vmem:[#allocation31 + $0x30] sm:$0xff]  }
0x2de9   : > { %10098 = vadd.xlane.f32.xlu1 %v10097_v30  ;;  %v9816_v59 = vpop.permute.xlu0 %9815 }
0x2dea   : > { %16040 = vpow2.f32 %v10092_v10  ;;  %v15778_v10 = vld [vmem:[#allocation31 + $0x28] sm:$0xff]  }
0x2ded   : > { %v9822_v16 = vpop.permute.xlu0 %9821 }
0x2def   : > { %v16039_v31 = vpop.eup %16038 }
0x2df0   : > { %v10100_v37 = vsel %vm2508_vm2, %v16039_v31, 0.0 }
0x2df1   : > { %10101 = vadd.xlane.f32.xlu0 %v10100_v37 }
0x2df7   : > { %v16041_v1 = vpop.eup %16040 }
0x2df8   : > { %v10103_v19 = vsel %vm2508_vm2, %v16041_v1, 0.0 }
0x2dfa   : > { %9818 = vrot.lane.b32.xlu1 %v9796_v27, %s17204_s10 }
0x2e1e   : > { %10118 = vxpose.xlu0.c.b16.start.end [1/1] (short) (narrow) %v9796_v27, 32  ;;  %10104 = vadd.xlane.f32.xlu1 %v10103_v19  ;;  %v15780_v19 = vld [vmem:[#allocation31 + $0x18] sm:$0xff]  }
0x2e26   : > { %v10096_v55 = vpop.xlane.xlu1 %10095 }
0x2e27   : > { %16042 = vrcp.f32 %v10096_v55  ;;  %v15781_v55 = vld [vmem:[#allocation31 + $0x10] sm:$0xff]  }
0x2e34   : > { %v16043_v13 = vpop.eup %16042 }
0x2e35   : > { %v10107_v44 = vmul.f32 %v16043_v13, %v16035_v42  ;;  %v15782_v13 = vld [vmem:[#allocation31 + $0x8] sm:$0xff]  }
0x2e37   : > { %v10114_v20 = vpack.c.bf16 %v10107_v44, %v10107_v44 }
0x2e39   : > { %15012 = vmatprep.subr.msk.bf16.mxu1 %vm2508_vm2, %v10114_v20  ;;  %v10189_v50 = vsel %vm2508_vm2, %v10114_v20, 0 }
0x2e3a   : > { %14853 = vmatpush3.bf16.xpose.msra.mxu1 %v10189_v50 }
0x2e4b   : > { %10134 = vxpose.xlu1.c.b16.start.end [1/1] (short) (narrow) %v9816_v59, 32 }
0x2e72   : > { %v10099_v22 = vpop.xlane.xlu1 %10098 }
0x2e73   : > { %16044 = vrcp.f32 %v10099_v22 }
0x2e76   : > { %v9819_v35 = vpop.permute.xlu1 %9818 }
0x2e77   : > { %10150 = vxpose.xlu0.c.b16.start.end [1/1] (short) (narrow) %v9819_v35, 32 }
0x2e7a   : > { %v10102_v46 = vpop.xlane.xlu0 %10101 }
0x2e7b   : > { %16046 = vrcp.f32 %v10102_v46 }
0x2e7c   : > { %10166 = vxpose.xlu0.c.b16.start.end [1/1] (short) (narrow) %v9822_v16, 32 }
0x2e80   : > { %v16045_v24 = vpop.eup %16044  ;;  %v10126_v26 = vpop.trf.xlu0 }
0x2e81   : > { %v10109_v41 = vmul.f32 %v16045_v24, %v16037_v9  ;;  %14854 = vmatprep.mubr.msk.bf16.mxu1 %vm2508_vm2, %v10126_v26 }
0x2e83   : > { %v10115_v28 = vpack.c.bf16 %v10109_v41, %v10109_v41 }
0x2e84   : > { %v10127_v17 = vpop.trf.xlu0 }
0x2e85   : > { %15013 = vmatprep.subr.msk.bf16.mxu0 %vm2508_vm2, %v10115_v28  ;;  %v10247_v29 = vsel %vm2508_vm2, %v10115_v28, 0  ;;  %14855 = vmatmul.mubr.msk.bf16.vlgmr.msra.gmra.mxu1 %vm2508_vm2, %v10127_v17 }
0x2e86   : > { %14859 = vmatpush3.bf16.xpose.msra.mxu0 %v10247_v29 }
0x2e88   : > { %v16047_v8 = vpop.eup %16046 }
0x2e89   : > { %v10111_v32 = vmul.f32 %v16047_v8, %v16039_v31 }
0x2e8b   : > { %v10116_v33 = vpack.c.bf16 %v10111_v32, %v10111_v32 }
0x2e8d   : > { %15014 = vmatprep.subr.msk.bf16.mxu1 %vm2508_vm2, %v10116_v33  ;;  %v10305_v54 = vsel %vm2508_vm2, %v10116_v33, 0  ;;  %v15783_v33 = vld [vmem:[#allocation31] sm:$0xff]  }
0x2e8e   : > { %14865 = vmatpush3.bf16.xpose.msra.mxu1 %v10305_v54 }
0x2e8f   : > { %14876 = vmatprep.subr.bf16.mxu1 %v17199_v3 }
0x2ea7   : > { %v10105_v58 = vpop.xlane.xlu1 %10104 }
0x2ea8   : > { %16048 = vrcp.f32 %v10105_v58 }
0x2ead   : > { %v10142_v18 = vpop.trf.xlu1 }
0x2eae   : > { %14860 = vmatprep.mubr.msk.bf16.mxu0 %vm2508_vm2, %v10142_v18 }
0x2eb1   : > { %v10143_v38 = vpop.trf.xlu1 }
0x2eb2   : > { %14861 = vmatmul.mubr.msk.bf16.vlgmr.msra.gmra.mxu0 %vm2508_vm2, %v10143_v38 }
0x2eb5   : > { %v16049_v51 = vpop.eup %16048 }
0x2eb6   : > { %v10113_v21 = vmul.f32 %v16049_v51, %v16041_v1  ;;  %v15779_v1 = vld [vmem:[#allocation31 + $0x20] sm:$0xff]  }
0x2eb8   : > { %v10117_v52 = vpack.c.bf16 %v10113_v21, %v10113_v21 }
0x2eba   : > { %15015 = vmatprep.subr.msk.bf16.mxu0 %vm2508_vm2, %v10117_v52  ;;  %v10363_v23 = vsel %vm2508_vm2, %v10117_v52, 0 }
0x2ebb   : > { %14871 = vmatpush3.bf16.xpose.msra.mxu0 %v10363_v23 }
0x2ebc   : > { %14896 = vmatprep.subr.bf16.mxu0 %v17199_v3 }
0x2ed9   : > { %v10158_v36 = vpop.trf.xlu0 }
0x2eda   : > { %14866 = vmatprep.mubr.msk.bf16.mxu1 %vm2508_vm2, %v10158_v36 }
0x2edd   : > { %v10159_v14 = vpop.trf.xlu0 }
0x2ede   : > { %14867 = vmatmul.mubr.msk.bf16.vlgmr.msra.gmra.mxu1 %vm2508_vm2, %v10159_v14 }
0x2edf   : > { %14892 = vmatprep.mubr.msk.bf16.mxu1 %vm17201_vm0, %v17199_v3  ;;  %14877 = vmatpush3.bf16.msra.mxu1 %v15776_v45 }
0x2ee0   : > { %14878 = vmatprep.subr.bf16.mxu1 %v17199_v3 }
0x2ee1   : > { %v10174_v49 = vpop.trf.xlu0 }
0x2ee2   : > { %14872 = vmatprep.mubr.msk.bf16.mxu0 %vm2508_vm2, %v10174_v49 }
0x2ee3   : > { %14879 = vmatpush3.bf16.msra.mxu1 %v15777_v60 }
0x2ee4   : > { %14880 = vmatprep.subr.bf16.mxu1 %v17199_v3 }
0x2ee5   : > { %v10175_v63 = vpop.trf.xlu0 }
0x2ee6   : > { %14873 = vmatmul.mubr.msk.bf16.vlgmr.msra.gmra.mxu0 %vm2508_vm2, %v10175_v63 }
0x2ee7   : > { %14912 = vmatprep.mubr.msk.bf16.mxu0 %vm17201_vm0, %v17199_v3  ;;  %14881 = vmatpush3.bf16.msra.mxu1 %v15778_v10 }
0x2ee8   : > { %14882 = vmatprep.subr.bf16.mxu1 %v17199_v3 }
0x2eeb   : > { %14883 = vmatpush3.bf16.msra.mxu1 %v15779_v1  ;;  %v15784_v1 = vld [vmem:[#allocation40 + $0x70] ss:$8 sps:$4 sm:$0xff]  }
0x2eec   : > { %14884 = vmatprep.subr.bf16.mxu1 %v17199_v3 }
0x2eef   : > { %14885 = vmatpush3.bf16.msra.mxu1 %v15780_v19 }
0x2ef0   : > { %14886 = vmatprep.subr.bf16.mxu1 %v17199_v3 }
0x2ef3   : > { %14887 = vmatpush3.bf16.msra.mxu1 %v15781_v55  ;;  %v15789_v55 = vld [vmem:[#allocation40 + $0x64] ss:$8 sps:$4 sm:$0xff]  }
0x2ef4   : > { %14888 = vmatprep.subr.bf16.mxu1 %v17199_v3 }
0x2ef7   : > { %14889 = vmatpush3.bf16.msra.mxu1 %v15782_v13  ;;  %v15787_v13 = vld [vmem:[#allocation40 + $0x60] ss:$8 sps:$4 sm:$0xff]  }
0x2ef8   : > { %14890 = vmatprep.subr.bf16.mxu1 %v17199_v3 }
0x2efb   : > { %14891 = vmatpush3.bf16.msra.mxu1 %v15783_v33 }
0x2f45   : > { %v14856_v27 = vpop.f32.mrf.mxu1 }
0x2f47   : > { %v10225_v0 = vpop.f32.mrf.mxu1 }
0x2f48   : > { %10414 = vxpose.xlu0.b32.start [1/4] (short) (narrow) %v10225_v0, 8 }
0x2f49   : > { %v14857_v47 = vpop.f32.mrf.mxu1 }
0x2f4b   : > { %v10228_v56 = vpop.f32.mrf.mxu1 }
0x2f4c   : > { %10415 = vxpose.xlu0.b32.cont [2/4] (short) (narrow) %v10228_v56, 8 }
0x2f50   : > { %10416 = vxpose.xlu0.b32.cont [3/4] (short) (narrow) %v14856_v27, 8  ;;  %v15786_v27 = vld [vmem:[#allocation40 + $0x74] ss:$8 sps:$4 sm:$0xff]  }
0x2f51   : > { %11063 = vmatprep.subr.bf16.mxu1 %v15786_v27 }
0x2f54   : > { %10417 = vxpose.xlu0.b32.end [4/4] (short) (narrow) %v14857_v47, 8 }
0x2f72   : > { %v14862_v42 = vpop.f32.mrf.mxu0 }
0x2f74   : > { %v10283_v57 = vpop.f32.mrf.mxu0 }
0x2f75   : > { %10446 = vxpose.xlu1.b32.start [1/4] (short) (narrow) %v10283_v57, 8 }
0x2f76   : > { %v14863_v5 = vpop.f32.mrf.mxu0 }
0x2f78   : > { %v10286_v40 = vpop.f32.mrf.mxu0 }
0x2f79   : > { %10447 = vxpose.xlu1.b32.cont [2/4] (short) (narrow) %v10286_v40, 8 }
0x2f7d   : > { %10448 = vxpose.xlu1.b32.cont [3/4] (short) (narrow) %v14862_v42, 8 }
0x2f81   : > { %10449 = vxpose.xlu1.b32.end [4/4] (short) (narrow) %v14863_v5, 8 }
0x2f9e   : > { %v14868_v4 = vpop.f32.mrf.mxu1 }
0x2fa0   : > { %v10341_v7 = vpop.f32.mrf.mxu1 }
0x2fa1   : > { %10478 = vxpose.xlu0.b32.start [1/4] (short) (narrow) %v10341_v7, 8 }
0x2fa2   : > { %v14869_v34 = vpop.f32.mrf.mxu1 }
0x2fa4   : > { %v10344_v15 = vpop.f32.mrf.mxu1 }
0x2fa5   : > { %10479 = vxpose.xlu0.b32.cont [2/4] (short) (narrow) %v10344_v15, 8 }
0x2fa6   : > { %v14874_v9 = vpop.f32.mrf.mxu0 }
0x2fa8   : > { %v10399_v30 = vpop.f32.mrf.mxu0 }
0x2fa9   : > { %10480 = vxpose.xlu0.b32.cont [3/4] (short) (narrow) %v14868_v4, 8  ;;  %10510 = vxpose.xlu1.b32.start [1/4] (short) (narrow) %v10399_v30, 8 }
0x2faa   : > { %v14875_v31 = vpop.f32.mrf.mxu0 }
0x2fac   : > { %v10402_v37 = vpop.f32.mrf.mxu0 }
0x2fad   : > { %10481 = vxpose.xlu0.b32.end [4/4] (short) (narrow) %v14869_v34, 8  ;;  %10511 = vxpose.xlu1.b32.cont [2/4] (short) (narrow) %v10402_v37, 8 }
0x2fb1   : > { %10512 = vxpose.xlu1.b32.cont [3/4] (short) (narrow) %v14874_v9, 8 }
0x2fb5   : > { %10513 = vxpose.xlu1.b32.end [4/4] (short) (narrow) %v14875_v31, 8 }
0x2fc4   : > { %v10430_v44 = vpop.trf.xlu0 }
0x2ff1   : > { %v10462_v20 = vpop.trf.xlu1 }
0x301d   : > { %v10494_v50 = vpop.trf.xlu0 }
0x301e   : > { %v10542_v59 = vcombine.low %v10430_v44, %v10494_v50  ;;  %v10543_v22 = vcombine.high %v10430_v44, %v10494_v50  ;;  %v15792_v44 = vld [vmem:[#allocation40 + $0x54] ss:$8 sps:$4 sm:$0xff]   ;;  %v15795_v50 = vld [vmem:[#allocation40 + $0x44] ss:$8 sps:$4 sm:$0xff]  }
0x3020   : > { %v10550_v24 = vrot.slane %v10542_v59, %v17955_v6  ;;  %v10557_v26 = vrot.slane %v10543_v22, %v17955_v6  ;;  %v15793_v59 = vld [vmem:[#allocation40 + $0x40] ss:$8 sps:$4 sm:$0xff]   ;;  %v15798_v22 = vld [vmem:[#allocation40 + $0x34] ss:$8 sps:$4 sm:$0xff]  }
0x3025   : > { %v10526_v16 = vpop.trf.xlu1 }
0x3026   : > { %v10558_v35 = vcombine.low %v10462_v20, %v10526_v16  ;;  %v10559_v46 = vcombine.high %v10462_v20, %v10526_v16  ;;  %v15790_v20 = vld [vmem:[#allocation40 + $0x50] ss:$8 sps:$4 sm:$0xff]  }
0x3027   : > { %v15796_v16 = vld [vmem:[#allocation40 + $0x30] ss:$8 sps:$4 sm:$0xff]  }
0x3028   : > { %v10566_v41 = vrot.slane %v10558_v35, %v17955_v6  ;;  %v10573_v28 = vrot.slane %v10559_v46, %v17955_v6  ;;  %v15801_v35 = vld [vmem:[#allocation40 + $0x24] ss:$8 sps:$4 sm:$0xff]   ;;  %v15799_v46 = vld [vmem:[#allocation40 + $0x20] ss:$8 sps:$4 sm:$0xff]  }
0x302a   : > { %v10574_v17 = vcombine.low %v10550_v24, %v10566_v41  ;;  %v10575_v29 = vcombine.high %v10550_v24, %v10566_v41  ;;  %v10590_v8 = vcombine.low %v10557_v26, %v10573_v28  ;;  %v10591_v32 = vcombine.high %v10557_v26, %v10573_v28  ;;  %v15804_v24 = vld [vmem:[#allocation40 + $0x14] ss:$8 sps:$4 sm:$0xff]   ;;  %v15802_v26 = vld [vmem:[#allocation40 + $0x10] ss:$8 sps:$4 sm:$0xff]   ;;  %v15807_v41 = vld [vmem:[#allocation40 + $0x4] ss:$8 sps:$4 sm:$0xff]  }
0x302b   : > { %v15805_v28 = vld [vmem:[#allocation40] ss:$8 sps:$4 sm:$0xff]  }
0x302c   : > { %v10582_v54 = vrot.slane %v10574_v17, %v17958_v12  ;;  %v10589_v58 = vrot.slane %v10575_v29, %v17958_v12  ;;  %v10598_v18 = vrot.slane %v10590_v8, %v17958_v12  ;;  %v10605_v38 = vrot.slane %v10591_v32, %v17958_v12  ;;  %v13864_v32 = vld [vmem:[#allocation32] ss:$0 sm:$0xff] }
0x302d   : > { %v9477_v17 = vadd.f32 %v18815_v61, %v18805_v11  ;;  %v10849_v61 = vld [vmem:[#allocation41] sm:$0x3] }
0x302e   : > { %v10610_v51 = vcombine.low %v10582_v54, %v10589_v58  ;;  %v13862_v21 = vcombine.high %v10582_v54, %v10589_v58  ;;  %v10626_v52 = vcombine.low %v10598_v18, %v10605_v38  ;;  %v13863_v23 = vcombine.high %v10598_v18, %v10605_v38  ;;  %v16077_v18 = vld [vmem:[%s18696_s2] sm:$0xff] }
0x302f   : > { %v9484_v29 = vadd.f32 %v9477_v17, %v18704_v53  ;;  %v10980_v62 = vrot.slane %v10849_v61, %v17872_v43 }
0x3030   : > { %v10617_v36 = vrot.slane %v10610_v51, %v17955_v6  ;;  %v10625_v14 = vrot.slane %v13862_v21, %v17955_v6  ;;  %v10633_v49 = vrot.slane %v10626_v52, %v17955_v6  ;;  %v10641_v63 = vrot.slane %v13863_v23, %v17955_v6 }
0x3031   : > { %v10971_v8 = vpack.c.bf16 %v9484_v29, %v9484_v29  ;;  %v10976_v23 = vrot.slane %v10849_v61, %v17881_v48 }
0x3032   : > { %v10643_v0 = vcombine.high %v10617_v36, %v10625_v14  ;;  %v10659_v47 = vcombine.high %v10633_v49, %v10641_v63  ;;  %v10642_v56 = vcombine.low %v10617_v36, %v10625_v14  ;;  %v10658_v42 = vcombine.low %v10633_v49, %v10641_v63 }
0x3034   : > { %v10657_v57 = vrot.slane %v10643_v0, %v17958_v12  ;;  %v10673_v5 = vrot.slane %v10659_v47, %v17958_v12  ;;  %v10650_v40 = vrot.slane %v10642_v56, %v17958_v12  ;;  %v10666_v4 = vrot.slane %v10658_v42, %v17958_v12 }
0x3036   : > { %v10676_v7 = vcombine.low %v10657_v57, %v10673_v5  ;;  %v10675_v34 = vcombine.high %v10650_v40, %v10666_v4  ;;  %v10674_v15 = vcombine.low %v10650_v40, %v10666_v4  ;;  %v10677_v9 = vcombine.high %v10657_v57, %v10673_v5  ;;  %v15808_v4 = vld [vmem:[#allocation37 + $0x38] sm:$0xff]  }
0x3037   : > { %14897 = vmatpush3.bf16.msra.mxu0 %v15808_v4 }
0x3038   : > { %10683 = vrot.lane.b32.xlu1 %v10676_v7, %s17204_s10  ;;  %10679 = vrot.lane.b32.xlu0 %v10675_v34, %s17202_s26  ;;  %v15809_v7 = vld [vmem:[#allocation37 + $0x30] sm:$0xff]  }
0x3039   : > { %14898 = vmatprep.subr.bf16.mxu0 %v17199_v3 }
0x303b   : > { %14899 = vmatpush3.bf16.msra.mxu0 %v15809_v7 }
0x303c   : > { %10687 = vrot.lane.b32.xlu1 %v10677_v9, %s17203_s25  ;;  %14900 = vmatprep.subr.bf16.mxu0 %v17199_v3 }
0x30aa   : > { %v10684_v30 = vpop.permute.xlu1 %10683  ;;  %v10680_v31 = vpop.permute.xlu0 %10679 }
0x30ab   : > { %v10690_v37 = vsel %vm2331_vm1, %v10674_v15, %v10680_v31  ;;  %v15810_v31 = vld [vmem:[#allocation37 + $0x28] sm:$0xff]  }
0x30ac   : > { %v10691_v60 = vsel %vm3130_vm3, %v10690_v37, %v10684_v30  ;;  %14901 = vmatpush3.bf16.msra.mxu0 %v15810_v31  ;;  %v15811_v37 = vld [vmem:[#allocation37 + $0x20] sm:$0xff]  }
0x30ad   : > { %14902 = vmatprep.subr.bf16.mxu0 %v17199_v3 }
0x30ae   : > { %v10688_v45 = vpop.permute.xlu1 %10687 }
0x30af   : > { %v10692_v10 = vsel %vm3132_vm4, %v10691_v60, %v10688_v45  ;;  %v15812_v45 = vld [vmem:[#allocation37 + $0x18] sm:$0xff]   ;;  %v15813_v60 = vld [vmem:[#allocation37 + $0x10] sm:$0xff]  }
0x30b0   : > { %v10693_v19 = vpack.c.bf16 %v10692_v10, %v10692_v10  ;;  %14903 = vmatpush3.bf16.msra.mxu0 %v15811_v37  ;;  %v15814_v10 = vld [vmem:[#allocation37 + $0x8] sm:$0xff]  }
0x30b1   : > { %14904 = vmatprep.subr.bf16.mxu0 %v17199_v3 }
0x30b2   : > { %14893 = vmatmul.mubr.bf16.vlgmr.msra.gmra.mxu1 %v10693_v19 }
0x30b3   : > { %11064 = vmatpush1.bf16.msra.mxu1 %v15784_v1  ;;  %11095 = vmatprep.mubr.bf16.mxu1 %v17200_v25  ;;  %v15815_v1 = vld [vmem:[#allocation37] sm:$0xff]  }
0x30b4   : > { %11065 = vmatprep.subr.bf16.mxu1 %v15789_v55  ;;  %14905 = vmatpush3.bf16.msra.mxu0 %v15812_v45 }
0x30b5   : > { %14906 = vmatprep.subr.bf16.mxu0 %v17199_v3 }
0x30b7   : > { %11066 = vmatpush1.bf16.msra.mxu1 %v15787_v13 }
0x30b8   : > { %11067 = vmatprep.subr.bf16.mxu1 %v15792_v44  ;;  %14907 = vmatpush3.bf16.msra.mxu0 %v15813_v60 }
0x30b9   : > { %14908 = vmatprep.subr.bf16.mxu0 %v17199_v3 }
0x30bb   : > { %11068 = vmatpush1.bf16.msra.mxu1 %v15790_v20 }
0x30bc   : > { %11069 = vmatprep.subr.bf16.mxu1 %v15795_v50  ;;  %14909 = vmatpush3.bf16.msra.mxu0 %v15814_v10 }
0x30bd   : > { %14910 = vmatprep.subr.bf16.mxu0 %v17199_v3 }
0x30bf   : > { %11070 = vmatpush1.bf16.msra.mxu1 %v15793_v59 }
0x30c0   : > { %11071 = vmatprep.subr.bf16.mxu1 %v15798_v22  ;;  %14911 = vmatpush3.bf16.msra.mxu0 %v15815_v1 }
0x30c1   : > { %14916 = vmatprep.subr.bf16.mxu0 %v17199_v3 }
0x30c3   : > { %11072 = vmatpush1.bf16.msra.mxu1 %v15796_v16  ;;  %v13873_v16 = vld [vmem:[#allocation34] ss:$0 sm:$0xff] }
0x30c4   : > { %11073 = vmatprep.subr.bf16.mxu1 %v15801_v35 }
0x30c7   : > { %11074 = vmatpush1.bf16.msra.mxu1 %v15799_v46  ;;  %v13874_v46 = vld [vmem:[#allocation35] ss:$0 sm:$0xff] }
0x30c8   : > { %11075 = vmatprep.subr.bf16.mxu1 %v15804_v24 }
0x30cb   : > { %11076 = vmatpush1.bf16.msra.mxu1 %v15802_v26 }
0x30cc   : > { %11077 = vmatprep.subr.bf16.mxu1 %v15807_v41 }
0x30cf   : > { %11078 = vmatpush1.bf16.msra.mxu1 %v15805_v28 }
0x30d2   : > { %11096 = vmatmul.mubr.bf16.vlgmr.msra.gmra.mxu1 %v10970_v2 }
0x30d3   : > { %11105 = vmatprep.mubr.bf16.mxu1 %v17200_v25 }
0x30da   : > { %11106 = vmatmul.mubr.bf16.gmra.mxu1 %v10971_v8 }
0x3172   : > { %v10782_v33 = vpop.f32.mrf.mxu1 }
0x3173   : > { %v10783_v54 = vadd.f32 %v13864_v32, %v10782_v33  ;;  %v13875_v32 = vld [vmem:[#allocation38] ss:$0 sm:$0xff] }
0x3174   : > { %v14894_v58 = vpop.f32.mrf.mxu1 }
0x3175   : > { %v18914_v38 = vadd.f32 %v16077_v18, %v10783_v54 }
0x3176   : > { %v10785_v51 = vpop.f32.mrf.mxu1 }
0x3177   : > { %10791 = vadd.xlane.f32.xlu1 %v18914_v38 }
0x3178   : > { %v14895_v11 = vpop.f32.mrf.mxu1 }
0x3192   : > { %v11097_v39 = vpop.f32.mrf.mxu1 }
0x3193   : > { %v11098_v57 = vadd.f32 %v11097_v39, %v10976_v23 }
0x3194   : > { %v11099_v2 = vpop.f32.mrf.mxu1 }
0x3195   : > { %v11100_v21 = vadd.f32 %v11099_v2, %v10980_v62 }
0x3196   : > { %v11101_v53 = vpop.f32.mrf.mxu1 }
0x3197   : > { %v11102_v0 = vadd.f32 %v11101_v53, %v10976_v23 }
0x3198   : > { %v11103_v52 = vpop.f32.mrf.mxu1 }
0x3199   : > { %v11104_v36 = vadd.f32 %v11103_v52, %v10980_v62  ;;  %v11114_v40 = vpack.c.bf16 %v11102_v0, %v11098_v57 }
0x319a   : > { %v11107_v14 = vpop.f32.mrf.mxu1 }
0x319b   : > { %v18919_v49 = vpack.c.bf16 %v11104_v36, %v11100_v21  ;;  %v11108_v63 = vadd.f32 %v11107_v14, %v10976_v23 }
0x319c   : > { %v11109_v27 = vpop.f32.mrf.mxu1 }
0x319d   : > { %v11116_v47 = vpack.c.bf16 %v11108_v63, %v11108_v63  ;;  %v18921_v56 = vadd.f32 %v11109_v27, %v10980_v62 }
0x319e   : > { %v11111_v42 = vpop.f32.mrf.mxu1 }
0x319f   : > { %11122 = vrot.lane.b32.xlu1 %v11116_v47, %s17203_s25 }
0x31a0   : > { %v11112_v5 = vpop.f32.mrf.mxu1 }
0x31a3   : > { %11126 = vrot.lane.b32.xlu1 %v11114_v40, %s17204_s10 }
0x31a7   : > { %11132 = vrot.lane.b32.xlu1 %v11114_v40, %s17202_s26 }
0x3200   : > { %v10792_v34 = vpop.xlane.xlu1 %10791 }
0x3201   : > { %v10793_v15 = vmul.f32 0.0078125, %v10792_v34 }
0x3203   : > { %v10794_v9 = vsub.f32 %v18914_v38, %v10793_v15 }
0x3205   : > { %v10795_v30 = vmul.f32 %v10794_v9, %v10794_v9 }
0x3207   : > { %10796 = vadd.xlane.f32.xlu0 %v10795_v30 }
0x3211   : > { %v11123_v20 = vpop.permute.xlu1 %11122 }
0x3215   : > { %v11127_v29 = vpop.permute.xlu1 %11126 }
0x3219   : > { %v11133_v8 = vpop.permute.xlu1 %11132 }
0x321d   : > { %11120 = vrot.lane.b32.xlu0 %v11114_v40, %s17203_s25 }
0x3221   : > { %11128 = vrot.lane.b32.xlu0 %v11116_v47, %s17204_s10 }
0x3225   : > { %11134 = vrot.lane.b32.xlu0 %v11116_v47, %s17202_s26 }
0x3243   : > { %11158 = vxpose.xlu0.c.b16.start [1/2] (short) (narrow) %v11114_v40, 32 }
0x3247   : > { %11159 = vxpose.xlu0.c.b16.end [2/2] (short) (narrow) %v11116_v47, 32 }
0x3290   : > { %v10797_v19 = vpop.xlane.xlu0 %10796 }
0x3291   : > { %v10798_v55 = vmul.f32 0.0078125, %v10797_v19 }
0x3293   : > { %v10799_v13 = vadd.f32 1e-05, %v10798_v55 }
0x3294   : > { %v11121_v44 = vpop.permute.xlu0 %11120 }
0x3295   : > { %16050 = vrsqrt.f32 %v10799_v13  ;;  %11174 = vxpose.xlu1.c.b16.start [1/2] (short) (narrow) %v11121_v44, 32 }
0x3298   : > { %v11129_v50 = vpop.permute.xlu0 %11128 }
0x3299   : > { %11175 = vxpose.xlu1.c.b16.end [2/2] (short) (narrow) %v11123_v20, 32 }
0x329c   : > { %v11135_v59 = vpop.permute.xlu0 %11134 }
0x32a2   : > { %v16051_v22 = vpop.eup %16050 }
0x32a3   : > { %v10801_v35 = vmul.f32 %v16051_v22, %v10794_v9 }
0x32a5   : > { %v10808_v24 = vmul.f32 %v13873_v16, %v10801_v35  ;;  %v11166_v26 = vpop.trf.xlu0  ;;  %v11117_v16 = vpack.c.bf16 %v18921_v56, %v18921_v56 }
0x32a7   : > { %v10815_v41 = vadd.f32 %v13874_v46, %v10808_v24 }
0x32a9   : > { %v10867_v28 = vpack.c.bf16 %v10815_v41, %v10815_v41  ;;  %v11167_v17 = vpop.trf.xlu0 }
0x32ab   : > { %14913 = vmatmul.mubr.bf16.vlgmr.msra.gmra.mxu0 %v10867_v28 }
0x32ac   : > { %14917 = vmatpush3.bf16.msra.mxu0 %v11167_v17  ;;  %14920 = vmatprep.mubr.msk.bf16.mxu0 %vm17201_vm0, %v17199_v3 }
0x32ad   : > { %14918 = vmatprep.subr.bf16.mxu0 %v17199_v3 }
0x32b0   : > { %14919 = vmatpush3.bf16.msra.mxu0 %v11166_v26 }
0x32b1   : > { %14924 = vmatprep.subr.bf16.mxu0 %v17199_v3 }
0x32f7   : > { %v11182_v33 = vpop.trf.xlu1 }
0x32fb   : > { %v11183_v61 = vpop.trf.xlu1 }
0x336b   : > { %v10956_v54 = vpop.f32.mrf.mxu0 }
0x336c   : > { %v10957_v58 = vadd.f32 %v13875_v32, %v10956_v54 }
0x336d   : > { %v14914_v18 = vpop.f32.mrf.mxu0 }
0x336e   : > { %v10962_v51 = vpack.c.bf16 %v10957_v58, %v10957_v58 }
0x336f   : > { %v10959_v11 = vpop.f32.mrf.mxu0 }
0x3370   : > { %10968 = vrot.lane.b32.xlu0 %v10962_v51, %s17202_s26  ;;  %10964 = vrot.lane.b32.xlu1 %v10962_v51, %s17203_s25 }
0x3371   : > { %14921 = vmatmul.mubr.msk.bf16.vlgmr.msra.gmra.mxu0 %vm2331_vm1, %v10962_v51  ;;  %v14915_v62 = vpop.f32.mrf.mxu0 }
0x3372   : > { %14925 = vmatpush3.bf16.msra.mxu0 %v11183_v61  ;;  %14928 = vmatprep.mubr.msk.bf16.mxu0 %vm17201_vm0, %v17199_v3 }
0x3373   : > { %14926 = vmatprep.subr.bf16.mxu0 %v17199_v3 }
0x3374   : > { %10966 = vrot.lane.b32.xlu1 %v10962_v51, %s17204_s10 }
0x3376   : > { %14927 = vmatpush3.bf16.msra.mxu0 %v11182_v33 }
0x3377   : > { %14932 = vmatprep.subr.bf16.mxu0 %v17199_v3 }
0x338e   : > { %11190 = vxpose.xlu0.c.b16.start [1/2] (short) (narrow) %v11127_v29, 32 }
0x3392   : > { %11191 = vxpose.xlu0.c.b16.end [2/2] (short) (narrow) %v11129_v50, 32 }
0x3397   : > { %11206 = vxpose.xlu1.c.b16.start [1/2] (short) (narrow) %v11133_v8, 32 }
0x339b   : > { %11140 = vrot.lane.b32.xlu0 %v18919_v49, %s17203_s25  ;;  %11207 = vxpose.xlu1.c.b16.end [2/2] (short) (narrow) %v11135_v59, 32 }
0x339f   : > { %11146 = vrot.lane.b32.xlu0 %v18919_v49, %s17204_s10 }
0x33e2   : > { %v10965_v39 = vpop.permute.xlu1 %10964  ;;  %v10969_v2 = vpop.permute.xlu0 %10968 }
0x33e3   : > { %14929 = vmatmul.mubr.msk.bf16.vlgmr.msra.gmra.mxu0 %vm2331_vm1, %v10965_v39 }
0x33e4   : > { %14936 = vmatprep.mubr.msk.bf16.mxu0 %vm17201_vm0, %v17199_v3 }
0x33e6   : > { %v10967_v52 = vpop.permute.xlu1 %10966 }
0x33f0   : > { %v11198_v21 = vpop.trf.xlu0 }
0x33f4   : > { %v11199_v53 = vpop.trf.xlu0 }
0x33f5   : > { %14933 = vmatpush3.bf16.msra.mxu0 %v11199_v53 }
0x33f6   : > { %14934 = vmatprep.subr.bf16.mxu0 %v17199_v3 }
0x33f9   : > { %v11214_v23 = vpop.trf.xlu1  ;;  %14935 = vmatpush3.bf16.msra.mxu0 %v11198_v21 }
0x33fa   : > { %14940 = vmatprep.subr.bf16.mxu0 %v17199_v3 }
0x33fc   : > { %14937 = vmatmul.mubr.msk.bf16.vlgmr.msra.gmra.mxu0 %vm2331_vm1, %v10967_v52 }
0x33fd   : > { %v11215_v36 = vpop.trf.xlu1  ;;  %14944 = vmatprep.mubr.msk.bf16.mxu0 %vm17201_vm0, %v17199_v3 }
0x33fe   : > { %14941 = vmatpush3.bf16.msra.mxu0 %v11215_v36 }
0x33ff   : > { %14942 = vmatprep.subr.bf16.mxu0 %v17199_v3 }
0x3402   : > { %14943 = vmatpush3.bf16.msra.mxu0 %v11214_v23 }
0x3405   : > { %14945 = vmatmul.mubr.msk.bf16.vlgmr.msra.gmra.mxu0 %vm2331_vm1, %v10969_v2 }
0x340d   : > { %v11141_v8 = vpop.permute.xlu0 %11140 }
0x3411   : > { %v11147_v56 = vpop.permute.xlu0 %11146 }
0x3431   : > { %v11259_v14 = vpop.f32.mrf.mxu0 }
0x3432   : > { %v11394_v63 = vmul.f32 0.17677669, %v11259_v14 }
0x3433   : > { %v14922_v27 = vpop.f32.mrf.mxu0 }
0x3434   : > { %v11398_v0 = vsel %vm7949_vm9, %v11394_v63, -inf }
0x3435   : > { %11399 = vmax.xlane.f32.xlu1 %v11398_v0  ;;  %v11262_v47 = vpop.f32.mrf.mxu0 }
0x3437   : > { %v14923_v42 = vpop.f32.mrf.mxu0 }
0x34a3   : > { %v11302_v57 = vpop.f32.mrf.mxu0 }
0x34a4   : > { %v11395_v5 = vmul.f32 0.17677669, %v11302_v57 }
0x34a5   : > { %v14930_v40 = vpop.f32.mrf.mxu0 }
0x34a6   : > { %v11401_v4 = vsel %vm7949_vm9, %v11395_v5, -inf }
0x34a7   : > { %11402 = vmax.xlane.f32.xlu1 %v11401_v4  ;;  %v11305_v7 = vpop.f32.mrf.mxu0 }
0x34a9   : > { %v14931_v34 = vpop.f32.mrf.mxu0 }
0x34bc   : > { %v11345_v15 = vpop.f32.mrf.mxu0 }
0x34bd   : > { %v11396_v9 = vmul.f32 0.17677669, %v11345_v15 }
0x34be   : > { %v11400_v30 = vpop.xlane.xlu1 %11399  ;;  %v14938_v31 = vpop.f32.mrf.mxu0 }
0x34bf   : > { %v11410_v37 = vsub.f32 %v11394_v63, %v11400_v30  ;;  %v11404_v45 = vsel %vm7949_vm9, %v11396_v9, -inf }
0x34c0   : > { %11405 = vmax.xlane.f32.xlu1 %v11404_v45  ;;  %v11348_v60 = vpop.f32.mrf.mxu0 }
0x34c1   : > { %v11414_v10 = vmul.f32 1.442695, %v11410_v37 }
0x34c2   : > { %v14939_v1 = vpop.f32.mrf.mxu0 }
0x34c3   : > { %16052 = vpow2.f32 %v11414_v10 }
0x34c5   : > { %v11388_v19 = vpop.f32.mrf.mxu0 }
0x34c6   : > { %v11397_v55 = vmul.f32 0.17677669, %v11388_v19 }
0x34c7   : > { %v14946_v13 = vpop.f32.mrf.mxu0 }
0x34c8   : > { %v11407_v44 = vsel %vm7949_vm9, %v11397_v55, -inf }
0x34c9   : > { %11408 = vmax.xlane.f32.xlu1 %v11407_v44  ;;  %v11391_v20 = vpop.f32.mrf.mxu0 }
0x34cb   : > { %v14947_v50 = vpop.f32.mrf.mxu0 }
0x34d0   : > { %v16053_v59 = vpop.eup %16052 }
0x34d1   : > { %v11422_v22 = vsel %vm7949_vm9, %v16053_v59, 0.0 }
0x34d2   : > { %11423 = vadd.xlane.f32.xlu0 %v11422_v22 }
0x34da   : > { %11142 = vrot.lane.b32.xlu1 %v11117_v16, %s17203_s25 }
0x34e8   : > { %11148 = vrot.lane.b32.xlu0 %v11117_v16, %s17204_s10 }
0x34ec   : > { %11154 = vrot.lane.b32.xlu0 %v11117_v16, %s17202_s26 }
0x3530   : > { %v11403_v35 = vpop.xlane.xlu1 %11402 }
0x3531   : > { %v11411_v46 = vsub.f32 %v11395_v5, %v11403_v35 }
0x3533   : > { %v11416_v24 = vmul.f32 1.442695, %v11411_v46 }
0x3535   : > { %16054 = vpow2.f32 %v11416_v24 }
0x3542   : > { %v16055_v26 = vpop.eup %16054 }
0x3543   : > { %v11425_v41 = vsel %vm7949_vm9, %v16055_v26, 0.0 }
0x3544   : > { %11426 = vadd.xlane.f32.xlu1 %v11425_v41 }
0x3549   : > { %v11406_v28 = vpop.xlane.xlu1 %11405 }
0x354a   : > { %v11412_v17 = vsub.f32 %v11396_v9, %v11406_v28 }
0x354c   : > { %v11418_v29 = vmul.f32 1.442695, %v11412_v17 }
0x354e   : > { %16056 = vpow2.f32 %v11418_v29 }
0x3552   : > { %v11409_v58 = vpop.xlane.xlu1 %11408 }
0x3553   : > { %v11413_v18 = vsub.f32 %v11397_v55, %v11409_v58  ;;  %v15821_v58 = vld [vmem:[#allocation43 + $0x10] sm:$0xff]  }
0x3555   : > { %11152 = vrot.lane.b32.xlu1 %v18919_v49, %s17202_s26  ;;  %v11420_v51 = vmul.f32 1.442695, %v11413_v18 }
0x3556   : > { %v11143_v52 = vpop.permute.xlu1 %11142 }
0x355b   : > { %v16057_v32 = vpop.eup %16056  ;;  %v11424_v33 = vpop.xlane.xlu0 %11423 }
0x355c   : > { %16058 = vrcp.f32 %v11424_v33  ;;  %v11428_v54 = vsel %vm7949_vm9, %v16057_v32, 0.0  ;;  %v15819_v33 = vld [vmem:[#allocation43 + $0x20] sm:$0xff]  }
0x355d   : > { %11429 = vadd.xlane.f32.xlu0 %v11428_v54  ;;  %16060 = vpow2.f32 %v11420_v51  ;;  %v15820_v54 = vld [vmem:[#allocation43 + $0x18] sm:$0xff]  }
0x355f   : > { %v11149_v53 = vpop.permute.xlu0 %11148 }
0x3563   : > { %v11155_v14 = vpop.permute.xlu0 %11154 }
0x3569   : > { %v16059_v11 = vpop.eup %16058 }
0x356a   : > { %v11435_v61 = vmul.f32 %v16059_v11, %v16053_v59  ;;  %v16061_v2 = vpop.eup %16060 }
0x356b   : > { %v11431_v21 = vsel %vm7949_vm9, %v16061_v2, 0.0 }
0x356c   : > { %v11442_v62 = vpack.c.bf16 %v11435_v61, %v11435_v61 }
0x356e   : > { %15016 = vmatprep.subr.msk.bf16.mxu0 %vm7949_vm9, %v11442_v62  ;;  %v11517_v39 = vsel %vm7949_vm9, %v11442_v62, 0 }
0x356f   : > { %14949 = vmatpush3.bf16.xpose.msra.mxu0 %v11517_v39 }
0x3579   : > { %11432 = vadd.xlane.f32.xlu1 %v11431_v21 }
0x358a   : > { %11446 = vxpose.xlu0.c.b16.start [1/2] (short) (narrow) %v18919_v49, 32 }
0x358e   : > { %11447 = vxpose.xlu0.c.b16.end [2/2] (short) (narrow) %v11117_v16, 32 }
0x3592   : > { %11478 = vxpose.xlu0.c.b16.start [1/2] (short) (narrow) %v11147_v56, 32  ;;  %v15817_v56 = vld [vmem:[#allocation43 + $0x30] sm:$0xff]  }
0x3596   : > { %11479 = vxpose.xlu0.c.b16.end [2/2] (short) (narrow) %v11149_v53, 32 }
0x35a6   : > { %11462 = vxpose.xlu1.c.b16.start [1/2] (short) (narrow) %v11141_v8, 32  ;;  %v15816_v8 = vld [vmem:[#allocation43 + $0x38] sm:$0xff]  }
0x35aa   : > { %11463 = vxpose.xlu1.c.b16.end [2/2] (short) (narrow) %v11143_v52, 32 }
0x35cd   : > { %v11427_v23 = vpop.xlane.xlu1 %11426 }
0x35ce   : > { %16062 = vrcp.f32 %v11427_v23 }
0x35d1   : > { %v11153_v36 = vpop.permute.xlu1 %11152 }
0x35d2   : > { %11494 = vxpose.xlu1.c.b16.start [1/2] (short) (narrow) %v11153_v36, 32 }
0x35d6   : > { %11495 = vxpose.xlu1.c.b16.end [2/2] (short) (narrow) %v11155_v14, 32 }
0x35db   : > { %v16063_v63 = vpop.eup %16062 }
0x35dc   : > { %v11437_v27 = vmul.f32 %v16063_v63, %v16055_v26 }
0x35de   : > { %v11443_v0 = vpack.c.bf16 %v11437_v27, %v11437_v27 }
0x35e0   : > { %15017 = vmatprep.subr.msk.bf16.mxu1 %vm7949_vm9, %v11443_v0  ;;  %v11575_v49 = vsel %vm7949_vm9, %v11443_v0, 0 }
0x35e1   : > { %14955 = vmatpush3.bf16.xpose.msra.mxu1 %v11575_v49  ;;  %v15822_v49 = vld [vmem:[#allocation43 + $0x8] sm:$0xff]  }
0x35e6   : > { %v11430_v47 = vpop.xlane.xlu0 %11429 }
0x35e7   : > { %16064 = vrcp.f32 %v11430_v47 }
0x35ec   : > { %v11454_v42 = vpop.trf.xlu0 }
0x35ed   : > { %14950 = vmatprep.mubr.msk.bf16.mxu0 %vm7949_vm9, %v11454_v42 }
0x35f0   : > { %v11455_v57 = vpop.trf.xlu0 }
0x35f1   : > { %14951 = vmatmul.mubr.msk.bf16.vlgmr.msra.gmra.mxu0 %vm7949_vm9, %v11455_v57 }
0x35f4   : > { %v16065_v5 = vpop.eup %16064  ;;  %v11486_v40 = vpop.trf.xlu0 }
0x35f5   : > { %v11439_v4 = vmul.f32 %v16065_v5, %v16057_v32  ;;  %14962 = vmatprep.mubr.msk.bf16.mxu0 %vm7949_vm9, %v11486_v40  ;;  %v15818_v32 = vld [vmem:[#allocation43 + $0x28] sm:$0xff]  }
0x35f7   : > { %v11444_v7 = vpack.c.bf16 %v11439_v4, %v11439_v4 }
0x35f8   : > { %v11487_v15 = vpop.trf.xlu0 }
0x35f9   : > { %15018 = vmatprep.subr.msk.bf16.mxu0 %vm7949_vm9, %v11444_v7  ;;  %v11633_v34 = vsel %vm7949_vm9, %v11444_v7, 0 }
0x35fa   : > { %14961 = vmatpush3.bf16.xpose.msra.mxu0 %v11633_v34 }
0x35fb   : > { %14972 = vmatprep.subr.bf16.mxu0 %v17199_v3 }
0x3601   : > { %14963 = vmatmul.mubr.msk.bf16.vlgmr.msra.gmra.mxu0 %vm7949_vm9, %v11487_v15  ;;  %v15823_v15 = vld [vmem:[#allocation43] sm:$0xff]  }
0x3602   : > { %v11433_v9 = vpop.xlane.xlu1 %11432  ;;  %14988 = vmatprep.mubr.msk.bf16.mxu0 %vm17201_vm0, %v17199_v3  ;;  %14973 = vmatpush3.bf16.msra.mxu0 %v15816_v8 }
0x3603   : > { %16066 = vrcp.f32 %v11433_v9  ;;  %14974 = vmatprep.subr.bf16.mxu0 %v17199_v3 }
0x3606   : > { %14975 = vmatpush3.bf16.msra.mxu0 %v15817_v56 }
0x3607   : > { %14976 = vmatprep.subr.bf16.mxu0 %v17199_v3 }
0x3608   : > { %v11470_v30 = vpop.trf.xlu1 }
0x3609   : > { %14956 = vmatprep.mubr.msk.bf16.mxu1 %vm7949_vm9, %v11470_v30 }
0x360a   : > { %14977 = vmatpush3.bf16.msra.mxu0 %v15818_v32  ;;  %v15824_v32 = vld [vmem:[#allocation49 + $0x70] ss:$8 sps:$4 sm:$0xff]  }
0x360b   : > { %14978 = vmatprep.subr.bf16.mxu0 %v17199_v3 }
0x360c   : > { %v11471_v31 = vpop.trf.xlu1 }
0x360d   : > { %14957 = vmatmul.mubr.msk.bf16.vlgmr.msra.gmra.mxu1 %vm7949_vm9, %v11471_v31 }
0x360e   : > { %14979 = vmatpush3.bf16.msra.mxu0 %v15819_v33  ;;  %v15826_v33 = vld [vmem:[#allocation49 + $0x74] ss:$8 sps:$4 sm:$0xff]  }
0x360f   : > { %14980 = vmatprep.subr.bf16.mxu0 %v17199_v3 }
0x3610   : > { %v16067_v37 = vpop.eup %16066 }
0x3611   : > { %v11441_v45 = vmul.f32 %v16067_v37, %v16061_v2 }
0x3612   : > { %14981 = vmatpush3.bf16.msra.mxu0 %v15820_v54  ;;  %v15829_v54 = vld [vmem:[#allocation49 + $0x64] ss:$8 sps:$4 sm:$0xff]  }
0x3613   : > { %v11445_v60 = vpack.c.bf16 %v11441_v45, %v11441_v45  ;;  %14982 = vmatprep.subr.bf16.mxu0 %v17199_v3 }
0x3615   : > { %15019 = vmatprep.subr.msk.bf16.mxu1 %vm7949_vm9, %v11445_v60  ;;  %v11691_v10 = vsel %vm7949_vm9, %v11445_v60, 0 }
0x3616   : > { %14967 = vmatpush3.bf16.xpose.msra.mxu1 %v11691_v10  ;;  %14983 = vmatpush3.bf16.msra.mxu0 %v15821_v58  ;;  %v15827_v58 = vld [vmem:[#allocation49 + $0x60] ss:$8 sps:$4 sm:$0xff]  }
0x3617   : > { %14984 = vmatprep.subr.bf16.mxu0 %v17199_v3  ;;  %12253 = vmatprep.subr.bf16.mxu1 %v15826_v33 }
0x361a   : > { %14985 = vmatpush3.bf16.msra.mxu0 %v15822_v49 }
0x361b   : > { %14986 = vmatprep.subr.bf16.mxu0 %v17199_v3 }
0x361e   : > { %14987 = vmatpush3.bf16.msra.mxu0 %v15823_v15  ;;  %v15848_v15 = vld [vmem:[#allocation52 + $0x78] sm:$0xff]  }
0x361f   : > { %14354 = vmatprep.subr.bf16.mxu0 %v15848_v15  ;;  %v15872_v15 = vld [vmem:[#allocation58 + $0x54] ss:$8 sps:$4 sm:$0xff]  }
0x3634   : > { %v11502_v1 = vpop.trf.xlu1 }
0x3635   : > { %14968 = vmatprep.mubr.msk.bf16.mxu1 %vm7949_vm9, %v11502_v1 }
0x3638   : > { %v11503_v19 = vpop.trf.xlu1 }
0x3639   : > { %14969 = vmatmul.mubr.msk.bf16.vlgmr.msra.gmra.mxu1 %vm7949_vm9, %v11503_v19 }
0x363a   : > { %12285 = vmatprep.mubr.bf16.mxu1 %v17200_v25  ;;  %12254 = vmatpush1.bf16.msra.mxu1 %v15824_v32 }
0x363b   : > { %12255 = vmatprep.subr.bf16.mxu1 %v15829_v54 }
0x363e   : > { %12256 = vmatpush1.bf16.msra.mxu1 %v15827_v58 }
0x36b1   : > { %v14952_v55 = vpop.f32.mrf.mxu0 }
0x36b3   : > { %v11553_v13 = vpop.f32.mrf.mxu0 }
0x36b4   : > { %11742 = vxpose.xlu0.b32.start [1/4] (short) (narrow) %v11553_v13, 8 }
0x36b5   : > { %v14953_v44 = vpop.f32.mrf.mxu0 }
0x36b7   : > { %v11556_v20 = vpop.f32.mrf.mxu0 }
0x36b8   : > { %11743 = vxpose.xlu0.b32.cont [2/4] (short) (narrow) %v11556_v20, 8 }
0x36bc   : > { %11744 = vxpose.xlu0.b32.cont [3/4] (short) (narrow) %v14952_v55, 8 }
0x36c0   : > { %11745 = vxpose.xlu0.b32.end [4/4] (short) (narrow) %v14953_v44, 8 }
0x36c1   : > { %v14964_v50 = vpop.f32.mrf.mxu0 }
0x36c3   : > { %v11669_v59 = vpop.f32.mrf.mxu0 }
0x36c4   : > { %11806 = vxpose.xlu0.b32.start [1/4] (short) (narrow) %v11669_v59, 8 }
0x36c5   : > { %v14965_v22 = vpop.f32.mrf.mxu0 }
0x36c7   : > { %v11672_v16 = vpop.f32.mrf.mxu0 }
0x36c8   : > { %11807 = vxpose.xlu0.b32.cont [2/4] (short) (narrow) %v11672_v16, 8 }
0x36cc   : > { %11808 = vxpose.xlu0.b32.cont [3/4] (short) (narrow) %v14964_v50, 8 }
0x36cd   : > { %v14958_v35 = vpop.f32.mrf.mxu1 }
0x36cf   : > { %v11611_v46 = vpop.f32.mrf.mxu1 }
0x36d0   : > { %11774 = vxpose.xlu1.b32.start [1/4] (short) (narrow) %v11611_v46, 8  ;;  %11809 = vxpose.xlu0.b32.end [4/4] (short) (narrow) %v14965_v22, 8 }
0x36d1   : > { %v14959_v24 = vpop.f32.mrf.mxu1 }
0x36d3   : > { %v11614_v26 = vpop.f32.mrf.mxu1 }
0x36d4   : > { %11775 = vxpose.xlu1.b32.cont [2/4] (short) (narrow) %v11614_v26, 8  ;;  %v13914_v26 = vld [vmem:[#allocation44] ss:$0 sm:$0xff] }
0x36d8   : > { %11776 = vxpose.xlu1.b32.cont [3/4] (short) (narrow) %v14958_v35, 8 }
0x36dc   : > { %11777 = vxpose.xlu1.b32.end [4/4] (short) (narrow) %v14959_v24, 8 }
0x36f9   : > { %v14970_v41 = vpop.f32.mrf.mxu1 }
0x36fb   : > { %v11727_v28 = vpop.f32.mrf.mxu1 }
0x36fc   : > { %11838 = vxpose.xlu1.b32.start [1/4] (short) (narrow) %v11727_v28, 8 }
0x36fd   : > { %v14971_v17 = vpop.f32.mrf.mxu1 }
0x36ff   : > { %v11730_v29 = vpop.f32.mrf.mxu1 }
0x3700   : > { %11839 = vxpose.xlu1.b32.cont [2/4] (short) (narrow) %v11730_v29, 8 }
0x3704   : > { %11840 = vxpose.xlu1.b32.cont [3/4] (short) (narrow) %v14970_v41, 8 }
0x3708   : > { %11841 = vxpose.xlu1.b32.end [4/4] (short) (narrow) %v14971_v17, 8 }
0x3730   : > { %v11758_v18 = vpop.trf.xlu0 }
0x3740   : > { %v11822_v11 = vpop.trf.xlu0 }
0x3741   : > { %v11870_v61 = vcombine.low %v11758_v18, %v11822_v11  ;;  %v11871_v62 = vcombine.high %v11758_v18, %v11822_v11 }
0x3743   : > { %v11878_v23 = vrot.slane %v11870_v61, %v17955_v6  ;;  %v11885_v36 = vrot.slane %v11871_v62, %v17955_v6  ;;  %v15830_v62 = vld [vmem:[#allocation49 + $0x50] ss:$8 sps:$4 sm:$0xff]  }
0x374c   : > { %v11790_v51 = vpop.trf.xlu1 }
0x3778   : > { %v11854_v39 = vpop.trf.xlu1 }
0x3779   : > { %v11886_v2 = vcombine.low %v11790_v51, %v11854_v39  ;;  %v11887_v21 = vcombine.high %v11790_v51, %v11854_v39  ;;  %v15835_v39 = vld [vmem:[#allocation49 + $0x44] ss:$8 sps:$4 sm:$0xff]  }
0x377b   : > { %v11894_v53 = vrot.slane %v11886_v2, %v17955_v6  ;;  %v11901_v52 = vrot.slane %v11887_v21, %v17955_v6  ;;  %v15833_v2 = vld [vmem:[#allocation49 + $0x40] ss:$8 sps:$4 sm:$0xff]   ;;  %v15838_v21 = vld [vmem:[#allocation49 + $0x34] ss:$8 sps:$4 sm:$0xff]  }
0x377d   : > { %v11902_v14 = vcombine.low %v11878_v23, %v11894_v53  ;;  %v11903_v63 = vcombine.high %v11878_v23, %v11894_v53  ;;  %v11918_v27 = vcombine.low %v11885_v36, %v11901_v52  ;;  %v11919_v0 = vcombine.high %v11885_v36, %v11901_v52  ;;  %v15836_v53 = vld [vmem:[#allocation49 + $0x30] ss:$8 sps:$4 sm:$0xff]   ;;  %v15841_v52 = vld [vmem:[#allocation49 + $0x24] ss:$8 sps:$4 sm:$0xff]   ;;  %v15839_v23 = vld [vmem:[#allocation49 + $0x20] ss:$8 sps:$4 sm:$0xff]  }
0x377e   : > { %v15844_v36 = vld [vmem:[#allocation49 + $0x14] ss:$8 sps:$4 sm:$0xff]  }
0x377f   : > { %v11910_v47 = vrot.slane %v11902_v14, %v17958_v12  ;;  %v11917_v42 = vrot.slane %v11903_v63, %v17958_v12  ;;  %v11926_v57 = vrot.slane %v11918_v27, %v17958_v12  ;;  %v11933_v5 = vrot.slane %v11919_v0, %v17958_v12  ;;  %v15842_v14 = vld [vmem:[#allocation49 + $0x10] ss:$8 sps:$4 sm:$0xff]   ;;  %v15847_v63 = vld [vmem:[#allocation49 + $0x4] ss:$8 sps:$4 sm:$0xff]   ;;  %v15845_v27 = vld [vmem:[#allocation49] ss:$8 sps:$4 sm:$0xff]  }
0x3781   : > { %v11938_v40 = vcombine.low %v11910_v47, %v11917_v42  ;;  %v13912_v4 = vcombine.high %v11910_v47, %v11917_v42  ;;  %v11954_v7 = vcombine.low %v11926_v57, %v11933_v5  ;;  %v13913_v34 = vcombine.high %v11926_v57, %v11933_v5  ;;  %v13923_v57 = vld [vmem:[#allocation46] ss:$0 sm:$0xff] }
0x3783   : > { %v11945_v9 = vrot.slane %v11938_v40, %v17955_v6  ;;  %v11953_v30 = vrot.slane %v13912_v4, %v17955_v6  ;;  %v11961_v31 = vrot.slane %v11954_v7, %v17955_v6  ;;  %v11969_v37 = vrot.slane %v13913_v34, %v17955_v6  ;;  %v13924_v40 = vld [vmem:[#allocation47] ss:$0 sm:$0xff] }
0x3785   : > { %v11970_v45 = vcombine.low %v11945_v9, %v11953_v30  ;;  %v11986_v60 = vcombine.low %v11961_v31, %v11969_v37  ;;  %v11971_v10 = vcombine.high %v11945_v9, %v11953_v30  ;;  %v11987_v1 = vcombine.high %v11961_v31, %v11969_v37  ;;  %v15849_v9 = vld [vmem:[#allocation52 + $0x38] sm:$0xff]   ;;  %v15850_v30 = vld [vmem:[#allocation52 + $0x70] sm:$0xff]   ;;  %v15852_v37 = vld [vmem:[#allocation52 + $0x68] sm:$0xff]  }
0x3786   : > { %v15851_v31 = vld [vmem:[#allocation52 + $0x30] sm:$0xff]  }
0x3787   : > { %v11978_v3 = vrot.slane %v11970_v45, %v17958_v12  ;;  %v11994_v19 = vrot.slane %v11986_v60, %v17958_v12  ;;  %v11985_v55 = vrot.slane %v11971_v10, %v17958_v12  ;;  %v12001_v13 = vrot.slane %v11987_v1, %v17958_v12  ;;  %v15853_v45 = vld [vmem:[#allocation52 + $0x28] sm:$0xff]   ;;  %v15854_v60 = vld [vmem:[#allocation52 + $0x60] sm:$0xff]   ;;  %v15856_v1 = vld [vmem:[#allocation52 + $0x58] sm:$0xff]  }
0x3788   : > { %v15855_v10 = vld [vmem:[#allocation52 + $0x20] sm:$0xff]  }
0x3789   : > { %v12003_v44 = vcombine.high %v11978_v3, %v11994_v19  ;;  %v12004_v20 = vcombine.low %v11985_v55, %v12001_v13  ;;  %v12002_v50 = vcombine.low %v11978_v3, %v11994_v19  ;;  %v12005_v6 = vcombine.high %v11985_v55, %v12001_v13  ;;  %v15857_v3 = vld [vmem:[#allocation52 + $0x18] sm:$0xff]   ;;  %v15859_v19 = vld [vmem:[#allocation52 + $0x10] sm:$0xff]   ;;  %v15860_v55 = vld [vmem:[#allocation52 + $0x48] sm:$0xff]  }
0x378a   : > { %v15861_v13 = vld [vmem:[#allocation52 + $0x8] sm:$0xff]  }
0x378b   : > { %12007 = vrot.lane.b32.xlu0 %v12003_v44, %s17202_s26  ;;  %12011 = vrot.lane.b32.xlu1 %v12004_v20, %s17204_s10  ;;  %v15862_v44 = vld [vmem:[#allocation52 + $0x40] sm:$0xff]   ;;  %s13257_s26 = sshll.u32 %s1911_s16, 4 }
0x378c   : > { %v15863_v20 = vld [vmem:[#allocation52] sm:$0xff]   ;;  %s1913_s10 = scalar_lea.vmem [#allocation59], %s13257_s26 }
0x378d   : > { %s12684_s4 = sshll.u32 %s1913_s10, 4  ;;  %s19046_s4 = int_to_ptr.vmem [resolvable:$true] %s12684_s4 }
0x378e   : > { %s16966_s23 = scalar_lea.vmem %s19046_s4, 256 }
0x378f   : > { %12015 = vrot.lane.b32.xlu0 %v12005_v6, %s17203_s25  ;;  %s13982_s25 = sshll.u32 %s17469_s22, 8  ;;  %p16967_p10 = scmp.ne.s32.totalorder %s19046_s4, %s16966_s23 }
0x3790   : > { %s19044_s0 = scalar_lea.hbm %s17446_s8, %s13982_s25  ;;  %s17207_s22 = smov [#allocation59]  }
0x3791   : > { %p16968_p0 = pnand %p16967_p10, %p19182_p13  ;;  %s16970_s9 = sshll.u32 %s17207_s22, 4  ;;  %s16971_s9 = int_to_ptr.vmem [resolvable:$false] %s16970_s9 }
0x3792   : > { %s16972_s2 = scalar_lea.vmem %s16971_s9, 512  ;;  %p16973_p2 = scmp.lt.s32.totalorder %s19046_s4, %s16971_s9 }
0x3793   : > { %p16969_p1 = pneg %p16968_p0  ;;  %p16974_p4 = scmp.lt.s32.totalorder %s16972_s2, %s16966_s23 }
0x3795   : > { %p16975_p3 = por %p16974_p4, %p16973_p2 }
0x3797   : > { %p16976_p6 = pnand %p16975_p3, %p16969_p1 }
0x37fd   : > { %v12008_v59 = vpop.permute.xlu0 %12007  ;;  %v12012_v16 = vpop.permute.xlu1 %12011 }
0x37fe   : > { %v12018_v22 = vsel %vm2331_vm1, %v12002_v50, %v12008_v59  ;;  %v12160_v50 = vld [vmem:[#allocation50] sm:$0x3] }
0x37ff   : > { %v12019_v35 = vsel %vm3130_vm3, %v12018_v22, %v12012_v16  ;;  %v12166_v6 = vrot.slane %v12160_v50, %v17881_v48  ;;  %v12170_v59 = vrot.slane %v12160_v50, %v17872_v43 }
0x3801   : > { %v12016_v46 = vpop.permute.xlu0 %12015 }
0x3802   : > { %v12020_v24 = vsel %vm3132_vm4, %v12019_v35, %v12016_v46 }
0x3803   : > { %v12021_v12 = vpack.c.bf16 %v12020_v24, %v12020_v24 }
0x3805   : > { %14989 = vmatmul.mubr.bf16.vlgmr.msra.gmra.mxu0 %v12021_v12 }
0x3806   : > { %14355 = vmatpush3.bf16.msra.mxu0 %v15849_v9  ;;  %v15870_v9 = vld [vmem:[#allocation58 + $0x50] ss:$8 sps:$4 sm:$0xff]  }
0x3807   : > { %14356 = vmatprep.subr.bf16.mxu0 %v15850_v30  ;;  %v15875_v30 = vld [vmem:[#allocation58 + $0x44] ss:$8 sps:$4 sm:$0xff]  }
0x380a   : > { %14357 = vmatpush3.bf16.msra.mxu0 %v15851_v31  ;;  %v15878_v31 = vld [vmem:[#allocation58 + $0x34] ss:$8 sps:$4 sm:$0xff]  }
0x380b   : > { %14358 = vmatprep.subr.bf16.mxu0 %v15852_v37  ;;  %v15876_v37 = vld [vmem:[#allocation58 + $0x30] ss:$8 sps:$4 sm:$0xff]  }
0x380e   : > { %14359 = vmatpush3.bf16.msra.mxu0 %v15853_v45  ;;  %v15881_v45 = vld [vmem:[#allocation58 + $0x24] ss:$8 sps:$4 sm:$0xff]  }
0x380f   : > { %14360 = vmatprep.subr.bf16.mxu0 %v15854_v60  ;;  %v15879_v60 = vld [vmem:[#allocation58 + $0x20] ss:$8 sps:$4 sm:$0xff]  }
0x3812   : > { %14361 = vmatpush3.bf16.msra.mxu0 %v15855_v10  ;;  %v15884_v10 = vld [vmem:[#allocation58 + $0x14] ss:$8 sps:$4 sm:$0xff]  }
0x3813   : > { %14362 = vmatprep.subr.bf16.mxu0 %v15856_v1  ;;  %v15882_v1 = vld [vmem:[#allocation58 + $0x10] ss:$8 sps:$4 sm:$0xff]  }
0x3816   : > { %14363 = vmatpush3.bf16.msra.mxu0 %v15857_v3  ;;  %v15887_v3 = vld [vmem:[#allocation58 + $0x4] ss:$8 sps:$4 sm:$0xff]  }
0x38c5   : > { %v12110_v41 = vpop.f32.mrf.mxu0 }
0x38c6   : > { %v12111_v28 = vadd.f32 %v13914_v26, %v12110_v41 }
0x38c7   : > { %v14990_v17 = vpop.f32.mrf.mxu0 }
0x38c8   : > { %v19030_v29 = vadd.f32 %v12111_v28, %v18914_v38  ;;  %v15832_v38 = vld [vmem:[#allocation49 + $0x54] ss:$8 sps:$4 sm:$0xff]  }
0x38c9   : > { %v12113_v8 = vpop.f32.mrf.mxu0  ;;  %12257 = vmatprep.subr.bf16.mxu1 %v15832_v38 }
0x38ca   : > { %12119 = vadd.xlane.f32.xlu1 %v19030_v29  ;;  %12258 = vmatpush1.bf16.msra.mxu1 %v15830_v62 }
0x38cb   : > { %v14991_v56 = vpop.f32.mrf.mxu0  ;;  %12259 = vmatprep.subr.bf16.mxu1 %v15835_v39 }
0x38ce   : > { %12260 = vmatpush1.bf16.msra.mxu1 %v15833_v2 }
0x38cf   : > { %12261 = vmatprep.subr.bf16.mxu1 %v15838_v21 }
0x38d2   : > { %12262 = vmatpush1.bf16.msra.mxu1 %v15836_v53 }
0x38d3   : > { %12263 = vmatprep.subr.bf16.mxu1 %v15841_v52 }
0x38d6   : > { %12264 = vmatpush1.bf16.msra.mxu1 %v15839_v23  ;;  %v13941_v23 = vld [vmem:[#allocation53] ss:$0 sm:$0xff] }
0x38d7   : > { %12265 = vmatprep.subr.bf16.mxu1 %v15844_v36 }
0x38da   : > { %12266 = vmatpush1.bf16.msra.mxu1 %v15842_v14 }
0x38db   : > { %12267 = vmatprep.subr.bf16.mxu1 %v15847_v63 }
0x38de   : > { %12268 = vmatpush1.bf16.msra.mxu1 %v15845_v27 }
0x3953   : > { %v12120_v18 = vpop.xlane.xlu1 %12119 }
0x3954   : > { %v12121_v51 = vmul.f32 0.0078125, %v12120_v18 }
0x3956   : > { %v12122_v11 = vsub.f32 %v19030_v29, %v12121_v51 }
0x3958   : > { %v12123_v61 = vmul.f32 %v12122_v11, %v12122_v11 }
0x395a   : > { %12124 = vadd.xlane.f32.xlu0 %v12123_v61 }
0x39e3   : > { %v12125_v0 = vpop.xlane.xlu0 %12124 }
0x39e4   : > { %v12126_v49 = vmul.f32 0.0078125, %v12125_v0 }
0x39e6   : > { %v12127_v47 = vadd.f32 1e-05, %v12126_v49 }
0x39e8   : > { %16068 = vrsqrt.f32 %v12127_v47  ;;  %v15864_v47 = vld [vmem:[#allocation58 + $0x70] ss:$8 sps:$4 sm:$0xff]  }
0x39f5   : > { %v16069_v42 = vpop.eup %16068 }
0x39f6   : > { %v12129_v5 = vmul.f32 %v16069_v42, %v12122_v11  ;;  %v15866_v42 = vld [vmem:[#allocation58 + $0x74] ss:$8 sps:$4 sm:$0xff]  }
0x39f7   : > { %12626 = vmatprep.subr.bf16.mxu1 %v15866_v42 }
0x39f8   : > { %v12136_v4 = vmul.f32 %v13923_v57, %v12129_v5  ;;  %v15869_v57 = vld [vmem:[#allocation58 + $0x64] ss:$8 sps:$4 sm:$0xff]   ;;  %v15867_v5 = vld [vmem:[#allocation58 + $0x60] ss:$8 sps:$4 sm:$0xff]  }
0x39fa   : > { %v12143_v7 = vadd.f32 %v13924_v40, %v12136_v4 }
0x39fc   : > { %v12161_v34 = vpack.c.bf16 %v12143_v7, %v12143_v7 }
0x39fe   : > { %12286 = vmatmul.mubr.bf16.vlgmr.msra.gmra.mxu1 %v12161_v34 }
0x39ff   : > { %12658 = vmatprep.mubr.bf16.mxu1 %v17200_v25  ;;  %v15858_v25 = vld [vmem:[#allocation52 + $0x50] sm:$0xff]   ;;  %12627 = vmatpush1.bf16.msra.mxu1 %v15864_v47 }
0x3a00   : > { %14364 = vmatprep.subr.bf16.mxu0 %v15858_v25  ;;  %12628 = vmatprep.subr.bf16.mxu1 %v15869_v57  ;;  %v15885_v25 = vld [vmem:[#allocation58] ss:$8 sps:$4 sm:$0xff]  }
0x3a01   : > { %14365 = vmatpush3.bf16.msra.mxu0 %v15859_v19 }
0x3a02   : > { %14366 = vmatprep.subr.bf16.mxu0 %v15860_v55 }
0x3a03   : > { %12629 = vmatpush1.bf16.msra.mxu1 %v15867_v5 }
0x3a04   : > { %12630 = vmatprep.subr.bf16.mxu1 %v15872_v15 }
0x3a05   : > { %14367 = vmatpush3.bf16.msra.mxu0 %v15861_v13 }
0x3a06   : > { %14368 = vmatprep.subr.bf16.mxu0 %v15862_v44 }
0x3a07   : > { %12631 = vmatpush1.bf16.msra.mxu1 %v15870_v9 }
0x3a08   : > { %12632 = vmatprep.subr.bf16.mxu1 %v15875_v30 }
0x3a09   : > { %14369 = vmatpush3.bf16.msra.mxu0 %v15863_v20  ;;  %v13958_v20 = vld [vmem:[#allocation55] ss:$0 sm:$0xff] }
0x3abe   : > { %v12287_v22 = vpop.f32.mrf.mxu1 }
0x3abf   : > { %v12288_v16 = vadd.f32 %v12287_v22, %v12166_v6  ;;  %v13959_v6 = vld [vmem:[#allocation56] ss:$0 sm:$0xff] }
0x3ac0   : > { %v12289_v35 = vpop.f32.mrf.mxu1 }
0x3ac1   : > { %v12294_v46 = vmul.f32 %v12288_v16, %v12288_v16  ;;  %v12290_v24 = vadd.f32 %v12289_v35, %v12170_v59  ;;  %v12533_v35 = vld [vmem:[%s17441_s3] sm:$0x3] }
0x3ac2   : > { %v12291_v12 = vpop.f32.mrf.mxu1 }
0x3ac3   : > { %v12296_v26 = vmul.f32 %v12294_v46, %v12288_v16  ;;  %v12295_v41 = vmul.f32 %v12290_v24, %v12290_v24  ;;  %v12539_v46 = vrot.slane %v12533_v35, %v17881_v48 }
0x3ac4   : > { %v12292_v28 = vpop.f32.mrf.mxu1 }
0x3ac5   : > { %v12298_v17 = vmul.f32 0.044715, %v12296_v26  ;;  %v12297_v8 = vmul.f32 %v12295_v41, %v12290_v24 }
0x3ac7   : > { %v12300_v56 = vadd.f32 %v12298_v17, %v12288_v16  ;;  %v12299_v32 = vmul.f32 0.044715, %v12297_v8 }
0x3ac9   : > { %v12302_v33 = vmul.f32 0.7978846, %v12300_v56  ;;  %v12301_v54 = vadd.f32 %v12299_v32, %v12290_v24 }
0x3acb   : > { %16070 = vtanh.f32 %v12302_v33  ;;  %v12303_v58 = vmul.f32 0.7978846, %v12301_v54 }
0x3acd   : > { %16072 = vtanh.f32 %v12303_v58 }
0x3ad8   : > { %v16071_v18 = vpop.eup %16070 }
0x3ad9   : > { %v12306_v51 = vadd.f32 1.0, %v16071_v18 }
0x3ada   : > { %v16073_v11 = vpop.eup %16072 }
0x3adb   : > { %v12308_v61 = vmul.f32 0.5, %v12306_v51  ;;  %v12307_v38 = vadd.f32 1.0, %v16073_v11 }
0x3add   : > { %v12309_v62 = vmul.f32 0.5, %v12307_v38  ;;  %v12310_v39 = vmul.f32 %v12308_v61, %v12288_v16 }
0x3adf   : > { %v12311_v2 = vmul.f32 %v12309_v62, %v12290_v24  ;;  %v12345_v53 = vpack.c.bf16 %v12310_v39, %v12310_v39  ;;  %v12543_v24 = vrot.slane %v12533_v35, %v17872_v43 }
0x3ae1   : > { %v12346_v21 = vpack.c.bf16 %v12311_v2, %v12311_v2 }
0x3ae3   : > { %12481 = vmatprep.mubr.bf16.mxu0 %v12346_v21 }
0x3ae4   : > { %12482 = vmatmul.mubr.bf16.vlgmr.msra.gmra.mxu0 %v12345_v53 }
0x3ba4   : > { %v14370_v52 = vpop.f32.mrf.mxu0 }
0x3ba6   : > { %v14371_v36 = vpop.f32.mrf.mxu0 }
0x3ba7   : > { %v14372_v14 = vadd.f32 %v14371_v36, %v14370_v52 }
0x3ba8   : > { %v14373_v63 = vpop.f32.mrf.mxu0 }
0x3ba9   : > { %v12484_v27 = vadd.f32 %v14372_v14, %v13941_v23 }
0x3baa   : > { %v14374_v0 = vpop.f32.mrf.mxu0 }
0x3bab   : > { %v12489_v49 = vadd.f32 %v12484_v27, %v19030_v29  ;;  %v15873_v29 = vld [vmem:[#allocation58 + $0x40] ss:$8 sps:$4 sm:$0xff]  }
0x3bac   : > { %12633 = vmatpush1.bf16.msra.mxu1 %v15873_v29 }
0x3bad   : > { %12492 = vadd.xlane.f32.xlu0 %v12489_v49  ;;  %12634 = vmatprep.subr.bf16.mxu1 %v15878_v31 }
0x3bb0   : > { %12635 = vmatpush1.bf16.msra.mxu1 %v15876_v37 }
0x3bb1   : > { %12636 = vmatprep.subr.bf16.mxu1 %v15881_v45 }
0x3bb4   : > { %12637 = vmatpush1.bf16.msra.mxu1 %v15879_v60 }
0x3bb5   : > { %12638 = vmatprep.subr.bf16.mxu1 %v15884_v10 }
0x3bb8   : > { %12639 = vmatpush1.bf16.msra.mxu1 %v15882_v1 }
0x3bb9   : > { %12640 = vmatprep.subr.bf16.mxu1 %v15887_v3 }
0x3bbc   : > { %12641 = vmatpush1.bf16.msra.mxu1 %v15885_v25 }
0x3c36   : > { %v12493_v40 = vpop.xlane.xlu0 %12492 }
0x3c37   : > { %v12494_v4 = vmul.f32 0.0078125, %v12493_v40 }
0x3c39   : > { %v12495_v7 = vsub.f32 %v12489_v49, %v12494_v4 }
0x3c3b   : > { %v12496_v34 = vmul.f32 %v12495_v7, %v12495_v7 }
0x3c3d   : > { %12497 = vadd.xlane.f32.xlu1 %v12496_v34 }
0x3cc6   : > { %v12498_v19 = vpop.xlane.xlu1 %12497 }
0x3cc7   : > { %v12499_v55 = vmul.f32 0.0078125, %v12498_v19 }
0x3cc9   : > { %v12500_v13 = vadd.f32 1e-05, %v12499_v55 }
0x3ccb   : > { %16074 = vrsqrt.f32 %v12500_v13 }
0x3cd8   : > { %v16075_v44 = vpop.eup %16074 }
0x3cd9   : > { %v12502_v50 = vmul.f32 %v16075_v44, %v12495_v7 }
0x3cdb   : > { %v12509_v59 = vmul.f32 %v13958_v20, %v12502_v50 }
0x3cdd   : > { %v12516_v22 = vadd.f32 %v13959_v6, %v12509_v59 }
0x3cdf   : > { %v12534_v16 = vpack.c.bf16 %v12516_v22, %v12516_v22 }
0x3ce1   : > { %12659 = vmatmul.mubr.bf16.vlgmr.msra.gmra.mxu1 %v12534_v16 }
0x3da1   : > { %v12660_v12 = vpop.f32.mrf.mxu1 }
0x3da2   : > { %v12661_v26 = vadd.f32 %v12660_v12, %v12539_v46 }
0x3da3   : > { %v12662_v41 = vpop.f32.mrf.mxu1 }
0x3da4   : > { %12667 = vst [vmem:[%s1913_s10] sm:$0xff] %v12661_v26  ;;  %v12663_v28 = vadd.f32 %v12662_v41, %v12543_v24 }
0x3da5   : > { %v12664_v17 = vpop.f32.mrf.mxu1 }
0x3da6   : > { %12668 = vst [vmem:[%s1913_s10 + $0x8] sm:$0xff] %v12663_v28 }
0x3da7   : > { %v12665_v48 = vpop.f32.mrf.mxu1 }
0x3da8   : > { %16979 = shalt.err (!%p16976_p6)
}
0x3da9   : > { %s16980_s16 = scalar_lea.hbm %s19044_s0, 256  ;;  %s16984_s26 = scalar_lea.hbm %s17446_s8, 512 }
0x3daa   : > { %p16981_p8 = scmp.ne.s32.totalorder %s19044_s0, %s16980_s16  ;;  %p16985_p11 = scmp.lt.s32.totalorder %s19044_s0, %s17446_s8 }
0x3dab   : > { %p16986_p12 = scmp.lt.s32.totalorder %s16984_s26, %s16980_s16 }
0x3dac   : > { %p16982_p5 = pnand %p16981_p8, %p19182_p13 }
0x3dad   : > { %p16987_p9 = por %p16986_p12, %p16985_p11 }
0x3dae   : > { %p16983_p7 = pneg %p16982_p5 }
0x3db0   : > { %p16988_p10 = pnand %p16987_p9, %p16983_p7 }
0x3db2   : > { %16991 = shalt.err (!%p16988_p10)
}
0x3db3   : > { %15168 = dma.vmem_to_hbm [thread:$0]  (%p19182_p13), %s19046_s4, 256, %s19044_s0, %s12670_s11  }
0x3db4 PF: > { %s19183_s25 = sld [smem:[#allocation113_spill]]  ;;  %p15248_p0 = scmp.ge.s32.totalorder %s17102_s18, 2 }
0x3db5   : > { %s19184_s10 = sld [smem:[#allocation117_spill]] }
0x3dba   : > { %s12696_s23 = sand.u32 1, %s19183_s25  }
0x3dbb   : > { %p19185_p1 = scmp.ne.s32.totalorder %s19184_s10, 0  ;;  %s12697_s22 = scalar_lea.sflag [#allocation4], %s12696_s23 }
0x3dbd   : > { %p15171_p2 = pnand %p15248_p0, %p19185_p1 }
0x3dbf   : > { %p15172_p4 = pneg %p15171_p2 }
0x3dc1   : > { %17085 = dma.done.wait (%p15172_p4), %s12697_s22, 256  }
0x3dc2   : > { %17087 = vsyncadd (%p15172_p4), %s12697_s22, 4294967040  ;;  %s19186_s18 = sld [smem:[#allocation115_spill]]  ;;  %s19189_s0 = smov %s17094_s15 }
0x3dc3   : > { %s19187_s9 = sld [smem:[#allocation114_spill]] }
0x3dc4   : > { %s19188_s16 = sld [smem:[#allocation116_spill]] }
0x3dc8   : > { %p122_p3 = scmp.ge.s32.totalorder %s19186_s18, 4  }
0x3dc9   : > { %s19190_s15 = smov %s19187_s9 }
0x3dca   :  { %124 = sbr.rel (!%p122_p3) target bundleno = 105 (0x69), region = 479 }
0x3dcf   :  { %12702 = vsyncpa [#allocation3], 1 }
0x3dd0   :  { %12704 = vsyncpa [#allocation3 + $0x1], 1 }
0x3dd1   :  { %12705 = vsyncpa [#allocation6], 1 }
0x3dd2   :  { %12706 = vsyncpa [#allocation9], 1 }
0x3dd3   :  { %12707 = vsyncpa [#allocation12], 1 }
0x3dd4   :  { %12708 = vsyncpa [#allocation15], 1 }
0x3dd5   :  { %12709 = vsyncpa [#allocation18], 1 }
0x3dd6   :  { %12710 = vsyncpa [#allocation21], 1 }
0x3dd7   :  { %12711 = vsyncpa [#allocation24], 1 }
0x3dd8   :  { %12712 = vsyncpa [#allocation27], 1 }
0x3dd9   :  { %12713 = vsyncpa [#allocation30], 1 }
0x3dda   :  { %12714 = vsyncpa [#allocation33], 1 }
0x3ddb   :  { %12715 = vsyncpa [#allocation36], 1 }
0x3ddc   :  { %12716 = vsyncpa [#allocation39], 1 }
0x3ddd   :  { %12717 = vsyncpa [#allocation42], 1 }
0x3dde   :  { %12718 = vsyncpa [#allocation45], 1 }
0x3ddf   :  { %12719 = vsyncpa [#allocation48], 1 }
0x3de0   :  { %12720 = vsyncpa [#allocation51], 1 }
0x3de1   :  { %12721 = vsyncpa [#allocation54], 1 }
0x3de2   :  { %12722 = vsyncpa [#allocation57], 1 }
0x3de3   :  { %12723 = vsyncpa [#allocation4], 1 }
0x3de4   :  { %12725 = vsyncpa [#allocation4 + $0x1], 1 }

</bundles_post_ra>
